<compile_context>
chip_gen: v6e
topology: v6e:2x2x1
jax: 0.10.0
libtpu: 0.0.40
codegen_flags: <defaults>
</compile_context>

<pallas_src>
import math

import jax
import jax.numpy as jnp
from jax.experimental import pallas as pl
from jax.experimental.pallas import tpu as pltpu

GROUPS = 100
GROUP_SIZE = 30
FLAT = GROUPS * GROUP_SIZE          # 3000
GROUPS_PAD = 128                    # lane-dense padded output width


def _ensemble_kernel(x_ref, w_ref, o_ref):
    # x_ref: (TB, 3000)  lane-dense batch tile
    # w_ref: (3000, 128) block-diagonal weights; index_map is constant so the
    #        block stays resident in VMEM across the whole grid.
    # o_ref: (TB, 128)   lane-dense padded output (cols 100..127 are zero)
    o_ref[...] = jnp.dot(
        x_ref[...],
        w_ref[...],
        preferred_element_type=jnp.float32,
        # Mem-bound kernel: multi-pass bf16 (HIGHEST) costs nothing here and
        # keeps the result at f32 accuracy so the 1e-5 check vs. the VPU
        # reference passes.
        precision=jax.lax.Precision.HIGHEST,
    )


def _block_diag_weights(weights):
    """(3000,) -> (3000, 128): group g's 30 weights land in rows g*30..g*30+29
    of column g; columns 100..127 are zero padding."""
    cols = jnp.arange(FLAT, dtype=jnp.int32) // GROUP_SIZE                  # (3000,)
    onehot = cols[:, None] == jnp.arange(GROUPS_PAD, dtype=jnp.int32)[None, :]
    return weights[:, None] * onehot.astype(weights.dtype)                  # (3000, 128)


def _round_up(n, m):
    return ((n + m - 1) // m) * m


def ensemble_net_forward(x, weights, *, block_b=512):
    """x: (B, 3000) f32, weights: (3000,) f32 -> (B, 100) f32.

    block_b=512 keeps per-step VMEM usage ~16 MiB (x tile 6 MiB x 2 buffers,
    weights 1.5 MiB x 2, out 0.25 MiB x 2) -- safe on v5e/v6e/v7x with the
    explicit vmem_limit below, and large enough (>= 512 rows) to sit near the
    HBM roofline.
    """
    B = x.shape[0]
    assert x.shape[1] == FLAT

    w_bd = _block_diag_weights(weights)

    block_b = _round_up(block_b, 8)
    tb = min(block_b, _round_up(B, 8))      # sublane-aligned batch tile
    grid_b = pl.cdiv(B, tb)                 # ragged tail handled by Pallas
                                            # boundary-block masking (no pad copy)

    out = pl.pallas_call(
        _ensemble_kernel,
        out_shape=jax.ShapeDtypeStruct((B, GROUPS_PAD), jnp.float32),
        grid_spec=pltpu.PrefetchScalarGridSpec(
            num_scalar_prefetch=0,
            grid=(grid_b,),
            in_specs=[
                # Lane-dense, contiguous 12 KB/row DMAs; TB rows per step.
                pl.BlockSpec((tb, FLAT), lambda i: (i, 0)),
                # Block-diagonal weights: same block every step -> VMEM resident.
                pl.BlockSpec((FLAT, GROUPS_PAD), lambda i: (0, 0)),
            ],
            # Lane-dense (TB, 128) output block -> unmasked full-lane stores.
            out_specs=pl.BlockSpec((tb, GROUPS_PAD), lambda i: (i, 0)),
        ),
        compiler_params=pltpu.CompilerParams(
            dimension_semantics=("parallel",),   # megacore-shardable batch axis
            # Above v5e's 16 MiB default scoped limit, well under v7x's
            # 64 MiB physical VMEM.
            vmem_limit_bytes=40 << 20,
        ),
    )(x, w_bd)

    # Drop the 28 padded columns (tiny XLA copy; keeps kernel stores unmasked).
    return out[:, :GROUPS]


def reference_forward(x, weights):
    y = x * weights
    y = y.reshape(-1, GROUPS, GROUP_SIZE)
    return jnp.sum(y, axis=2)


if __name__ == "__main__":
    key = jax.random.PRNGKey(0)
    k_w, k_x1, k_x2 = jax.random.split(key, 3)

    # Deterministic parameter init mirroring torch.randn(3000) / sqrt(30).
    weights = jax.random.normal(k_w, (FLAT,), dtype=jnp.float32) / math.sqrt(30.0)

    fwd = jax.jit(ensemble_net_forward)

    # Small shape consistent with the module (batch=2, flat last dim 3000).
    x_small = jax.random.normal(k_x1, (2, FLAT), dtype=jnp.float32)
    out_small = jax.block_until_ready(fwd(x_small, weights))
    ref_small = reference_forward(x_small, weights)
    assert out_small.shape == (2, GROUPS)
    assert jnp.allclose(out_small, ref_small, atol=1e-5, rtol=1e-5)

    # Larger ragged batch (1000 % 512 != 0): exercises the no-pad boundary-block path.
    x_big = jax.random.normal(k_x2, (1000, FLAT), dtype=jnp.float32)
    out_big = jax.block_until_ready(fwd(x_big, weights))
    ref_big = reference_forward(x_big, weights)
    assert out_big.shape == (1000, GROUPS)
    assert jnp.allclose(out_big, ref_big, atol=1e-5, rtol=1e-5)

    print("KERNEL_OK")
</pallas_src>

<mosaic_0001>
module attributes {stable_mosaic.version = 11 : i64} {
  func.func @_ensemble_kernel(%arg0: i32, %arg1: memref<8x3000xf32, #tpu.memory_space<vmem>>, %arg2: memref<3000x128xf32, #tpu.memory_space<vmem>>, %arg3: memref<8x128xf32, #tpu.memory_space<vmem>>) attributes {dimension_semantics = [#tpu.dimension_semantics<parallel>], iteration_bounds = array<i64: 1>, scalar_prefetch = 0 : i64, scratch_operands = 0 : i64, tpu.core_type = #tpu.core_type<tc>, window_params = [{transform_indices = @transform_0, window_bounds = array<i64: 8, 3000>}, {pipeline_mode = #tpu.pipeline_mode<synchronous>, transform_indices = @transform_1, window_bounds = array<i64: 3000, 128>}, {transform_indices = @transform_2, window_bounds = array<i64: 8, 128>}]} {
    %c0 = arith.constant 0 : index
    %c0_0 = arith.constant 0 : index
    %0 = vector.load %arg1[%c0, %c0_0] : memref<8x3000xf32, #tpu.memory_space<vmem>>, vector<8x3000xf32>
    %c0_1 = arith.constant 0 : index
    %c0_2 = arith.constant 0 : index
    %1 = vector.load %arg2[%c0_1, %c0_2] : memref<3000x128xf32, #tpu.memory_space<vmem>>, vector<3000x128xf32>
    %cst = arith.constant dense<0.000000e+00> : vector<8x128xf32>
    %2 = tpu.matmul %0, %1, %cst {dimension_numbers = #tpu.dot_dimension_numbers<[1], [0], [0], [1], [0, 0, 1, 1], [], []>, precision = #tpu.contract_precision<fp32>} : vector<8x3000xf32>, vector<3000x128xf32>, vector<8x128xf32> -> vector<8x128xf32>
    %c0_3 = arith.constant 0 : index
    %c0_4 = arith.constant 0 : index
    %3 = vector.load %arg3[%c0_3, %c0_4] : memref<8x128xf32, #tpu.memory_space<vmem>>, vector<8x128xf32>
    tpu.vector_store %arg3[%c0_3, %c0_4], %2 {strides = array<i32>} : memref<8x128xf32, #tpu.memory_space<vmem>>, vector<8x128xf32>,
    return
  }
  func.func @transform_0(%arg0: i32) -> (i32, i32) {
    %c0_i32 = arith.constant 0 : i32
    %c0_i32_0 = arith.constant 0 : i32
    return %arg0, %c0_i32 : i32, i32
  }
  func.func @transform_1(%arg0: i32) -> (i32, i32) {
    %c0_i32 = arith.constant 0 : i32
    %c0_i32_0 = arith.constant 0 : i32
    %c0_i32_1 = arith.constant 0 : i32
    return %c0_i32, %c0_i32_0 : i32, i32
  }
  func.func @transform_2(%arg0: i32) -> (i32, i32) {
    %c0_i32 = arith.constant 0 : i32
    %c0_i32_0 = arith.constant 0 : i32
    return %arg0, %c0_i32 : i32, i32
  }
}

</mosaic_0001>

<bundles_post_ra>
// kernel: ensemble_net_forward.1
= control target key start
LH: loop header
LB: loop body
LE: loop exit
PB: predicated region body
PF: predicated region fallthrough
CT: control target
= control target key end

     0   :  { %7 = vsyncpa [#allocation3], 0  ;;  %v13294_v14 = vmov 1983009808   ;;  %vm674_vm0 = vcmask 457728   ;;  %s21622_s0 = inlined_call_operand.vmem [shape: f32[2,3000], index: 0, kind: input, shape index: {}]   ;;  %s21623_s1 = inlined_call_operand.vmem [shape: f32[3000,128], index: 1, kind: input, shape index: {}]   ;;  %s21624_s2 = inlined_call_operand.hbm [shape: f32[2,128], index: 2, kind: output, shape index: {}]  }
   0x1   :  { %v67_v0 = vld [vmem:[%s21623_s1 + $0xf8] sm:$0xff]  ;;  %v66_v4 = vld [vmem:[%s21623_s1 + $0xf0] sm:$0xff]  ;;  %v65_v6 = vld [vmem:[%s21623_s1 + $0xe8] sm:$0xff]  ;;  %v13348_v15 = vunpack.c.l.s4 %v13294_v14 }
   0x2   :  { %v51_v1 = vld [vmem:[%s21623_s1 + $0x78] sm:$0xff]  ;;  %v13320_v2 = vand.u32 4294901760, %v67_v0  ;;  %v50_v5 = vld [vmem:[%s21623_s1 + $0x70] sm:$0xff]  ;;  %v13333_v8 = vand.u32 4294901760, %v66_v4  ;;  %v13337_v10 = vand.u32 4294901760, %v65_v6  ;;  %v49_v11 = vld [vmem:[%s21623_s1 + $0x68] sm:$0xff] }
   0x3   :  { %v13322_v3 = vand.u32 4294901760, %v51_v1  ;;  %v13335_v9 = vand.u32 4294901760, %v50_v5  ;;  %v64_v12 = vld [vmem:[%s21623_s1 + $0xe0] sm:$0xff]  ;;  %v13351_v16 = vand.u32 4294901760, %v49_v11  ;;  %v63_v19 = vld [vmem:[%s21623_s1 + $0xd8] sm:$0xff]  ;;  %v13371_v22 = vld [vmem:[%s21623_s1 + $0xd0] sm:$0xff] }
   0x4   :  { %v48_v13 = vld [vmem:[%s21623_s1 + $0x60] sm:$0xff]  ;;  %10921 = vmatprep.subr.mxu0 %v13320_v2  ;;  %v13353_v17 = vand.u32 4294901760, %v64_v12  ;;  %v13361_v20 = vsub.f32 %v67_v0, %v13320_v2  ;;  %v13366_v21 = vld [vmem:[%s21623_s1 + $0x58] sm:$0xff]  ;;  %v13374_v23 = vand.u32 4294901760, %v63_v19  ;;  %v13383_v26 = vand.u32 4294901760, %v13371_v22  ;;  %v13388_v27 = vld [vmem:[%s21623_s1 + $0x50] sm:$0xff] }
   0x5   :  { %v13355_v18 = vand.u32 4294901760, %v48_v13  ;;  %10922 = vmatpush3.msra.mxu0 %v13322_v3  ;;  %v13377_v24 = vand.u32 4294901760, %v13366_v21  ;;  %v13380_v25 = vsub.f32 %v51_v1, %v13322_v3  ;;  %v13393_v28 = vld [vmem:[%s21623_s1 + $0xc8] sm:$0xff]  ;;  %v13403_v31 = vsub.f32 %v66_v4, %v13333_v8  ;;  %v13414_v34 = vld [vmem:[%s21623_s1 + $0xc0] sm:$0xff]  ;;  %v13463_v52 = vld [vmem:[%s21623_s1 + $0xb8] sm:$0xff] }
   0x6   :  { %22453 = vst [vmem:[#allocation5_spill] sm:$0xff] %v13361_v20  ;;  %v13398_v29 = vld [vmem:[%s21623_s1 + $0x48] sm:$0xff]  ;;  %10923 = vmatprep.subr.mxu0 %v13333_v8  ;;  %v21637_v30 = vand.u32 4294901760, %v13361_v20  ;;  %v13406_v32 = vand.u32 4294901760, %v13388_v27  ;;  %v13409_v33 = vsub.f32 %v50_v5, %v13335_v9  ;;  %v13419_v36 = vand.u32 4294901760, %v13393_v28  ;;  %v13439_v43 = vld [vmem:[%s21623_s1 + $0x40] sm:$0xff] }
   0x7   :  { %10924 = vmatpush3.msra.mxu0 %v13335_v9  ;;  %v21636_v35 = vand.u32 4294901760, %v13380_v25  ;;  %v13422_v37 = vsub.f32 %v65_v6, %v13337_v10  ;;  %v13425_v38 = vand.u32 4294901760, %v13398_v29  ;;  %v21634_v40 = vand.u32 4294901760, %v13403_v31  ;;  %v13476_v57 = vld [vmem:[%s21623_s1 + $0x38] sm:$0xff]  ;;  %v13481_v58 = vld [vmem:[%s21623_s1 + $0xb0] sm:$0xff]  ;;  %v13517_v14 = vld [vmem:[%s21623_s1 + $0xa8] sm:$0xff] }
   0x8   :  { %10925 = vmatprep.subr.mxu0 %v13337_v10  ;;  %v905_v39 = vsub.f32 %v13361_v20, %v21637_v30  ;;  %v21633_v41 = vand.u32 4294901760, %v13409_v33  ;;  %v13434_v42 = vsub.f32 %v49_v11, %v13351_v16  ;;  %v13447_v46 = vand.u32 4294901760, %v13414_v34  ;;  %v13503_v5 = vld [vmem:[%s21623_s1 + $0x30] sm:$0xff] }
   0x9   :  { %10926 = vmatpush3.msra.mxu0 %v13351_v16  ;;  %v793_v44 = vsub.f32 %v13380_v25, %v21636_v35  ;;  %v21631_v45 = vand.u32 4294901760, %v13422_v37  ;;  %v13450_v47 = vsub.f32 %v64_v12, %v13353_v17  ;;  %v912_v49 = vsub.f32 %v13403_v31, %v21634_v40  ;;  %v13630_v35 = vld [vmem:[%s21623_s1 + $0x10] sm:$0xff] }
   0xa   :  { %22454 = vst [vmem:[#allocation6_spill] sm:$0xff] %v13447_v46  ;;  %10927 = vmatprep.subr.mxu0 %v13353_v17  ;;  %v906_v48 = vand.u32 4294901760, %v905_v39  ;;  %v800_v50 = vsub.f32 %v13409_v33, %v21633_v41  ;;  %v21629_v51 = vand.u32 4294901760, %v13434_v42  ;;  %v13471_v56 = vand.u32 4294901760, %v13439_v43 }
   0xb   :  { %10928 = vmatpush3.msra.mxu0 %v13355_v18  ;;  %v794_v53 = vand.u32 4294901760, %v793_v44  ;;  %v919_v54 = vsub.f32 %v13422_v37, %v21631_v45  ;;  %v21628_v55 = vand.u32 4294901760, %v13450_v47  ;;  %v913_v59 = vand.u32 4294901760, %v912_v49  ;;  %v13603_v45 = vld [vmem:[%s21623_s1 + $0x18] sm:$0xff] }
   0xc   :  { %22455 = vst [vmem:[#allocation7_spill] sm:$0xff] %v13471_v56  ;;  %10929 = vmatprep.subr.mxu0 %v13374_v23  ;;  %10956 = vmatprep.subr.mxu1 %v906_v48  ;;  %v801_v60 = vand.u32 4294901760, %v800_v50  ;;  %v807_v61 = vsub.f32 %v13434_v42, %v21629_v51  ;;  %v13488_v62 = vsub.f32 %v48_v13, %v13355_v18  ;;  %v13495_v1 = vand.u32 4294901760, %v13463_v52 }
   0xd   :  { %10930 = vmatpush3.msra.mxu0 %v13377_v24  ;;  %10957 = vmatpush3.msra.mxu1 %v794_v53  ;;  %v920_v63 = vand.u32 4294901760, %v919_v54  ;;  %v926_v0 = vsub.f32 %v13450_v47, %v21628_v55  ;;  %v13498_v4 = vsub.f32 %v63_v19, %v13374_v23  ;;  %v13508_v12 = vand.u32 4294901760, %v13476_v57  ;;  %v13587_v55 = vld [vmem:[%s21623_s1 + $0x98] sm:$0xff] }
   0xe   :  { %22456 = vst [vmem:[#allocation8_spill] sm:$0xff] %v13495_v1  ;;  %10931 = vmatprep.subr.mxu0 %v13383_v26  ;;  %10958 = vmatprep.subr.mxu1 %v913_v59  ;;  %v808_v6 = vand.u32 4294901760, %v807_v61  ;;  %v21626_v11 = vand.u32 4294901760, %v13488_v62  ;;  %v13512_v13 = vsub.f32 %v13366_v21, %v13377_v24  ;;  %v13522_v44 = vand.u32 4294901760, %v13481_v58  ;;  %v13531_v21 = vld [vmem:[%s21623_s1 + $0x28] sm:$0xff] }
   0xf   :  { %22457 = vst [vmem:[#allocation9_spill] sm:$0xff] %v13508_v12  ;;  %10932 = vmatpush3.msra.mxu0 %v13406_v32  ;;  %10959 = vmatpush3.msra.mxu1 %v801_v60  ;;  %v927_v19 = vand.u32 4294901760, %v926_v0  ;;  %v21625_v39 = vand.u32 4294901760, %v13498_v4  ;;  %v13526_v48 = vsub.f32 %v13371_v22, %v13383_v26  ;;  %v13539_v53 = vand.u32 4294901760, %v13503_v5 }
  0x10   :  { %22458 = vst [vmem:[#allocation10_spill] sm:$0xff] %v13522_v44  ;;  %10933 = vmatprep.subr.mxu0 %v13419_v36  ;;  %10960 = vmatprep.subr.mxu1 %v920_v63  ;;  %v814_v49 = vsub.f32 %v13488_v62, %v21626_v11  ;;  %v21627_v50 = vand.u32 4294901760, %v13512_v13  ;;  %v13543_v22 = vsub.f32 %v13388_v27, %v13406_v32  ;;  %v13551_v60 = vand.u32 4294901760, %v13517_v14  ;;  %v13560_v27 = vld [vmem:[%s21623_s1 + $0xa0] sm:$0xff] }
  0x11   :  { %22459 = vst [vmem:[#allocation11_spill] sm:$0xff] %v13539_v53  ;;  %10934 = vmatpush3.msra.mxu0 %v13425_v38  ;;  %10961 = vmatpush3.msra.mxu1 %v808_v6  ;;  %v933_v54 = vsub.f32 %v13498_v4, %v21625_v39  ;;  %v21630_v59 = vand.u32 4294901760, %v13526_v48  ;;  %v13555_v61 = vsub.f32 %v13393_v28, %v13419_v36  ;;  %v13568_v39 = vand.u32 4294901760, %v13531_v21  ;;  %v13573_v28 = vld [vmem:[%s21623_s1 + $0x20] sm:$0xff] }
  0x12   :  { %22460 = vst [vmem:[#allocation12_spill] sm:$0xff] %v13551_v60  ;;  %10935 = vmatprep.subr.mxu0 %v13447_v46  ;;  %10962 = vmatprep.subr.mxu1 %v927_v19  ;;  %v815_v63 = vand.u32 4294901760, %v814_v49  ;;  %v821_v0 = vsub.f32 %v13512_v13, %v21627_v50  ;;  %v21632_v6 = vand.u32 4294901760, %v13543_v22  ;;  %v13582_v50 = vsub.f32 %v13398_v29, %v13425_v38 }
  0x13   :  { %22461 = vst [vmem:[#allocation13_spill] sm:$0xff] %v13568_v39  ;;  %10936 = vmatpush3.msra.mxu0 %v13471_v56  ;;  %v934_v11 = vand.u32 4294901760, %v933_v54  ;;  %v940_v19 = vsub.f32 %v13526_v48, %v21630_v59  ;;  %v21635_v49 = vand.u32 4294901760, %v13555_v61  ;;  %v13594_v59 = vand.u32 4294901760, %v13560_v27 }
  0x14   :  { %10963 = vmatpush3.msra.mxu1 %v815_v63  ;;  %10937 = vmatprep.subr.mxu0 %v13495_v1  ;;  %v822_v51 = vand.u32 4294901760, %v821_v0  ;;  %v828_v54 = vsub.f32 %v13543_v22, %v21632_v6  ;;  %v13598_v29 = vsub.f32 %v13414_v34, %v13447_v46  ;;  %v21638_v6 = vand.u32 4294901760, %v13582_v50  ;;  %v13616_v34 = vld [vmem:[%s21623_s1 + $0x90] sm:$0xff] }
  0x15   :  { %22462 = vst [vmem:[#allocation14_spill] sm:$0xff] %v13594_v59  ;;  %10964 = vmatprep.subr.mxu1 %v934_v11  ;;  %10938 = vmatpush3.msra.mxu0 %v13508_v12  ;;  %v941_v63 = vand.u32 4294901760, %v940_v19  ;;  %v947_v0 = vsub.f32 %v13555_v61, %v21635_v49  ;;  %v13611_v41 = vand.u32 4294901760, %v13573_v28  ;;  %v13622_v40 = vsub.f32 %v13439_v43, %v13471_v56  ;;  %v13691_v56 = vld [vmem:[%s21623_s1] sm:$0xff] }
  0x16   :  { %22463 = vst [vmem:[#allocation15_spill] sm:$0xff] %v13598_v29  ;;  %10965 = vmatpush3.msra.mxu1 %v822_v51  ;;  %10939 = vmatprep.subr.mxu0 %v13522_v44  ;;  %v829_v11 = vand.u32 4294901760, %v828_v54  ;;  %v21639_v19 = vand.u32 4294901760, %v13598_v29  ;;  %v13625_v49 = vand.u32 4294901760, %v13587_v55  ;;  %v835_v54 = vsub.f32 %v13582_v50, %v21638_v6 }
  0x17   :  { %22464 = vst [vmem:[#allocation16_spill] sm:$0xff] %v13611_v41  ;;  %22465 = vst [vmem:[#allocation17_spill] sm:$0xff] %v13622_v40  ;;  %10966 = vmatprep.subr.mxu1 %v941_v63  ;;  %10940 = vmatpush3.msra.mxu0 %v13539_v53  ;;  %v948_v51 = vand.u32 4294901760, %v947_v0  ;;  %v13638_v43 = vsub.f32 %v13463_v52, %v13495_v1  ;;  %v13641_v30 = vand.u32 4294901760, %v13603_v45  ;;  %v13653_v6 = vand.u32 4294901760, %v13616_v34  ;;  %v13658_v52 = vld [vmem:[%s21623_s1 + $0x88] sm:$0xff] }
  0x18   :  { %22466 = vst [vmem:[#allocation18_spill] sm:$0xff] %v13625_v49  ;;  %10967 = vmatpush3.msra.mxu1 %v829_v11  ;;  %10941 = vmatprep.subr.mxu0 %v13551_v60  ;;  %v954_v63 = vsub.f32 %v13598_v29, %v21639_v19  ;;  %v13650_v7 = vsub.f32 %v13476_v57, %v13508_v12  ;;  %v836_v11 = vand.u32 4294901760, %v835_v54  ;;  %v13667_v57 = vand.u32 4294901760, %v13630_v35  ;;  %v13672_v12 = vld [vmem:[%s21623_s1 + $0x8] sm:$0xff] }
  0x19   :  { %22467 = vst [vmem:[#allocation19_spill] sm:$0xff] %v13638_v43  ;;  %22468 = vst [vmem:[#allocation20_spill] sm:$0xff] %v13641_v30  ;;  %10968 = vmatprep.subr.mxu1 %v948_v51  ;;  %10942 = vmatpush3.msra.mxu0 %v13568_v39  ;;  %v13664_v0 = vsub.f32 %v13481_v58, %v13522_v44  ;;  %v13677_v51 = vld [vmem:[%s21623_s1 + $0x80] sm:$0xff]  ;;  %v22471_v19 = vand.u32 4294901760, %v13622_v40  ;;  %v13686_v1 = vsub.f32 %v13503_v5, %v13539_v53 }
  0x1a   :  { %22469 = vst [vmem:[#allocation21_spill] sm:$0xff] %v13653_v6  ;;  %22470 = vst [vmem:[#allocation22_spill] sm:$0xff] %v13667_v57  ;;  %10943 = vmatprep.subr.mxu0 %v13594_v59  ;;  %v955_v54 = vand.u32 4294901760, %v954_v63  ;;  %10969 = vmatpush3.msra.mxu1 %v836_v11  ;;  %v22472_v63 = vand.u32 4294901760, %v13638_v43  ;;  %v13699_v44 = vand.u32 4294901760, %v13658_v52  ;;  %v13703_v5 = vsub.f32 %v13517_v14, %v13551_v60 }
  0x1b   :  { %v842_v58 = vsub.f32 %v13622_v40, %v22471_v19  ;;  %10944 = vmatpush3.msra.mxu0 %v13611_v41  ;;  %v22474_v11 = vand.u32 4294901760, %v13650_v7  ;;  %v21662_v29 = vand.u32 4294901760, %v13686_v1  ;;  %v13727_v60 = vand.u32 4294901760, %v13677_v51 }
  0x1c   :  { %v961_v46 = vsub.f32 %v13638_v43, %v22472_v63  ;;  %22473 = vst [vmem:[#allocation23_spill] sm:$0xff] %v13699_v44  ;;  %10970 = vmatprep.subr.mxu1 %v955_v54  ;;  %10945 = vmatprep.subr.mxu0 %v13625_v49  ;;  %v13711_v63 = vand.u32 4294901760, %v13672_v12  ;;  %v22476_v43 = vand.u32 4294901760, %v13664_v0 }
  0x1d   :  { %v843_v53 = vand.u32 4294901760, %v842_v58  ;;  %v849_v40 = vsub.f32 %v13650_v7, %v22474_v11  ;;  %10946 = vmatpush3.msra.mxu0 %v13641_v30  ;;  %v13720_v58 = vsub.f32 %v13531_v21, %v13568_v39  ;;  %22477 = vst [vmem:[#allocation25_spill] sm:$0xff] %v13727_v60  ;;  %v22478_v21 = vand.u32 4294901760, %v13703_v5 }
  0x1e   :  { %22475 = vst [vmem:[#allocation24_spill] sm:$0xff] %v13711_v63  ;;  %v962_v19 = vand.u32 4294901760, %v961_v46  ;;  %v968_v14 = vsub.f32 %v13664_v0, %v22476_v43  ;;  %10947 = vmatprep.subr.mxu0 %v13653_v6  ;;  %v856_v46 = vsub.f32 %v13686_v1, %v21662_v29  ;;  %v13731_v43 = vsub.f32 %v13560_v27, %v13594_v59 }
  0x1f   :  { %10971 = vmatpush3.msra.mxu1 %v843_v53  ;;  %v850_v11 = vand.u32 4294901760, %v849_v40  ;;  %10948 = vmatpush3.msra.mxu0 %v13667_v57  ;;  %v975_v40 = vsub.f32 %v13703_v5, %v22478_v21  ;;  %v21665_v53 = vand.u32 4294901760, %v13720_v58  ;;  %v13739_v39 = vand.u32 4294901760, %v13691_v56 }
  0x20   :  { %10972 = vmatprep.subr.mxu1 %v962_v19  ;;  %v969_v54 = vand.u32 4294901760, %v968_v14  ;;  %v857_v29 = vand.u32 4294901760, %v856_v46  ;;  %10949 = vmatprep.subr.mxu0 %v13699_v44  ;;  %v13745_v19 = vsub.f32 %v13573_v28, %v13611_v41  ;;  %v441_v14 = vunpack.c.0.s8 %v13348_v15  ;;  %v13239_v46 = vld [vmem:[%s21622_s0 + $0x60] ss:$48 sps:$4 sm:$0xff]  }
  0x21   :  { %22479 = vst [vmem:[#allocation26_spill] sm:$0xff] %v13739_v39  ;;  %10973 = vmatpush3.msra.mxu1 %v850_v11  ;;  %v976_v59 = vand.u32 4294901760, %v975_v40  ;;  %10950 = vmatpush3.msra.mxu0 %v13711_v63  ;;  %v863_v21 = vsub.f32 %v13720_v58, %v21665_v53  ;;  %v13236_v11 = vld [vmem:[%s21622_s0] ss:$48 sps:$4 sm:$0xff]   ;;  %v22480_v28 = vlaneseq  ;;  %v13761_v15 = vsub.f32 %v13587_v55, %v13625_v49 }
  0x22   :  { %10974 = vmatprep.subr.mxu1 %v969_v54  ;;  %10951 = vmatprep.subr.mxu0 %v13727_v60  ;;  %v22481_v54 = vand.u32 4294901760, %v13731_v43  ;;  %v13770_v41 = vsub.f32 %v13603_v45, %v13641_v30  ;;  %v22483_v45 = vand.u32 4294901760, %v13745_v19 }
  0x23   :  { %v443_v27 = vshrl.u32 %v22480_v28, 7  ;;  %10975 = vmatpush3.msra.mxu1 %v857_v29  ;;  %v13774_v28 = vsub.f32 %v13616_v34, %v13653_v6  ;;  %v864_v55 = vand.u32 4294901760, %v863_v21  ;;  %10952 = vmatpush3.msra.mxu0 %v13739_v39  ;;  %v21675_v49 = vand.u32 4294901760, %v13761_v15 }
  0x24   :  { %v982_v40 = vsub.f32 %v13731_v43, %v22481_v54  ;;  %10976 = vmatprep.subr.mxu1 %v976_v59  ;;  %v13782_v54 = vsub.f32 %v13630_v35, %v13667_v57  ;;  %v870_v30 = vsub.f32 %v13745_v19, %v22483_v45  ;;  %10991 = vmatprep.subr.mxu0 %v13361_v20  ;;  %v21676_v59 = vand.u32 4294901760, %v13770_v41 }
  0x25   :  { %v13777_v29 = vsub.s32 %v441_v14, %v443_v27  ;;  %v21679_v34 = vand.u32 4294901760, %v13774_v28  ;;  %10977 = vmatpush3.msra.mxu1 %v864_v55  ;;  %v989_v35 = vsub.f32 %v13761_v15, %v21675_v49  ;;  %v13812_v57 = vsub.f32 %v13672_v12, %v13711_v63 }
  0x26   :  { %v983_v53 = vand.u32 4294901760, %v982_v40  ;;  %v21682_v21 = vand.u32 4294901760, %v13782_v54  ;;  %v871_v40 = vand.u32 4294901760, %v870_v30  ;;  %v877_v45 = vsub.f32 %v13770_v41, %v21676_v59 }
  0x27   :  { %22482 = vst [vmem:[#allocation27_spill] sm:$0xff] %v13777_v29  ;;  %v445_v27 = vrot.slane %v13236_v11, %v13777_v29  ;;  %v459_v14 = vrot.slane %v13239_v46, %v13777_v29  ;;  %v996_v55 = vsub.f32 %v13774_v28, %v21679_v34  ;;  %v13804_v11 = vsub.f32 %v13658_v52, %v13699_v44 }
  0x28   :  { %10978 = vmatprep.subr.mxu1 %v983_v53  ;;  %v990_v29 = vand.u32 4294901760, %v989_v35  ;;  %v884_v53 = vsub.f32 %v13782_v54, %v21682_v21  ;;  %v878_v30 = vand.u32 4294901760, %v877_v45  ;;  %v13828_v12 = vsub.f32 %v13691_v56, %v13739_v39 }
  0x29   :  { %v468_v46 = vcombine.high %v445_v27, %v459_v14  ;;  %v467_v20 = vcombine.low %v445_v27, %v459_v14  ;;  %10979 = vmatpush3.msra.mxu1 %v871_v40  ;;  %v997_v49 = vand.u32 4294901760, %v996_v55  ;;  %v21681_v59 = vand.u32 4294901760, %v13804_v11 }
  0x2a   :  { %10980 = vmatprep.subr.mxu1 %v990_v29  ;;  %v885_v35 = vand.u32 4294901760, %v884_v53  ;;  %v13820_v27 = vsub.f32 %v13677_v51, %v13727_v60  ;;  %v21680_v40 = vand.u32 4294901760, %v13812_v57  ;;  %v21687_v56 = vand.u32 4294901760, %v13828_v12 }
  0x2b   :  { %v13814_v34 = vand.u32 4294901760, %v468_v46  ;;  %v13816_v52 = vand.u32 4294901760, %v467_v20  ;;  %10981 = vmatpush3.msra.mxu1 %v878_v30  ;;  %v1003_v14 = vsub.f32 %v13804_v11, %v21681_v59 }
  0x2c   :  { %22486 = vst [vmem:[#allocation30_spill] sm:$0xff] %v13820_v27  ;;  %10982 = vmatprep.subr.mxu1 %v997_v49  ;;  %v21688_v51 = vand.u32 4294901760, %v13820_v27  ;;  %v891_v53 = vsub.f32 %v13812_v57, %v21680_v40 }
  0x2d   :  { %22484 = vst [vmem:[#allocation28_spill] sm:$0xff] %v13814_v34  ;;  %22485 = vst [vmem:[#allocation29_spill] sm:$0xff] %v13816_v52  ;;  %v13831_v29 = vsub.f32 %v468_v46, %v13814_v34  ;;  %v13834_v45 = vsub.f32 %v467_v20, %v13816_v52  ;;  %1014 = vmatprep.mubr.f32.mxu1 %v13814_v34  ;;  %10983 = vmatpush3.msra.mxu1 %v885_v35  ;;  %v1004_v55 = vand.u32 4294901760, %v1003_v14 }
  0x2e   :  { %v1010_v20 = vsub.f32 %v13820_v27, %v21688_v51  ;;  %v892_v49 = vand.u32 4294901760, %v891_v53  ;;  %v898_v35 = vsub.f32 %v13828_v12, %v21687_v56  ;;  %v22493_v53 = vld [vmem:[#allocation9_spill] sm:$0xff]  ;;  %v22498_v56 = vld [vmem:[#allocation14_spill] sm:$0xff]  ;;  %v22499_v51 = vld [vmem:[#allocation16_spill] sm:$0xff] }
  0x2f   :  { %v21690_v30 = vand.u32 4294901760, %v13831_v29  ;;  %v21689_v46 = vand.u32 4294901760, %v13834_v45  ;;  %10984 = vmatprep.subr.mxu1 %v1004_v55  ;;  %v22492_v55 = vld [vmem:[#allocation8_spill] sm:$0xff] }
  0x30   :  { %v1011_v59 = vand.u32 4294901760, %v1010_v20  ;;  %10985 = vmatpush3.msra.mxu1 %v892_v49  ;;  %v899_v21 = vand.u32 4294901760, %v898_v35  ;;  %v22494_v20 = vld [vmem:[#allocation10_spill] sm:$0xff]  ;;  %v22495_v49 = vld [vmem:[#allocation11_spill] sm:$0xff]  ;;  %v22496_v35 = vld [vmem:[#allocation12_spill] sm:$0xff] }
  0x31   :  { %v776_v14 = vsub.f32 %v13831_v29, %v21690_v30  ;;  %v782_v40 = vsub.f32 %v13834_v45, %v21689_v46  ;;  %v22500_v46 = vld [vmem:[#allocation18_spill] sm:$0xff]  ;;  %v22501_v30 = vld [vmem:[#allocation20_spill] sm:$0xff] }
  0x32   :  { %10986 = vmatprep.subr.mxu1 %v1011_v59  ;;  %v22488_v59 = vld [vmem:[#allocation6_spill] sm:$0xff] }
  0x33   :  { %v777_v34 = vand.u32 4294901760, %v776_v14  ;;  %v783_v39 = vand.u32 4294901760, %v782_v40  ;;  %10987 = vmatpush3.msra.mxu1 %v899_v21  ;;  %v22490_v21 = vld [vmem:[#allocation7_spill] sm:$0xff]  ;;  %v22497_v14 = vld [vmem:[#allocation13_spill] sm:$0xff] }
  0x34   :  { %1016 = vmatmul.mubr.f32.vlgmr.msra.gmra.mxu1 %v13816_v52  ;;  %11026 = vmatprep.subr.mxu1 %v13320_v2  ;;  %v22491_v40 = vld [vmem:[#allocation19_spill] sm:$0xff]  ;;  %v22502_v52 = vld [vmem:[#allocation22_spill] sm:$0xff] }
  0x35   :  { %778 = vmatprep.mubr.f32.mxu0 %v777_v34  ;;  %11027 = vmatpush3.msra.mxu1 %v13322_v3  ;;  %v22489_v34 = vld [vmem:[#allocation17_spill] sm:$0xff] }
  0x36   :  { %784 = vmatmul.mubr.f32.vlgmr.msra.gmra.mxu0 %v783_v39  ;;  %11028 = vmatprep.subr.mxu1 %v13333_v8  ;;  %v22487_v39 = vld [vmem:[#allocation15_spill] sm:$0xff] }
  0x37   :  { %10992 = vmatpush3.msra.mxu0 %v13380_v25  ;;  %11029 = vmatpush3.msra.mxu1 %v13335_v9 }
  0x38   :  { %10993 = vmatprep.subr.mxu0 %v13403_v31  ;;  %11030 = vmatprep.subr.mxu1 %v13337_v10 }
  0x39   :  { %10994 = vmatpush3.msra.mxu0 %v13409_v33  ;;  %11031 = vmatpush3.msra.mxu1 %v13351_v16 }
  0x3a   :  { %10995 = vmatprep.subr.mxu0 %v13422_v37  ;;  %11032 = vmatprep.subr.mxu1 %v13353_v17 }
  0x3b   :  { %10996 = vmatpush3.msra.mxu0 %v13434_v42  ;;  %11033 = vmatpush3.msra.mxu1 %v13355_v18 }
  0x3c   :  { %10997 = vmatprep.subr.mxu0 %v13450_v47  ;;  %11034 = vmatprep.subr.mxu1 %v13374_v23 }
  0x3d   :  { %10998 = vmatpush3.msra.mxu0 %v13488_v62  ;;  %11035 = vmatpush3.msra.mxu1 %v13377_v24 }
  0x3e   :  { %10999 = vmatprep.subr.mxu0 %v13498_v4  ;;  %11036 = vmatprep.subr.mxu1 %v13383_v26 }
  0x3f   :  { %11000 = vmatpush3.msra.mxu0 %v13512_v13  ;;  %11037 = vmatpush3.msra.mxu1 %v13406_v32 }
  0x40   :  { %11001 = vmatprep.subr.mxu0 %v13526_v48  ;;  %11038 = vmatprep.subr.mxu1 %v13419_v36 }
  0x41   :  { %11002 = vmatpush3.msra.mxu0 %v13543_v22  ;;  %11039 = vmatpush3.msra.mxu1 %v13425_v38 }
  0x42   :  { %11003 = vmatprep.subr.mxu0 %v13555_v61  ;;  %11040 = vmatprep.subr.mxu1 %v22488_v59 }
  0x43   :  { %11004 = vmatpush3.msra.mxu0 %v13582_v50  ;;  %11041 = vmatpush3.msra.mxu1 %v22490_v21 }
  0x44   :  { %11005 = vmatprep.subr.mxu0 %v22487_v39  ;;  %11042 = vmatprep.subr.mxu1 %v22492_v55 }
  0x45   :  { %11006 = vmatpush3.msra.mxu0 %v22489_v34  ;;  %11043 = vmatpush3.msra.mxu1 %v22493_v53 }
  0x46   :  { %11007 = vmatprep.subr.mxu0 %v22491_v40  ;;  %11044 = vmatprep.subr.mxu1 %v22494_v20 }
  0x47   :  { %11008 = vmatpush3.msra.mxu0 %v13650_v7  ;;  %11045 = vmatpush3.msra.mxu1 %v22495_v49 }
  0x48   :  { %11009 = vmatprep.subr.mxu0 %v13664_v0  ;;  %11046 = vmatprep.subr.mxu1 %v22496_v35 }
  0x49   :  { %11010 = vmatpush3.msra.mxu0 %v13686_v1  ;;  %11047 = vmatpush3.msra.mxu1 %v22497_v14 }
  0x4a   :  { %11011 = vmatprep.subr.mxu0 %v13703_v5  ;;  %11048 = vmatprep.subr.mxu1 %v22498_v56 }
  0x4b   :  { %11012 = vmatpush3.msra.mxu0 %v13720_v58  ;;  %1151 = vmatprep.mubr.f32.mxu0 %v13831_v29 }
  0x4c   :  { %11013 = vmatprep.subr.mxu0 %v13731_v43  ;;  %11049 = vmatpush3.msra.mxu1 %v22499_v51 }
  0x4d   :  { %11014 = vmatpush3.msra.mxu0 %v13745_v19  ;;  %11050 = vmatprep.subr.mxu1 %v22500_v46  ;;  %v22505_v46 = vand.u32 4294901760, %v13380_v25  ;;  %v22512_v25 = vand.u32 4294901760, %v13434_v42  ;;  %v22519_v42 = vand.u32 4294901760, %v13555_v61 }
  0x4e   :  { %11015 = vmatprep.subr.mxu0 %v13761_v15  ;;  %11051 = vmatpush3.msra.mxu1 %v22501_v30  ;;  %v22503_v30 = vld [vmem:[#allocation5_spill] sm:$0xff] }
  0x4f   :  { %11016 = vmatpush3.msra.mxu0 %v13770_v41  ;;  %11052 = vmatprep.subr.mxu1 %v13653_v6  ;;  %v22504_v6 = vand.u32 4294901760, %v22503_v30  ;;  %v22511_v30 = vand.u32 4294901760, %v13422_v37  ;;  %v22515_v37 = vand.u32 4294901760, %v13498_v4 }
  0x50   :  { %11017 = vmatprep.subr.mxu0 %v13774_v28  ;;  %11053 = vmatpush3.msra.mxu1 %v22502_v52  ;;  %v22506_v52 = vld [vmem:[#allocation26_spill] sm:$0xff] }
  0x51   :  { %11018 = vmatpush3.msra.mxu0 %v13782_v54  ;;  %11054 = vmatprep.subr.mxu1 %v13699_v44  ;;  %v22507_v44 = vand.u32 4294901760, %v13403_v31  ;;  %v22513_v31 = vand.u32 4294901760, %v13450_v47  ;;  %v81_v47 = vld [vmem:[%s21623_s1 + $0x168] sm:$0xff] }
  0x52   :  { %11019 = vmatprep.subr.mxu0 %v13804_v11  ;;  %11055 = vmatpush3.msra.mxu1 %v13711_v63  ;;  %v22509_v63 = vand.u32 4294901760, %v13409_v33  ;;  %v22514_v33 = vand.u32 4294901760, %v13488_v62  ;;  %v22520_v62 = vand.u32 4294901760, %v13582_v50  ;;  %v13996_v50 = vand.u32 4294901760, %v81_v47 }
  0x53   :  { %11020 = vmatpush3.msra.mxu0 %v13812_v57  ;;  %11056 = vmatprep.subr.mxu1 %v13727_v60  ;;  %v22510_v60 = vand.u32 4294901760, %v13834_v45 }
  0x54   :  { %11021 = vmatprep.subr.mxu0 %v13820_v27  ;;  %11057 = vmatpush3.msra.mxu1 %v22506_v52  ;;  %v22508_v27 = vand.u32 4294901760, %v13831_v29  ;;  %22524 = vst [vmem:[#allocation6_spill] sm:$0xff] %v13996_v50 }
  0x55   :  { %11022 = vmatpush3.msra.mxu0 %v13828_v12  ;;  %11096 = vmatprep.subr.mxu1 %v13320_v2  ;;  %v22516_v2 = vand.u32 4294901760, %v13512_v13  ;;  %v22522_v13 = vand.u32 4294901760, %v22487_v39  ;;  %v95_v39 = vld [vmem:[%s21623_s1 + $0x1d8] sm:$0xff] }
  0x56   :  { %1154 = vmatmul.mubr.f32.vlgmr.msra.gmra.mxu0 %v13834_v45  ;;  %11061 = vmatprep.subr.mxu0 %v22504_v6 }
  0x57   :  { %11062 = vmatpush3.msra.mxu0 %v22505_v46  ;;  %1258 = vmatprep.mubr.f32.mxu1 %v22508_v27  ;;  %v14028_v27 = vsub.f32 %v81_v47, %v13996_v50  ;;  %v92_v47 = vld [vmem:[%s21623_s1 + $0x1c0] sm:$0xff] }
  0x58   :  { %11063 = vmatprep.subr.mxu0 %v22507_v44  ;;  %1262 = vmatmul.mubr.f32.vlgmr.msra.gmra.mxu1 %v22510_v60  ;;  %v97_v44 = vld [vmem:[%s21623_s1 + $0x1e8] sm:$0xff]  ;;  %v22526_v60 = vand.u32 4294901760, %v13650_v7 }
  0x59   :  { %11064 = vmatpush3.msra.mxu0 %v22509_v63  ;;  %11097 = vmatpush3.msra.mxu1 %v13322_v3  ;;  %v22517_v3 = vand.u32 4294901760, %v13526_v48  ;;  %v22523_v48 = vand.u32 4294901760, %v22489_v34  ;;  %v14013_v6 = vand.u32 4294901760, %v97_v44  ;;  %v22528_v63 = vand.u32 4294901760, %v13664_v0 }
  0x5a   :  { %11065 = vmatprep.subr.mxu0 %v22511_v30  ;;  %11098 = vmatprep.subr.mxu1 %v13333_v8  ;;  %v83_v8 = vld [vmem:[%s21623_s1 + $0x178] sm:$0xff]  ;;  %v22531_v0 = vand.u32 4294901760, %v13703_v5 }
  0x5b   :  { %11066 = vmatpush3.msra.mxu0 %v22512_v25  ;;  %11099 = vmatpush3.msra.mxu1 %v13335_v9  ;;  %v82_v9 = vld [vmem:[%s21623_s1 + $0x170] sm:$0xff]  ;;  %22527 = vst [vmem:[#allocation17_spill] sm:$0xff] %v14013_v6  ;;  %v21699_v25 = vand.u32 4294901760, %v14028_v27 }
  0x5c   :  { %11067 = vmatprep.subr.mxu0 %v22513_v31  ;;  %11100 = vmatprep.subr.mxu1 %v13337_v10  ;;  %v22518_v10 = vand.u32 4294901760, %v13543_v22  ;;  %v13981_v4 = vand.u32 4294901760, %v82_v9  ;;  %v22525_v22 = vand.u32 4294901760, %v22491_v40  ;;  %v22536_v31 = vand.u32 4294901760, %v13761_v15 }
  0x5d   :  { %11068 = vmatpush3.msra.mxu0 %v22514_v33  ;;  %11101 = vmatpush3.msra.mxu1 %v13351_v16  ;;  %v99_v16 = vld [vmem:[%s21623_s1 + $0x1f8] sm:$0xff] }
  0x5e   :  { %11069 = vmatprep.subr.mxu0 %v22515_v37  ;;  %11102 = vmatprep.subr.mxu1 %v13353_v17  ;;  %v98_v17 = vld [vmem:[%s21623_s1 + $0x1f0] sm:$0xff]  ;;  %22521 = vst [vmem:[#allocation15_spill] sm:$0xff] %v13981_v4  ;;  %v14011_v61 = vsub.f32 %v82_v9, %v13981_v4 }
  0x5f   :  { %11070 = vmatpush3.msra.mxu0 %v22516_v2  ;;  %11103 = vmatpush3.msra.mxu1 %v13355_v18  ;;  %v13979_v18 = vand.u32 4294901760, %v83_v8  ;;  %v22539_v2 = vand.u32 4294901760, %v13770_v41 }
  0x60   :  { %11071 = vmatprep.subr.mxu0 %v22517_v3  ;;  %11104 = vmatprep.subr.mxu1 %v13374_v23  ;;  %v13986_v23 = vand.u32 4294901760, %v99_v16  ;;  %v21701_v34 = vand.u32 4294901760, %v14011_v61 }
  0x61   :  { %11072 = vmatpush3.msra.mxu0 %v22518_v10  ;;  %11105 = vmatpush3.msra.mxu1 %v13377_v24  ;;  %v13994_v24 = vand.u32 4294901760, %v98_v17 }
  0x62   :  { %11073 = vmatprep.subr.mxu0 %v22519_v42  ;;  %11106 = vmatprep.subr.mxu1 %v13383_v26  ;;  %v80_v26 = vld [vmem:[%s21623_s1 + $0x160] sm:$0xff]  ;;  %v14022_v7 = vsub.f32 %v99_v16, %v13986_v23  ;;  %v14098_v3 = vsub.f32 %v14011_v61, %v21701_v34  ;;  %v22543_v16 = vand.u32 4294901760, %v13782_v54 }
  0x63   :  { %11074 = vmatpush3.msra.mxu0 %v22520_v62  ;;  %11107 = vmatpush3.msra.mxu1 %v13406_v32  ;;  %v14008_v32 = vsub.f32 %v83_v8, %v13979_v18  ;;  %v14030_v29 = vand.u32 4294901760, %v80_v26  ;;  %v14033_v45 = vsub.f32 %v98_v17, %v13994_v24  ;;  %v93_v8 = vld [vmem:[%s21623_s1 + $0x1c8] sm:$0xff]  ;;  %v22544_v42 = vld [vmem:[#allocation28_spill] sm:$0xff] }
  0x64   :  { %11075 = vmatprep.subr.mxu0 %v22522_v13  ;;  %11108 = vmatprep.subr.mxu1 %v13419_v36  ;;  %v96_v36 = vld [vmem:[%s21623_s1 + $0x1e0] sm:$0xff]  ;;  %v21705_v40 = vand.u32 4294901760, %v14022_v7  ;;  %v22546_v13 = vand.u32 4294901760, %v13804_v11  ;;  %v22567_v11 = vld [vmem:[#allocation27_spill] sm:$0xff] }
  0x65   :  { %11076 = vmatpush3.msra.mxu0 %v22523_v48  ;;  %11109 = vmatpush3.msra.mxu1 %v13425_v38  ;;  %v22529_v38 = vand.u32 4294901760, %v13686_v1  ;;  %22530 = vst [vmem:[#allocation7_spill] sm:$0xff] %v14030_v29  ;;  %v14038_v46 = vand.u32 4294901760, %v96_v36  ;;  %v22533_v1 = vand.u32 4294901760, %v13720_v58  ;;  %v21703_v5 = vand.u32 4294901760, %v14008_v32  ;;  %v76_v54 = vld [vmem:[%s21623_s1 + $0x140] sm:$0xff] }
  0x66   :  { %11077 = vmatprep.subr.mxu0 %v22525_v22  ;;  %11110 = vmatprep.subr.mxu1 %v22488_v59  ;;  %v79_v59 = vld [vmem:[%s21623_s1 + $0x158] sm:$0xff]  ;;  %v22534_v58 = vand.u32 4294901760, %v13731_v43  ;;  %v14065_v30 = vsub.f32 %v80_v26, %v14030_v29  ;;  %v94_v43 = vld [vmem:[%s21623_s1 + $0x1d0] sm:$0xff]  ;;  %v14110_v9 = vsub.f32 %v14022_v7, %v21705_v40  ;;  %v14142_v48 = vand.u32 4294901760, %v93_v8 }
  0x67   :  { %11078 = vmatpush3.msra.mxu0 %v22526_v60  ;;  %11111 = vmatpush3.msra.mxu1 %v22490_v21  ;;  %22532 = vst [vmem:[#allocation19_spill] sm:$0xff] %v14038_v46  ;;  %v14052_v21 = vsub.f32 %v97_v44, %v14013_v6  ;;  %v14077_v33 = vand.u32 4294901760, %v79_v59  ;;  %v14083_v37 = vsub.f32 %v96_v36, %v14038_v46  ;;  %v14112_v10 = vand.u32 4294901760, %v94_v43  ;;  %v22549_v36 = vld [vmem:[#allocation18_spill] sm:$0xff] }
  0x68   :  { %11079 = vmatprep.subr.mxu0 %v22528_v63  ;;  %11112 = vmatprep.subr.mxu1 %v22492_v55  ;;  %v78_v55 = vld [vmem:[%s21623_s1 + $0x150] sm:$0xff]  ;;  %v14091_v15 = vsub.f32 %v14008_v32, %v21703_v5  ;;  %v21698_v62 = vand.u32 4294901760, %v14065_v30  ;;  %22547 = vst [vmem:[#allocation13_spill] sm:$0xff] %v14142_v48  ;;  %v22548_v60 = vand.u32 4294901760, %v13812_v57  ;;  %v14223_v5 = vsub.f32 %v93_v8, %v14142_v48  ;;  %v22566_v8 = vld [vmem:[#allocation24_spill] sm:$0xff] }
  0x69   :  { %11080 = vmatpush3.msra.mxu0 %v22529_v38  ;;  %11113 = vmatpush3.msra.mxu1 %v22493_v53  ;;  %v22535_v53 = vand.u32 4294901760, %v13745_v19  ;;  %v14075_v19 = vand.u32 4294901760, %v95_v39  ;;  %22538 = vst [vmem:[#allocation9_spill] sm:$0xff] %v14077_v33  ;;  %v21700_v41 = vand.u32 4294901760, %v14052_v21  ;;  %22542 = vst [vmem:[#allocation11_spill] sm:$0xff] %v14112_v10  ;;  %v14140_v44 = vsub.f32 %v79_v59, %v14077_v33  ;;  %v22553_v59 = vld [vmem:[#allocation20_spill] sm:$0xff] }
  0x6a   :  { %11081 = vmatprep.subr.mxu0 %v22531_v0  ;;  %11114 = vmatprep.subr.mxu1 %v22494_v20  ;;  %v21702_v20 = vand.u32 4294901760, %v14033_v45  ;;  %v21704_v22 = vand.u32 4294901760, %v14083_v37  ;;  %v75_v0 = vld [vmem:[%s21623_s1 + $0x138] sm:$0xff]  ;;  %v13238_v57 = vld [vmem:[%s21622_s0 + $0x4] ss:$48 sps:$4 sm:$0xff]  }
  0x6b   :  { %11082 = vmatpush3.msra.mxu0 %v22533_v1  ;;  %11115 = vmatpush3.msra.mxu1 %v22495_v49  ;;  %22537 = vst [vmem:[#allocation8_spill] sm:$0xff] %v14075_v19  ;;  %v77_v49 = vld [vmem:[%s21623_s1 + $0x148] sm:$0xff]  ;;  %v14146_v26 = vsub.f32 %v95_v39, %v14075_v19  ;;  %v14159_v38 = vsub.f32 %v14052_v21, %v21700_v41  ;;  %v22551_v1 = vld [vmem:[#allocation30_spill] sm:$0xff] }
  0x6c   :  { %11083 = vmatprep.subr.mxu0 %v22534_v58  ;;  %11116 = vmatprep.subr.mxu1 %v22496_v35  ;;  %v14093_v35 = vand.u32 4294901760, %v78_v55  ;;  %v14120_v17 = vsub.f32 %v14033_v45, %v21702_v20  ;;  %v22552_v39 = vand.u32 4294901760, %v22551_v1  ;;  %v452_v58 = vrot.slane %v13238_v57, %v22567_v11  ;;  %v22568_v20 = vld [vmem:[#allocation25_spill] sm:$0xff] }
  0x6d   :  { %11084 = vmatpush3.msra.mxu0 %v22535_v53  ;;  %11117 = vmatpush3.msra.mxu1 %v22497_v14  ;;  %v22541_v14 = vand.u32 4294901760, %v13774_v28  ;;  %v14122_v28 = vand.u32 4294901760, %v77_v49  ;;  %v14173_v53 = vand.u32 4294901760, %v76_v54 }
  0x6e   :  { %11085 = vmatprep.subr.mxu0 %v22536_v31  ;;  %22540 = vst [vmem:[#allocation10_spill] sm:$0xff] %v14093_v35  ;;  %11118 = vmatprep.subr.mxu1 %v22498_v56  ;;  %v14127_v56 = vsub.f32 %v14028_v27, %v21699_v25  ;;  %v14153_v63 = vsub.f32 %v78_v55, %v14093_v35  ;;  %v14171_v55 = vand.u32 4294901760, %v92_v47  ;;  %v91_v31 = vld [vmem:[%s21623_s1 + $0x1b8] sm:$0xff]  ;;  %v22560_v25 = vld [vmem:[#allocation22_spill] sm:$0xff] }
  0x6f   :  { %11086 = vmatpush3.msra.mxu0 %v22539_v2  ;;  %1428 = vmatprep.mubr.f32.mxu0 %v22544_v42  ;;  %22545 = vst [vmem:[#allocation12_spill] sm:$0xff] %v14122_v28  ;;  %22555 = vst [vmem:[#allocation5_spill] sm:$0xff] %v14173_v53  ;;  %v14179_v2 = vsub.f32 %v94_v43, %v14112_v10  ;;  %v14195_v43 = vsub.f32 %v14065_v30, %v21698_v62  ;;  %v14219_v34 = vand.u32 4294901760, %v91_v31 }
  0x70   :  { %11087 = vmatprep.subr.mxu0 %v22541_v14  ;;  %11119 = vmatpush3.msra.mxu1 %v22499_v51  ;;  %22550 = vst [vmem:[#allocation14_spill] sm:$0xff] %v14153_v63  ;;  %22554 = vst [vmem:[#allocation16_spill] sm:$0xff] %v14171_v55  ;;  %v13241_v14 = vld [vmem:[%s21622_s0 + $0x64] ss:$48 sps:$4 sm:$0xff]   ;;  %v14228_v40 = vsub.f32 %v76_v54, %v14173_v53  ;;  %v73_v51 = vld [vmem:[%s21623_s1 + $0x128] sm:$0xff]  ;;  %v14243_v54 = vsub.f32 %v92_v47, %v14171_v55 }
  0x71   :  { %11088 = vmatpush3.msra.mxu0 %v22543_v16  ;;  %11120 = vmatprep.subr.mxu1 %v22549_v36  ;;  %v22556_v16 = vand.u32 4294901760, %v13828_v12  ;;  %v14189_v36 = vsub.f32 %v77_v49, %v14122_v28  ;;  %v74_v12 = vld [vmem:[%s21623_s1 + $0x130] sm:$0xff]  ;;  %v14210_v49 = vsub.f32 %v14083_v37, %v21704_v22  ;;  %22561 = vst [vmem:[#allocation28_spill] sm:$0xff] %v14219_v34  ;;  %v22562_v22 = vld [vmem:[#allocation23_spill] sm:$0xff]  ;;  %v14277_v62 = vand.u32 4294901760, %v73_v51 }
  0x72   :  { %11089 = vmatprep.subr.mxu0 %v22546_v13  ;;  %11121 = vmatpush3.msra.mxu1 %v22553_v59  ;;  %v22557_v13 = vld [vmem:[#allocation21_spill] sm:$0xff]  ;;  %22563 = vst [vmem:[#allocation18_spill] sm:$0xff] %v14228_v40  ;;  %v14234_v41 = vand.u32 4294901760, %v74_v12 }
  0x73   :  { %11090 = vmatpush3.msra.mxu0 %v22548_v60  ;;  %11122 = vmatprep.subr.mxu1 %v22557_v13  ;;  %v22558_v59 = vld [vmem:[#allocation29_spill] sm:$0xff]  ;;  %v14213_v13 = vand.u32 4294901760, %v75_v0  ;;  %v72_v60 = vld [vmem:[%s21623_s1 + $0x120] sm:$0xff]  ;;  %22571 = vst [vmem:[#allocation21_spill] sm:$0xff] %v14277_v62 }
  0x74   :  { %11091 = vmatprep.subr.mxu0 %v22552_v39  ;;  %v14200_v39 = vld [vmem:[%s21623_s1 + $0x1b0] sm:$0xff]  ;;  %11123 = vmatpush3.msra.mxu1 %v22560_v25  ;;  %22565 = vst [vmem:[#allocation20_spill] sm:$0xff] %v14234_v41  ;;  %v466_v25 = vrot.slane %v13241_v14, %v22567_v11  ;;  %v89_v14 = vld [vmem:[%s21623_s1 + $0x1a8] sm:$0xff]  ;;  %v88_v11 = vld [vmem:[%s21623_s1 + $0x1a0] sm:$0xff] }
  0x75   :  { %11092 = vmatpush3.msra.mxu0 %v22556_v16  ;;  %v21706_v16 = vand.u32 4294901760, %v14146_v26  ;;  %22559 = vst [vmem:[#allocation26_spill] sm:$0xff] %v14213_v13  ;;  %11124 = vmatprep.subr.mxu1 %v22562_v22  ;;  %v14231_v1 = vand.u32 4294901760, %v14200_v39  ;;  %v14259_v47 = vsub.f32 %v75_v0, %v14213_v13  ;;  %v22569_v22 = vand.u32 4294901760, %v14140_v44 }
  0x76   :  { %1430 = vmatmul.mubr.f32.vlgmr.msra.gmra.mxu0 %v22558_v59  ;;  %11131 = vmatprep.subr.mxu0 %v13986_v23  ;;  %v14293_v0 = vand.u32 4294901760, %v72_v60 }
  0x77   :  { %11132 = vmatpush3.msra.mxu0 %v13979_v18  ;;  %22564 = vst [vmem:[#allocation30_spill] sm:$0xff] %v14231_v1  ;;  %11125 = vmatpush3.msra.mxu1 %v22566_v8  ;;  %v14256_v8 = vsub.f32 %v14146_v26, %v21706_v16  ;;  %v14264_v57 = vsub.f32 %v14140_v44, %v22569_v22 }
  0x78   :  { %11133 = vmatprep.subr.mxu0 %v13994_v24  ;;  %11126 = vmatprep.subr.mxu1 %v22568_v20  ;;  %v22570_v20 = vand.u32 4294901760, %v14153_v63  ;;  %22574 = vst [vmem:[#allocation22_spill] sm:$0xff] %v14293_v0  ;;  %v14296_v22 = vsub.f32 %v91_v31, %v14219_v34 }
  0x79   :  { %11134 = vmatpush3.msra.mxu0 %v13981_v4  ;;  %11127 = vmatpush3.msra.mxu1 %v22506_v52  ;;  %v22572_v52 = vand.u32 4294901760, %v14179_v2  ;;  %v1796_v4 = vand.u32 4294901760, %v14256_v8  ;;  %v1684_v31 = vand.u32 4294901760, %v14264_v57  ;;  %v14324_v57 = vsub.f32 %v73_v51, %v14277_v62  ;;  %v87_v51 = vld [vmem:[%s21623_s1 + $0x198] sm:$0xff] }
  0x7a   :  { %11135 = vmatprep.subr.mxu0 %v14013_v6  ;;  %v14274_v16 = vsub.f32 %v14153_v63, %v22570_v20  ;;  %1532 = vmatprep.mubr.f32.mxu1 %v22544_v42  ;;  %v14291_v20 = vsub.f32 %v74_v12, %v14234_v41  ;;  %v22576_v12 = vand.u32 4294901760, %v14110_v9  ;;  %v14309_v63 = vand.u32 4294901760, %v88_v11 }
  0x7b   :  { %11136 = vmatpush3.msra.mxu0 %v13996_v50  ;;  %v14288_v50 = vsub.f32 %v14179_v2, %v22572_v52  ;;  %1534 = vmatmul.mubr.f32.vlgmr.msra.gmra.mxu1 %v22558_v59  ;;  %v470_v52 = vcombine.high %v452_v58, %v466_v25  ;;  %v71_v59 = vld [vmem:[%s21623_s1 + $0x118] sm:$0xff]  ;;  %v22577_v6 = vand.u32 4294901760, %v14091_v15  ;;  %v22578_v9 = vand.u32 4294901760, %v14223_v5  ;;  %v70_v15 = vld [vmem:[%s21623_s1 + $0x110] sm:$0xff] }
  0x7c   :  { %11137 = vmatprep.subr.mxu0 %v14038_v46  ;;  %22573 = vst [vmem:[#allocation29_spill] sm:$0xff] %v14291_v20  ;;  %v14300_v46 = vand.u32 4294901760, %v89_v14  ;;  %11166 = vmatprep.subr.mxu1 %v22576_v12  ;;  %v22579_v12 = vand.u32 4294901760, %v14189_v36 }
  0x7d   :  { %11138 = vmatpush3.msra.mxu0 %v14030_v29  ;;  %v469_v29 = vcombine.low %v452_v58, %v466_v25  ;;  %11167 = vmatpush3.msra.mxu1 %v22577_v6  ;;  %v14321_v8 = vsub.f32 %v14223_v5, %v22578_v9  ;;  %v22580_v6 = vand.u32 4294901760, %v14120_v17  ;;  %v1803_v58 = vand.u32 4294901760, %v14288_v50 }
  0x7e   :  { %22575 = vst [vmem:[#allocation23_spill] sm:$0xff] %v14300_v46  ;;  %11139 = vmatprep.subr.mxu0 %v14075_v19  ;;  %v14329_v19 = vsub.f32 %v14189_v36, %v22579_v12  ;;  %v14339_v25 = vsub.f32 %v72_v60, %v14293_v0  ;;  %v14347_v12 = vsub.f32 %v14200_v39, %v14231_v1  ;;  %v22582_v17 = vand.u32 4294901760, %v14098_v3  ;;  %v86_v39 = vld [vmem:[%s21623_s1 + $0x190] sm:$0xff] }
  0x7f   :  { %11140 = vmatpush3.msra.mxu0 %v14077_v33  ;;  %11168 = vmatprep.subr.mxu1 %v22580_v6  ;;  %v22583_v50 = vand.u32 4294901760, %v14243_v54  ;;  %v22584_v6 = vand.u32 4294901760, %v14228_v40  ;;  %v14362_v9 = vand.u32 4294901760, %v71_v59  ;;  %v22586_v3 = vand.u32 4294901760, %v14159_v38 }
  0x80   :  { %11141 = vmatprep.subr.mxu0 %v14112_v10  ;;  %22581 = vst [vmem:[#allocation24_spill] sm:$0xff] %v14339_v25  ;;  %11169 = vmatpush3.msra.mxu1 %v22582_v17  ;;  %v14378_v10 = vand.u32 4294901760, %v469_v29  ;;  %v22588_v33 = vand.u32 4294901760, %v14127_v56  ;;  %v14385_v38 = vand.u32 4294901760, %v87_v51  ;;  %v22590_v17 = vand.u32 4294901760, %v14296_v22 }
  0x81   :  { %11142 = vmatpush3.msra.mxu0 %v14093_v35  ;;  %v14355_v60 = vsub.f32 %v14243_v54, %v22583_v50  ;;  %v14360_v42 = vsub.f32 %v14228_v40, %v22584_v6  ;;  %v14367_v35 = vand.u32 4294901760, %v470_v52  ;;  %11170 = vmatprep.subr.mxu1 %v22586_v3  ;;  %v14373_v50 = vand.u32 4294901760, %v70_v15 }
  0x82   :  { %11143 = vmatprep.subr.mxu0 %v14142_v48  ;;  %v14376_v6 = vsub.f32 %v89_v14, %v14300_v46  ;;  %22587 = vst [vmem:[#allocation31_spill] sm:$0xff] %v14378_v10  ;;  %11171 = vmatpush3.msra.mxu1 %v22588_v33  ;;  %v1810_v40 = vand.u32 4294901760, %v14321_v8  ;;  %v1698_v48 = vand.u32 4294901760, %v14329_v19  ;;  %v22589_v14 = vand.u32 4294901760, %v14210_v49  ;;  %v85_v19 = vld [vmem:[%s21623_s1 + $0x188] sm:$0xff] }
  0x83   :  { %22585 = vst [vmem:[#allocation25_spill] sm:$0xff] %v14367_v35  ;;  %11144 = vmatpush3.msra.mxu0 %v14122_v28  ;;  %v14394_v28 = vsub.f32 %v14296_v22, %v22590_v17  ;;  %v14396_v56 = vand.u32 4294901760, %v86_v39  ;;  %v14403_v8 = vsub.f32 %v88_v11, %v14309_v63  ;;  %v22592_v49 = vand.u32 4294901760, %v14195_v43  ;;  %v69_v33 = vld [vmem:[%s21623_s1 + $0x108] sm:$0xff]  ;;  %1876 = vmatprep.mubr.f32.mxu1 %v14367_v35 }
  0x84   :  { %11145 = vmatprep.subr.mxu0 %v14171_v55  ;;  %11172 = vmatprep.subr.mxu1 %v22589_v14  ;;  %v1817_v14 = vand.u32 4294901760, %v14355_v60  ;;  %v1705_v17 = vand.u32 4294901760, %v14360_v42  ;;  %v14411_v3 = vsub.f32 %v71_v59, %v14362_v9  ;;  %v14417_v55 = vsub.f32 %v470_v52, %v14367_v35  ;;  %v84_v59 = vld [vmem:[%s21623_s1 + $0x180] sm:$0xff] }
  0x85   :  { %22591 = vst [vmem:[#allocation32_spill] sm:$0xff] %v14396_v56  ;;  %11146 = vmatpush3.msra.mxu0 %v14173_v53  ;;  %11173 = vmatpush3.msra.mxu1 %v22592_v49  ;;  %v22593_v11 = vand.u32 4294901760, %v14259_v47  ;;  %v14424_v60 = vsub.f32 %v70_v15, %v14373_v50  ;;  %v68_v52 = vld [vmem:[%s21623_s1 + $0x100] sm:$0xff]  ;;  %v14434_v49 = vsub.f32 %v469_v29, %v14378_v10  ;;  %v1824_v29 = vand.u32 4294901760, %v14394_v28 }
  0x86   :  { %11147 = vmatprep.subr.mxu0 %v14219_v34  ;;  %11174 = vmatprep.subr.mxu1 %v1796_v4  ;;  %v22594_v4 = vand.u32 4294901760, %v14291_v20  ;;  %v14444_v34 = vsub.f32 %v87_v51, %v14385_v38  ;;  %v22595_v53 = vand.u32 4294901760, %v14347_v12  ;;  %v22596_v42 = vand.u32 4294901760, %v14274_v16  ;;  %v22629_v35 = vld [vmem:[#allocation20_spill] sm:$0xff] }
  0x87   :  { %v1711_v43 = vsub.f32 %v14259_v47, %v22593_v11  ;;  %11148 = vmatpush3.msra.mxu0 %v14213_v13  ;;  %11175 = vmatpush3.msra.mxu1 %v1684_v31  ;;  %v14440_v11 = vand.u32 4294901760, %v85_v19  ;;  %v14451_v13 = vand.u32 4294901760, %v69_v33  ;;  %v14457_v51 = vand.u32 4294901760, %v84_v59 }
  0x88   :  { %v1718_v15 = vsub.f32 %v14291_v20, %v22594_v4  ;;  %11149 = vmatprep.subr.mxu0 %v14231_v1  ;;  %11176 = vmatprep.subr.mxu1 %v1803_v58  ;;  %v1830_v31 = vsub.f32 %v14347_v12, %v22595_v53  ;;  %v14459_v20 = vand.u32 4294901760, %v68_v52  ;;  %v14463_v28 = vsub.f32 %v86_v39, %v14396_v56 }
  0x89   :  { %11150 = vmatpush3.msra.mxu0 %v14234_v41  ;;  %11177 = vmatpush3.msra.mxu1 %v22596_v42  ;;  %v1712_v53 = vand.u32 4294901760, %v1711_v43  ;;  %v22597_v4 = vand.u32 4294901760, %v14376_v6  ;;  %v21750_v16 = vand.u32 4294901760, %v14339_v25  ;;  %v22598_v58 = vand.u32 4294901760, %v14324_v57 }
  0x8a   :  { %11151 = vmatprep.subr.mxu0 %v14300_v46  ;;  %11178 = vmatprep.subr.mxu1 %v1810_v40  ;;  %v1719_v1 = vand.u32 4294901760, %v1718_v15  ;;  %v14477_v40 = vsub.f32 %v85_v19, %v14440_v11  ;;  %v1831_v43 = vand.u32 4294901760, %v1830_v31  ;;  %v22599_v42 = vand.u32 4294901760, %v14403_v8 }
  0x8b   :  { %v1837_v41 = vsub.f32 %v14376_v6, %v22597_v4  ;;  %11152 = vmatpush3.msra.mxu0 %v14277_v62  ;;  %11179 = vmatpush3.msra.mxu1 %v1698_v48  ;;  %v1725_v39 = vsub.f32 %v14324_v57, %v22598_v58  ;;  %v14481_v4 = vsub.f32 %v69_v33, %v14451_v13  ;;  %v22601_v19 = vand.u32 4294901760, %v14417_v55 }
  0x8c   :  { %11153 = vmatprep.subr.mxu0 %v14309_v63  ;;  %11180 = vmatprep.subr.mxu1 %v1817_v14  ;;  %v1844_v48 = vsub.f32 %v14403_v8, %v22599_v42  ;;  %v14489_v58 = vsub.f32 %v68_v52, %v14459_v20  ;;  %v14496_v33 = vsub.f32 %v84_v59, %v14457_v51  ;;  %v22603_v52 = vand.u32 4294901760, %v14434_v49 }
  0x8d   :  { %11154 = vmatpush3.msra.mxu0 %v14293_v0  ;;  %11181 = vmatpush3.msra.mxu1 %v1705_v17  ;;  %v1638_v14 = vsub.f32 %v14417_v55, %v22601_v19  ;;  %v1838_v42 = vand.u32 4294901760, %v1837_v41  ;;  %v1732_v17 = vsub.f32 %v14339_v25, %v21750_v16  ;;  %v1726_v19 = vand.u32 4294901760, %v1725_v39 }
  0x8e   :  { %22600 = vst [vmem:[#allocation33_spill] sm:$0xff] %v14489_v58  ;;  %22602 = vst [vmem:[#allocation34_spill] sm:$0xff] %v14496_v33  ;;  %11155 = vmatprep.subr.mxu0 %v14385_v38  ;;  %11182 = vmatprep.subr.mxu1 %v1824_v29  ;;  %v1644_v15 = vsub.f32 %v14434_v49, %v22603_v52  ;;  %v22604_v59 = vand.u32 4294901760, %v14444_v34  ;;  %v1845_v29 = vand.u32 4294901760, %v1844_v48  ;;  %v22605_v16 = vand.u32 4294901760, %v14411_v3 }
  0x8f   :  { %11156 = vmatpush3.msra.mxu0 %v14362_v9  ;;  %11183 = vmatpush3.msra.mxu1 %v1712_v53  ;;  %v1639_v53 = vand.u32 4294901760, %v1638_v14  ;;  %v22606_v39 = vand.u32 4294901760, %v14463_v28  ;;  %v21754_v41 = vand.u32 4294901760, %v14496_v33  ;;  %v21753_v46 = vand.u32 4294901760, %v14489_v58 }
  0x90   :  { %v1851_v31 = vsub.f32 %v14444_v34, %v22604_v59  ;;  %11157 = vmatprep.subr.mxu0 %v14396_v56  ;;  %11184 = vmatprep.subr.mxu1 %v1831_v43  ;;  %v1739_v52 = vsub.f32 %v14411_v3, %v22605_v16  ;;  %v1733_v43 = vand.u32 4294901760, %v1732_v17  ;;  %v1645_v48 = vand.u32 4294901760, %v1644_v15 }
  0x91   :  { %11158 = vmatpush3.msra.mxu0 %v14373_v50  ;;  %11185 = vmatpush3.msra.mxu1 %v1719_v1  ;;  %v1858_v59 = vsub.f32 %v14463_v28, %v22606_v39  ;;  %v22607_v56 = vand.u32 4294901760, %v14424_v60  ;;  %v22608_v14 = vand.u32 4294901760, %v14477_v40  ;;  %v22609_v15 = vand.u32 4294901760, %v14481_v4 }
  0x92   :  { %11159 = vmatprep.subr.mxu0 %v14440_v11  ;;  %11186 = vmatprep.subr.mxu1 %v1838_v42  ;;  %v1852_v1 = vand.u32 4294901760, %v1851_v31  ;;  %v1740_v42 = vand.u32 4294901760, %v1739_v52  ;;  %v1872_v31 = vsub.f32 %v14496_v33, %v21754_v41  ;;  %v22627_v41 = vld [vmem:[#allocation26_spill] sm:$0xff] }
  0x93   :  { %v1746_v16 = vsub.f32 %v14424_v60, %v22607_v56  ;;  %11160 = vmatpush3.msra.mxu0 %v14451_v13  ;;  %11187 = vmatpush3.msra.mxu1 %v1726_v19  ;;  %v1865_v39 = vsub.f32 %v14477_v40, %v22608_v14  ;;  %v1753_v17 = vsub.f32 %v14481_v4, %v22609_v15  ;;  %v1859_v56 = vand.u32 4294901760, %v1858_v59  ;;  %v22613_v14 = vld [vmem:[#allocation6_spill] sm:$0xff]  ;;  %v22616_v15 = vld [vmem:[#allocation7_spill] sm:$0xff] }
  0x94   :  { %11161 = vmatprep.subr.mxu0 %v14457_v51  ;;  %11188 = vmatprep.subr.mxu1 %v1845_v29  ;;  %v1760_v29 = vsub.f32 %v14489_v58, %v21753_v46  ;;  %v1873_v59 = vand.u32 4294901760, %v1872_v31  ;;  %v22619_v31 = vld [vmem:[#allocation11_spill] sm:$0xff]  ;;  %v22626_v46 = vld [vmem:[#allocation28_spill] sm:$0xff] }
  0x95   :  { %11162 = vmatpush3.msra.mxu0 %v14459_v20  ;;  %1640 = vmatprep.mubr.f32.mxu0 %v1639_v53  ;;  %v1747_v19 = vand.u32 4294901760, %v1746_v16  ;;  %v1866_v52 = vand.u32 4294901760, %v1865_v39  ;;  %v1754_v53 = vand.u32 4294901760, %v1753_v17  ;;  %v22611_v16 = vld [vmem:[#allocation15_spill] sm:$0xff]  ;;  %v22617_v17 = vld [vmem:[#allocation8_spill] sm:$0xff] }
  0x96   :  { %11189 = vmatpush3.msra.mxu1 %v1733_v43  ;;  %1646 = vmatmul.mubr.f32.vlgmr.msra.gmra.mxu0 %v1645_v48  ;;  %v1761_v43 = vand.u32 4294901760, %v1760_v29  ;;  %v22610_v48 = vld [vmem:[#allocation14_spill] sm:$0xff]  ;;  %v22614_v39 = vld [vmem:[#allocation19_spill] sm:$0xff] }
  0x97   :  { %11190 = vmatprep.subr.mxu1 %v1852_v1  ;;  %11201 = vmatprep.subr.mxu0 %v14022_v7  ;;  %v22612_v1 = vld [vmem:[#allocation17_spill] sm:$0xff]  ;;  %v22621_v29 = vld [vmem:[#allocation10_spill] sm:$0xff] }
  0x98   :  { %11191 = vmatpush3.msra.mxu1 %v1740_v42  ;;  %11202 = vmatpush3.msra.mxu0 %v14008_v32  ;;  %v22615_v42 = vld [vmem:[#allocation18_spill] sm:$0xff] }
  0x99   :  { %11192 = vmatprep.subr.mxu1 %v1859_v56  ;;  %11203 = vmatprep.subr.mxu0 %v14033_v45  ;;  %v22618_v56 = vld [vmem:[#allocation9_spill] sm:$0xff] }
  0x9a   :  { %11193 = vmatpush3.msra.mxu1 %v1747_v19  ;;  %11204 = vmatpush3.msra.mxu0 %v14011_v61  ;;  %v22620_v19 = vld [vmem:[#allocation29_spill] sm:$0xff] }
  0x9b   :  { %11194 = vmatprep.subr.mxu1 %v1866_v52  ;;  %11205 = vmatprep.subr.mxu0 %v14052_v21  ;;  %v22622_v52 = vld [vmem:[#allocation13_spill] sm:$0xff] }
  0x9c   :  { %11195 = vmatpush3.msra.mxu1 %v1754_v53  ;;  %11206 = vmatpush3.msra.mxu0 %v14028_v27  ;;  %v22623_v53 = vld [vmem:[#allocation12_spill] sm:$0xff] }
  0x9d   :  { %11196 = vmatprep.subr.mxu1 %v1873_v59  ;;  %11207 = vmatprep.subr.mxu0 %v14083_v37  ;;  %v22624_v59 = vld [vmem:[#allocation16_spill] sm:$0xff] }
  0x9e   :  { %11197 = vmatpush3.msra.mxu1 %v1761_v43  ;;  %11208 = vmatpush3.msra.mxu0 %v14065_v30  ;;  %v22625_v43 = vld [vmem:[#allocation5_spill] sm:$0xff] }
  0x9f   :  { %1878 = vmatmul.mubr.f32.vlgmr.msra.gmra.mxu1 %v14378_v10  ;;  %11209 = vmatprep.subr.mxu0 %v14146_v26  ;;  %v22628_v10 = vld [vmem:[#allocation30_spill] sm:$0xff] }
  0xa0   :  { %11236 = vmatprep.subr.mxu1 %v13986_v23  ;;  %11210 = vmatpush3.msra.mxu0 %v14140_v44 }
  0xa1   :  { %11237 = vmatpush3.msra.mxu1 %v13979_v18  ;;  %11211 = vmatprep.subr.mxu0 %v14179_v2 }
  0xa2   :  { %11238 = vmatprep.subr.mxu1 %v13994_v24  ;;  %11212 = vmatpush3.msra.mxu0 %v22610_v48 }
  0xa3   :  { %11239 = vmatpush3.msra.mxu1 %v22611_v16  ;;  %11213 = vmatprep.subr.mxu0 %v14223_v5 }
  0xa4   :  { %11240 = vmatprep.subr.mxu1 %v22612_v1  ;;  %11214 = vmatpush3.msra.mxu0 %v14189_v36 }
  0xa5   :  { %11241 = vmatpush3.msra.mxu1 %v22613_v14  ;;  %11215 = vmatprep.subr.mxu0 %v14243_v54 }
  0xa6   :  { %11242 = vmatprep.subr.mxu1 %v22614_v39  ;;  %11216 = vmatpush3.msra.mxu0 %v22615_v42 }
  0xa7   :  { %11243 = vmatpush3.msra.mxu1 %v22616_v15  ;;  %11217 = vmatprep.subr.mxu0 %v14296_v22 }
  0xa8   :  { %11244 = vmatprep.subr.mxu1 %v22617_v17  ;;  %11218 = vmatpush3.msra.mxu0 %v14259_v47 }
  0xa9   :  { %11245 = vmatpush3.msra.mxu1 %v22618_v56  ;;  %11219 = vmatprep.subr.mxu0 %v14347_v12 }
  0xaa   :  { %11246 = vmatprep.subr.mxu1 %v22619_v31  ;;  %11220 = vmatpush3.msra.mxu0 %v22620_v19 }
  0xab   :  { %11247 = vmatpush3.msra.mxu1 %v22621_v29  ;;  %11221 = vmatprep.subr.mxu0 %v14376_v6 }
  0xac   :  { %11248 = vmatprep.subr.mxu1 %v22622_v52  ;;  %11222 = vmatpush3.msra.mxu0 %v14324_v57 }
  0xad   :  { %11249 = vmatpush3.msra.mxu1 %v22623_v53  ;;  %11223 = vmatprep.subr.mxu0 %v14403_v8 }
  0xae   :  { %11250 = vmatprep.subr.mxu1 %v22624_v59  ;;  %11224 = vmatpush3.msra.mxu0 %v14339_v25  ;;  %v22630_v25 = vld [vmem:[#allocation23_spill] sm:$0xff] }
  0xaf   :  { %11251 = vmatpush3.msra.mxu1 %v22625_v43  ;;  %11225 = vmatprep.subr.mxu0 %v14444_v34 }
  0xb0   :  { %11252 = vmatprep.subr.mxu1 %v22626_v46  ;;  %11226 = vmatpush3.msra.mxu0 %v14411_v3 }
  0xb1   :  { %11253 = vmatpush3.msra.mxu1 %v22627_v41  ;;  %11227 = vmatprep.subr.mxu0 %v14463_v28 }
  0xb2   :  { %11254 = vmatprep.subr.mxu1 %v22628_v10  ;;  %11228 = vmatpush3.msra.mxu0 %v14424_v60 }
  0xb3   :  { %11255 = vmatpush3.msra.mxu1 %v22629_v35  ;;  %11229 = vmatprep.subr.mxu0 %v14477_v40 }
  0xb4   :  { %11256 = vmatprep.subr.mxu1 %v22630_v25  ;;  %11230 = vmatpush3.msra.mxu0 %v14481_v4  ;;  %v22631_v25 = vand.u32 4294901760, %v14022_v7  ;;  %v22636_v7 = vand.u32 4294901760, %v14052_v21  ;;  %v22641_v21 = vand.u32 4294901760, %v14434_v49 }
  0xb5   :  { %11257 = vmatpush3.msra.mxu1 %v14277_v62  ;;  %11231 = vmatprep.subr.mxu0 %v14496_v33  ;;  %v22632_v62 = vand.u32 4294901760, %v14008_v32  ;;  %v22633_v33 = vld [vmem:[#allocation32_spill] sm:$0xff]  ;;  %v22637_v32 = vand.u32 4294901760, %v14028_v27  ;;  %v22643_v27 = vand.u32 4294901760, %v14140_v44 }
  0xb6   :  { %11258 = vmatprep.subr.mxu1 %v14309_v63  ;;  %11232 = vmatpush3.msra.mxu0 %v14489_v58  ;;  %v22634_v58 = vand.u32 4294901760, %v14033_v45  ;;  %v22638_v45 = vand.u32 4294901760, %v14083_v37  ;;  %v22644_v37 = vand.u32 4294901760, %v14179_v2  ;;  %v22648_v2 = vand.u32 4294901760, %v14243_v54 }
  0xb7   :  { %2013 = vmatprep.mubr.f32.mxu0 %v14417_v55  ;;  %11259 = vmatpush3.msra.mxu1 %v14293_v0  ;;  %v22635_v0 = vand.u32 4294901760, %v14011_v61  ;;  %v22639_v61 = vand.u32 4294901760, %v14417_v55  ;;  %v22645_v55 = vand.u32 4294901760, %v22610_v48  ;;  %v22650_v54 = vand.u32 4294901760, %v14296_v22  ;;  %v113_v48 = vld [vmem:[%s21623_s1 + $0x268] sm:$0xff] }
  0xb8   :  { %2016 = vmatmul.mubr.f32.vlgmr.msra.gmra.mxu0 %v14434_v49  ;;  %11260 = vmatprep.subr.mxu1 %v14385_v38  ;;  %v129_v49 = vld [vmem:[%s21623_s1 + $0x2e8] sm:$0xff]  ;;  %v22652_v22 = vand.u32 4294901760, %v14347_v12  ;;  %v112_v12 = vld [vmem:[%s21623_s1 + $0x260] sm:$0xff] }
  0xb9   :  { %11271 = vmatprep.subr.mxu0 %v22631_v25  ;;  %11261 = vmatpush3.msra.mxu1 %v14362_v9  ;;  %v22649_v25 = vand.u32 4294901760, %v22615_v42  ;;  %v128_v42 = vld [vmem:[%s21623_s1 + $0x2e0] sm:$0xff] }
  0xba   :  { %11272 = vmatpush3.msra.mxu0 %v22632_v62  ;;  %11262 = vmatprep.subr.mxu1 %v22633_v33  ;;  %v22640_v62 = vand.u32 4294901760, %v14065_v30  ;;  %v115_v30 = vld [vmem:[%s21623_s1 + $0x278] sm:$0xff] }
  0xbb   :  { %11273 = vmatprep.subr.mxu0 %v22634_v58  ;;  %11263 = vmatpush3.msra.mxu1 %v14373_v50  ;;  %v14653_v44 = vand.u32 4294901760, %v115_v30 }
  0xbc   :  { %11274 = vmatpush3.msra.mxu0 %v22635_v0  ;;  %11264 = vmatprep.subr.mxu1 %v14440_v11  ;;  %v22642_v0 = vand.u32 4294901760, %v14146_v26  ;;  %v130_v26 = vld [vmem:[%s21623_s1 + $0x2f0] sm:$0xff] }
  0xbd   :  { %11275 = vmatprep.subr.mxu0 %v22636_v7  ;;  %11265 = vmatpush3.msra.mxu1 %v14451_v13  ;;  %v14675_v58 = vand.u32 4294901760, %v130_v26 }
  0xbe   :  { %11276 = vmatpush3.msra.mxu0 %v22637_v32  ;;  %11266 = vmatprep.subr.mxu1 %v14457_v51  ;;  %v14722_v32 = vand.u32 4294901760, %v128_v42 }
  0xbf   :  { %11277 = vmatprep.subr.mxu0 %v22638_v45  ;;  %11267 = vmatpush3.msra.mxu1 %v14459_v20  ;;  %v22659_v45 = vand.u32 4294901760, %v14403_v8  ;;  %v110_v8 = vld [vmem:[%s21623_s1 + $0x250] sm:$0xff] }
  0xc0   :  { %2120 = vmatprep.mubr.f32.mxu1 %v22639_v61  ;;  %11278 = vmatpush3.msra.mxu0 %v22640_v62  ;;  %22658 = vst [vmem:[#allocation17_spill] sm:$0xff] %v14722_v32  ;;  %v22661_v62 = vld [vmem:[#allocation24_spill] sm:$0xff] }
  0xc1   :  { %2124 = vmatmul.mubr.f32.vlgmr.msra.gmra.mxu1 %v22641_v21  ;;  %11279 = vmatprep.subr.mxu0 %v22642_v0  ;;  %v22662_v21 = vand.u32 4294901760, %v22661_v62  ;;  %v124_v62 = vld [vmem:[%s21623_s1 + $0x2c0] sm:$0xff] }
  0xc2   :  { %11306 = vmatprep.subr.mxu1 %v13986_v23  ;;  %11280 = vmatpush3.msra.mxu0 %v22643_v27  ;;  %v131_v23 = vld [vmem:[%s21623_s1 + $0x2f8] sm:$0xff] }
  0xc3   :  { %11307 = vmatpush3.msra.mxu1 %v13979_v18  ;;  %11281 = vmatprep.subr.mxu0 %v22644_v37  ;;  %v22646_v18 = vand.u32 4294901760, %v14223_v5  ;;  %v14661_v5 = vand.u32 4294901760, %v131_v23 }
  0xc4   :  { %11308 = vmatprep.subr.mxu1 %v13994_v24  ;;  %11282 = vmatpush3.msra.mxu0 %v22645_v55  ;;  %v22647_v24 = vand.u32 4294901760, %v14189_v36  ;;  %v114_v36 = vld [vmem:[%s21623_s1 + $0x270] sm:$0xff]  ;;  %v22666_v55 = vand.u32 4294901760, %v14411_v3 }
  0xc5   :  { %11309 = vmatpush3.msra.mxu1 %v22611_v16  ;;  %11283 = vmatprep.subr.mxu0 %v22646_v18  ;;  %v22651_v16 = vand.u32 4294901760, %v14259_v47  ;;  %v14697_v47 = vsub.f32 %v131_v23, %v14661_v5  ;;  %v125_v23 = vld [vmem:[%s21623_s1 + $0x2c8] sm:$0xff]  ;;  %v14770_v18 = vsub.f32 %v128_v42, %v14722_v32 }
  0xc6   :  { %11310 = vmatprep.subr.mxu1 %v22612_v1  ;;  %11284 = vmatpush3.msra.mxu0 %v22647_v24  ;;  %v14684_v1 = vsub.f32 %v115_v30, %v14653_v44  ;;  %v22667_v24 = vand.u32 4294901760, %v14463_v28 }
  0xc7   :  { %11311 = vmatpush3.msra.mxu1 %v22613_v14  ;;  %11285 = vmatprep.subr.mxu0 %v22648_v2  ;;  %v14686_v14 = vand.u32 4294901760, %v114_v36 }
  0xc8   :  { %11312 = vmatprep.subr.mxu1 %v22614_v39  ;;  %11286 = vmatpush3.msra.mxu0 %v22649_v25  ;;  %v14691_v39 = vand.u32 4294901760, %v129_v49 }
  0xc9   :  { %11313 = vmatpush3.msra.mxu1 %v22616_v15  ;;  %11287 = vmatprep.subr.mxu0 %v22650_v54  ;;  %v22654_v15 = vand.u32 4294901760, %v22620_v19  ;;  %v14714_v19 = vsub.f32 %v130_v26, %v14675_v58  ;;  %v14720_v7 = vsub.f32 %v114_v36, %v14686_v14  ;;  %v14783_v26 = vand.u32 4294901760, %v110_v8  ;;  %v22672_v54 = vld [vmem:[#allocation23_spill] sm:$0xff] }
  0xca   :  { %11314 = vmatprep.subr.mxu1 %v22617_v17  ;;  %11288 = vmatpush3.msra.mxu0 %v22651_v16  ;;  %22653 = vst [vmem:[#allocation14_spill] sm:$0xff] %v14691_v39  ;;  %v14702_v17 = vand.u32 4294901760, %v113_v48  ;;  %v14735_v61 = vsub.f32 %v129_v49, %v14691_v39  ;;  %v22669_v36 = vand.u32 4294901760, %v14424_v60  ;;  %v22671_v49 = vand.u32 4294901760, %v14477_v40  ;;  %v109_v16 = vld [vmem:[%s21623_s1 + $0x248] sm:$0xff] }
  0xcb   :  { %11315 = vmatpush3.msra.mxu1 %v22618_v56  ;;  %11289 = vmatprep.subr.mxu0 %v22652_v22  ;;  %v22656_v56 = vand.u32 4294901760, %v14376_v6  ;;  %v111_v6 = vld [vmem:[%s21623_s1 + $0x258] sm:$0xff]  ;;  %v21768_v30 = vand.u32 4294901760, %v14714_v19  ;;  %22668 = vst [vmem:[#allocation7_spill] sm:$0xff] %v14783_v26  ;;  %v22674_v22 = vand.u32 4294901760, %v14481_v4  ;;  %v22675_v40 = vld [vmem:[#allocation21_spill] sm:$0xff] }
  0xcc   :  { %11316 = vmatprep.subr.mxu1 %v22619_v31  ;;  %11290 = vmatpush3.msra.mxu0 %v22654_v15  ;;  %22655 = vst [vmem:[#allocation15_spill] sm:$0xff] %v14702_v17  ;;  %v127_v31 = vld [vmem:[%s21623_s1 + $0x2d8] sm:$0xff]  ;;  %v14741_v0 = vsub.f32 %v113_v48, %v14702_v17  ;;  %v14751_v37 = vand.u32 4294901760, %v111_v6  ;;  %v21766_v2 = vand.u32 4294901760, %v14735_v61 }
  0xcd   :  { %11317 = vmatpush3.msra.mxu1 %v22621_v29  ;;  %11291 = vmatprep.subr.mxu0 %v22656_v56  ;;  %v22657_v29 = vand.u32 4294901760, %v14324_v57  ;;  %v14731_v57 = vand.u32 4294901760, %v112_v12  ;;  %v14743_v27 = vand.u32 4294901760, %v127_v31  ;;  %v14804_v60 = vsub.f32 %v14714_v19, %v21768_v30  ;;  %v108_v56 = vld [vmem:[%s21623_s1 + $0x240] sm:$0xff] }
  0xce   :  { %11318 = vmatprep.subr.mxu1 %v22622_v52  ;;  %v21769_v52 = vand.u32 4294901760, %v14684_v1  ;;  %22665 = vst [vmem:[#allocation18_spill] sm:$0xff] %v14751_v37  ;;  %v14799_v48 = vsub.f32 %v111_v6, %v14751_v37  ;;  %v14829_v6 = vsub.f32 %v110_v8, %v14783_v26 }
  0xcf   :  { %11292 = vmatpush3.msra.mxu0 %v22657_v29  ;;  %11319 = vmatpush3.msra.mxu1 %v22623_v53  ;;  %22660 = vst [vmem:[#allocation6_spill] sm:$0xff] %v14731_v57  ;;  %v21771_v53 = vand.u32 4294901760, %v14697_v47  ;;  %22663 = vst [vmem:[#allocation19_spill] sm:$0xff] %v14743_v27  ;;  %v14776_v3 = vsub.f32 %v112_v12, %v14731_v57  ;;  %v14793_v25 = vsub.f32 %v127_v31, %v14743_v27  ;;  %v22676_v31 = vld [vmem:[#allocation34_spill] sm:$0xff] }
  0xd0   :  { %11293 = vmatprep.subr.mxu0 %v22659_v45  ;;  %11320 = vmatprep.subr.mxu1 %v22624_v59  ;;  %v22664_v59 = vand.u32 4294901760, %v14444_v34  ;;  %v14763_v34 = vsub.f32 %v14684_v1, %v21769_v52  ;;  %v21765_v12 = vand.u32 4294901760, %v14770_v18  ;;  %v22677_v29 = vand.u32 4294901760, %v22676_v31  ;;  %v123_v52 = vld [vmem:[%s21623_s1 + $0x2b8] sm:$0xff] }
  0xd1   :  { %11294 = vmatpush3.msra.mxu0 %v22662_v21  ;;  %11321 = vmatpush3.msra.mxu1 %v22625_v43  ;;  %v126_v43 = vld [vmem:[%s21623_s1 + $0x2d0] sm:$0xff]  ;;  %v14834_v45 = vsub.f32 %v14735_v61, %v21766_v2  ;;  %v21770_v21 = vand.u32 4294901760, %v14776_v3  ;;  %v14857_v31 = vand.u32 4294901760, %v108_v56 }
  0xd2   :  { %11295 = vmatprep.subr.mxu0 %v22664_v59  ;;  %11322 = vmatprep.subr.mxu1 %v22626_v46  ;;  %v21767_v46 = vand.u32 4294901760, %v14720_v7  ;;  %v14789_v28 = vand.u32 4294901760, %v126_v43  ;;  %v22678_v59 = vld [vmem:[#allocation33_spill] sm:$0xff] }
  0xd3   :  { %11296 = vmatpush3.msra.mxu0 %v22666_v55  ;;  %11323 = vmatpush3.msra.mxu1 %v22627_v41  ;;  %v14781_v41 = vsub.f32 %v14697_v47, %v21771_v53  ;;  %v22679_v55 = vand.u32 4294901760, %v22678_v59  ;;  %22684 = vst [vmem:[#allocation29_spill] sm:$0xff] %v14857_v31  ;;  %v14888_v2 = vsub.f32 %v14776_v3, %v21770_v21 }
  0xd4   :  { %11297 = vmatprep.subr.mxu0 %v22667_v24  ;;  %11324 = vmatprep.subr.mxu1 %v22628_v10  ;;  %22670 = vst [vmem:[#allocation8_spill] sm:$0xff] %v14789_v28  ;;  %v21764_v10 = vand.u32 4294901760, %v14741_v0  ;;  %v14818_v15 = vsub.f32 %v14720_v7, %v21767_v46  ;;  %v14843_v24 = vand.u32 4294901760, %v109_v16  ;;  %v21774_v46 = vand.u32 4294901760, %v14829_v6 }
  0xd5   :  { %11298 = vmatpush3.msra.mxu0 %v22669_v36  ;;  %11325 = vmatpush3.msra.mxu1 %v22629_v35  ;;  %v14806_v35 = vand.u32 4294901760, %v125_v23  ;;  %v21772_v36 = vand.u32 4294901760, %v14793_v25 }
  0xd6   :  { %11299 = vmatprep.subr.mxu0 %v22671_v49  ;;  %11326 = vmatprep.subr.mxu1 %v22672_v54  ;;  %22681 = vst [vmem:[#allocation11_spill] sm:$0xff] %v14843_v24  ;;  %v14848_v8 = vsub.f32 %v14741_v0, %v21764_v10  ;;  %v14852_v49 = vsub.f32 %v126_v43, %v14789_v28  ;;  %v22682_v54 = vld [vmem:[#allocation22_spill] sm:$0xff]  ;;  %v14939_v10 = vand.u32 4294901760, %v123_v52 }
  0xd7   :  { %22673 = vst [vmem:[#allocation9_spill] sm:$0xff] %v14806_v35  ;;  %11300 = vmatpush3.msra.mxu0 %v22674_v22  ;;  %11327 = vmatpush3.msra.mxu1 %v22675_v40  ;;  %v22683_v22 = vld [vmem:[#allocation31_spill] sm:$0xff]  ;;  %v14861_v59 = vsub.f32 %v125_v23, %v14806_v35  ;;  %v14870_v43 = vsub.f32 %v14770_v18, %v21765_v12  ;;  %v122_v12 = vld [vmem:[%s21623_s1 + $0x2b0] sm:$0xff] }
  0xd8   :  { %11301 = vmatprep.subr.mxu0 %v22677_v29  ;;  %11328 = vmatprep.subr.mxu1 %v14309_v63  ;;  %v22680_v63 = vld [vmem:[#allocation25_spill] sm:$0xff]  ;;  %v21773_v29 = vand.u32 4294901760, %v14799_v48  ;;  %v14894_v30 = vsub.f32 %v109_v16, %v14843_v24  ;;  %v14903_v21 = vsub.f32 %v14793_v25, %v21772_v36  ;;  %v14912_v16 = vsub.f32 %v108_v56, %v14857_v31 }
  0xd9   :  { %11302 = vmatpush3.msra.mxu0 %v22679_v55  ;;  %2290 = vmatprep.mubr.f32.mxu0 %v22680_v63  ;;  %22685 = vst [vmem:[#allocation10_spill] sm:$0xff] %v14861_v59  ;;  %v14865_v55 = vand.u32 4294901760, %v124_v62  ;;  %v13242_v23 = vld [vmem:[%s21622_s0 + $0x8] ss:$48 sps:$4 sm:$0xff]   ;;  %22691 = vst [vmem:[#allocation28_spill] sm:$0xff] %v14939_v10  ;;  %v14946_v53 = vsub.f32 %v14829_v6, %v21774_v46  ;;  %v22697_v46 = vand.u32 4294901760, %v14781_v41 }
  0xda   :  { %11329 = vmatpush3.msra.mxu1 %v22682_v54  ;;  %2292 = vmatmul.mubr.f32.vlgmr.msra.gmra.mxu0 %v22683_v22  ;;  %v107_v54 = vld [vmem:[%s21623_s1 + $0x238] sm:$0xff]  ;;  %22687 = vst [vmem:[#allocation12_spill] sm:$0xff] %v14912_v16  ;;  %v14919_v36 = vsub.f32 %v14799_v48, %v21773_v29  ;;  %v105_v56 = vld [vmem:[%s21623_s1 + $0x228] sm:$0xff]  ;;  %v22700_v41 = vand.u32 4294901760, %v14894_v30 }
  0xdb   :  { %11330 = vmatprep.subr.mxu1 %v14385_v38  ;;  %11341 = vmatprep.subr.mxu0 %v14661_v5  ;;  %22686 = vst [vmem:[#allocation13_spill] sm:$0xff] %v14865_v55  ;;  %v13244_v38 = vld [vmem:[%s21622_s0 + $0x68] ss:$48 sps:$4 sm:$0xff]   ;;  %v14932_v40 = vsub.f32 %v124_v62, %v14865_v55 }
  0xdc   :  { %11331 = vmatpush3.msra.mxu1 %v14362_v9  ;;  %11342 = vmatpush3.msra.mxu0 %v14653_v44  ;;  %v14914_v9 = vand.u32 4294901760, %v107_v54  ;;  %v22690_v29 = vld [vmem:[#allocation27_spill] sm:$0xff]  ;;  %v121_v62 = vld [vmem:[%s21623_s1 + $0x2a8] sm:$0xff] }
  0xdd   :  { %11332 = vmatprep.subr.mxu1 %v22633_v33  ;;  %11343 = vmatprep.subr.mxu0 %v14675_v58  ;;  %v106_v33 = vld [vmem:[%s21623_s1 + $0x230] sm:$0xff]  ;;  %22689 = vst [vmem:[#allocation5_spill] sm:$0xff] %v14932_v40  ;;  %v481_v42 = vrot.slane %v13242_v23, %v22690_v29  ;;  %v495_v4 = vrot.slane %v13244_v38, %v22690_v29  ;;  %v14954_v23 = vand.u32 4294901760, %v122_v12  ;;  %v22694_v38 = vand.u32 4294901760, %v14852_v49 }
  0xde   :  { %11333 = vmatpush3.msra.mxu1 %v14373_v50  ;;  %11344 = vmatpush3.msra.mxu0 %v14686_v14  ;;  %22688 = vst [vmem:[#allocation16_spill] sm:$0xff] %v14914_v9  ;;  %v14941_v50 = vand.u32 4294901760, %v106_v33  ;;  %v14965_v29 = vsub.f32 %v107_v54, %v14914_v9 }
  0xdf   :  { %11334 = vmatprep.subr.mxu1 %v14440_v11  ;;  %11345 = vmatprep.subr.mxu0 %v14691_v39  ;;  %22693 = vst [vmem:[#allocation30_spill] sm:$0xff] %v14954_v23  ;;  %v14959_v11 = vsub.f32 %v14852_v49, %v22694_v38  ;;  %v120_v38 = vld [vmem:[%s21623_s1 + $0x2a0] sm:$0xff]  ;;  %v503_v54 = vcombine.low %v481_v42, %v495_v4 }
  0xe0   :  { %11335 = vmatpush3.msra.mxu1 %v14451_v13  ;;  %11346 = vmatpush3.msra.mxu0 %v14702_v17  ;;  %22692 = vst [vmem:[#allocation26_spill] sm:$0xff] %v14941_v50  ;;  %v22695_v13 = vand.u32 4294901760, %v14861_v59  ;;  %v14973_v17 = vand.u32 4294901760, %v105_v56  ;;  %v14991_v39 = vsub.f32 %v106_v33, %v14941_v50  ;;  %v15007_v33 = vsub.f32 %v14894_v30, %v22700_v41 }
  0xe1   :  { %11336 = vmatprep.subr.mxu1 %v14457_v51  ;;  %11347 = vmatprep.subr.mxu0 %v14722_v32  ;;  %v504_v51 = vcombine.high %v481_v42, %v495_v4  ;;  %v102_v42 = vld [vmem:[%s21623_s1 + $0x210] sm:$0xff] }
  0xe2   :  { %11337 = vmatpush3.msra.mxu1 %v14459_v20  ;;  %2394 = vmatprep.mubr.f32.mxu1 %v22680_v63  ;;  %v14971_v32 = vsub.f32 %v14861_v59, %v22695_v13  ;;  %v104_v20 = vld [vmem:[%s21623_s1 + $0x220] sm:$0xff]  ;;  %v14983_v63 = vand.u32 4294901760, %v121_v62  ;;  %22698 = vst [vmem:[#allocation32_spill] sm:$0xff] %v14991_v39  ;;  %v22699_v13 = vand.u32 4294901760, %v14763_v34  ;;  %v15009_v59 = vand.u32 4294901760, %v120_v38 }
  0xe3   :  { %11348 = vmatpush3.msra.mxu0 %v14731_v57  ;;  %2396 = vmatmul.mubr.f32.vlgmr.msra.gmra.mxu1 %v22683_v22  ;;  %v14995_v57 = vsub.f32 %v123_v52, %v14939_v10  ;;  %v103_v22 = vld [vmem:[%s21623_s1 + $0x218] sm:$0xff]  ;;  %v15011_v52 = vand.u32 4294901760, %v104_v20  ;;  %v22703_v34 = vand.u32 4294901760, %v14804_v60  ;;  %v22705_v60 = vand.u32 4294901760, %v14932_v40 }
  0xe4   :  { %22696 = vst [vmem:[#allocation20_spill] sm:$0xff] %v14983_v63  ;;  %11349 = vmatprep.subr.mxu0 %v14743_v27  ;;  %11376 = vmatprep.subr.mxu1 %v22697_v46  ;;  %v2665_v46 = vand.u32 4294901760, %v14959_v11  ;;  %22701 = vst [vmem:[#allocation24_spill] sm:$0xff] %v15009_v59  ;;  %v15021_v11 = vsub.f32 %v105_v56, %v14973_v17  ;;  %v22706_v56 = vand.u32 4294901760, %v14912_v16  ;;  %v15043_v27 = vand.u32 4294901760, %v103_v22 }
  0xe5   :  { %11350 = vmatpush3.msra.mxu0 %v14751_v37  ;;  %11377 = vmatpush3.msra.mxu1 %v22699_v13  ;;  %22702 = vst [vmem:[#allocation23_spill] sm:$0xff] %v15011_v52  ;;  %v119_v13 = vld [vmem:[%s21623_s1 + $0x298] sm:$0xff]  ;;  %v15028_v37 = vsub.f32 %v122_v12, %v14954_v23  ;;  %v118_v12 = vld [vmem:[%s21623_s1 + $0x290] sm:$0xff]  ;;  %v15048_v41 = vand.u32 4294901760, %v504_v51 }
  0xe6   :  { %11351 = vmatprep.subr.mxu0 %v14789_v28  ;;  %11378 = vmatprep.subr.mxu1 %v22703_v34  ;;  %v22704_v28 = vand.u32 4294901760, %v14818_v15  ;;  %v15036_v34 = vsub.f32 %v14932_v40, %v22705_v60  ;;  %v15041_v4 = vsub.f32 %v14912_v16, %v22706_v56  ;;  %22707 = vst [vmem:[#allocation21_spill] sm:$0xff] %v15043_v27  ;;  %v15054_v60 = vand.u32 4294901760, %v102_v42 }
  0xe7   :  { %11352 = vmatpush3.msra.mxu0 %v14783_v26  ;;  %22708 = vst [vmem:[#allocation34_spill] sm:$0xff] %v15048_v41  ;;  %v15057_v56 = vsub.f32 %v121_v62, %v14983_v63  ;;  %v15059_v26 = vand.u32 4294901760, %v503_v54  ;;  %v22712_v16 = vand.u32 4294901760, %v14848_v8  ;;  %v2560_v40 = vand.u32 4294901760, %v15007_v33  ;;  %2738 = vmatprep.mubr.f32.mxu1 %v15048_v41 }
  0xe8   :  { %11379 = vmatpush3.msra.mxu1 %v22704_v28  ;;  %11353 = vmatprep.subr.mxu0 %v14806_v35  ;;  %v22709_v28 = vand.u32 4294901760, %v14834_v45  ;;  %22710 = vst [vmem:[#allocation33_spill] sm:$0xff] %v15054_v60  ;;  %v15066_v35 = vsub.f32 %v104_v20, %v15011_v52  ;;  %v15068_v45 = vand.u32 4294901760, %v119_v13  ;;  %v22714_v62 = vand.u32 4294901760, %v14870_v43  ;;  %v117_v20 = vld [vmem:[%s21623_s1 + $0x288] sm:$0xff] }
  0xe9   :  { %22711 = vst [vmem:[#allocation25_spill] sm:$0xff] %v15059_v26  ;;  %11354 = vmatpush3.msra.mxu0 %v14843_v24  ;;  %v22715_v15 = vand.u32 4294901760, %v14965_v29  ;;  %v15079_v8 = vand.u32 4294901760, %v118_v12  ;;  %v15086_v33 = vsub.f32 %v120_v38, %v15009_v59  ;;  %v22717_v43 = vand.u32 4294901760, %v14888_v2 }
  0xea   :  { %11380 = vmatprep.subr.mxu1 %v22709_v28  ;;  %22713 = vst [vmem:[#allocation22_spill] sm:$0xff] %v15068_v45  ;;  %11355 = vmatprep.subr.mxu0 %v14865_v55  ;;  %v15094_v28 = vsub.f32 %v103_v22, %v15043_v27  ;;  %v15100_v55 = vsub.f32 %v504_v51, %v15048_v41  ;;  %v22718_v38 = vand.u32 4294901760, %v14903_v21  ;;  %v22719_v2 = vand.u32 4294901760, %v14995_v57 }
  0xeb   :  { %11381 = vmatpush3.msra.mxu1 %v22712_v16  ;;  %v15077_v24 = vsub.f32 %v14965_v29, %v22715_v15  ;;  %22716 = vst [vmem:[#allocation31_spill] sm:$0xff] %v15079_v8  ;;  %11356 = vmatpush3.msra.mxu0 %v14857_v31  ;;  %v2567_v15 = vand.u32 4294901760, %v15041_v4  ;;  %v101_v16 = vld [vmem:[%s21623_s1 + $0x208] sm:$0xff]  ;;  %v15109_v4 = vsub.f32 %v102_v42, %v15054_v60  ;;  %v22722_v21 = vand.u32 4294901760, %v14919_v36 }
  0xec   :  { %11382 = vmatprep.subr.mxu1 %v22714_v62  ;;  %v2679_v62 = vand.u32 4294901760, %v15036_v34  ;;  %11357 = vmatprep.subr.mxu0 %v14939_v10  ;;  %v2685_v34 = vsub.f32 %v14995_v57, %v22719_v2  ;;  %v15116_v51 = vsub.f32 %v503_v54, %v15059_v26  ;;  %v15124_v42 = vand.u32 4294901760, %v117_v20  ;;  %v100_v10 = vld [vmem:[%s21623_s1 + $0x200] sm:$0xff] }
  0xed   :  { %11383 = vmatpush3.msra.mxu1 %v22717_v43  ;;  %22720 = vst [vmem:[#allocation35_spill] sm:$0xff] %v15109_v4  ;;  %v116_v43 = vld [vmem:[%s21623_s1 + $0x280] sm:$0xff]  ;;  %11358 = vmatpush3.msra.mxu0 %v14914_v9  ;;  %v15131_v54 = vsub.f32 %v119_v13, %v15068_v45  ;;  %v2574_v36 = vand.u32 4294901760, %v15077_v24  ;;  %v15138_v9 = vand.u32 4294901760, %v101_v16  ;;  %v22725_v31 = vand.u32 4294901760, %v14946_v53 }
  0xee   :  { %11384 = vmatprep.subr.mxu1 %v22718_v38  ;;  %22721 = vst [vmem:[#allocation36_spill] sm:$0xff] %v15116_v51  ;;  %v22723_v38 = vand.u32 4294901760, %v14991_v39  ;;  %11359 = vmatprep.subr.mxu0 %v14954_v23  ;;  %v15144_v13 = vand.u32 4294901760, %v116_v43  ;;  %v15149_v24 = vsub.f32 %v118_v12, %v15079_v8  ;;  %v2686_v22 = vand.u32 4294901760, %v2685_v34 }
  0xef   :  { %11385 = vmatpush3.msra.mxu1 %v22722_v21  ;;  %v22724_v21 = vand.u32 4294901760, %v15028_v37  ;;  %11360 = vmatpush3.msra.mxu0 %v14941_v50  ;;  %v22728_v50 = vand.u32 4294901760, %v15057_v56  ;;  %v22729_v12 = vand.u32 4294901760, %v15021_v11  ;;  %v15166_v34 = vsub.f32 %v117_v20, %v15124_v42 }
  0xf0   :  { %v2580_v2 = vsub.f32 %v14991_v39, %v22723_v38  ;;  %11386 = vmatprep.subr.mxu1 %v2665_v46  ;;  %22726 = vst [vmem:[#allocation37_spill] sm:$0xff] %v15149_v24  ;;  %11361 = vmatprep.subr.mxu0 %v14983_v63  ;;  %v22731_v39 = vand.u32 4294901760, %v15086_v33 }
  0xf1   :  { %v2692_v38 = vsub.f32 %v15028_v37, %v22724_v21  ;;  %11387 = vmatpush3.msra.mxu1 %v22725_v31  ;;  %v22727_v21 = vand.u32 4294901760, %v14971_v32  ;;  %v2699_v53 = vsub.f32 %v15057_v56, %v22728_v50  ;;  %v15157_v31 = vand.u32 4294901760, %v100_v10  ;;  %11362 = vmatpush3.msra.mxu0 %v14973_v17 }
  0xf2   :  { %v2581_v46 = vand.u32 4294901760, %v2580_v2  ;;  %v2587_v23 = vsub.f32 %v15021_v11, %v22729_v12  ;;  %11363 = vmatprep.subr.mxu0 %v15009_v59  ;;  %v22732_v12 = vand.u32 4294901760, %v15100_v55  ;;  %v22733_v32 = vand.u32 4294901760, %v15066_v35 }
  0xf3   :  { %11388 = vmatprep.subr.mxu1 %v22727_v21  ;;  %v2693_v50 = vand.u32 4294901760, %v2692_v38  ;;  %v15170_v21 = vsub.f32 %v101_v16, %v15138_v9  ;;  %11364 = vmatpush3.msra.mxu0 %v15011_v52  ;;  %v15185_v38 = vsub.f32 %v116_v43, %v15144_v13  ;;  %v15189_v2 = vsub.f32 %v100_v10, %v15157_v31 }
  0xf4   :  { %11389 = vmatpush3.msra.mxu1 %v2560_v40  ;;  %v2706_v40 = vsub.f32 %v15086_v33, %v22731_v39  ;;  %v2500_v20 = vsub.f32 %v15100_v55, %v22732_v12  ;;  %11365 = vmatprep.subr.mxu0 %v15068_v45  ;;  %v2700_v39 = vand.u32 4294901760, %v2699_v53  ;;  %v22735_v43 = vand.u32 4294901760, %v15131_v54  ;;  %v10988_v53 = vpop.f32.mrf.mxu1 }
  0xf5   :  { %11390 = vmatprep.subr.mxu1 %v2679_v62  ;;  %22730 = vst [vmem:[#allocation38_spill] sm:$0xff] %v15170_v21  ;;  %v2594_v62 = vsub.f32 %v15066_v35, %v22733_v32  ;;  %11366 = vmatpush3.msra.mxu0 %v15043_v27  ;;  %v2588_v32 = vand.u32 4294901760, %v2587_v23  ;;  %v22736_v45 = vand.u32 4294901760, %v15094_v28 }
  0xf6   :  { %11391 = vmatpush3.msra.mxu1 %v2567_v15  ;;  %v22734_v15 = vand.u32 4294901760, %v15116_v51  ;;  %v2713_v16 = vsub.f32 %v15131_v54, %v22735_v43  ;;  %11367 = vmatprep.subr.mxu0 %v15079_v8  ;;  %v2707_v10 = vand.u32 4294901760, %v2706_v40  ;;  %v10953_v52 = vpop.f32.mrf.mxu0  ;;  %v2501_v23 = vand.u32 4294901760, %v2500_v20 }
  0xf7   :  { %11392 = vmatprep.subr.mxu1 %v2686_v22  ;;  %11368 = vmatpush3.msra.mxu0 %v15054_v60  ;;  %v22737_v43 = vand.u32 4294901760, %v15149_v24 }
  0xf8   :  { %v2506_v12 = vsub.f32 %v15116_v51, %v22734_v15  ;;  %11393 = vmatpush3.msra.mxu1 %v2574_v36  ;;  %v2601_v15 = vsub.f32 %v15094_v28, %v22736_v45  ;;  %v2595_v36 = vand.u32 4294901760, %v2594_v62  ;;  %11369 = vmatprep.subr.mxu0 %v15124_v42  ;;  %v22738_v45 = vand.u32 4294901760, %v15109_v4  ;;  %v10954_v51 = vpop.f32.mrf.mxu0 }
  0xf9   :  { %11394 = vmatprep.subr.mxu1 %v2693_v50  ;;  %v2720_v22 = vsub.f32 %v15149_v24, %v22737_v43  ;;  %v10989_v50 = vpop.f32.mrf.mxu1  ;;  %11370 = vmatpush3.msra.mxu0 %v15138_v9  ;;  %v2714_v62 = vand.u32 4294901760, %v2713_v16  ;;  %v22739_v43 = vand.u32 4294901760, %v15166_v34  ;;  %v10955_v60 = vadd.f32 %v10954_v51, %v10953_v52 }
  0xfa   :  { %11395 = vmatpush3.msra.mxu1 %v2581_v46  ;;  %v2507_v40 = vand.u32 4294901760, %v2506_v12  ;;  %v2608_v27 = vsub.f32 %v15109_v4, %v22738_v45  ;;  %v21828_v46 = vand.u32 4294901760, %v15189_v2  ;;  %v10990_v20 = vadd.f32 %v10989_v50, %v10988_v53  ;;  %11371 = vmatprep.subr.mxu0 %v15144_v13 }
  0xfb   :  { %11396 = vmatprep.subr.mxu1 %v2700_v39  ;;  %v2727_v8 = vsub.f32 %v15166_v34, %v22739_v43  ;;  %v2602_v39 = vand.u32 4294901760, %v2601_v15  ;;  %v22740_v12 = vand.u32 4294901760, %v15170_v21  ;;  %11372 = vmatpush3.msra.mxu0 %v15157_v31  ;;  %v2721_v53 = vand.u32 4294901760, %v2720_v22  ;;  %v22743_v15 = vld [vmem:[#allocation14_spill] sm:$0xff]  ;;  %v22749_v43 = vld [vmem:[#allocation19_spill] sm:$0xff] }
  0xfc   :  { %11397 = vmatpush3.msra.mxu1 %v2588_v32  ;;  %2502 = vmatprep.mubr.f32.mxu0 %v2501_v23  ;;  %v22741_v32 = vand.u32 4294901760, %v15185_v38  ;;  %v15227_v50 = vadd.f32 %v10990_v20, %v10955_v60  ;;  %v2609_v52 = vand.u32 4294901760, %v2608_v27  ;;  %v2622_v51 = vsub.f32 %v15189_v2, %v21828_v46  ;;  %v22744_v23 = vld [vmem:[#allocation15_spill] sm:$0xff]  ;;  %v22747_v20 = vld [vmem:[#allocation12_spill] sm:$0xff] }
  0xfd   :  { %11398 = vmatprep.subr.mxu1 %v2707_v10  ;;  %v2615_v45 = vsub.f32 %v15170_v21, %v22740_v12  ;;  %2508 = vmatmul.mubr.f32.vlgmr.msra.gmra.mxu0 %v2507_v40  ;;  %v2728_v10 = vand.u32 4294901760, %v2727_v8  ;;  %v22742_v8 = vld [vmem:[#allocation10_spill] sm:$0xff]  ;;  %v22746_v40 = vld [vmem:[#allocation17_spill] sm:$0xff]  ;;  %v22751_v12 = vld [vmem:[#allocation8_spill] sm:$0xff] }
  0xfe   :  { %v2734_v16 = vsub.f32 %v15185_v38, %v22741_v32  ;;  %11399 = vmatpush3.msra.mxu1 %v2595_v36  ;;  %11411 = vmatprep.subr.mxu0 %v14697_v47  ;;  %v2623_v27 = vand.u32 4294901760, %v2622_v51  ;;  %v22745_v36 = vld [vmem:[#allocation5_spill] sm:$0xff] }
  0xff   :  { %11400 = vmatprep.subr.mxu1 %v2714_v62  ;;  %11412 = vmatpush3.msra.mxu0 %v14684_v1  ;;  %v2616_v22 = vand.u32 4294901760, %v2615_v45  ;;  %v22748_v62 = vld [vmem:[#allocation6_spill] sm:$0xff]  ;;  %v22752_v45 = vld [vmem:[#allocation32_spill] sm:$0xff]  ;;  %v22754_v32 = vld [vmem:[#allocation9_spill] sm:$0xff] }
 0x100   :  { %11401 = vmatpush3.msra.mxu1 %v2602_v39  ;;  %11413 = vmatprep.subr.mxu0 %v14714_v19  ;;  %v2735_v60 = vand.u32 4294901760, %v2734_v16  ;;  %v22750_v39 = vld [vmem:[#allocation18_spill] sm:$0xff]  ;;  %v22755_v16 = vld [vmem:[#allocation11_spill] sm:$0xff]  ;;  %v22757_v51 = vld [vmem:[#allocation29_spill] sm:$0xff] }
 0x101   :  { %11402 = vmatprep.subr.mxu1 %v2721_v53  ;;  %11414 = vmatpush3.msra.mxu0 %v14720_v7  ;;  %v22753_v53 = vld [vmem:[#allocation7_spill] sm:$0xff] }
 0x102   :  { %11403 = vmatpush3.msra.mxu1 %v2609_v52  ;;  %11415 = vmatprep.subr.mxu0 %v14735_v61  ;;  %v22756_v52 = vld [vmem:[#allocation13_spill] sm:$0xff] }
 0x103   :  { %11404 = vmatprep.subr.mxu1 %v2728_v10  ;;  %11416 = vmatpush3.msra.mxu0 %v14741_v0  ;;  %v22758_v10 = vld [vmem:[#allocation28_spill] sm:$0xff] }
 0x104   :  { %11405 = vmatpush3.msra.mxu1 %v2616_v22  ;;  %11417 = vmatprep.subr.mxu0 %v14770_v18 }
 0x105   :  { %11406 = vmatprep.subr.mxu1 %v2735_v60  ;;  %11418 = vmatpush3.msra.mxu0 %v14776_v3  ;;  %v22759_v60 = vld [vmem:[#allocation16_spill] sm:$0xff] }
 0x106   :  { %11407 = vmatpush3.msra.mxu1 %v2623_v27  ;;  %11419 = vmatprep.subr.mxu0 %v14793_v25  ;;  %v22760_v27 = vld [vmem:[#allocation30_spill] sm:$0xff] }
 0x107   :  { %2740 = vmatmul.mubr.f32.vlgmr.msra.gmra.mxu1 %v15059_v26  ;;  %11446 = vmatprep.subr.mxu1 %v14661_v5  ;;  %v22761_v26 = vld [vmem:[#allocation26_spill] sm:$0xff] }
 0x108   :  { %11420 = vmatpush3.msra.mxu0 %v14799_v48  ;;  %11447 = vmatpush3.msra.mxu1 %v14653_v44 }
 0x109   :  { %11421 = vmatprep.subr.mxu0 %v14852_v49  ;;  %11448 = vmatprep.subr.mxu1 %v14675_v58 }
 0x10a   :  { %11422 = vmatpush3.msra.mxu0 %v14829_v6  ;;  %11449 = vmatpush3.msra.mxu1 %v14686_v14 }
 0x10b   :  { %11423 = vmatprep.subr.mxu0 %v22742_v8  ;;  %11450 = vmatprep.subr.mxu1 %v22743_v15 }
 0x10c   :  { %11424 = vmatpush3.msra.mxu0 %v14894_v30  ;;  %11451 = vmatpush3.msra.mxu1 %v22744_v23 }
 0x10d   :  { %11425 = vmatprep.subr.mxu0 %v22745_v36  ;;  %11452 = vmatprep.subr.mxu1 %v22746_v40 }
 0x10e   :  { %11426 = vmatpush3.msra.mxu0 %v22747_v20  ;;  %11453 = vmatpush3.msra.mxu1 %v22748_v62 }
 0x10f   :  { %11427 = vmatprep.subr.mxu0 %v14995_v57  ;;  %11454 = vmatprep.subr.mxu1 %v22749_v43 }
 0x110   :  { %11428 = vmatpush3.msra.mxu0 %v14965_v29  ;;  %11455 = vmatpush3.msra.mxu1 %v22750_v39 }
 0x111   :  { %11429 = vmatprep.subr.mxu0 %v15028_v37  ;;  %11456 = vmatprep.subr.mxu1 %v22751_v12 }
 0x112   :  { %11430 = vmatpush3.msra.mxu0 %v22752_v45  ;;  %11457 = vmatpush3.msra.mxu1 %v22753_v53 }
 0x113   :  { %11431 = vmatprep.subr.mxu0 %v15057_v56  ;;  %11458 = vmatprep.subr.mxu1 %v22754_v32 }
 0x114   :  { %11432 = vmatpush3.msra.mxu0 %v15021_v11  ;;  %11459 = vmatpush3.msra.mxu1 %v22755_v16 }
 0x115   :  { %11433 = vmatprep.subr.mxu0 %v15086_v33  ;;  %11460 = vmatprep.subr.mxu1 %v22756_v52 }
 0x116   :  { %11434 = vmatpush3.msra.mxu0 %v15066_v35  ;;  %11461 = vmatpush3.msra.mxu1 %v22757_v51  ;;  %v11023_v22 = vpop.f32.mrf.mxu0 }
 0x117   :  { %11435 = vmatprep.subr.mxu0 %v15131_v54  ;;  %11462 = vmatprep.subr.mxu1 %v22758_v10 }
 0x118   :  { %11436 = vmatpush3.msra.mxu0 %v15094_v28  ;;  %11463 = vmatpush3.msra.mxu1 %v22759_v60  ;;  %v11024_v46 = vpop.f32.mrf.mxu0  ;;  %v11058_v51 = vpop.f32.mrf.mxu1 }
 0x119   :  { %11437 = vmatprep.subr.mxu0 %v15149_v24  ;;  %11464 = vmatprep.subr.mxu1 %v22760_v27  ;;  %v11025_v41 = vadd.f32 %v11024_v46, %v11023_v22  ;;  %v22762_v46 = vld [vmem:[#allocation23_spill] sm:$0xff]  ;;  %v22763_v22 = vld [vmem:[#allocation36_spill] sm:$0xff] }
 0x11a   :  { %11438 = vmatpush3.msra.mxu0 %v15109_v4  ;;  %11465 = vmatpush3.msra.mxu1 %v22761_v26  ;;  %v11059_v24 = vpop.f32.mrf.mxu1 }
 0x11b   :  { %11439 = vmatprep.subr.mxu0 %v15166_v34  ;;  %11466 = vmatprep.subr.mxu1 %v14983_v63  ;;  %v1156_v60 = vadd.f32 %v11025_v41, %v15227_v50  ;;  %v11060_v4 = vadd.f32 %v11059_v24, %v11058_v51  ;;  %v22765_v41 = vand.u32 4294901760, %v14697_v47  ;;  %v22766_v50 = vld [vmem:[#allocation21_spill] sm:$0xff]  ;;  %v22768_v24 = vld [vmem:[#allocation31_spill] sm:$0xff]  ;;  %v22769_v51 = vand.u32 4294901760, %v14714_v19 }
 0x11c   :  { %11440 = vmatpush3.msra.mxu0 %v15170_v21  ;;  %11467 = vmatpush3.msra.mxu1 %v14973_v17  ;;  %v22764_v21 = vld [vmem:[#allocation22_spill] sm:$0xff]  ;;  %v22772_v47 = vand.u32 4294901760, %v14735_v61  ;;  %v22774_v19 = vand.u32 4294901760, %v14770_v18  ;;  %v22777_v61 = vand.u32 4294901760, %v22763_v22  ;;  %v163_v18 = vld [vmem:[%s21623_s1 + $0x3f8] sm:$0xff] }
 0x11d   :  { %11441 = vmatprep.subr.mxu0 %v15185_v38  ;;  %11468 = vmatprep.subr.mxu1 %v15009_v59  ;;  %v15293_v63 = vadd.f32 %v11060_v4, %v1156_v60  ;;  %v22767_v59 = vand.u32 4294901760, %v14684_v1  ;;  %v22771_v4 = vand.u32 4294901760, %v14720_v7  ;;  %v22773_v1 = vand.u32 4294901760, %v14741_v0 }
 0x11e   :  { %11442 = vmatpush3.msra.mxu0 %v15189_v2  ;;  %2875 = vmatprep.mubr.f32.mxu0 %v15100_v55  ;;  %v22775_v7 = vand.u32 4294901760, %v15100_v55  ;;  %v22778_v60 = vand.u32 4294901760, %v14793_v25  ;;  %v22779_v0 = vand.u32 4294901760, %v14799_v48  ;;  %v22780_v55 = vand.u32 4294901760, %v14852_v49 }
 0x11f   :  { %11469 = vmatpush3.msra.mxu1 %v22762_v46  ;;  %2878 = vmatmul.mubr.f32.vlgmr.msra.gmra.mxu0 %v22763_v22  ;;  %v22770_v46 = vld [vmem:[#allocation33_spill] sm:$0xff]  ;;  %v22781_v25 = vand.u32 4294901760, %v14829_v6  ;;  %v22782_v48 = vand.u32 4294901760, %v22742_v8  ;;  %v15350_v49 = vand.u32 4294901760, %v163_v18  ;;  %v22783_v22 = vand.u32 4294901760, %v14894_v30 }
 0x120   :  { %11470 = vmatprep.subr.mxu1 %v22764_v21  ;;  %11481 = vmatprep.subr.mxu0 %v22765_v41  ;;  %v161_v6 = vld [vmem:[%s21623_s1 + $0x3e8] sm:$0xff]  ;;  %v22784_v8 = vand.u32 4294901760, %v22745_v36  ;;  %v22786_v41 = vand.u32 4294901760, %v22747_v20  ;;  %v22788_v30 = vand.u32 4294901760, %v14995_v57  ;;  %v22789_v20 = vand.u32 4294901760, %v14965_v29 }
 0x121   :  { %11471 = vmatpush3.msra.mxu1 %v22766_v50  ;;  %11482 = vmatpush3.msra.mxu0 %v22767_v59  ;;  %v22776_v59 = vand.u32 4294901760, %v14776_v3  ;;  %v147_v3 = vld [vmem:[%s21623_s1 + $0x378] sm:$0xff]  ;;  %v145_v36 = vld [vmem:[%s21623_s1 + $0x368] sm:$0xff]  ;;  %v22791_v29 = vand.u32 4294901760, %v22752_v45 }
 0x122   :  { %11472 = vmatprep.subr.mxu1 %v22768_v24  ;;  %11483 = vmatprep.subr.mxu0 %v22769_v51  ;;  %v15370_v51 = vand.u32 4294901760, %v161_v6  ;;  %v159_v45 = vld [vmem:[%s21623_s1 + $0x3d8] sm:$0xff] }
 0x123   :  { %11473 = vmatpush3.msra.mxu1 %v22770_v46  ;;  %11484 = vmatpush3.msra.mxu0 %v22771_v4  ;;  %v160_v4 = vld [vmem:[%s21623_s1 + $0x3e0] sm:$0xff] }
 0x124   :  { %11474 = vmatprep.subr.mxu1 %v15124_v42  ;;  %11485 = vmatprep.subr.mxu0 %v22772_v47  ;;  %22787 = vst [vmem:[#allocation14_spill] sm:$0xff] %v15370_v51  ;;  %v22793_v47 = vand.u32 4294901760, %v15057_v56  ;;  %v143_v56 = vld [vmem:[%s21623_s1 + $0x358] sm:$0xff] }
 0x125   :  { %11475 = vmatpush3.msra.mxu1 %v15138_v9  ;;  %11486 = vmatpush3.msra.mxu0 %v22773_v1 }
 0x126   :  { %11476 = vmatprep.subr.mxu1 %v15144_v13  ;;  %11487 = vmatprep.subr.mxu0 %v22774_v19  ;;  %v22794_v19 = vand.u32 4294901760, %v15021_v11 }
 0x127   :  { %11477 = vmatpush3.msra.mxu1 %v15157_v31  ;;  %2982 = vmatprep.mubr.f32.mxu1 %v22775_v7  ;;  %v15421_v7 = vand.u32 4294901760, %v160_v4 }
 0x128   :  { %11488 = vmatpush3.msra.mxu0 %v22776_v59  ;;  %2986 = vmatmul.mubr.f32.vlgmr.msra.gmra.mxu1 %v22777_v61  ;;  %v22796_v59 = vand.u32 4294901760, %v15086_v33  ;;  %v158_v33 = vld [vmem:[%s21623_s1 + $0x3d0] sm:$0xff] }
 0x129   :  { %11489 = vmatprep.subr.mxu0 %v22778_v60  ;;  %11516 = vmatprep.subr.mxu1 %v14661_v5  ;;  %v162_v5 = vld [vmem:[%s21623_s1 + $0x3f0] sm:$0xff]  ;;  %22795 = vst [vmem:[#allocation5_spill] sm:$0xff] %v15421_v7 }
 0x12a   :  { %11490 = vmatpush3.msra.mxu0 %v22779_v0  ;;  %11517 = vmatpush3.msra.mxu1 %v14653_v44  ;;  %v146_v44 = vld [vmem:[%s21623_s1 + $0x370] sm:$0xff]  ;;  %v22799_v0 = vld [vmem:[#allocation29_spill] sm:$0xff] }
 0x12b   :  { %11491 = vmatprep.subr.mxu0 %v22780_v55  ;;  %11518 = vmatprep.subr.mxu1 %v14675_v58  ;;  %v15352_v58 = vand.u32 4294901760, %v147_v3 }
 0x12c   :  { %11492 = vmatpush3.msra.mxu0 %v22781_v25  ;;  %11519 = vmatpush3.msra.mxu1 %v14686_v14  ;;  %v15360_v14 = vand.u32 4294901760, %v162_v5 }
 0x12d   :  { %11493 = vmatprep.subr.mxu0 %v22782_v48  ;;  %11520 = vmatprep.subr.mxu1 %v22743_v15  ;;  %v15365_v15 = vand.u32 4294901760, %v146_v44 }
 0x12e   :  { %11494 = vmatpush3.msra.mxu0 %v22783_v22  ;;  %11521 = vmatpush3.msra.mxu1 %v22744_v23  ;;  %v15376_v23 = vsub.f32 %v147_v3, %v15352_v58  ;;  %v15388_v57 = vsub.f32 %v162_v5, %v15360_v14  ;;  %v15439_v3 = vand.u32 4294901760, %v159_v45 }
 0x12f   :  { %11495 = vmatprep.subr.mxu0 %v22784_v8  ;;  %11522 = vmatprep.subr.mxu1 %v22746_v40  ;;  %22785 = vst [vmem:[#allocation10_spill] sm:$0xff] %v15365_v15  ;;  %v15382_v40 = vsub.f32 %v163_v18, %v15350_v49  ;;  %v157_v8 = vld [vmem:[%s21623_s1 + $0x3c8] sm:$0xff] }
 0x130   :  { %11496 = vmatpush3.msra.mxu0 %v22786_v41  ;;  %11523 = vmatpush3.msra.mxu1 %v22748_v62  ;;  %v22790_v62 = vand.u32 4294901760, %v15028_v37  ;;  %v144_v37 = vld [vmem:[%s21623_s1 + $0x360] sm:$0xff]  ;;  %v21841_v1 = vand.u32 4294901760, %v15376_v23  ;;  %22800 = vst [vmem:[#allocation12_spill] sm:$0xff] %v15439_v3  ;;  %v15475_v41 = vsub.f32 %v160_v4, %v15421_v7 }
 0x131   :  { %11497 = vmatprep.subr.mxu0 %v22788_v30  ;;  %11524 = vmatprep.subr.mxu1 %v22749_v43  ;;  %v15394_v43 = vsub.f32 %v146_v44, %v15365_v15  ;;  %v15430_v60 = vand.u32 4294901760, %v144_v37  ;;  %v15456_v44 = vand.u32 4294901760, %v143_v56  ;;  %v22805_v30 = vld [vmem:[#allocation37_spill] sm:$0xff] }
 0x132   :  { %11498 = vmatpush3.msra.mxu0 %v22789_v20  ;;  %11525 = vmatpush3.msra.mxu1 %v22750_v39  ;;  %v15402_v39 = vand.u32 4294901760, %v145_v36  ;;  %v15461_v48 = vsub.f32 %v15376_v23, %v21841_v1  ;;  %v15483_v20 = vand.u32 4294901760, %v158_v33 }
 0x133   :  { %11499 = vmatprep.subr.mxu0 %v22790_v62  ;;  %11526 = vmatprep.subr.mxu1 %v22751_v12  ;;  %v15408_v12 = vsub.f32 %v161_v6, %v15370_v51  ;;  %22797 = vst [vmem:[#allocation17_spill] sm:$0xff] %v15430_v60  ;;  %v21839_v11 = vand.u32 4294901760, %v15394_v43  ;;  %22802 = vst [vmem:[#allocation6_spill] sm:$0xff] %v15456_v44  ;;  %v22803_v6 = vand.u32 4294901760, %v15094_v28 }
 0x134   :  { %11500 = vmatpush3.msra.mxu0 %v22791_v29  ;;  %11527 = vmatpush3.msra.mxu1 %v22753_v53  ;;  %22792 = vst [vmem:[#allocation15_spill] sm:$0xff] %v15402_v39  ;;  %v21842_v53 = vand.u32 4294901760, %v15382_v40  ;;  %v15437_v18 = vsub.f32 %v145_v36, %v15402_v39  ;;  %v22806_v36 = vand.u32 4294901760, %v22805_v30  ;;  %v15481_v28 = vsub.f32 %v144_v37, %v15430_v60 }
 0x135   :  { %11501 = vmatprep.subr.mxu0 %v22793_v47  ;;  %11528 = vmatprep.subr.mxu1 %v22754_v32  ;;  %v21840_v32 = vand.u32 4294901760, %v15388_v57  ;;  %v21838_v55 = vand.u32 4294901760, %v15408_v12  ;;  %22807 = vst [vmem:[#allocation19_spill] sm:$0xff] %v15483_v20  ;;  %v15490_v29 = vsub.f32 %v15394_v43, %v21839_v11  ;;  %v22809_v47 = vld [vmem:[#allocation35_spill] sm:$0xff]  ;;  %v22816_v30 = vand.u32 4294901760, %v15185_v38  ;;  %v22819_v38 = vld [vmem:[#allocation34_spill] sm:$0xff] }
 0x136   :  { %11502 = vmatpush3.msra.mxu0 %v22794_v19  ;;  %11529 = vmatpush3.msra.mxu1 %v22755_v16  ;;  %v11093_v61 = vpop.f32.mrf.mxu0  ;;  %v22798_v16 = vand.u32 4294901760, %v15066_v35  ;;  %v22801_v35 = vand.u32 4294901760, %v15131_v54  ;;  %v15454_v25 = vsub.f32 %v15382_v40, %v21842_v53  ;;  %v22804_v54 = vld [vmem:[#allocation16_spill] sm:$0xff]  ;;  %v22810_v4 = vand.u32 4294901760, %v22809_v47  ;;  %v22821_v11 = vld [vmem:[#allocation23_spill] sm:$0xff] }
 0x137   :  { %11503 = vmatprep.subr.mxu0 %v22796_v59  ;;  %11530 = vmatprep.subr.mxu1 %v22756_v52  ;;  %v142_v52 = vld [vmem:[%s21623_s1 + $0x350] sm:$0xff]  ;;  %v21843_v37 = vand.u32 4294901760, %v15437_v18  ;;  %v15503_v59 = vsub.f32 %v159_v45, %v15439_v3 }
 0x138   :  { %11504 = vmatpush3.msra.mxu0 %v22798_v16  ;;  %11531 = vmatpush3.msra.mxu1 %v22799_v0  ;;  %v11094_v5 = vpop.f32.mrf.mxu0  ;;  %v15485_v62 = vand.u32 4294901760, %v142_v52  ;;  %v22812_v16 = vld [vmem:[#allocation20_spill] sm:$0xff]  ;;  %v15509_v0 = vsub.f32 %v143_v56, %v15456_v44  ;;  %v21844_v56 = vand.u32 4294901760, %v15475_v41 }
 0x139   :  { %11505 = vmatprep.subr.mxu0 %v22801_v35  ;;  %11532 = vmatprep.subr.mxu1 %v22758_v10  ;;  %v11095_v22 = vadd.f32 %v11094_v5, %v11093_v61  ;;  %v15469_v10 = vsub.f32 %v15388_v57, %v21840_v32  ;;  %v22811_v61 = vand.u32 4294901760, %v15166_v34  ;;  %v22814_v35 = vld [vmem:[#allocation38_spill] sm:$0xff]  ;;  %v155_v32 = vld [vmem:[%s21623_s1 + $0x3b8] sm:$0xff] }
 0x13a   :  { %11506 = vmatpush3.msra.mxu0 %v22803_v6  ;;  %11533 = vmatpush3.msra.mxu1 %v22804_v54  ;;  %22808 = vst [vmem:[#allocation18_spill] sm:$0xff] %v15485_v62  ;;  %v22815_v5 = vand.u32 4294901760, %v22814_v35  ;;  %v22818_v35 = vand.u32 4294901760, %v15189_v2  ;;  %v21847_v1 = vand.u32 4294901760, %v15509_v0  ;;  %v136_v6 = vld [vmem:[%s21623_s1 + $0x320] sm:$0xff] }
 0x13b   :  { %11507 = vmatprep.subr.mxu0 %v22806_v36  ;;  %11534 = vmatprep.subr.mxu1 %v22760_v27  ;;  %v1432_v19 = vadd.f32 %v11095_v22, %v15293_v63  ;;  %v15499_v27 = vsub.f32 %v15408_v12, %v21838_v55  ;;  %v141_v63 = vld [vmem:[%s21623_s1 + $0x348] sm:$0xff]  ;;  %v11128_v45 = vpop.f32.mrf.mxu1  ;;  %v140_v22 = vld [vmem:[%s21623_s1 + $0x340] sm:$0xff]  ;;  %v21846_v55 = vand.u32 4294901760, %v15503_v59 }
 0x13c   :  { %11508 = vmatpush3.msra.mxu0 %v22810_v4  ;;  %11535 = vmatpush3.msra.mxu1 %v22761_v26  ;;  %v15511_v26 = vand.u32 4294901760, %v157_v8  ;;  %v22817_v36 = vld [vmem:[#allocation24_spill] sm:$0xff] }
 0x13d   :  { %11509 = vmatprep.subr.mxu0 %v22811_v61  ;;  %11536 = vmatprep.subr.mxu1 %v22812_v16  ;;  %v156_v4 = vld [vmem:[%s21623_s1 + $0x3c0] sm:$0xff]  ;;  %v21845_v61 = vand.u32 4294901760, %v15481_v28  ;;  %v15538_v16 = vsub.f32 %v158_v33, %v15483_v20  ;;  %v22822_v33 = vld [vmem:[#allocation25_spill] sm:$0xff] }
 0x13e   :  { %22813 = vst [vmem:[#allocation8_spill] sm:$0xff] %v15511_v26  ;;  %11510 = vmatpush3.msra.mxu0 %v22815_v5  ;;  %11537 = vmatpush3.msra.mxu1 %v14973_v17  ;;  %v15530_v17 = vsub.f32 %v142_v52, %v15485_v62  ;;  %v11129_v5 = vpop.f32.mrf.mxu1  ;;  %v15561_v53 = vsub.f32 %v157_v8, %v15511_v26  ;;  %v13246_v8 = vld [vmem:[%s21622_s0 + $0xc] ss:$48 sps:$4 sm:$0xff]  }
 0x13f   :  { %11511 = vmatprep.subr.mxu0 %v22816_v30  ;;  %11538 = vmatprep.subr.mxu1 %v22817_v36  ;;  %v15544_v30 = vand.u32 4294901760, %v141_v63  ;;  %v15549_v36 = vsub.f32 %v15437_v18, %v21843_v37  ;;  %v11130_v2 = vadd.f32 %v11129_v5, %v11128_v45  ;;  %v15565_v37 = vand.u32 4294901760, %v156_v4  ;;  %v139_v45 = vld [vmem:[%s21623_s1 + $0x338] sm:$0xff] }
 0x140   :  { %11512 = vmatpush3.msra.mxu0 %v22818_v35  ;;  %3152 = vmatprep.mubr.f32.mxu0 %v22819_v38  ;;  %v15554_v35 = vand.u32 4294901760, %v140_v22  ;;  %22824 = vst [vmem:[#allocation9_spill] sm:$0xff] %v15561_v53 }
 0x141   :  { %22820 = vst [vmem:[#allocation32_spill] sm:$0xff] %v15544_v30  ;;  %11539 = vmatpush3.msra.mxu1 %v22821_v11  ;;  %3154 = vmatmul.mubr.f32.vlgmr.msra.gmra.mxu0 %v22822_v33  ;;  %22825 = vst [vmem:[#allocation11_spill] sm:$0xff] %v15565_v37  ;;  %v15570_v11 = vsub.f32 %v15475_v41, %v21844_v56  ;;  %v15583_v5 = vadd.f32 %v11130_v2, %v1432_v19  ;;  %v15598_v19 = vand.u32 4294901760, %v155_v32 }
 0x142   :  { %22823 = vst [vmem:[#allocation7_spill] sm:$0xff] %v15554_v35  ;;  %11540 = vmatprep.subr.mxu1 %v22764_v21  ;;  %11551 = vmatprep.subr.mxu0 %v15350_v49  ;;  %v13247_v21 = vld [vmem:[%s21622_s0 + $0x6c] ss:$48 sps:$4 sm:$0xff]   ;;  %v15588_v56 = vsub.f32 %v15481_v28, %v21845_v61  ;;  %v15595_v54 = vsub.f32 %v141_v63, %v15544_v30  ;;  %v138_v61 = vld [vmem:[%s21623_s1 + $0x330] sm:$0xff]  ;;  %v15613_v63 = vand.u32 4294901760, %v139_v45 }
 0x143   :  { %11541 = vmatpush3.msra.mxu1 %v22766_v50  ;;  %11552 = vmatpush3.msra.mxu0 %v15352_v58  ;;  %22826 = vst [vmem:[#allocation13_spill] sm:$0xff] %v15598_v19  ;;  %v15603_v2 = vsub.f32 %v15503_v59, %v21846_v55  ;;  %v15618_v50 = vsub.f32 %v15509_v0, %v21847_v1  ;;  %v154_v55 = vld [vmem:[%s21623_s1 + $0x3b0] sm:$0xff]  ;;  %v22830_v1 = vld [vmem:[#allocation27_spill] sm:$0xff] }
 0x144   :  { %11542 = vmatprep.subr.mxu1 %v22768_v24  ;;  %11553 = vmatprep.subr.mxu0 %v15360_v14  ;;  %v15611_v24 = vsub.f32 %v140_v22, %v15554_v35  ;;  %22828 = vst [vmem:[#allocation30_spill] sm:$0xff] %v15613_v63  ;;  %v15631_v34 = vsub.f32 %v156_v4, %v15565_v37  ;;  %v22833_v4 = vand.u32 4294901760, %v15530_v17 }
 0x145   :  { %11543 = vmatpush3.msra.mxu1 %v22770_v46  ;;  %11554 = vmatpush3.msra.mxu0 %v15365_v15  ;;  %v137_v46 = vld [vmem:[%s21623_s1 + $0x328] sm:$0xff]  ;;  %v488_v47 = vrot.slane %v13246_v8, %v22830_v1  ;;  %v502_v52 = vrot.slane %v13247_v21, %v22830_v1  ;;  %v22831_v15 = vand.u32 4294901760, %v15538_v16  ;;  %v15656_v21 = vand.u32 4294901760, %v154_v55  ;;  %v152_v8 = vld [vmem:[%s21623_s1 + $0x3a0] sm:$0xff] }
 0x146   :  { %22827 = vst [vmem:[#allocation28_spill] sm:$0xff] %v15611_v24  ;;  %11544 = vmatprep.subr.mxu1 %v15124_v42  ;;  %11555 = vmatprep.subr.mxu0 %v15370_v51  ;;  %22829 = vst [vmem:[#allocation26_spill] sm:$0xff] %v15631_v34  ;;  %v15643_v51 = vand.u32 4294901760, %v138_v61  ;;  %v15648_v22 = vsub.f32 %v15530_v17, %v22833_v4  ;;  %v15664_v4 = vsub.f32 %v139_v45, %v15613_v63 }
 0x147   :  { %11545 = vmatpush3.msra.mxu1 %v15138_v9  ;;  %11556 = vmatpush3.msra.mxu0 %v15402_v39  ;;  %v15641_v42 = vsub.f32 %v15538_v16, %v22831_v15  ;;  %v153_v9 = vld [vmem:[%s21623_s1 + $0x3a8] sm:$0xff]  ;;  %22834 = vst [vmem:[#allocation22_spill] sm:$0xff] %v15656_v21  ;;  %v15658_v15 = vand.u32 4294901760, %v137_v46  ;;  %v22836_v1 = vand.u32 4294901760, %v15561_v53  ;;  %v506_v39 = vcombine.high %v488_v47, %v502_v52 }
 0x148   :  { %22832 = vst [vmem:[#allocation36_spill] sm:$0xff] %v15643_v51  ;;  %11546 = vmatprep.subr.mxu1 %v15144_v13  ;;  %11557 = vmatprep.subr.mxu0 %v15421_v7  ;;  %v15684_v45 = vand.u32 4294901760, %v153_v9  ;;  %v22840_v7 = vand.u32 4294901760, %v15461_v48 }
 0x149   :  { %22835 = vst [vmem:[#allocation21_spill] sm:$0xff] %v15658_v15  ;;  %11547 = vmatpush3.msra.mxu1 %v15157_v31  ;;  %3256 = vmatprep.mubr.f32.mxu1 %v22819_v38  ;;  %v15669_v13 = vsub.f32 %v15561_v53, %v22836_v1  ;;  %v15679_v38 = vsub.f32 %v155_v32, %v15598_v19  ;;  %v22838_v53 = vand.u32 4294901760, %v15454_v25  ;;  %v15709_v31 = vand.u32 4294901760, %v152_v8 }
 0x14a   :  { %11558 = vmatpush3.msra.mxu0 %v15430_v60  ;;  %3258 = vmatmul.mubr.f32.vlgmr.msra.gmra.mxu1 %v22822_v33  ;;  %v15692_v32 = vsub.f32 %v138_v61, %v15643_v51  ;;  %v135_v33 = vld [vmem:[%s21623_s1 + $0x318] sm:$0xff]  ;;  %v505_v1 = vcombine.low %v488_v47, %v502_v52  ;;  %v15702_v25 = vsub.f32 %v137_v46, %v15658_v15  ;;  %v15711_v60 = vand.u32 4294901760, %v136_v6  ;;  %v134_v47 = vld [vmem:[%s21623_s1 + $0x310] sm:$0xff] }
 0x14b   :  { %22837 = vst [vmem:[#allocation31_spill] sm:$0xff] %v15679_v38  ;;  %11559 = vmatprep.subr.mxu0 %v15439_v3  ;;  %11586 = vmatprep.subr.mxu1 %v22838_v53  ;;  %v22842_v53 = vand.u32 4294901760, %v15595_v54  ;;  %22843 = vst [vmem:[#allocation16_spill] sm:$0xff] %v15709_v31  ;;  %v22846_v52 = vand.u32 4294901760, %v15611_v24  ;;  %v15743_v3 = vand.u32 4294901760, %v135_v33 }
 0x14c   :  { %22839 = vst [vmem:[#allocation33_spill] sm:$0xff] %v15692_v32  ;;  %11560 = vmatpush3.msra.mxu0 %v15456_v44  ;;  %11587 = vmatpush3.msra.mxu1 %v22840_v7  ;;  %22841 = vst [vmem:[#allocation29_spill] sm:$0xff] %v15702_v25  ;;  %v22845_v7 = vand.u32 4294901760, %v15469_v10  ;;  %v15733_v10 = vsub.f32 %v154_v55, %v15656_v21  ;;  %v22850_v55 = vand.u32 4294901760, %v15499_v27  ;;  %v22853_v44 = vand.u32 4294901760, %v15549_v36 }
 0x14d   :  { %v15707_v61 = vsub.f32 %v15595_v54, %v22842_v53  ;;  %22844 = vst [vmem:[#allocation37_spill] sm:$0xff] %v15711_v60  ;;  %11561 = vmatprep.subr.mxu0 %v15483_v20  ;;  %v15723_v46 = vsub.f32 %v15611_v24, %v22846_v52  ;;  %v151_v53 = vld [vmem:[%s21623_s1 + $0x398] sm:$0xff]  ;;  %v150_v20 = vld [vmem:[%s21623_s1 + $0x390] sm:$0xff]  ;;  %v22848_v52 = vand.u32 4294901760, %v15631_v34  ;;  %v15746_v24 = vand.u32 4294901760, %v506_v39 }
 0x14e   :  { %11588 = vmatprep.subr.mxu1 %v22845_v7  ;;  %11562 = vmatpush3.msra.mxu0 %v15485_v62  ;;  %v22847_v7 = vand.u32 4294901760, %v15490_v29  ;;  %v15751_v62 = vand.u32 4294901760, %v134_v47  ;;  %v15766_v27 = vand.u32 4294901760, %v151_v53  ;;  %v22858_v36 = vand.u32 4294901760, %v15664_v4 }
 0x14f   :  { %v15741_v48 = vsub.f32 %v15631_v34, %v22848_v52  ;;  %22849 = vst [vmem:[#allocation35_spill] sm:$0xff] %v15746_v24  ;;  %11563 = vmatprep.subr.mxu0 %v15511_v26  ;;  %v15757_v52 = vand.u32 4294901760, %v505_v1  ;;  %v3422_v34 = vand.u32 4294901760, %v15707_v61  ;;  %v15764_v26 = vsub.f32 %v136_v6, %v15711_v60  ;;  %v149_v6 = vld [vmem:[%s21623_s1 + $0x388] sm:$0xff]  ;;  %3600 = vmatprep.mubr.f32.mxu1 %v15746_v24 }
 0x150   :  { %11589 = vmatpush3.msra.mxu1 %v22847_v7  ;;  %v15755_v7 = vsub.f32 %v153_v9, %v15684_v45  ;;  %11564 = vmatpush3.msra.mxu0 %v15544_v30  ;;  %v22854_v9 = vand.u32 4294901760, %v15570_v11  ;;  %v3429_v29 = vand.u32 4294901760, %v15723_v46  ;;  %v22855_v30 = vand.u32 4294901760, %v15679_v38  ;;  %v133_v61 = vld [vmem:[%s21623_s1 + $0x308] sm:$0xff] }
 0x151   :  { %11590 = vmatprep.subr.mxu1 %v22850_v55  ;;  %22852 = vst [vmem:[#allocation38_spill] sm:$0xff] %v15757_v52  ;;  %v15768_v55 = vand.u32 4294901760, %v150_v20  ;;  %11565 = vmatprep.subr.mxu0 %v15565_v37  ;;  %v15787_v11 = vsub.f32 %v152_v8, %v15709_v31  ;;  %v22857_v46 = vand.u32 4294901760, %v15588_v56  ;;  %v3435_v37 = vsub.f32 %v15664_v4, %v22858_v36 }
 0x152   :  { %22851 = vst [vmem:[#allocation20_spill] sm:$0xff] %v15755_v7  ;;  %11591 = vmatpush3.msra.mxu1 %v22853_v44  ;;  %v15777_v44 = vsub.f32 %v15679_v38, %v22855_v30  ;;  %11566 = vmatpush3.msra.mxu0 %v15554_v35  ;;  %v3541_v30 = vand.u32 4294901760, %v15741_v48  ;;  %v132_v38 = vld [vmem:[%s21623_s1 + $0x300] sm:$0xff]  ;;  %v15803_v8 = vsub.f32 %v506_v39, %v15746_v24  ;;  %v22859_v56 = vand.u32 4294901760, %v15603_v2 }
 0x153   :  { %11592 = vmatprep.subr.mxu1 %v22854_v9  ;;  %22856 = vst [vmem:[#allocation24_spill] sm:$0xff] %v15787_v11  ;;  %v15794_v9 = vsub.f32 %v135_v33, %v15743_v3  ;;  %11567 = vmatprep.subr.mxu0 %v15598_v19  ;;  %v15809_v48 = vsub.f32 %v134_v47, %v15751_v62  ;;  %v22860_v33 = vand.u32 4294901760, %v15692_v32  ;;  %v148_v39 = vld [vmem:[%s21623_s1 + $0x380] sm:$0xff]  ;;  %v22861_v2 = vand.u32 4294901760, %v15618_v50 }
 0x154   :  { %11593 = vmatpush3.msra.mxu1 %v22857_v46  ;;  %v15821_v35 = vsub.f32 %v505_v1, %v15757_v52  ;;  %11568 = vmatpush3.msra.mxu0 %v15613_v63  ;;  %v15826_v47 = vand.u32 4294901760, %v149_v6  ;;  %v15832_v36 = vsub.f32 %v151_v53, %v15766_v27  ;;  %v22862_v19 = vand.u32 4294901760, %v15641_v42 }
 0x155   :  { %11594 = vmatprep.subr.mxu1 %v22859_v56  ;;  %v15814_v46 = vsub.f32 %v15692_v32, %v22860_v33  ;;  %v15828_v56 = vand.u32 4294901760, %v133_v61  ;;  %11569 = vmatprep.subr.mxu0 %v15656_v21  ;;  %v3548_v1 = vand.u32 4294901760, %v15777_v44  ;;  %v22863_v63 = vand.u32 4294901760, %v15733_v10 }
 0x156   :  { %11595 = vmatpush3.msra.mxu1 %v22861_v2  ;;  %v15842_v32 = vand.u32 4294901760, %v132_v38  ;;  %11570 = vmatpush3.msra.mxu0 %v15643_v51  ;;  %v22864_v53 = vand.u32 4294901760, %v15648_v22  ;;  %v3436_v33 = vand.u32 4294901760, %v3435_v37  ;;  %v15847_v21 = vand.u32 4294901760, %v148_v39 }
 0x157   :  { %11596 = vmatprep.subr.mxu1 %v22862_v19  ;;  %v3554_v50 = vsub.f32 %v15733_v10, %v22863_v63  ;;  %v15851_v42 = vsub.f32 %v150_v20, %v15768_v55  ;;  %11571 = vmatprep.subr.mxu0 %v15684_v45  ;;  %v22865_v63 = vand.u32 4294901760, %v15669_v13  ;;  %v3443_v44 = vand.u32 4294901760, %v15814_v46 }
 0x158   :  { %11597 = vmatpush3.msra.mxu1 %v22864_v53  ;;  %v22866_v2 = vand.u32 4294901760, %v15755_v7  ;;  %v11163_v53 = vpop.f32.mrf.mxu0  ;;  %11572 = vmatpush3.msra.mxu0 %v15658_v15  ;;  %v15864_v20 = vsub.f32 %v133_v61, %v15828_v56  ;;  %v22868_v13 = vand.u32 4294901760, %v15702_v25  ;;  %v15871_v19 = vsub.f32 %v149_v6, %v15826_v47 }
 0x159   :  { %11598 = vmatprep.subr.mxu1 %v22865_v63  ;;  %11573 = vmatprep.subr.mxu0 %v15709_v31  ;;  %v22870_v51 = vand.u32 4294901760, %v15787_v11  ;;  %v15878_v61 = vsub.f32 %v132_v38, %v15842_v32  ;;  %v22872_v6 = vand.u32 4294901760, %v15803_v8  ;;  %v22874_v38 = vand.u32 4294901760, %v15764_v26 }
 0x15a   :  { %v3561_v22 = vsub.f32 %v15755_v7, %v22866_v2  ;;  %11599 = vmatpush3.msra.mxu1 %v3422_v34  ;;  %22867 = vst [vmem:[#allocation34_spill] sm:$0xff] %v15864_v20  ;;  %v3449_v63 = vsub.f32 %v15702_v25, %v22868_v13  ;;  %22869 = vst [vmem:[#allocation23_spill] sm:$0xff] %v15871_v19  ;;  %v3555_v2 = vand.u32 4294901760, %v3554_v50  ;;  %v11164_v15 = vpop.f32.mrf.mxu0  ;;  %11574 = vmatpush3.msra.mxu0 %v15711_v60 }
 0x15b   :  { %11600 = vmatprep.subr.mxu1 %v3541_v30  ;;  %v3568_v34 = vsub.f32 %v15787_v11, %v22870_v51  ;;  %22871 = vst [vmem:[#allocation25_spill] sm:$0xff] %v15878_v61  ;;  %v3362_v13 = vsub.f32 %v15803_v8, %v22872_v6  ;;  %v11165_v46 = vadd.f32 %v11164_v15, %v11163_v53  ;;  %v21898_v30 = vand.u32 4294901760, %v15878_v61 }
 0x15c   :  { %11601 = vmatpush3.msra.mxu1 %v3429_v29  ;;  %v15887_v50 = vsub.f32 %v148_v39, %v15847_v21  ;;  %11575 = vmatprep.subr.mxu0 %v15766_v27  ;;  %v3562_v51 = vand.u32 4294901760, %v3561_v22  ;;  %v3456_v37 = vsub.f32 %v15764_v26, %v22874_v38  ;;  %v22875_v29 = vand.u32 4294901760, %v15821_v35 }
 0x15d   :  { %11602 = vmatprep.subr.mxu1 %v3548_v1  ;;  %11576 = vmatpush3.msra.mxu0 %v15743_v3  ;;  %v3450_v15 = vand.u32 4294901760, %v3449_v63  ;;  %v22876_v39 = vand.u32 4294901760, %v15832_v36  ;;  %v1648_v1 = vadd.f32 %v11165_v46, %v15583_v5  ;;  %v21897_v22 = vand.u32 4294901760, %v15871_v19 }
 0x15e   :  { %22873 = vst [vmem:[#allocation39_spill] sm:$0xff] %v15887_v50  ;;  %v3368_v60 = vsub.f32 %v15821_v35, %v22875_v29  ;;  %11603 = vmatpush3.msra.mxu1 %v3436_v33  ;;  %11577 = vmatprep.subr.mxu0 %v15768_v55  ;;  %v3569_v38 = vand.u32 4294901760, %v3568_v34  ;;  %v22877_v29 = vand.u32 4294901760, %v15794_v9  ;;  %v3363_v33 = vand.u32 4294901760, %v3362_v13 }
 0x15f   :  { %v3575_v53 = vsub.f32 %v15832_v36, %v22876_v39  ;;  %11604 = vmatprep.subr.mxu1 %v3555_v2  ;;  %11578 = vmatpush3.msra.mxu0 %v15751_v62  ;;  %v22878_v63 = vand.u32 4294901760, %v15851_v42  ;;  %v21899_v46 = vand.u32 4294901760, %v15887_v50  ;;  %v3457_v2 = vand.u32 4294901760, %v3456_v37 }
 0x160   :  { %v3463_v6 = vsub.f32 %v15794_v9, %v22877_v29  ;;  %11605 = vmatpush3.msra.mxu1 %v3443_v44  ;;  %11579 = vmatprep.subr.mxu0 %v15826_v47  ;;  %v3369_v34 = vand.u32 4294901760, %v3368_v60  ;;  %v22879_v39 = vand.u32 4294901760, %v15809_v48  ;;  %v3589_v13 = vsub.f32 %v15871_v19, %v21897_v22 }
 0x161   :  { %v3582_v5 = vsub.f32 %v15851_v42, %v22878_v63  ;;  %11606 = vmatprep.subr.mxu1 %v3562_v51  ;;  %11580 = vmatpush3.msra.mxu0 %v15828_v56  ;;  %v3576_v44 = vand.u32 4294901760, %v3575_v53  ;;  %v11198_v63 = vpop.f32.mrf.mxu1  ;;  %v22880_v60 = vand.u32 4294901760, %v15864_v20 }
 0x162   :  { %v3470_v29 = vsub.f32 %v15809_v48, %v22879_v39  ;;  %11607 = vmatpush3.msra.mxu1 %v3450_v15  ;;  %11581 = vmatprep.subr.mxu0 %v15847_v21  ;;  %v3464_v37 = vand.u32 4294901760, %v3463_v6  ;;  %v3596_v15 = vsub.f32 %v15887_v50, %v21899_v46  ;;  %v3484_v6 = vsub.f32 %v15878_v61, %v21898_v30  ;;  %v22897_v30 = vld [vmem:[#allocation11_spill] sm:$0xff] }
 0x163   :  { %11608 = vmatprep.subr.mxu1 %v3569_v38  ;;  %v3477_v51 = vsub.f32 %v15864_v20, %v22880_v60  ;;  %11582 = vmatpush3.msra.mxu0 %v15842_v32  ;;  %v3583_v39 = vand.u32 4294901760, %v3582_v5  ;;  %v11199_v53 = vpop.f32.mrf.mxu1  ;;  %v3590_v60 = vand.u32 4294901760, %v3589_v13  ;;  %v22885_v13 = vld [vmem:[#allocation26_spill] sm:$0xff] }
 0x164   :  { %3364 = vmatprep.mubr.f32.mxu0 %v3363_v33  ;;  %11609 = vmatpush3.msra.mxu1 %v3457_v2  ;;  %v3471_v22 = vand.u32 4294901760, %v3470_v29  ;;  %v11200_v38 = vadd.f32 %v11199_v53, %v11198_v63  ;;  %v3597_v2 = vand.u32 4294901760, %v3596_v15  ;;  %v22883_v29 = vld [vmem:[#allocation14_spill] sm:$0xff]  ;;  %v22886_v63 = vld [vmem:[#allocation5_spill] sm:$0xff]  ;;  %v22890_v15 = vld [vmem:[#allocation12_spill] sm:$0xff] }
 0x165   :  { %3370 = vmatmul.mubr.f32.vlgmr.msra.gmra.mxu0 %v3369_v34  ;;  %11610 = vmatprep.subr.mxu1 %v3576_v44  ;;  %v3478_v33 = vand.u32 4294901760, %v3477_v51  ;;  %v3485_v34 = vand.u32 4294901760, %v3484_v6  ;;  %v22884_v44 = vld [vmem:[#allocation15_spill] sm:$0xff]  ;;  %v22888_v51 = vld [vmem:[#allocation17_spill] sm:$0xff]  ;;  %v22891_v53 = vld [vmem:[#allocation6_spill] sm:$0xff] }
 0x166   :  { %11621 = vmatprep.subr.mxu0 %v15382_v40  ;;  %11611 = vmatpush3.msra.mxu1 %v3464_v37  ;;  %v1880_v5 = vadd.f32 %v11200_v38, %v1648_v1  ;;  %v22881_v1 = vld [vmem:[#allocation10_spill] sm:$0xff]  ;;  %v22887_v37 = vld [vmem:[#allocation28_spill] sm:$0xff]  ;;  %v22892_v6 = vld [vmem:[#allocation19_spill] sm:$0xff] }
 0x167   :  { %11622 = vmatpush3.msra.mxu0 %v15376_v23  ;;  %11612 = vmatprep.subr.mxu1 %v3583_v39  ;;  %v22889_v39 = vld [vmem:[#allocation31_spill] sm:$0xff]  ;;  %v22893_v38 = vld [vmem:[#allocation33_spill] sm:$0xff] }
 0x168   :  { %11623 = vmatprep.subr.mxu0 %v15388_v57  ;;  %11613 = vmatpush3.msra.mxu1 %v3471_v22  ;;  %v22882_v22 = vld [vmem:[#allocation9_spill] sm:$0xff] }
 0x169   :  { %11624 = vmatpush3.msra.mxu0 %v15394_v43  ;;  %11614 = vmatprep.subr.mxu1 %v3590_v60  ;;  %v22894_v60 = vld [vmem:[#allocation18_spill] sm:$0xff] }
 0x16a   :  { %11625 = vmatprep.subr.mxu0 %v15408_v12  ;;  %11615 = vmatpush3.msra.mxu1 %v3478_v33  ;;  %v22895_v33 = vld [vmem:[#allocation8_spill] sm:$0xff] }
 0x16b   :  { %11626 = vmatpush3.msra.mxu0 %v15437_v18  ;;  %11616 = vmatprep.subr.mxu1 %v3597_v2 }
 0x16c   :  { %11627 = vmatprep.subr.mxu0 %v15475_v41  ;;  %11617 = vmatpush3.msra.mxu1 %v3485_v34  ;;  %v22896_v34 = vld [vmem:[#allocation32_spill] sm:$0xff] }
 0x16d   :  { %11628 = vmatpush3.msra.mxu0 %v15481_v28  ;;  %3602 = vmatmul.mubr.f32.vlgmr.msra.gmra.mxu1 %v15757_v52  ;;  %v22898_v52 = vld [vmem:[#allocation7_spill] sm:$0xff] }
 0x16e   :  { %11629 = vmatprep.subr.mxu0 %v15503_v59  ;;  %11656 = vmatprep.subr.mxu1 %v15350_v49 }
 0x16f   :  { %11630 = vmatpush3.msra.mxu0 %v15509_v0  ;;  %11657 = vmatpush3.msra.mxu1 %v15352_v58 }
 0x170   :  { %11631 = vmatprep.subr.mxu0 %v15538_v16  ;;  %11658 = vmatprep.subr.mxu1 %v15360_v14 }
 0x171   :  { %11632 = vmatpush3.msra.mxu0 %v15530_v17  ;;  %11659 = vmatpush3.msra.mxu1 %v22881_v1 }
 0x172   :  { %11633 = vmatprep.subr.mxu0 %v22882_v22  ;;  %11660 = vmatprep.subr.mxu1 %v22883_v29 }
 0x173   :  { %11634 = vmatpush3.msra.mxu0 %v15595_v54  ;;  %11661 = vmatpush3.msra.mxu1 %v22884_v44 }
 0x174   :  { %11635 = vmatprep.subr.mxu0 %v22885_v13  ;;  %11662 = vmatprep.subr.mxu1 %v22886_v63 }
 0x175   :  { %11636 = vmatpush3.msra.mxu0 %v22887_v37  ;;  %11663 = vmatpush3.msra.mxu1 %v22888_v51 }
 0x176   :  { %11637 = vmatprep.subr.mxu0 %v22889_v39  ;;  %11664 = vmatprep.subr.mxu1 %v22890_v15 }
 0x177   :  { %11638 = vmatpush3.msra.mxu0 %v15664_v4  ;;  %11665 = vmatpush3.msra.mxu1 %v22891_v53 }
 0x178   :  { %11639 = vmatprep.subr.mxu0 %v15733_v10  ;;  %11666 = vmatprep.subr.mxu1 %v22892_v6  ;;  %v11233_v2 = vpop.f32.mrf.mxu0 }
 0x179   :  { %11640 = vmatpush3.msra.mxu0 %v22893_v38  ;;  %11667 = vmatpush3.msra.mxu1 %v22894_v60 }
 0x17a   :  { %11641 = vmatprep.subr.mxu0 %v15755_v7  ;;  %11668 = vmatprep.subr.mxu1 %v22895_v33  ;;  %v11234_v46 = vpop.f32.mrf.mxu0  ;;  %v22899_v7 = vld [vmem:[#allocation13_spill] sm:$0xff]  ;;  %v22900_v33 = vld [vmem:[#allocation30_spill] sm:$0xff] }
 0x17b   :  { %11642 = vmatpush3.msra.mxu0 %v15702_v25  ;;  %11669 = vmatpush3.msra.mxu1 %v22896_v34  ;;  %v11235_v24 = vadd.f32 %v11234_v46, %v11233_v2  ;;  %v22903_v46 = vld [vmem:[#allocation21_spill] sm:$0xff] }
 0x17c   :  { %11643 = vmatprep.subr.mxu0 %v15787_v11  ;;  %11670 = vmatprep.subr.mxu1 %v22897_v30  ;;  %v22901_v11 = vld [vmem:[#allocation22_spill] sm:$0xff]  ;;  %v22902_v30 = vld [vmem:[#allocation36_spill] sm:$0xff] }
 0x17d   :  { %11644 = vmatpush3.msra.mxu0 %v15764_v26  ;;  %11671 = vmatpush3.msra.mxu1 %v22898_v52  ;;  %v2018_v25 = vadd.f32 %v11235_v24, %v1880_v5  ;;  %v22904_v5 = vld [vmem:[#allocation37_spill] sm:$0xff] }
 0x17e   :  { %11645 = vmatprep.subr.mxu0 %v15832_v36  ;;  %11672 = vmatprep.subr.mxu1 %v22899_v7 }
 0x17f   :  { %11646 = vmatpush3.msra.mxu0 %v15794_v9  ;;  %11673 = vmatpush3.msra.mxu1 %v22900_v33 }
 0x180   :  { %11647 = vmatprep.subr.mxu0 %v15851_v42  ;;  %11674 = vmatprep.subr.mxu1 %v22901_v11 }
 0x181   :  { %11648 = vmatpush3.msra.mxu0 %v15809_v48  ;;  %11675 = vmatpush3.msra.mxu1 %v22902_v30  ;;  %v11268_v2 = vpop.f32.mrf.mxu1 }
 0x182   :  { %11649 = vmatprep.subr.mxu0 %v15871_v19  ;;  %11676 = vmatprep.subr.mxu1 %v15684_v45 }
 0x183   :  { %11650 = vmatpush3.msra.mxu0 %v15864_v20  ;;  %11677 = vmatpush3.msra.mxu1 %v22903_v46  ;;  %v11269_v24 = vpop.f32.mrf.mxu1  ;;  %v22905_v20 = vand.u32 4294901760, %v15382_v40  ;;  %v22909_v40 = vand.u32 4294901760, %v15408_v12  ;;  %v22914_v12 = vand.u32 4294901760, %v15821_v35 }
 0x184   :  { %11651 = vmatprep.subr.mxu0 %v15887_v50  ;;  %11678 = vmatprep.subr.mxu1 %v15709_v31  ;;  %v11270_v19 = vadd.f32 %v11269_v24, %v11268_v2  ;;  %v22906_v50 = vand.u32 4294901760, %v15376_v23  ;;  %v22908_v2 = vand.u32 4294901760, %v15394_v43  ;;  %v22910_v23 = vand.u32 4294901760, %v15437_v18  ;;  %v176_v24 = vld [vmem:[%s21623_s1 + $0x460] sm:$0xff] }
 0x185   :  { %11652 = vmatpush3.msra.mxu0 %v15878_v61  ;;  %3737 = vmatprep.mubr.f32.mxu0 %v15803_v8  ;;  %v22907_v61 = vand.u32 4294901760, %v15388_v57  ;;  %v22911_v57 = vand.u32 4294901760, %v15475_v41  ;;  %v22912_v43 = vand.u32 4294901760, %v15803_v8  ;;  %v22916_v18 = vand.u32 4294901760, %v15509_v0  ;;  %v195_v41 = vld [vmem:[%s21623_s1 + $0x4f8] sm:$0xff] }
 0x186   :  { %11679 = vmatpush3.msra.mxu1 %v22904_v5  ;;  %3740 = vmatmul.mubr.f32.vlgmr.msra.gmra.mxu0 %v15821_v35  ;;  %v15999_v31 = vadd.f32 %v11270_v19, %v2018_v25  ;;  %v22913_v25 = vand.u32 4294901760, %v15481_v28  ;;  %v22915_v19 = vand.u32 4294901760, %v15503_v59  ;;  %v179_v28 = vld [vmem:[%s21623_s1 + $0x478] sm:$0xff]  ;;  %v22917_v35 = vand.u32 4294901760, %v15538_v16 }
 0x187   :  { %11680 = vmatprep.subr.mxu1 %v15766_v27  ;;  %11691 = vmatprep.subr.mxu0 %v22905_v20  ;;  %v22918_v59 = vand.u32 4294901760, %v15530_v17  ;;  %v22919_v0 = vand.u32 4294901760, %v22882_v22  ;;  %v16050_v16 = vand.u32 4294901760, %v195_v41  ;;  %v22920_v8 = vand.u32 4294901760, %v15595_v54  ;;  %v193_v20 = vld [vmem:[%s21623_s1 + $0x4e8] sm:$0xff] }
 0x188   :  { %11681 = vmatpush3.msra.mxu1 %v15743_v3  ;;  %11692 = vmatpush3.msra.mxu0 %v22906_v50  ;;  %v22925_v54 = vand.u32 4294901760, %v22889_v39  ;;  %v22928_v39 = vand.u32 4294901760, %v15733_v10  ;;  %v22932_v10 = vld [vmem:[#allocation20_spill] sm:$0xff] }
 0x189   :  { %11682 = vmatprep.subr.mxu1 %v15768_v55  ;;  %11693 = vmatprep.subr.mxu0 %v22907_v61  ;;  %v22922_v61 = vand.u32 4294901760, %v22885_v13  ;;  %v192_v13 = vld [vmem:[%s21623_s1 + $0x4e0] sm:$0xff] }
 0x18a   :  { %11683 = vmatpush3.msra.mxu1 %v15751_v62  ;;  %11694 = vmatpush3.msra.mxu0 %v22908_v2  ;;  %v16107_v2 = vand.u32 4294901760, %v192_v13 }
 0x18b   :  { %11684 = vmatprep.subr.mxu1 %v15826_v47  ;;  %11695 = vmatprep.subr.mxu0 %v22909_v40  ;;  %v22933_v40 = vand.u32 4294901760, %v22932_v10  ;;  %v22946_v10 = vand.u32 4294901760, %v15851_v42  ;;  %v189_v42 = vld [vmem:[%s21623_s1 + $0x4c8] sm:$0xff] }
 0x18c   :  { %11685 = vmatpush3.msra.mxu1 %v15828_v56  ;;  %11696 = vmatpush3.msra.mxu0 %v22910_v23  ;;  %22931 = vst [vmem:[#allocation26_spill] sm:$0xff] %v16107_v2 }
 0x18d   :  { %11686 = vmatprep.subr.mxu1 %v15847_v21  ;;  %11697 = vmatprep.subr.mxu0 %v22911_v57  ;;  %v191_v57 = vld [vmem:[%s21623_s1 + $0x4d8] sm:$0xff] }
 0x18e   :  { %11687 = vmatpush3.msra.mxu1 %v15842_v32  ;;  %3844 = vmatprep.mubr.f32.mxu1 %v22912_v43 }
 0x18f   :  { %11698 = vmatpush3.msra.mxu0 %v22913_v25  ;;  %3848 = vmatmul.mubr.f32.vlgmr.msra.gmra.mxu1 %v22914_v12  ;;  %v22935_v25 = vld [vmem:[#allocation29_spill] sm:$0xff] }
 0x190   :  { %11699 = vmatprep.subr.mxu0 %v22915_v19  ;;  %11726 = vmatprep.subr.mxu1 %v15350_v49  ;;  %v194_v49 = vld [vmem:[%s21623_s1 + $0x4f0] sm:$0xff]  ;;  %v22936_v12 = vand.u32 4294901760, %v22935_v25  ;;  %v16123_v19 = vand.u32 4294901760, %v176_v24 }
 0x191   :  { %11700 = vmatpush3.msra.mxu0 %v22916_v18  ;;  %11727 = vmatpush3.msra.mxu1 %v15352_v58  ;;  %v178_v58 = vld [vmem:[%s21623_s1 + $0x470] sm:$0xff]  ;;  %v16057_v17 = vand.u32 4294901760, %v194_v49  ;;  %v175_v18 = vld [vmem:[%s21623_s1 + $0x458] sm:$0xff] }
 0x192   :  { %11701 = vmatprep.subr.mxu0 %v22917_v35  ;;  %11728 = vmatprep.subr.mxu1 %v15360_v14  ;;  %v16052_v14 = vand.u32 4294901760, %v179_v28  ;;  %v16065_v50 = vand.u32 4294901760, %v178_v58  ;;  %22937 = vst [vmem:[#allocation5_spill] sm:$0xff] %v16123_v19 }
 0x193   :  { %11702 = vmatpush3.msra.mxu0 %v22918_v59  ;;  %11729 = vmatpush3.msra.mxu1 %v22881_v1  ;;  %22921 = vst [vmem:[#allocation10_spill] sm:$0xff] %v16057_v17  ;;  %v22924_v1 = vand.u32 4294901760, %v22887_v37  ;;  %v22927_v37 = vand.u32 4294901760, %v15664_v4  ;;  %v22929_v4 = vand.u32 4294901760, %v22893_v38 }
 0x194   :  { %11703 = vmatprep.subr.mxu0 %v22919_v0  ;;  %11730 = vmatprep.subr.mxu1 %v22883_v29  ;;  %22923 = vst [vmem:[#allocation9_spill] sm:$0xff] %v16065_v50  ;;  %v16074_v22 = vsub.f32 %v179_v28, %v16052_v14  ;;  %v16076_v29 = vand.u32 4294901760, %v193_v20  ;;  %v22938_v28 = vld [vmem:[#allocation24_spill] sm:$0xff]  ;;  %v22941_v0 = vand.u32 4294901760, %v15764_v26  ;;  %v22943_v26 = vand.u32 4294901760, %v15832_v36 }
 0x195   :  { %11704 = vmatpush3.msra.mxu0 %v22920_v8  ;;  %11731 = vmatpush3.msra.mxu1 %v22884_v44  ;;  %v177_v44 = vld [vmem:[%s21623_s1 + $0x468] sm:$0xff]  ;;  %v22939_v35 = vand.u32 4294901760, %v22938_v28  ;;  %v16171_v36 = vsub.f32 %v176_v24, %v16123_v19  ;;  %v22952_v28 = vld [vmem:[#allocation34_spill] sm:$0xff] }
 0x196   :  { %11705 = vmatprep.subr.mxu0 %v22922_v61  ;;  %11732 = vmatprep.subr.mxu1 %v22886_v63  ;;  %22926 = vst [vmem:[#allocation14_spill] sm:$0xff] %v16076_v29  ;;  %v16085_v63 = vsub.f32 %v195_v41, %v16050_v16  ;;  %v21916_v38 = vand.u32 4294901760, %v16074_v22  ;;  %v190_v61 = vld [vmem:[%s21623_s1 + $0x4d0] sm:$0xff] }
 0x197   :  { %11706 = vmatpush3.msra.mxu0 %v22924_v1  ;;  %11733 = vmatpush3.msra.mxu1 %v22888_v51  ;;  %v16091_v51 = vsub.f32 %v194_v49, %v16057_v17  ;;  %v22940_v49 = vld [vmem:[#allocation11_spill] sm:$0xff]  ;;  %v174_v1 = vld [vmem:[%s21623_s1 + $0x450] sm:$0xff] }
 0x198   :  { %11707 = vmatprep.subr.mxu0 %v22925_v54  ;;  %11734 = vmatprep.subr.mxu1 %v22890_v15  ;;  %v16097_v15 = vsub.f32 %v178_v58, %v16065_v50  ;;  %v21918_v43 = vand.u32 4294901760, %v16085_v63  ;;  %v16148_v54 = vsub.f32 %v192_v13, %v16107_v2 }
 0x199   :  { %11708 = vmatpush3.msra.mxu0 %v22927_v37  ;;  %11735 = vmatpush3.msra.mxu1 %v22891_v53  ;;  %v16105_v53 = vand.u32 4294901760, %v177_v44  ;;  %v21914_v41 = vand.u32 4294901760, %v16091_v51  ;;  %v16163_v37 = vsub.f32 %v16074_v22, %v21916_v38 }
 0x19a   :  { %11709 = vmatprep.subr.mxu0 %v22928_v39  ;;  %11736 = vmatprep.subr.mxu1 %v22892_v6  ;;  %v22934_v6 = vld [vmem:[#allocation8_spill] sm:$0xff]  ;;  %v11303_v23 = vpop.f32.mrf.mxu0  ;;  %v21913_v58 = vand.u32 4294901760, %v16097_v15  ;;  %v22945_v39 = vand.u32 4294901760, %v15794_v9  ;;  %v16183_v9 = vand.u32 4294901760, %v174_v1  ;;  %v21917_v24 = vand.u32 4294901760, %v16148_v54 }
 0x19b   :  { %11710 = vmatpush3.msra.mxu0 %v22929_v4  ;;  %11737 = vmatpush3.msra.mxu1 %v22894_v60  ;;  %22930 = vst [vmem:[#allocation15_spill] sm:$0xff] %v16105_v53  ;;  %v16118_v60 = vsub.f32 %v193_v20, %v16076_v29  ;;  %v16137_v8 = vsub.f32 %v177_v44, %v16105_v53  ;;  %v16139_v20 = vand.u32 4294901760, %v191_v57  ;;  %v16158_v44 = vand.u32 4294901760, %v175_v18 }
 0x19c   :  { %11711 = vmatprep.subr.mxu0 %v22933_v40  ;;  %11738 = vmatprep.subr.mxu1 %v22934_v6  ;;  %v11304_v59 = vpop.f32.mrf.mxu0  ;;  %v16176_v4 = vsub.f32 %v16091_v51, %v21914_v41  ;;  %v16181_v40 = vand.u32 4294901760, %v190_v61  ;;  %22948 = vst [vmem:[#allocation12_spill] sm:$0xff] %v16183_v9 }
 0x19d   :  { %11712 = vmatpush3.msra.mxu0 %v22936_v12  ;;  %11739 = vmatpush3.msra.mxu1 %v22896_v34  ;;  %v11305_v34 = vadd.f32 %v11304_v59, %v11303_v23  ;;  %22942 = vst [vmem:[#allocation28_spill] sm:$0xff] %v16139_v20  ;;  %22944 = vst [vmem:[#allocation17_spill] sm:$0xff] %v16158_v44  ;;  %v21912_v13 = vand.u32 4294901760, %v16118_v60  ;;  %v16199_v6 = vsub.f32 %v191_v57, %v16139_v20  ;;  %v22950_v23 = vld [vmem:[#allocation23_spill] sm:$0xff]  ;;  %v173_v12 = vld [vmem:[%s21623_s1 + $0x448] sm:$0xff] }
 0x19e   :  { %11713 = vmatprep.subr.mxu0 %v22939_v35  ;;  %11740 = vmatprep.subr.mxu1 %v22940_v49  ;;  %22947 = vst [vmem:[#allocation31_spill] sm:$0xff] %v16181_v40  ;;  %v22951_v25 = vand.u32 4294901760, %v22950_v23  ;;  %v22953_v57 = vand.u32 4294901760, %v22952_v28  ;;  %v172_v59 = vld [vmem:[%s21623_s1 + $0x440] sm:$0xff]  ;;  %v22959_v28 = vld [vmem:[#allocation25_spill] sm:$0xff] }
 0x19f   :  { %11714 = vmatpush3.msra.mxu0 %v22941_v0  ;;  %11741 = vmatpush3.msra.mxu1 %v22898_v52  ;;  %v16156_v52 = vsub.f32 %v16085_v63, %v21918_v43  ;;  %v21919_v0 = vand.u32 4294901760, %v16171_v36  ;;  %v188_v23 = vld [vmem:[%s21623_s1 + $0x4c0] sm:$0xff] }
 0x1a0   :  { %11715 = vmatprep.subr.mxu0 %v22943_v26  ;;  %11742 = vmatprep.subr.mxu1 %v22899_v7  ;;  %v2294_v7 = vadd.f32 %v11305_v34, %v15999_v31  ;;  %v16188_v31 = vsub.f32 %v16097_v15, %v21913_v58  ;;  %v22954_v34 = vld [vmem:[#allocation39_spill] sm:$0xff] }
 0x1a1   :  { %11716 = vmatpush3.msra.mxu0 %v22945_v39  ;;  %11743 = vmatpush3.msra.mxu1 %v22900_v33  ;;  %v22949_v33 = vand.u32 4294901760, %v15809_v48  ;;  %v16205_v48 = vsub.f32 %v175_v18, %v16158_v44  ;;  %v22955_v26 = vand.u32 4294901760, %v22954_v34  ;;  %v22956_v39 = vld [vmem:[#allocation16_spill] sm:$0xff]  ;;  %v22961_v34 = vld [vmem:[#allocation35_spill] sm:$0xff]  ;;  %v16272_v43 = vsub.f32 %v16171_v36, %v21919_v0 }
 0x1a2   :  { %11717 = vmatprep.subr.mxu0 %v22946_v10  ;;  %11744 = vmatprep.subr.mxu1 %v22901_v11  ;;  %v21915_v11 = vand.u32 4294901760, %v16137_v8  ;;  %v170_v10 = vld [vmem:[%s21623_s1 + $0x430] sm:$0xff] }
 0x1a3   :  { %11718 = vmatpush3.msra.mxu0 %v22949_v33  ;;  %11745 = vmatpush3.msra.mxu1 %v22902_v30  ;;  %v16210_v30 = vsub.f32 %v16118_v60, %v21912_v13  ;;  %v11338_v35 = vpop.f32.mrf.mxu1  ;;  %v16232_v33 = vand.u32 4294901760, %v189_v42  ;;  %v16253_v13 = vsub.f32 %v16148_v54, %v21917_v24  ;;  %v21920_v38 = vand.u32 4294901760, %v16205_v48 }
 0x1a4   :  { %11719 = vmatprep.subr.mxu0 %v22951_v25  ;;  %11746 = vmatprep.subr.mxu1 %v15684_v45  ;;  %v16238_v25 = vsub.f32 %v190_v61, %v16181_v40  ;;  %v187_v61 = vld [vmem:[%s21623_s1 + $0x4b8] sm:$0xff]  ;;  %v16267_v24 = vand.u32 4294901760, %v188_v23 }
 0x1a5   :  { %11720 = vmatpush3.msra.mxu0 %v22953_v57  ;;  %11747 = vmatpush3.msra.mxu1 %v22903_v46  ;;  %v16229_v46 = vsub.f32 %v174_v1, %v16183_v9  ;;  %22958 = vst [vmem:[#allocation19_spill] sm:$0xff] %v16232_v33  ;;  %v22960_v57 = vand.u32 4294901760, %v22959_v28  ;;  %v16248_v1 = vsub.f32 %v16137_v8, %v21915_v11  ;;  %v21921_v28 = vand.u32 4294901760, %v16199_v6 }
 0x1a6   :  { %11721 = vmatprep.subr.mxu0 %v22955_v26  ;;  %11748 = vmatprep.subr.mxu1 %v22956_v39  ;;  %v11339_v26 = vpop.f32.mrf.mxu1  ;;  %v16243_v39 = vand.u32 4294901760, %v173_v12  ;;  %v16262_v11 = vand.u32 4294901760, %v172_v59  ;;  %22965 = vst [vmem:[#allocation32_spill] sm:$0xff] %v16267_v24  ;;  %v16287_v0 = vand.u32 4294901760, %v187_v61  ;;  %v16306_v18 = vsub.f32 %v189_v42, %v16232_v33  ;;  %v186_v42 = vld [vmem:[%s21623_s1 + $0x4b0] sm:$0xff] }
 0x1a7   :  { %22957 = vst [vmem:[#allocation6_spill] sm:$0xff] %v16229_v46  ;;  %11722 = vmatpush3.msra.mxu0 %v22960_v57  ;;  %4014 = vmatprep.mubr.f32.mxu0 %v22961_v34  ;;  %v22963_v57 = vld [vmem:[#allocation38_spill] sm:$0xff]  ;;  %v11340_v58 = vadd.f32 %v11339_v26, %v11338_v35 }
 0x1a8   :  { %22962 = vst [vmem:[#allocation33_spill] sm:$0xff] %v16243_v39  ;;  %11749 = vmatpush3.msra.mxu1 %v22904_v5  ;;  %4016 = vmatmul.mubr.f32.vlgmr.msra.gmra.mxu0 %v22963_v57  ;;  %22964 = vst [vmem:[#allocation18_spill] sm:$0xff] %v16262_v11  ;;  %v171_v5 = vld [vmem:[%s21623_s1 + $0x438] sm:$0xff]  ;;  %v13248_v35 = vld [vmem:[%s21622_s0 + $0x10] ss:$48 sps:$4 sm:$0xff]   ;;  %v16312_v45 = vsub.f32 %v172_v59, %v16262_v11 }
 0x1a9   :  { %11750 = vmatprep.subr.mxu1 %v15766_v27  ;;  %11761 = vmatprep.subr.mxu0 %v16050_v16  ;;  %v13250_v27 = vld [vmem:[%s21622_s0 + $0x70] ss:$48 sps:$4 sm:$0xff]   ;;  %v16285_v26 = vadd.f32 %v11340_v58, %v2294_v7  ;;  %22966 = vst [vmem:[#allocation7_spill] sm:$0xff] %v16287_v0  ;;  %v16303_v7 = vsub.f32 %v16199_v6, %v21921_v28  ;;  %v16331_v59 = vld [vmem:[%s21623_s1 + $0x4a8] sm:$0xff] }
 0x1aa   :  { %11751 = vmatpush3.msra.mxu1 %v15743_v3  ;;  %11762 = vmatpush3.msra.mxu0 %v16052_v14  ;;  %v16297_v3 = vsub.f32 %v173_v12, %v16243_v39  ;;  %22967 = vst [vmem:[#allocation13_spill] sm:$0xff] %v16312_v45  ;;  %v16314_v12 = vand.u32 4294901760, %v171_v5  ;;  %v16319_v58 = vsub.f32 %v16205_v48, %v21920_v38  ;;  %v169_v38 = vld [vmem:[%s21623_s1 + $0x428] sm:$0xff] }
 0x1ab   :  { %11752 = vmatprep.subr.mxu1 %v15768_v55  ;;  %11763 = vmatprep.subr.mxu0 %v16057_v17  ;;  %v16337_v28 = vsub.f32 %v188_v23, %v16267_v24  ;;  %v22970_v55 = vld [vmem:[#allocation27_spill] sm:$0xff]  ;;  %v22972_v17 = vand.u32 4294901760, %v16229_v46 }
 0x1ac   :  { %11753 = vmatpush3.msra.mxu1 %v15751_v62  ;;  %11764 = vmatpush3.msra.mxu0 %v16065_v50  ;;  %22968 = vst [vmem:[#allocation30_spill] sm:$0xff] %v16314_v12  ;;  %v16326_v62 = vand.u32 4294901760, %v170_v10  ;;  %v517_v49 = vrot.slane %v13248_v35, %v22970_v55  ;;  %v16355_v35 = vsub.f32 %v187_v61, %v16287_v0  ;;  %v22979_v61 = vand.u32 4294901760, %v16306_v18 }
 0x1ad   :  { %11754 = vmatprep.subr.mxu1 %v15826_v47  ;;  %11765 = vmatprep.subr.mxu0 %v16076_v29  ;;  %v531_v47 = vrot.slane %v13250_v27, %v22970_v55  ;;  %v22971_v29 = vand.u32 4294901760, %v16238_v25  ;;  %v16352_v23 = vsub.f32 %v16229_v46, %v22972_v17  ;;  %v16360_v27 = vand.u32 4294901760, %v186_v42 }
 0x1ae   :  { %22969 = vst [vmem:[#allocation22_spill] sm:$0xff] %v16326_v62  ;;  %11755 = vmatpush3.msra.mxu1 %v15828_v56  ;;  %11766 = vmatpush3.msra.mxu0 %v16105_v53  ;;  %v16367_v17 = vsub.f32 %v171_v5, %v16314_v12  ;;  %v16373_v55 = vand.u32 4294901760, %v169_v38  ;;  %v168_v56 = vld [vmem:[%s21623_s1 + $0x420] sm:$0xff]  ;;  %v22986_v53 = vand.u32 4294901760, %v16337_v28 }
 0x1af   :  { %v16347_v50 = vsub.f32 %v16238_v25, %v22971_v29  ;;  %11756 = vmatprep.subr.mxu1 %v15847_v21  ;;  %11767 = vmatprep.subr.mxu0 %v16107_v2  ;;  %v16371_v21 = vand.u32 4294901760, %v16331_v59  ;;  %v184_v5 = vld [vmem:[%s21623_s1 + $0x4a0] sm:$0xff]  ;;  %v540_v41 = vcombine.high %v517_v49, %v531_v47  ;;  %v22977_v2 = vand.u32 4294901760, %v16156_v52 }
 0x1b0   :  { %11757 = vmatpush3.msra.mxu1 %v15842_v32  ;;  %4118 = vmatprep.mubr.f32.mxu1 %v22961_v34  ;;  %22973 = vst [vmem:[#allocation36_spill] sm:$0xff] %v16367_v17  ;;  %22975 = vst [vmem:[#allocation37_spill] sm:$0xff] %v16373_v55  ;;  %v167_v32 = vld [vmem:[%s21623_s1 + $0x418] sm:$0xff]  ;;  %v16384_v34 = vsub.f32 %v170_v10, %v16326_v62  ;;  %v539_v46 = vcombine.low %v517_v49, %v531_v47  ;;  %v22978_v29 = vand.u32 4294901760, %v16163_v37 }
 0x1b1   :  { %22974 = vst [vmem:[#allocation21_spill] sm:$0xff] %v16371_v21  ;;  %11768 = vmatpush3.msra.mxu0 %v16123_v19  ;;  %4120 = vmatmul.mubr.f32.vlgmr.msra.gmra.mxu1 %v22963_v57  ;;  %v183_v10 = vld [vmem:[%s21623_s1 + $0x498] sm:$0xff]  ;;  %v22980_v52 = vand.u32 4294901760, %v16297_v3  ;;  %v16413_v19 = vand.u32 4294901760, %v168_v56  ;;  %v22982_v49 = vand.u32 4294901760, %v16176_v4  ;;  %v16421_v37 = vsub.f32 %v169_v38, %v16373_v55 }
 0x1b2   :  { %22976 = vst [vmem:[#allocation20_spill] sm:$0xff] %v16384_v34  ;;  %11769 = vmatprep.subr.mxu0 %v16139_v20  ;;  %11796 = vmatprep.subr.mxu1 %v22977_v2  ;;  %v16406_v2 = vsub.f32 %v16306_v18, %v22979_v61  ;;  %v16415_v20 = vand.u32 4294901760, %v167_v32  ;;  %v16423_v47 = vand.u32 4294901760, %v184_v5  ;;  %v16427_v61 = vsub.f32 %v186_v42, %v16360_v27  ;;  %v182_v42 = vld [vmem:[%s21623_s1 + $0x490] sm:$0xff] }
 0x1b3   :  { %11770 = vmatpush3.msra.mxu0 %v16158_v44  ;;  %11797 = vmatpush3.msra.mxu1 %v22978_v29  ;;  %v16411_v57 = vsub.f32 %v16297_v3, %v22980_v52  ;;  %22981 = vst [vmem:[#allocation8_spill] sm:$0xff] %v16413_v19  ;;  %22983 = vst [vmem:[#allocation29_spill] sm:$0xff] %v16421_v37  ;;  %v22985_v52 = vand.u32 4294901760, %v16188_v31  ;;  %v16435_v4 = vsub.f32 %v16337_v28, %v22986_v53 }
 0x1b4   :  { %11771 = vmatprep.subr.mxu0 %v16181_v40  ;;  %11798 = vmatprep.subr.mxu1 %v22982_v49  ;;  %22984 = vst [vmem:[#allocation24_spill] sm:$0xff] %v16423_v47  ;;  %v22987_v38 = vand.u32 4294901760, %v16312_v45  ;;  %v16442_v40 = vand.u32 4294901760, %v183_v10  ;;  %v16447_v29 = vand.u32 4294901760, %v540_v41  ;;  %v22989_v31 = vand.u32 4294901760, %v16210_v30 }
 0x1b5   :  { %11772 = vmatpush3.msra.mxu0 %v16183_v9  ;;  %11799 = vmatpush3.msra.mxu1 %v22985_v52  ;;  %v22990_v53 = vand.u32 4294901760, %v16355_v35  ;;  %v16463_v44 = vsub.f32 %v16331_v59, %v16371_v21  ;;  %v22993_v30 = vand.u32 4294901760, %v16248_v1  ;;  %v16476_v9 = vsub.f32 %v167_v32, %v16415_v20  ;;  %v165_v32 = vld [vmem:[%s21623_s1 + $0x408] sm:$0xff] }
 0x1b6   :  { %v16440_v49 = vsub.f32 %v16312_v45, %v22987_v38  ;;  %22988 = vst [vmem:[#allocation11_spill] sm:$0xff] %v16447_v29  ;;  %11773 = vmatprep.subr.mxu0 %v16232_v33  ;;  %11800 = vmatprep.subr.mxu1 %v22989_v31  ;;  %v166_v38 = vld [vmem:[%s21623_s1 + $0x410] sm:$0xff]  ;;  %v16465_v45 = vand.u32 4294901760, %v539_v46  ;;  %v4396_v31 = vand.u32 4294901760, %v16406_v2  ;;  %v16473_v33 = vsub.f32 %v168_v56, %v16413_v19  ;;  %v181_v56 = vld [vmem:[%s21623_s1 + $0x488] sm:$0xff] }
 0x1b7   :  { %v16455_v52 = vsub.f32 %v16355_v35, %v22990_v53  ;;  %22991 = vst [vmem:[#allocation23_spill] sm:$0xff] %v16463_v44  ;;  %11774 = vmatpush3.msra.mxu0 %v16243_v39  ;;  %11801 = vmatpush3.msra.mxu1 %v22993_v30  ;;  %v4284_v53 = vand.u32 4294901760, %v16411_v57  ;;  %22994 = vst [vmem:[#allocation39_spill] sm:$0xff] %v16476_v9  ;;  %v22995_v59 = vand.u32 4294901760, %v16253_v13  ;;  %v22996_v39 = vand.u32 4294901760, %v16367_v17 }
 0x1b8   :  { %22992 = vst [vmem:[#allocation34_spill] sm:$0xff] %v16465_v45  ;;  %11775 = vmatprep.subr.mxu0 %v16267_v24  ;;  %v16486_v30 = vand.u32 4294901760, %v182_v42  ;;  %v16496_v13 = vsub.f32 %v184_v5, %v16423_v47  ;;  %v4403_v2 = vand.u32 4294901760, %v16435_v4  ;;  %v16503_v57 = vand.u32 4294901760, %v166_v38  ;;  %v164_v24 = vld [vmem:[%s21623_s1 + $0x400] sm:$0xff]  ;;  %4462 = vmatprep.mubr.f32.mxu1 %v16447_v29 }
 0x1b9   :  { %11802 = vmatprep.subr.mxu1 %v22995_v59  ;;  %v16484_v1 = vsub.f32 %v16367_v17, %v22996_v39  ;;  %11776 = vmatpush3.msra.mxu0 %v16262_v11  ;;  %v22997_v39 = vand.u32 4294901760, %v16272_v43  ;;  %v4291_v59 = vand.u32 4294901760, %v16440_v49  ;;  %v16509_v17 = vsub.f32 %v540_v41, %v16447_v29  ;;  %v180_v11 = vld [vmem:[%s21623_s1 + $0x480] sm:$0xff] }
 0x1ba   :  { %11777 = vmatprep.subr.mxu0 %v16287_v0  ;;  %v22998_v5 = vand.u32 4294901760, %v16303_v7  ;;  %v4410_v43 = vand.u32 4294901760, %v16455_v52  ;;  %v22999_v4 = vand.u32 4294901760, %v16384_v34  ;;  %v16525_v41 = vsub.f32 %v539_v46, %v16465_v45 }
 0x1bb   :  { %11803 = vmatpush3.msra.mxu1 %v22997_v39  ;;  %11778 = vmatpush3.msra.mxu0 %v16314_v12  ;;  %v23000_v7 = vand.u32 4294901760, %v16319_v58  ;;  %v16530_v52 = vand.u32 4294901760, %v181_v56  ;;  %v16536_v39 = vsub.f32 %v183_v10, %v16442_v40  ;;  %v23001_v0 = vand.u32 4294901760, %v16347_v50 }
 0x1bc   :  { %11804 = vmatprep.subr.mxu1 %v22998_v5  ;;  %v16518_v49 = vsub.f32 %v16384_v34, %v22999_v4  ;;  %v16532_v5 = vand.u32 4294901760, %v165_v32  ;;  %11779 = vmatprep.subr.mxu0 %v16360_v27  ;;  %v4298_v46 = vand.u32 4294901760, %v16484_v1  ;;  %v23002_v12 = vand.u32 4294901760, %v16427_v61 }
 0x1bd   :  { %11805 = vmatpush3.msra.mxu1 %v23000_v7  ;;  %v16546_v34 = vand.u32 4294901760, %v164_v24  ;;  %11780 = vmatpush3.msra.mxu0 %v16326_v62  ;;  %v23003_v10 = vand.u32 4294901760, %v16352_v23  ;;  %v16552_v4 = vsub.f32 %v166_v38, %v16503_v57  ;;  %v16554_v50 = vand.u32 4294901760, %v180_v11  ;;  %v11373_v38 = vpop.f32.mrf.mxu0 }
 0x1be   :  { %11806 = vmatprep.subr.mxu1 %v23001_v0  ;;  %v4416_v58 = vsub.f32 %v16427_v61, %v23002_v12  ;;  %v16558_v1 = vsub.f32 %v182_v42, %v16486_v30  ;;  %11781 = vmatprep.subr.mxu0 %v16371_v21  ;;  %v4305_v12 = vand.u32 4294901760, %v16518_v49  ;;  %v23004_v7 = vand.u32 4294901760, %v16463_v44 }
 0x1bf   :  { %11807 = vmatpush3.msra.mxu1 %v23003_v10  ;;  %11782 = vmatpush3.msra.mxu0 %v16373_v55  ;;  %v16569_v42 = vsub.f32 %v165_v32, %v16532_v5  ;;  %v23006_v0 = vand.u32 4294901760, %v16421_v37  ;;  %v16576_v21 = vsub.f32 %v181_v56, %v16530_v52  ;;  %v23008_v62 = vand.u32 4294901760, %v16496_v13  ;;  %v11374_v55 = vpop.f32.mrf.mxu0 }
 0x1c0   :  { %11808 = vmatprep.subr.mxu1 %v4396_v31  ;;  %v4423_v23 = vsub.f32 %v16463_v44, %v23004_v7  ;;  %11783 = vmatprep.subr.mxu0 %v16423_v47  ;;  %v4417_v7 = vand.u32 4294901760, %v4416_v58  ;;  %v16583_v32 = vsub.f32 %v164_v24, %v16546_v34  ;;  %v23010_v56 = vand.u32 4294901760, %v16509_v17 }
 0x1c1   :  { %11809 = vmatpush3.msra.mxu1 %v4284_v53  ;;  %23005 = vst [vmem:[#allocation16_spill] sm:$0xff] %v16569_v42  ;;  %v4311_v31 = vsub.f32 %v16421_v37, %v23006_v0  ;;  %23007 = vst [vmem:[#allocation25_spill] sm:$0xff] %v16576_v21  ;;  %v4430_v53 = vsub.f32 %v16496_v13, %v23008_v62  ;;  %11784 = vmatpush3.msra.mxu0 %v16413_v19  ;;  %v23012_v62 = vand.u32 4294901760, %v16473_v33 }
 0x1c2   :  { %11810 = vmatprep.subr.mxu1 %v4403_v2  ;;  %23009 = vst [vmem:[#allocation35_spill] sm:$0xff] %v16583_v32  ;;  %v4224_v0 = vsub.f32 %v16509_v17, %v23010_v56  ;;  %v11375_v49 = vadd.f32 %v11374_v55, %v11373_v38  ;;  %v16592_v58 = vsub.f32 %v180_v11, %v16554_v50  ;;  %v4424_v24 = vand.u32 4294901760, %v4423_v23 }
 0x1c3   :  { %11811 = vmatpush3.msra.mxu1 %v4291_v59  ;;  %11785 = vmatprep.subr.mxu0 %v16442_v40  ;;  %v4318_v10 = vsub.f32 %v16473_v33, %v23012_v62  ;;  %v23013_v59 = vand.u32 4294901760, %v16525_v41  ;;  %v4312_v55 = vand.u32 4294901760, %v4311_v31  ;;  %v23014_v11 = vand.u32 4294901760, %v16536_v39 }
 0x1c4   :  { %23011 = vst [vmem:[#allocation38_spill] sm:$0xff] %v16592_v58  ;;  %11812 = vmatprep.subr.mxu1 %v4410_v43  ;;  %11786 = vmatpush3.msra.mxu0 %v16415_v20  ;;  %v2510_v43 = vadd.f32 %v11375_v49, %v16285_v26  ;;  %v21971_v23 = vand.u32 4294901760, %v16576_v21  ;;  %v4431_v62 = vand.u32 4294901760, %v4430_v53  ;;  %v23016_v31 = vand.u32 4294901760, %v16558_v1 }
 0x1c5   :  { %v4230_v19 = vsub.f32 %v16525_v41, %v23013_v59  ;;  %11813 = vmatpush3.msra.mxu1 %v4298_v46  ;;  %v4437_v38 = vsub.f32 %v16536_v39, %v23014_v11  ;;  %11787 = vmatprep.subr.mxu0 %v16486_v30  ;;  %v23015_v59 = vand.u32 4294901760, %v16476_v9  ;;  %v4225_v46 = vand.u32 4294901760, %v4224_v0 }
 0x1c6   :  { %11814 = vmatprep.subr.mxu1 %v4417_v7  ;;  %11788 = vmatpush3.msra.mxu0 %v16503_v57  ;;  %v4444_v26 = vsub.f32 %v16558_v1, %v23016_v31  ;;  %v21973_v49 = vand.u32 4294901760, %v16592_v58  ;;  %v4319_v7 = vand.u32 4294901760, %v4318_v10  ;;  %v23017_v11 = vand.u32 4294901760, %v16552_v4 }
 0x1c7   :  { %v4325_v56 = vsub.f32 %v16476_v9, %v23015_v59  ;;  %11815 = vmatpush3.msra.mxu1 %v4305_v12  ;;  %11789 = vmatprep.subr.mxu0 %v16530_v52  ;;  %v4231_v53 = vand.u32 4294901760, %v4230_v19  ;;  %v21972_v2 = vand.u32 4294901760, %v16583_v32  ;;  %v4438_v12 = vand.u32 4294901760, %v4437_v38  ;;  %v11408_v31 = vpop.f32.mrf.mxu1 }
 0x1c8   :  { %11816 = vmatprep.subr.mxu1 %v4424_v24  ;;  %v4332_v59 = vsub.f32 %v16552_v4, %v23017_v11  ;;  %11790 = vmatpush3.msra.mxu0 %v16532_v5  ;;  %v4451_v0 = vsub.f32 %v16576_v21, %v21971_v23  ;;  %v23018_v19 = vand.u32 4294901760, %v16569_v42  ;;  %v4445_v11 = vand.u32 4294901760, %v4444_v26 }
 0x1c9   :  { %11817 = vmatpush3.msra.mxu1 %v4312_v55  ;;  %11791 = vmatprep.subr.mxu0 %v16554_v50  ;;  %v4326_v10 = vand.u32 4294901760, %v4325_v56  ;;  %v4458_v55 = vsub.f32 %v16592_v58, %v21973_v49  ;;  %v11409_v38 = vpop.f32.mrf.mxu1  ;;  %v4346_v56 = vsub.f32 %v16583_v32, %v21972_v2  ;;  %v23035_v2 = vld [vmem:[#allocation32_spill] sm:$0xff] }
 0x1ca   :  { %11818 = vmatprep.subr.mxu1 %v4431_v62  ;;  %v4339_v24 = vsub.f32 %v16569_v42, %v23018_v19  ;;  %11792 = vmatpush3.msra.mxu0 %v16546_v34  ;;  %v4333_v23 = vand.u32 4294901760, %v4332_v59  ;;  %v11410_v62 = vadd.f32 %v11409_v38, %v11408_v31  ;;  %v4452_v19 = vand.u32 4294901760, %v4451_v0  ;;  %v23021_v59 = vld [vmem:[#allocation9_spill] sm:$0xff]  ;;  %v23023_v0 = vld [vmem:[#allocation15_spill] sm:$0xff]  ;;  %v23024_v31 = vld [vmem:[#allocation26_spill] sm:$0xff] }
 0x1cb   :  { %4226 = vmatprep.mubr.f32.mxu0 %v4225_v46  ;;  %11819 = vmatpush3.msra.mxu1 %v4319_v7  ;;  %v4459_v7 = vand.u32 4294901760, %v4458_v55  ;;  %v23028_v55 = vld [vmem:[#allocation36_spill] sm:$0xff]  ;;  %v23029_v38 = vld [vmem:[#allocation17_spill] sm:$0xff] }
 0x1cc   :  { %4232 = vmatmul.mubr.f32.vlgmr.msra.gmra.mxu0 %v4231_v53  ;;  %11820 = vmatprep.subr.mxu1 %v4438_v12  ;;  %v4340_v46 = vand.u32 4294901760, %v4339_v24  ;;  %v2742_v26 = vadd.f32 %v11410_v62, %v2510_v43  ;;  %v4347_v53 = vand.u32 4294901760, %v4346_v56  ;;  %v23019_v43 = vld [vmem:[#allocation10_spill] sm:$0xff]  ;;  %v23026_v24 = vld [vmem:[#allocation5_spill] sm:$0xff]  ;;  %v23030_v56 = vld [vmem:[#allocation31_spill] sm:$0xff] }
 0x1cd   :  { %11831 = vmatprep.subr.mxu0 %v16085_v63  ;;  %11821 = vmatpush3.msra.mxu1 %v4326_v10  ;;  %v23022_v12 = vld [vmem:[#allocation14_spill] sm:$0xff]  ;;  %v23025_v10 = vld [vmem:[#allocation13_spill] sm:$0xff]  ;;  %v23031_v62 = vld [vmem:[#allocation20_spill] sm:$0xff] }
 0x1ce   :  { %11832 = vmatpush3.msra.mxu0 %v16074_v22  ;;  %11822 = vmatprep.subr.mxu1 %v4445_v11  ;;  %v23027_v11 = vld [vmem:[#allocation28_spill] sm:$0xff] }
 0x1cf   :  { %11833 = vmatprep.subr.mxu0 %v16091_v51  ;;  %11823 = vmatpush3.msra.mxu1 %v4333_v23  ;;  %v23020_v23 = vld [vmem:[#allocation6_spill] sm:$0xff] }
 0x1d0   :  { %11834 = vmatpush3.msra.mxu0 %v16097_v15  ;;  %11824 = vmatprep.subr.mxu1 %v4452_v19  ;;  %v23032_v19 = vld [vmem:[#allocation12_spill] sm:$0xff] }
 0x1d1   :  { %11835 = vmatprep.subr.mxu0 %v16118_v60  ;;  %11825 = vmatpush3.msra.mxu1 %v4340_v46  ;;  %v23033_v46 = vld [vmem:[#allocation19_spill] sm:$0xff] }
 0x1d2   :  { %11836 = vmatpush3.msra.mxu0 %v16137_v8  ;;  %11826 = vmatprep.subr.mxu1 %v4459_v7 }
 0x1d3   :  { %11837 = vmatprep.subr.mxu0 %v16148_v54  ;;  %11827 = vmatpush3.msra.mxu1 %v4347_v53  ;;  %v23034_v53 = vld [vmem:[#allocation33_spill] sm:$0xff] }
 0x1d4   :  { %11838 = vmatpush3.msra.mxu0 %v16171_v36  ;;  %4464 = vmatmul.mubr.f32.vlgmr.msra.gmra.mxu1 %v16465_v45  ;;  %v23036_v45 = vld [vmem:[#allocation18_spill] sm:$0xff] }
 0x1d5   :  { %11839 = vmatprep.subr.mxu0 %v16199_v6  ;;  %11866 = vmatprep.subr.mxu1 %v16050_v16 }
 0x1d6   :  { %11840 = vmatpush3.msra.mxu0 %v16205_v48  ;;  %11867 = vmatpush3.msra.mxu1 %v16052_v14 }
 0x1d7   :  { %11841 = vmatprep.subr.mxu0 %v16238_v25  ;;  %11868 = vmatprep.subr.mxu1 %v23019_v43 }
 0x1d8   :  { %11842 = vmatpush3.msra.mxu0 %v23020_v23  ;;  %11869 = vmatpush3.msra.mxu1 %v23021_v59 }
 0x1d9   :  { %11843 = vmatprep.subr.mxu0 %v16306_v18  ;;  %11870 = vmatprep.subr.mxu1 %v23022_v12 }
 0x1da   :  { %11844 = vmatpush3.msra.mxu0 %v16297_v3  ;;  %11871 = vmatpush3.msra.mxu1 %v23023_v0 }
 0x1db   :  { %11845 = vmatprep.subr.mxu0 %v16337_v28  ;;  %11872 = vmatprep.subr.mxu1 %v23024_v31 }
 0x1dc   :  { %11846 = vmatpush3.msra.mxu0 %v23025_v10  ;;  %11873 = vmatpush3.msra.mxu1 %v23026_v24 }
 0x1dd   :  { %11847 = vmatprep.subr.mxu0 %v16355_v35  ;;  %11874 = vmatprep.subr.mxu1 %v23027_v11 }
 0x1de   :  { %11848 = vmatpush3.msra.mxu0 %v23028_v55  ;;  %11875 = vmatpush3.msra.mxu1 %v23029_v38 }
 0x1df   :  { %11849 = vmatprep.subr.mxu0 %v16427_v61  ;;  %11876 = vmatprep.subr.mxu1 %v23030_v56  ;;  %v11443_v7 = vpop.f32.mrf.mxu0 }
 0x1e0   :  { %11850 = vmatpush3.msra.mxu0 %v23031_v62  ;;  %11877 = vmatpush3.msra.mxu1 %v23032_v19 }
 0x1e1   :  { %11851 = vmatprep.subr.mxu0 %v16463_v44  ;;  %11878 = vmatprep.subr.mxu1 %v23033_v46  ;;  %v11444_v49 = vpop.f32.mrf.mxu0  ;;  %v23037_v44 = vld [vmem:[#allocation7_spill] sm:$0xff]  ;;  %v23038_v46 = vld [vmem:[#allocation30_spill] sm:$0xff] }
 0x1e2   :  { %11852 = vmatpush3.msra.mxu0 %v16421_v37  ;;  %11879 = vmatpush3.msra.mxu1 %v23034_v53  ;;  %v11445_v29 = vadd.f32 %v11444_v49, %v11443_v7  ;;  %v23040_v49 = vld [vmem:[#allocation21_spill] sm:$0xff] }
 0x1e3   :  { %11853 = vmatprep.subr.mxu0 %v16496_v13  ;;  %11880 = vmatprep.subr.mxu1 %v23035_v2  ;;  %v23039_v2 = vld [vmem:[#allocation22_spill] sm:$0xff]  ;;  %v23041_v7 = vld [vmem:[#allocation37_spill] sm:$0xff] }
 0x1e4   :  { %11854 = vmatpush3.msra.mxu0 %v16473_v33  ;;  %11881 = vmatpush3.msra.mxu1 %v23036_v45  ;;  %v2880_v37 = vadd.f32 %v11445_v29, %v2742_v26  ;;  %v23042_v26 = vld [vmem:[#allocation8_spill] sm:$0xff] }
 0x1e5   :  { %11855 = vmatprep.subr.mxu0 %v16536_v39  ;;  %11882 = vmatprep.subr.mxu1 %v23037_v44 }
 0x1e6   :  { %11856 = vmatpush3.msra.mxu0 %v16476_v9  ;;  %11883 = vmatpush3.msra.mxu1 %v23038_v46 }
 0x1e7   :  { %11857 = vmatprep.subr.mxu0 %v16558_v1  ;;  %11884 = vmatprep.subr.mxu1 %v16360_v27 }
 0x1e8   :  { %11858 = vmatpush3.msra.mxu0 %v16552_v4  ;;  %11885 = vmatpush3.msra.mxu1 %v23039_v2  ;;  %v11478_v9 = vpop.f32.mrf.mxu1 }
 0x1e9   :  { %11859 = vmatprep.subr.mxu0 %v16576_v21  ;;  %11886 = vmatprep.subr.mxu1 %v23040_v49 }
 0x1ea   :  { %11860 = vmatpush3.msra.mxu0 %v16569_v42  ;;  %11887 = vmatpush3.msra.mxu1 %v23041_v7  ;;  %v11479_v29 = vpop.f32.mrf.mxu1  ;;  %v23043_v42 = vand.u32 4294901760, %v16085_v63  ;;  %v23047_v63 = vand.u32 4294901760, %v16118_v60  ;;  %v23052_v60 = vand.u32 4294901760, %v16525_v41 }
 0x1eb   :  { %11861 = vmatprep.subr.mxu0 %v16592_v58  ;;  %11888 = vmatprep.subr.mxu1 %v16423_v47  ;;  %v11480_v21 = vadd.f32 %v11479_v29, %v11478_v9  ;;  %v23044_v58 = vand.u32 4294901760, %v16074_v22  ;;  %v23046_v9 = vand.u32 4294901760, %v16097_v15  ;;  %v23048_v22 = vand.u32 4294901760, %v16137_v8  ;;  %v208_v29 = vld [vmem:[%s21623_s1 + $0x560] sm:$0xff] }
 0x1ec   :  { %11862 = vmatpush3.msra.mxu0 %v16583_v32  ;;  %4599 = vmatprep.mubr.f32.mxu0 %v16509_v17  ;;  %v23045_v32 = vand.u32 4294901760, %v16091_v51  ;;  %v23049_v51 = vand.u32 4294901760, %v16148_v54  ;;  %v23050_v15 = vand.u32 4294901760, %v16509_v17  ;;  %v23054_v8 = vand.u32 4294901760, %v16205_v48  ;;  %v227_v54 = vld [vmem:[%s21623_s1 + $0x5f8] sm:$0xff] }
 0x1ed   :  { %11889 = vmatpush3.msra.mxu1 %v23042_v26  ;;  %4602 = vmatmul.mubr.f32.vlgmr.msra.gmra.mxu0 %v16525_v41  ;;  %v16704_v47 = vadd.f32 %v11480_v21, %v2880_v37  ;;  %v23051_v21 = vand.u32 4294901760, %v16171_v36  ;;  %v23053_v37 = vand.u32 4294901760, %v16199_v6  ;;  %v211_v36 = vld [vmem:[%s21623_s1 + $0x578] sm:$0xff]  ;;  %v23055_v17 = vand.u32 4294901760, %v16238_v25 }
 0x1ee   :  { %11890 = vmatprep.subr.mxu1 %v16442_v40  ;;  %11901 = vmatprep.subr.mxu0 %v23043_v42  ;;  %v23056_v6 = vand.u32 4294901760, %v23020_v23  ;;  %v23057_v48 = vand.u32 4294901760, %v16306_v18  ;;  %v16755_v25 = vand.u32 4294901760, %v227_v54  ;;  %v16757_v41 = vand.u32 4294901760, %v211_v36 }
 0x1ef   :  { %11891 = vmatpush3.msra.mxu1 %v16415_v20  ;;  %11902 = vmatpush3.msra.mxu0 %v23044_v58  ;;  %v23058_v42 = vand.u32 4294901760, %v16297_v3  ;;  %v225_v58 = vld [vmem:[%s21623_s1 + $0x5e8] sm:$0xff]  ;;  %v23060_v18 = vand.u32 4294901760, %v16337_v28  ;;  %v23062_v23 = vand.u32 4294901760, %v23025_v10  ;;  %v23063_v3 = vand.u32 4294901760, %v16355_v35 }
 0x1f0   :  { %11892 = vmatprep.subr.mxu1 %v16486_v30  ;;  %11903 = vmatprep.subr.mxu0 %v23045_v32  ;;  %v209_v28 = vld [vmem:[%s21623_s1 + $0x568] sm:$0xff]  ;;  %v23065_v35 = vand.u32 4294901760, %v23028_v55  ;;  %v23067_v55 = vand.u32 4294901760, %v23031_v62 }
 0x1f1   :  { %11893 = vmatpush3.msra.mxu1 %v16503_v57  ;;  %11904 = vmatpush3.msra.mxu0 %v23046_v9 }
 0x1f2   :  { %11894 = vmatprep.subr.mxu1 %v16530_v52  ;;  %11905 = vmatprep.subr.mxu0 %v23047_v63 }
 0x1f3   :  { %11895 = vmatpush3.msra.mxu1 %v16532_v5  ;;  %11906 = vmatpush3.msra.mxu0 %v23048_v22 }
 0x1f4   :  { %11896 = vmatprep.subr.mxu1 %v16554_v50  ;;  %11907 = vmatprep.subr.mxu0 %v23049_v51  ;;  %v223_v51 = vld [vmem:[%s21623_s1 + $0x5d8] sm:$0xff] }
 0x1f5   :  { %11897 = vmatpush3.msra.mxu1 %v16546_v34  ;;  %4706 = vmatprep.mubr.f32.mxu1 %v23050_v15 }
 0x1f6   :  { %11908 = vmatpush3.msra.mxu0 %v23051_v21  ;;  %4710 = vmatmul.mubr.f32.vlgmr.msra.gmra.mxu1 %v23052_v60  ;;  %v23073_v21 = vld [vmem:[#allocation29_spill] sm:$0xff] }
 0x1f7   :  { %11909 = vmatprep.subr.mxu0 %v23053_v37  ;;  %11936 = vmatprep.subr.mxu1 %v16050_v16  ;;  %v226_v16 = vld [vmem:[%s21623_s1 + $0x5f0] sm:$0xff]  ;;  %v23074_v60 = vand.u32 4294901760, %v23073_v21  ;;  %v16828_v37 = vand.u32 4294901760, %v208_v29 }
 0x1f8   :  { %11910 = vmatpush3.msra.mxu0 %v23054_v8  ;;  %11937 = vmatpush3.msra.mxu1 %v16052_v14  ;;  %v210_v14 = vld [vmem:[%s21623_s1 + $0x570] sm:$0xff]  ;;  %v16762_v32 = vand.u32 4294901760, %v226_v16  ;;  %v207_v8 = vld [vmem:[%s21623_s1 + $0x558] sm:$0xff] }
 0x1f9   :  { %11911 = vmatprep.subr.mxu0 %v23055_v17  ;;  %11938 = vmatprep.subr.mxu1 %v23019_v43  ;;  %v16770_v43 = vand.u32 4294901760, %v210_v14  ;;  %23075 = vst [vmem:[#allocation26_spill] sm:$0xff] %v16828_v37  ;;  %v23077_v17 = vld [vmem:[#allocation32_spill] sm:$0xff] }
 0x1fa   :  { %11912 = vmatpush3.msra.mxu0 %v23056_v6  ;;  %11939 = vmatpush3.msra.mxu1 %v23021_v59  ;;  %23059 = vst [vmem:[#allocation10_spill] sm:$0xff] %v16762_v32  ;;  %v16779_v59 = vsub.f32 %v211_v36, %v16757_v41  ;;  %v16796_v10 = vsub.f32 %v226_v16, %v16762_v32  ;;  %v23076_v36 = vand.u32 4294901760, %v16496_v13  ;;  %v222_v13 = vld [vmem:[%s21623_s1 + $0x5d0] sm:$0xff] }
 0x1fb   :  { %11913 = vmatprep.subr.mxu0 %v23057_v48  ;;  %11940 = vmatprep.subr.mxu1 %v23022_v12  ;;  %23061 = vst [vmem:[#allocation6_spill] sm:$0xff] %v16770_v43  ;;  %v16781_v12 = vand.u32 4294901760, %v225_v58 }
 0x1fc   :  { %11914 = vmatpush3.msra.mxu0 %v23058_v42  ;;  %11941 = vmatpush3.msra.mxu1 %v23023_v0  ;;  %v224_v0 = vld [vmem:[%s21623_s1 + $0x5e0] sm:$0xff]  ;;  %v21990_v62 = vand.u32 4294901760, %v16779_v59  ;;  %v16844_v42 = vand.u32 4294901760, %v223_v51 }
 0x1fd   :  { %11915 = vmatprep.subr.mxu0 %v23060_v18  ;;  %11942 = vmatprep.subr.mxu1 %v23024_v31  ;;  %23064 = vst [vmem:[#allocation9_spill] sm:$0xff] %v16781_v12  ;;  %v16790_v31 = vsub.f32 %v227_v54, %v16755_v25  ;;  %v16812_v9 = vand.u32 4294901760, %v224_v0  ;;  %v21988_v54 = vand.u32 4294901760, %v16796_v10  ;;  %v23080_v18 = vand.u32 4294901760, %v16536_v39 }
 0x1fe   :  { %11916 = vmatpush3.msra.mxu0 %v23062_v23  ;;  %11943 = vmatpush3.msra.mxu1 %v23026_v24  ;;  %v23066_v24 = vand.u32 4294901760, %v16427_v61  ;;  %v23070_v61 = vld [vmem:[#allocation23_spill] sm:$0xff]  ;;  %23079 = vst [vmem:[#allocation13_spill] sm:$0xff] %v16844_v42  ;;  %v16865_v23 = vsub.f32 %v16779_v59, %v21990_v62 }
 0x1ff   :  { %11917 = vmatprep.subr.mxu0 %v23063_v3  ;;  %11944 = vmatprep.subr.mxu1 %v23027_v11  ;;  %v16802_v11 = vsub.f32 %v210_v14, %v16770_v43  ;;  %23069 = vst [vmem:[#allocation15_spill] sm:$0xff] %v16812_v9  ;;  %v23071_v63 = vand.u32 4294901760, %v23070_v61  ;;  %v21992_v15 = vand.u32 4294901760, %v16790_v31  ;;  %v23078_v14 = vand.u32 4294901760, %v16473_v33  ;;  %v206_v3 = vld [vmem:[%s21623_s1 + $0x550] sm:$0xff] }
 0x200   :  { %11918 = vmatpush3.msra.mxu0 %v23065_v35  ;;  %11945 = vmatpush3.msra.mxu1 %v23029_v38  ;;  %v16810_v38 = vand.u32 4294901760, %v209_v28  ;;  %v16860_v33 = vand.u32 4294901760, %v207_v8  ;;  %v16876_v35 = vsub.f32 %v208_v29, %v16828_v37  ;;  %v16886_v61 = vand.u32 4294901760, %v222_v13 }
 0x201   :  { %11919 = vmatprep.subr.mxu0 %v23066_v24  ;;  %11946 = vmatprep.subr.mxu1 %v23030_v56  ;;  %v23072_v56 = vld [vmem:[#allocation19_spill] sm:$0xff]  ;;  %v11513_v22 = vpop.f32.mrf.mxu0  ;;  %v21987_v6 = vand.u32 4294901760, %v16802_v11  ;;  %v16881_v24 = vsub.f32 %v16796_v10, %v21988_v54  ;;  %v16896_v29 = vand.u32 4294901760, %v206_v3 }
 0x202   :  { %11920 = vmatpush3.msra.mxu0 %v23067_v55  ;;  %11947 = vmatpush3.msra.mxu1 %v23032_v19  ;;  %23068 = vst [vmem:[#allocation14_spill] sm:$0xff] %v16810_v38  ;;  %v16823_v19 = vsub.f32 %v225_v58, %v16781_v12  ;;  %v16842_v48 = vsub.f32 %v209_v28, %v16810_v38  ;;  %23081 = vst [vmem:[#allocation5_spill] sm:$0xff] %v16860_v33  ;;  %v23082_v28 = vld [vmem:[#allocation39_spill] sm:$0xff]  ;;  %v23084_v55 = vand.u32 4294901760, %v16558_v1  ;;  %v221_v1 = vld [vmem:[%s21623_s1 + $0x5c8] sm:$0xff] }
 0x203   :  { %11921 = vmatprep.subr.mxu0 %v23071_v63  ;;  %11948 = vmatprep.subr.mxu1 %v23072_v56  ;;  %v11514_v16 = vpop.f32.mrf.mxu0  ;;  %v16850_v58 = vsub.f32 %v224_v0, %v16812_v9  ;;  %23085 = vst [vmem:[#allocation28_spill] sm:$0xff] %v16886_v61  ;;  %23087 = vst [vmem:[#allocation36_spill] sm:$0xff] %v16896_v29 }
 0x204   :  { %11922 = vmatpush3.msra.mxu0 %v23074_v60  ;;  %11949 = vmatpush3.msra.mxu1 %v23034_v53  ;;  %v11515_v53 = vadd.f32 %v11514_v16, %v11513_v22  ;;  %v21986_v39 = vand.u32 4294901760, %v16823_v19  ;;  %v21989_v63 = vand.u32 4294901760, %v16842_v48  ;;  %v16907_v22 = vsub.f32 %v223_v51, %v16844_v42  ;;  %v23108_v16 = vld [vmem:[#allocation27_spill] sm:$0xff] }
 0x205   :  { %11923 = vmatprep.subr.mxu0 %v23076_v36  ;;  %11950 = vmatprep.subr.mxu1 %v23077_v17  ;;  %v21991_v56 = vand.u32 4294901760, %v16850_v58  ;;  %v23090_v36 = vld [vmem:[#allocation16_spill] sm:$0xff] }
 0x206   :  { %11924 = vmatpush3.msra.mxu0 %v23078_v14  ;;  %11951 = vmatpush3.msra.mxu1 %v23036_v45  ;;  %v16858_v45 = vsub.f32 %v16790_v31, %v21992_v15  ;;  %v3156_v0 = vadd.f32 %v11515_v53, %v16704_v47  ;;  %v23086_v47 = vand.u32 4294901760, %v16552_v4  ;;  %v23088_v4 = vld [vmem:[#allocation25_spill] sm:$0xff]  ;;  %v16918_v60 = vsub.f32 %v16823_v19, %v21986_v39 }
 0x207   :  { %11925 = vmatprep.subr.mxu0 %v23080_v18  ;;  %11952 = vmatprep.subr.mxu1 %v23037_v44  ;;  %v23083_v44 = vand.u32 4294901760, %v23082_v28  ;;  %v23089_v21 = vand.u32 4294901760, %v23088_v4  ;;  %v23091_v17 = vand.u32 4294901760, %v23090_v36  ;;  %v21993_v53 = vand.u32 4294901760, %v16876_v35  ;;  %v23092_v18 = vld [vmem:[#allocation38_spill] sm:$0xff]  ;;  %v220_v4 = vld [vmem:[%s21623_s1 + $0x5c0] sm:$0xff] }
 0x208   :  { %11953 = vmatpush3.msra.mxu1 %v23038_v46  ;;  %v16891_v46 = vsub.f32 %v16802_v11, %v21987_v6  ;;  %v23093_v28 = vand.u32 4294901760, %v23092_v18  ;;  %v23097_v36 = vld [vmem:[#allocation35_spill] sm:$0xff]  ;;  %v16953_v39 = vsub.f32 %v16842_v48, %v21989_v63  ;;  %v16958_v6 = vsub.f32 %v16850_v58, %v21991_v56 }
 0x209   :  { %11926 = vmatpush3.msra.mxu0 %v23083_v44  ;;  %11954 = vmatprep.subr.mxu1 %v16360_v27  ;;  %v205_v27 = vld [vmem:[%s21623_s1 + $0x548] sm:$0xff]  ;;  %v23094_v44 = vld [vmem:[#allocation24_spill] sm:$0xff]  ;;  %v23099_v18 = vld [vmem:[#allocation11_spill] sm:$0xff]  ;;  %v16972_v56 = vand.u32 4294901760, %v220_v4  ;;  %v16977_v15 = vsub.f32 %v16876_v35, %v21993_v53 }
 0x20a   :  { %11927 = vmatprep.subr.mxu0 %v23084_v55  ;;  %11955 = vmatpush3.msra.mxu1 %v23039_v2  ;;  %v16913_v2 = vsub.f32 %v207_v8, %v16860_v33  ;;  %v11548_v51 = vpop.f32.mrf.mxu1  ;;  %v204_v8 = vld [vmem:[%s21623_s1 + $0x540] sm:$0xff]  ;;  %v16934_v55 = vand.u32 4294901760, %v221_v1 }
 0x20b   :  { %11928 = vmatpush3.msra.mxu0 %v23086_v47  ;;  %11956 = vmatprep.subr.mxu1 %v23040_v49  ;;  %v16936_v47 = vand.u32 4294901760, %v205_v27  ;;  %v16967_v63 = vand.u32 4294901760, %v204_v8  ;;  %23102 = vst [vmem:[#allocation12_spill] sm:$0xff] %v16972_v56  ;;  %v202_v49 = vld [vmem:[%s21623_s1 + $0x530] sm:$0xff] }
 0x20c   :  { %11929 = vmatprep.subr.mxu0 %v23089_v21  ;;  %11957 = vmatpush3.msra.mxu1 %v23041_v7  ;;  %23095 = vst [vmem:[#allocation17_spill] sm:$0xff] %v16934_v55  ;;  %v16942_v21 = vsub.f32 %v222_v13, %v16886_v61  ;;  %v219_v13 = vld [vmem:[%s21623_s1 + $0x5b8] sm:$0xff]  ;;  %v21995_v62 = vand.u32 4294901760, %v16913_v2 }
 0x20d   :  { %11930 = vmatpush3.msra.mxu0 %v23091_v17  ;;  %11958 = vmatprep.subr.mxu1 %v23094_v44  ;;  %23096 = vst [vmem:[#allocation31_spill] sm:$0xff] %v16936_v47  ;;  %v23098_v17 = vand.u32 4294901760, %v23097_v36  ;;  %v16948_v44 = vsub.f32 %v206_v3, %v16896_v29  ;;  %v21994_v36 = vand.u32 4294901760, %v16907_v22  ;;  %v23100_v3 = vld [vmem:[#allocation34_spill] sm:$0xff]  ;;  %23101 = vst [vmem:[#allocation20_spill] sm:$0xff] %v16967_v63  ;;  %v16995_v54 = vand.u32 4294901760, %v219_v13 }
 0x20e   :  { %11931 = vmatprep.subr.mxu0 %v23093_v28  ;;  %4876 = vmatprep.mubr.f32.mxu0 %v23099_v18  ;;  %v11549_v28 = vpop.f32.mrf.mxu1  ;;  %v16993_v53 = vsub.f32 %v205_v27, %v16936_v47  ;;  %v17017_v14 = vsub.f32 %v204_v8, %v16967_v63  ;;  %v17036_v8 = vld [vmem:[%s21623_s1 + $0x5a8] sm:$0xff] }
 0x20f   :  { %11932 = vmatpush3.msra.mxu0 %v23098_v17  ;;  %11959 = vmatpush3.msra.mxu1 %v23042_v26  ;;  %v11550_v17 = vadd.f32 %v11549_v28, %v11548_v51  ;;  %v203_v26 = vld [vmem:[%s21623_s1 + $0x538] sm:$0xff]  ;;  %v13252_v51 = vld [vmem:[%s21622_s0 + $0x14] ss:$48 sps:$4 sm:$0xff]   ;;  %23104 = vst [vmem:[#allocation18_spill] sm:$0xff] %v16995_v54 }
 0x210   :  { %4878 = vmatmul.mubr.f32.vlgmr.msra.gmra.mxu0 %v23100_v3  ;;  %11960 = vmatprep.subr.mxu1 %v16442_v40  ;;  %v13253_v40 = vld [vmem:[%s21622_s0 + $0x74] ss:$48 sps:$4 sm:$0xff]   ;;  %23103 = vst [vmem:[#allocation33_spill] sm:$0xff] %v16993_v53  ;;  %23105 = vst [vmem:[#allocation7_spill] sm:$0xff] %v17017_v14  ;;  %v524_v27 = vrot.slane %v13252_v51, %v23108_v16 }
 0x211   :  { %11971 = vmatprep.subr.mxu0 %v16755_v25  ;;  %11961 = vmatpush3.msra.mxu1 %v16415_v20  ;;  %v16990_v28 = vadd.f32 %v11550_v17, %v3156_v0  ;;  %v17007_v0 = vsub.f32 %v16907_v22, %v21994_v36  ;;  %v17011_v17 = vsub.f32 %v221_v1, %v16934_v55  ;;  %v17019_v20 = vand.u32 4294901760, %v203_v26  ;;  %v218_v1 = vld [vmem:[%s21623_s1 + $0x5b0] sm:$0xff] }
 0x212   :  { %11972 = vmatpush3.msra.mxu0 %v16757_v41  ;;  %11962 = vmatprep.subr.mxu1 %v16486_v30  ;;  %v17024_v36 = vsub.f32 %v16913_v2, %v21995_v62  ;;  %v201_v62 = vld [vmem:[%s21623_s1 + $0x528] sm:$0xff]  ;;  %v17042_v30 = vsub.f32 %v220_v4, %v16972_v56  ;;  %v17056_v4 = vsub.f32 %v219_v13, %v16995_v54  ;;  %v17061_v51 = vand.u32 4294901760, %v218_v1 }
 0x213   :  { %11973 = vmatprep.subr.mxu0 %v16762_v32  ;;  %11963 = vmatpush3.msra.mxu1 %v16503_v57  ;;  %23106 = vst [vmem:[#allocation30_spill] sm:$0xff] %v17019_v20  ;;  %v17031_v57 = vand.u32 4294901760, %v202_v49  ;;  %v17072_v13 = vsub.f32 %v203_v26, %v17019_v20  ;;  %v17078_v32 = vand.u32 4294901760, %v201_v62  ;;  %v216_v26 = vld [vmem:[%s21623_s1 + $0x5a0] sm:$0xff] }
 0x214   :  { %11974 = vmatpush3.msra.mxu0 %v16770_v43  ;;  %11964 = vmatprep.subr.mxu1 %v16530_v52  ;;  %v538_v52 = vrot.slane %v13253_v40, %v23108_v16  ;;  %v23110_v40 = vand.u32 4294901760, %v16948_v44 }
 0x215   :  { %11975 = vmatprep.subr.mxu0 %v16781_v12  ;;  %23107 = vst [vmem:[#allocation22_spill] sm:$0xff] %v17031_v57  ;;  %11965 = vmatpush3.msra.mxu1 %v16532_v5  ;;  %v23109_v12 = vand.u32 4294901760, %v16942_v21  ;;  %23111 = vst [vmem:[#allocation21_spill] sm:$0xff] %v17072_v13  ;;  %v17076_v5 = vand.u32 4294901760, %v17036_v8 }
 0x216   :  { %11976 = vmatpush3.msra.mxu0 %v16810_v38  ;;  %11966 = vmatprep.subr.mxu1 %v16554_v50  ;;  %v17066_v7 = vsub.f32 %v16948_v44, %v23110_v40  ;;  %23113 = vst [vmem:[#allocation8_spill] sm:$0xff] %v17078_v32  ;;  %v200_v40 = vld [vmem:[%s21623_s1 + $0x520] sm:$0xff]  ;;  %v542_v16 = vcombine.high %v524_v27, %v538_v52  ;;  %v215_v38 = vld [vmem:[%s21623_s1 + $0x598] sm:$0xff]  ;;  %v23124_v50 = vand.u32 4294901760, %v17042_v30 }
 0x217   :  { %v17052_v43 = vsub.f32 %v16942_v21, %v23109_v12  ;;  %11977 = vmatprep.subr.mxu0 %v16812_v9  ;;  %11967 = vmatpush3.msra.mxu1 %v16546_v34  ;;  %23112 = vst [vmem:[#allocation37_spill] sm:$0xff] %v17076_v5  ;;  %v199_v34 = vld [vmem:[%s21623_s1 + $0x518] sm:$0xff]  ;;  %v23115_v9 = vand.u32 4294901760, %v16858_v45  ;;  %v541_v12 = vcombine.low %v524_v27, %v538_v52  ;;  %v23118_v45 = vand.u32 4294901760, %v17011_v17 }
 0x218   :  { %4980 = vmatprep.mubr.f32.mxu1 %v23099_v18  ;;  %11978 = vmatpush3.msra.mxu0 %v16828_v37  ;;  %v17089_v18 = vsub.f32 %v202_v49, %v17031_v57  ;;  %v23120_v27 = vand.u32 4294901760, %v16881_v24  ;;  %v17126_v52 = vsub.f32 %v201_v62, %v17078_v32  ;;  %v17140_v24 = vsub.f32 %v17042_v30, %v23124_v50 }
 0x219   :  { %4982 = vmatmul.mubr.f32.vlgmr.msra.gmra.mxu1 %v23100_v3  ;;  %11979 = vmatprep.subr.mxu0 %v16844_v42  ;;  %v23116_v3 = vand.u32 4294901760, %v16993_v53  ;;  %v23117_v42 = vand.u32 4294901760, %v16865_v23  ;;  %v17116_v37 = vsub.f32 %v17011_v17, %v23118_v45  ;;  %v23123_v45 = vand.u32 4294901760, %v16891_v46 }
 0x21a   :  { %23114 = vst [vmem:[#allocation23_spill] sm:$0xff] %v17089_v18  ;;  %12006 = vmatprep.subr.mxu1 %v23115_v9  ;;  %11980 = vmatpush3.msra.mxu0 %v16860_v33  ;;  %23121 = vst [vmem:[#allocation29_spill] sm:$0xff] %v17126_v52  ;;  %v17132_v9 = vsub.f32 %v218_v1, %v17061_v51  ;;  %v23125_v62 = vand.u32 4294901760, %v17017_v14  ;;  %v214_v1 = vld [vmem:[%s21623_s1 + $0x590] sm:$0xff]  ;;  %v17152_v23 = vand.u32 4294901760, %v542_v16  ;;  %v23127_v46 = vand.u32 4294901760, %v16918_v60 }
 0x21b   :  { %v17103_v49 = vsub.f32 %v16993_v53, %v23116_v3  ;;  %12007 = vmatpush3.msra.mxu1 %v23117_v42  ;;  %v17118_v3 = vand.u32 4294901760, %v200_v40  ;;  %v17120_v53 = vand.u32 4294901760, %v199_v34  ;;  %11981 = vmatprep.subr.mxu0 %v16886_v61  ;;  %v17128_v42 = vand.u32 4294901760, %v216_v26 }
 0x21c   :  { %12008 = vmatprep.subr.mxu1 %v23120_v27  ;;  %11982 = vmatpush3.msra.mxu0 %v16896_v29  ;;  %v17145_v27 = vsub.f32 %v17017_v14, %v23125_v62  ;;  %v17147_v61 = vand.u32 4294901760, %v215_v38  ;;  %23126 = vst [vmem:[#allocation39_spill] sm:$0xff] %v17152_v23  ;;  %v198_v29 = vld [vmem:[%s21623_s1 + $0x510] sm:$0xff]  ;;  %v17168_v33 = vsub.f32 %v17036_v8, %v17076_v5  ;;  %v17170_v14 = vand.u32 4294901760, %v541_v12  ;;  %v197_v8 = vld [vmem:[%s21623_s1 + $0x508] sm:$0xff] }
 0x21d   :  { %23119 = vst [vmem:[#allocation19_spill] sm:$0xff] %v17118_v3  ;;  %23122 = vst [vmem:[#allocation32_spill] sm:$0xff] %v17128_v42  ;;  %12009 = vmatpush3.msra.mxu1 %v23123_v45  ;;  %11983 = vmatprep.subr.mxu0 %v16934_v55  ;;  %v5146_v50 = vand.u32 4294901760, %v17103_v49  ;;  %v23128_v45 = vand.u32 4294901760, %v17056_v4  ;;  %v23131_v60 = vand.u32 4294901760, %v16953_v39  ;;  %v5258_v49 = vand.u32 4294901760, %v17116_v37 }
 0x21e   :  { %12010 = vmatprep.subr.mxu1 %v23127_v46  ;;  %23129 = vst [vmem:[#allocation25_spill] sm:$0xff] %v17168_v33  ;;  %23130 = vst [vmem:[#allocation16_spill] sm:$0xff] %v17170_v14  ;;  %11984 = vmatpush3.msra.mxu0 %v16936_v47  ;;  %v17177_v46 = vsub.f32 %v200_v40, %v17118_v3  ;;  %v23133_v47 = vand.u32 4294901760, %v16958_v6  ;;  %v23134_v39 = vand.u32 4294901760, %v17072_v13  ;;  %v17194_v40 = vand.u32 4294901760, %v214_v1 }
 0x21f   :  { %v17161_v62 = vsub.f32 %v17056_v4, %v23128_v45  ;;  %12011 = vmatpush3.msra.mxu1 %v23131_v60  ;;  %v17180_v45 = vsub.f32 %v199_v34, %v17120_v53  ;;  %11985 = vmatprep.subr.mxu0 %v16972_v56  ;;  %v213_v60 = vld [vmem:[%s21623_s1 + $0x588] sm:$0xff]  ;;  %v17201_v55 = vsub.f32 %v216_v26, %v17128_v42  ;;  %v23135_v6 = vand.u32 4294901760, %v16977_v15  ;;  %v196_v34 = vld [vmem:[%s21623_s1 + $0x500] sm:$0xff] }
 0x220   :  { %12012 = vmatprep.subr.mxu1 %v23133_v47  ;;  %v17192_v37 = vsub.f32 %v17072_v13, %v23134_v39  ;;  %11986 = vmatpush3.msra.mxu0 %v16967_v63  ;;  %v5265_v47 = vand.u32 4294901760, %v17140_v24  ;;  %v5153_v39 = vand.u32 4294901760, %v17145_v27  ;;  %v17208_v56 = vand.u32 4294901760, %v198_v29  ;;  %v212_v27 = vld [vmem:[%s21623_s1 + $0x580] sm:$0xff] }
 0x221   :  { %23132 = vst [vmem:[#allocation38_spill] sm:$0xff] %v17180_v45  ;;  %12013 = vmatpush3.msra.mxu1 %v23135_v6  ;;  %v17214_v13 = vsub.f32 %v542_v16, %v17152_v23  ;;  %11987 = vmatprep.subr.mxu0 %v16995_v54  ;;  %v23136_v26 = vand.u32 4294901760, %v17007_v0  ;;  %v5272_v15 = vand.u32 4294901760, %v17161_v62  ;;  %v17221_v6 = vand.u32 4294901760, %v197_v8 }
 0x222   :  { %v17227_v63 = vsub.f32 %v541_v12, %v17170_v14  ;;  %11988 = vmatpush3.msra.mxu0 %v17019_v20  ;;  %v23137_v16 = vand.u32 4294901760, %v17024_v36  ;;  %v23138_v0 = vand.u32 4294901760, %v17089_v18  ;;  %v17239_v54 = vsub.f32 %v215_v38, %v17147_v61  ;;  %5324 = vmatprep.mubr.f32.mxu1 %v17152_v23 }
 0x223   :  { %12014 = vmatprep.subr.mxu1 %v23136_v26  ;;  %v17235_v26 = vand.u32 4294901760, %v213_v60  ;;  %11989 = vmatprep.subr.mxu0 %v17061_v51  ;;  %v23139_v12 = vand.u32 4294901760, %v17052_v43  ;;  %v5160_v20 = vand.u32 4294901760, %v17192_v37  ;;  %v23140_v36 = vand.u32 4294901760, %v17132_v9 }
 0x224   :  { %12015 = vmatpush3.msra.mxu1 %v23137_v16  ;;  %v5166_v62 = vsub.f32 %v17089_v18, %v23138_v0  ;;  %v17249_v18 = vand.u32 4294901760, %v196_v34  ;;  %11990 = vmatpush3.msra.mxu0 %v17031_v57  ;;  %v23141_v38 = vand.u32 4294901760, %v17066_v7  ;;  %v17255_v24 = vsub.f32 %v198_v29, %v17208_v56 }
 0x225   :  { %12016 = vmatprep.subr.mxu1 %v23139_v12  ;;  %v5278_v16 = vsub.f32 %v17132_v9, %v23140_v36  ;;  %v17257_v43 = vand.u32 4294901760, %v212_v27  ;;  %v17261_v12 = vsub.f32 %v214_v1, %v17194_v40  ;;  %11991 = vmatprep.subr.mxu0 %v17076_v5  ;;  %v23142_v36 = vand.u32 4294901760, %v17168_v33 }
 0x226   :  { %12017 = vmatpush3.msra.mxu1 %v23141_v38  ;;  %v17268_v7 = vsub.f32 %v197_v8, %v17221_v6  ;;  %v11583_v38 = vpop.f32.mrf.mxu0  ;;  %11992 = vmatpush3.msra.mxu0 %v17078_v32  ;;  %v5167_v1 = vand.u32 4294901760, %v5166_v62  ;;  %v23144_v37 = vand.u32 4294901760, %v17126_v52  ;;  %v23146_v29 = vand.u32 4294901760, %v17201_v55 }
 0x227   :  { %12018 = vmatprep.subr.mxu1 %v5258_v49  ;;  %v5285_v0 = vsub.f32 %v17168_v33, %v23142_v36  ;;  %v17278_v36 = vsub.f32 %v213_v60, %v17235_v26  ;;  %11993 = vmatprep.subr.mxu0 %v17128_v42  ;;  %v5279_v8 = vand.u32 4294901760, %v5278_v16  ;;  %v23148_v60 = vand.u32 4294901760, %v17214_v13 }
 0x228   :  { %23143 = vst [vmem:[#allocation24_spill] sm:$0xff] %v17268_v7  ;;  %12019 = vmatpush3.msra.mxu1 %v5146_v50  ;;  %v5173_v49 = vsub.f32 %v17126_v52, %v23144_v37  ;;  %v5292_v57 = vsub.f32 %v17201_v55, %v23146_v29  ;;  %v17285_v50 = vsub.f32 %v196_v34, %v17249_v18  ;;  %v11584_v32 = vpop.f32.mrf.mxu0  ;;  %v23150_v29 = vand.u32 4294901760, %v17177_v46 }
 0x229   :  { %23145 = vst [vmem:[#allocation35_spill] sm:$0xff] %v17278_v36  ;;  %12020 = vmatprep.subr.mxu1 %v5265_v47  ;;  %11994 = vmatpush3.msra.mxu0 %v17118_v3  ;;  %v5086_v37 = vsub.f32 %v17214_v13, %v23148_v60  ;;  %v11585_v5 = vadd.f32 %v11584_v32, %v11583_v38  ;;  %v5286_v34 = vand.u32 4294901760, %v5285_v0  ;;  %v22045_v0 = vand.u32 4294901760, %v17278_v36 }
 0x22a   :  { %23147 = vst [vmem:[#allocation11_spill] sm:$0xff] %v17285_v50  ;;  %12021 = vmatpush3.msra.mxu1 %v5153_v39  ;;  %v17294_v16 = vsub.f32 %v212_v27, %v17257_v43  ;;  %11995 = vmatprep.subr.mxu0 %v17147_v61  ;;  %v5180_v62 = vsub.f32 %v17177_v46, %v23150_v29  ;;  %v23151_v39 = vand.u32 4294901760, %v17227_v63  ;;  %v5174_v32 = vand.u32 4294901760, %v5173_v49 }
 0x22b   :  { %12022 = vmatprep.subr.mxu1 %v5272_v15  ;;  %11996 = vmatpush3.msra.mxu0 %v17120_v53  ;;  %v23152_v27 = vand.u32 4294901760, %v17239_v54  ;;  %v3372_v15 = vadd.f32 %v11585_v5, %v16990_v28  ;;  %v5293_v29 = vand.u32 4294901760, %v5292_v57  ;;  %v23154_v49 = vand.u32 4294901760, %v17261_v12 }
 0x22c   :  { %23149 = vst [vmem:[#allocation34_spill] sm:$0xff] %v17294_v16  ;;  %v5092_v3 = vsub.f32 %v17227_v63, %v23151_v39  ;;  %12023 = vmatpush3.msra.mxu1 %v5160_v20  ;;  %11997 = vmatprep.subr.mxu0 %v17194_v40  ;;  %v23153_v39 = vand.u32 4294901760, %v17180_v45  ;;  %v5087_v20 = vand.u32 4294901760, %v5086_v37  ;;  %v22047_v5 = vand.u32 4294901760, %v17294_v16 }
 0x22d   :  { %v5299_v38 = vsub.f32 %v17239_v54, %v23152_v27  ;;  %12024 = vmatprep.subr.mxu1 %v5279_v8  ;;  %11998 = vmatpush3.msra.mxu0 %v17208_v56  ;;  %v5306_v28 = vsub.f32 %v17261_v12, %v23154_v49  ;;  %v5181_v57 = vand.u32 4294901760, %v5180_v62  ;;  %v23155_v27 = vand.u32 4294901760, %v17255_v24  ;;  %v11618_v49 = vpop.f32.mrf.mxu1 }
 0x22e   :  { %v5187_v60 = vsub.f32 %v17180_v45, %v23153_v39  ;;  %12025 = vmatpush3.msra.mxu1 %v5167_v1  ;;  %11999 = vmatprep.subr.mxu0 %v17235_v26  ;;  %v5093_v8 = vand.u32 4294901760, %v5092_v3  ;;  %v22046_v47 = vand.u32 4294901760, %v17285_v50  ;;  %v5313_v37 = vsub.f32 %v17278_v36, %v22045_v0 }
 0x22f   :  { %12026 = vmatprep.subr.mxu1 %v5286_v34  ;;  %v5194_v39 = vsub.f32 %v17255_v24, %v23155_v27  ;;  %12000 = vmatpush3.msra.mxu0 %v17221_v6  ;;  %v5300_v1 = vand.u32 4294901760, %v5299_v38  ;;  %v23156_v3 = vand.u32 4294901760, %v17268_v7  ;;  %v5307_v27 = vand.u32 4294901760, %v5306_v28  ;;  %v11619_v38 = vpop.f32.mrf.mxu1 }
 0x230   :  { %12027 = vmatpush3.msra.mxu1 %v5174_v32  ;;  %12001 = vmatprep.subr.mxu0 %v17257_v43  ;;  %v5188_v62 = vand.u32 4294901760, %v5187_v60  ;;  %v5320_v32 = vsub.f32 %v17294_v16, %v22047_v5  ;;  %v5208_v60 = vsub.f32 %v17285_v50, %v22046_v47  ;;  %v23173_v47 = vld [vmem:[#allocation12_spill] sm:$0xff] }
 0x231   :  { %12028 = vmatprep.subr.mxu1 %v5293_v29  ;;  %v5201_v34 = vsub.f32 %v17268_v7, %v23156_v3  ;;  %12002 = vmatpush3.msra.mxu0 %v17249_v18  ;;  %v5195_v0 = vand.u32 4294901760, %v5194_v39  ;;  %v11620_v29 = vadd.f32 %v11619_v38, %v11618_v49  ;;  %v5314_v3 = vand.u32 4294901760, %v5313_v37  ;;  %v23159_v39 = vld [vmem:[#allocation9_spill] sm:$0xff]  ;;  %v23161_v37 = vld [vmem:[#allocation14_spill] sm:$0xff]  ;;  %v23162_v49 = vld [vmem:[#allocation15_spill] sm:$0xff] }
 0x232   :  { %5088 = vmatprep.mubr.f32.mxu0 %v5087_v20  ;;  %12029 = vmatpush3.msra.mxu1 %v5181_v57  ;;  %v5321_v57 = vand.u32 4294901760, %v5320_v32  ;;  %v23166_v32 = vld [vmem:[#allocation21_spill] sm:$0xff] }
 0x233   :  { %5094 = vmatmul.mubr.f32.vlgmr.msra.gmra.mxu0 %v5093_v8  ;;  %12030 = vmatprep.subr.mxu1 %v5300_v1  ;;  %v5202_v20 = vand.u32 4294901760, %v5201_v34  ;;  %v3604_v28 = vadd.f32 %v11620_v29, %v3372_v15  ;;  %v5209_v8 = vand.u32 4294901760, %v5208_v60  ;;  %v23157_v15 = vld [vmem:[#allocation10_spill] sm:$0xff]  ;;  %v23160_v1 = vld [vmem:[#allocation33_spill] sm:$0xff]  ;;  %v23168_v60 = vld [vmem:[#allocation28_spill] sm:$0xff] }
 0x234   :  { %12041 = vmatprep.subr.mxu0 %v16790_v31  ;;  %12031 = vmatpush3.msra.mxu1 %v5188_v62  ;;  %v23163_v62 = vld [vmem:[#allocation7_spill] sm:$0xff]  ;;  %v23164_v34 = vld [vmem:[#allocation26_spill] sm:$0xff]  ;;  %v23167_v38 = vld [vmem:[#allocation5_spill] sm:$0xff] }
 0x235   :  { %12042 = vmatpush3.msra.mxu0 %v16779_v59  ;;  %12032 = vmatprep.subr.mxu1 %v5307_v27  ;;  %v23165_v27 = vld [vmem:[#allocation13_spill] sm:$0xff]  ;;  %v23169_v29 = vld [vmem:[#allocation23_spill] sm:$0xff] }
 0x236   :  { %12043 = vmatprep.subr.mxu0 %v16796_v10  ;;  %12033 = vmatpush3.msra.mxu1 %v5195_v0  ;;  %v23158_v0 = vld [vmem:[#allocation6_spill] sm:$0xff] }
 0x237   :  { %12044 = vmatpush3.msra.mxu0 %v16802_v11  ;;  %12034 = vmatprep.subr.mxu1 %v5314_v3  ;;  %v23170_v3 = vld [vmem:[#allocation36_spill] sm:$0xff] }
 0x238   :  { %12045 = vmatprep.subr.mxu0 %v16823_v19  ;;  %12035 = vmatpush3.msra.mxu1 %v5202_v20  ;;  %v23171_v20 = vld [vmem:[#allocation17_spill] sm:$0xff] }
 0x239   :  { %12046 = vmatpush3.msra.mxu0 %v16842_v48  ;;  %12036 = vmatprep.subr.mxu1 %v5321_v57 }
 0x23a   :  { %12047 = vmatprep.subr.mxu0 %v16850_v58  ;;  %12037 = vmatpush3.msra.mxu1 %v5209_v8  ;;  %v23172_v8 = vld [vmem:[#allocation31_spill] sm:$0xff] }
 0x23b   :  { %12048 = vmatpush3.msra.mxu0 %v16876_v35  ;;  %5326 = vmatmul.mubr.f32.vlgmr.msra.gmra.mxu1 %v17170_v14  ;;  %v23174_v14 = vld [vmem:[#allocation20_spill] sm:$0xff] }
 0x23c   :  { %12049 = vmatprep.subr.mxu0 %v16907_v22  ;;  %12076 = vmatprep.subr.mxu1 %v16755_v25 }
 0x23d   :  { %12050 = vmatpush3.msra.mxu0 %v16913_v2  ;;  %12077 = vmatpush3.msra.mxu1 %v16757_v41 }
 0x23e   :  { %12051 = vmatprep.subr.mxu0 %v16942_v21  ;;  %12078 = vmatprep.subr.mxu1 %v23157_v15 }
 0x23f   :  { %12052 = vmatpush3.msra.mxu0 %v16948_v44  ;;  %12079 = vmatpush3.msra.mxu1 %v23158_v0 }
 0x240   :  { %12053 = vmatprep.subr.mxu0 %v17011_v17  ;;  %12080 = vmatprep.subr.mxu1 %v23159_v39 }
 0x241   :  { %12054 = vmatpush3.msra.mxu0 %v23160_v1  ;;  %12081 = vmatpush3.msra.mxu1 %v23161_v37 }
 0x242   :  { %12055 = vmatprep.subr.mxu0 %v17042_v30  ;;  %12082 = vmatprep.subr.mxu1 %v23162_v49 }
 0x243   :  { %12056 = vmatpush3.msra.mxu0 %v23163_v62  ;;  %12083 = vmatpush3.msra.mxu1 %v23164_v34 }
 0x244   :  { %12057 = vmatprep.subr.mxu0 %v17056_v4  ;;  %12084 = vmatprep.subr.mxu1 %v23165_v27 }
 0x245   :  { %12058 = vmatpush3.msra.mxu0 %v23166_v32  ;;  %12085 = vmatpush3.msra.mxu1 %v23167_v38 }
 0x246   :  { %12059 = vmatprep.subr.mxu0 %v17132_v9  ;;  %12086 = vmatprep.subr.mxu1 %v23168_v60  ;;  %v11653_v57 = vpop.f32.mrf.mxu0 }
 0x247   :  { %12060 = vmatpush3.msra.mxu0 %v23169_v29  ;;  %12087 = vmatpush3.msra.mxu1 %v23170_v3 }
 0x248   :  { %12061 = vmatprep.subr.mxu0 %v17168_v33  ;;  %12088 = vmatprep.subr.mxu1 %v23171_v20  ;;  %v11654_v5 = vpop.f32.mrf.mxu0  ;;  %v23175_v33 = vld [vmem:[#allocation18_spill] sm:$0xff] }
 0x249   :  { %12062 = vmatpush3.msra.mxu0 %v17126_v52  ;;  %12089 = vmatpush3.msra.mxu1 %v23172_v8  ;;  %v11655_v23 = vadd.f32 %v11654_v5, %v11653_v57  ;;  %v23176_v20 = vld [vmem:[#allocation30_spill] sm:$0xff]  ;;  %v23178_v5 = vld [vmem:[#allocation37_spill] sm:$0xff]  ;;  %v23179_v57 = vld [vmem:[#allocation8_spill] sm:$0xff] }
 0x24a   :  { %12063 = vmatprep.subr.mxu0 %v17201_v55  ;;  %12090 = vmatprep.subr.mxu1 %v23173_v47  ;;  %v23177_v47 = vld [vmem:[#allocation22_spill] sm:$0xff] }
 0x24b   :  { %12064 = vmatpush3.msra.mxu0 %v17177_v46  ;;  %12091 = vmatpush3.msra.mxu1 %v23174_v14  ;;  %v3742_v52 = vadd.f32 %v11655_v23, %v3604_v28  ;;  %v23180_v28 = vld [vmem:[#allocation19_spill] sm:$0xff] }
 0x24c   :  { %12065 = vmatprep.subr.mxu0 %v17239_v54  ;;  %12092 = vmatprep.subr.mxu1 %v23175_v33 }
 0x24d   :  { %12066 = vmatpush3.msra.mxu0 %v17180_v45  ;;  %12093 = vmatpush3.msra.mxu1 %v23176_v20 }
 0x24e   :  { %12067 = vmatprep.subr.mxu0 %v17261_v12  ;;  %12094 = vmatprep.subr.mxu1 %v17061_v51 }
 0x24f   :  { %12068 = vmatpush3.msra.mxu0 %v17255_v24  ;;  %12095 = vmatpush3.msra.mxu1 %v23177_v47  ;;  %v11688_v45 = vpop.f32.mrf.mxu1 }
 0x250   :  { %12069 = vmatprep.subr.mxu0 %v17278_v36  ;;  %12096 = vmatprep.subr.mxu1 %v23178_v5 }
 0x251   :  { %12070 = vmatpush3.msra.mxu0 %v17268_v7  ;;  %12097 = vmatpush3.msra.mxu1 %v23179_v57  ;;  %v11689_v23 = vpop.f32.mrf.mxu1  ;;  %v23181_v7 = vand.u32 4294901760, %v16790_v31  ;;  %v23185_v31 = vand.u32 4294901760, %v16823_v19  ;;  %v23190_v19 = vand.u32 4294901760, %v17227_v63 }
 0x252   :  { %12071 = vmatprep.subr.mxu0 %v17294_v16  ;;  %12098 = vmatprep.subr.mxu1 %v17128_v42  ;;  %v11690_v36 = vadd.f32 %v11689_v23, %v11688_v45  ;;  %v23182_v16 = vand.u32 4294901760, %v16779_v59  ;;  %v23184_v45 = vand.u32 4294901760, %v16802_v11  ;;  %v23186_v59 = vand.u32 4294901760, %v16842_v48  ;;  %v240_v23 = vld [vmem:[%s21623_s1 + $0x660] sm:$0xff] }
 0x253   :  { %12072 = vmatpush3.msra.mxu0 %v17285_v50  ;;  %5461 = vmatprep.mubr.f32.mxu0 %v17214_v13  ;;  %v23183_v50 = vand.u32 4294901760, %v16796_v10  ;;  %v23187_v10 = vand.u32 4294901760, %v16850_v58  ;;  %v23188_v11 = vand.u32 4294901760, %v17214_v13  ;;  %v23192_v48 = vand.u32 4294901760, %v16913_v2  ;;  %v259_v58 = vld [vmem:[%s21623_s1 + $0x6f8] sm:$0xff] }
 0x254   :  { %12099 = vmatpush3.msra.mxu1 %v23180_v28  ;;  %5464 = vmatmul.mubr.f32.vlgmr.msra.gmra.mxu0 %v17227_v63  ;;  %v17406_v42 = vadd.f32 %v11690_v36, %v3742_v52  ;;  %v23189_v52 = vand.u32 4294901760, %v16876_v35  ;;  %v243_v35 = vld [vmem:[%s21623_s1 + $0x678] sm:$0xff]  ;;  %v23193_v63 = vand.u32 4294901760, %v16942_v21  ;;  %v23195_v2 = vand.u32 4294901760, %v17011_v17 }
 0x255   :  { %12100 = vmatprep.subr.mxu1 %v17147_v61  ;;  %12111 = vmatprep.subr.mxu0 %v23181_v7  ;;  %v23191_v7 = vand.u32 4294901760, %v16907_v22  ;;  %v23194_v22 = vand.u32 4294901760, %v16948_v44  ;;  %v17457_v21 = vand.u32 4294901760, %v259_v58  ;;  %v17459_v13 = vand.u32 4294901760, %v243_v35 }
 0x256   :  { %12101 = vmatpush3.msra.mxu1 %v17120_v53  ;;  %12112 = vmatpush3.msra.mxu0 %v23182_v16  ;;  %v23196_v36 = vand.u32 4294901760, %v23160_v1  ;;  %v23198_v17 = vand.u32 4294901760, %v17042_v30  ;;  %v241_v30 = vld [vmem:[%s21623_s1 + $0x668] sm:$0xff] }
 0x257   :  { %12102 = vmatprep.subr.mxu1 %v17194_v40  ;;  %12113 = vmatprep.subr.mxu0 %v23183_v50  ;;  %v257_v50 = vld [vmem:[%s21623_s1 + $0x6e8] sm:$0xff] }
 0x258   :  { %12103 = vmatpush3.msra.mxu1 %v17208_v56  ;;  %12114 = vmatpush3.msra.mxu0 %v23184_v45  ;;  %v17483_v1 = vand.u32 4294901760, %v257_v50 }
 0x259   :  { %12104 = vmatprep.subr.mxu1 %v17235_v26  ;;  %12115 = vmatprep.subr.mxu0 %v23185_v31 }
 0x25a   :  { %12105 = vmatpush3.msra.mxu1 %v17221_v6  ;;  %12116 = vmatpush3.msra.mxu0 %v23186_v59  ;;  %23202 = vst [vmem:[#allocation9_spill] sm:$0xff] %v17483_v1 }
 0x25b   :  { %12106 = vmatprep.subr.mxu1 %v17257_v43  ;;  %12117 = vmatprep.subr.mxu0 %v23187_v10  ;;  %v255_v10 = vld [vmem:[%s21623_s1 + $0x6d8] sm:$0xff] }
 0x25c   :  { %12107 = vmatpush3.msra.mxu1 %v17249_v18  ;;  %5568 = vmatprep.mubr.f32.mxu1 %v23188_v11 }
 0x25d   :  { %12118 = vmatpush3.msra.mxu0 %v23189_v52  ;;  %5572 = vmatmul.mubr.f32.vlgmr.msra.gmra.mxu1 %v23190_v19  ;;  %v23211_v52 = vld [vmem:[#allocation29_spill] sm:$0xff] }
 0x25e   :  { %12119 = vmatprep.subr.mxu0 %v23191_v7  ;;  %12146 = vmatprep.subr.mxu1 %v16755_v25  ;;  %v258_v25 = vld [vmem:[%s21623_s1 + $0x6f0] sm:$0xff]  ;;  %v23212_v19 = vand.u32 4294901760, %v23211_v52  ;;  %v17530_v7 = vand.u32 4294901760, %v240_v23 }
 0x25f   :  { %12120 = vmatpush3.msra.mxu0 %v23192_v48  ;;  %12147 = vmatpush3.msra.mxu1 %v16757_v41  ;;  %v242_v41 = vld [vmem:[%s21623_s1 + $0x670] sm:$0xff]  ;;  %v17464_v44 = vand.u32 4294901760, %v258_v25  ;;  %v239_v48 = vld [vmem:[%s21623_s1 + $0x658] sm:$0xff] }
 0x260   :  { %12121 = vmatprep.subr.mxu0 %v23193_v63  ;;  %12148 = vmatprep.subr.mxu1 %v23157_v15  ;;  %v17472_v16 = vand.u32 4294901760, %v242_v41  ;;  %v23200_v15 = vand.u32 4294901760, %v23163_v62  ;;  %23213 = vst [vmem:[#allocation15_spill] sm:$0xff] %v17530_v7  ;;  %v23215_v63 = vld [vmem:[#allocation12_spill] sm:$0xff] }
 0x261   :  { %12122 = vmatpush3.msra.mxu0 %v23194_v22  ;;  %12149 = vmatpush3.msra.mxu1 %v23158_v0  ;;  %23197 = vst [vmem:[#allocation10_spill] sm:$0xff] %v17464_v44  ;;  %v23201_v0 = vand.u32 4294901760, %v17056_v4  ;;  %v23203_v4 = vand.u32 4294901760, %v23166_v32  ;;  %v17498_v62 = vsub.f32 %v258_v25, %v17464_v44  ;;  %v23205_v32 = vand.u32 4294901760, %v23169_v29 }
 0x262   :  { %12123 = vmatprep.subr.mxu0 %v23195_v2  ;;  %12150 = vmatprep.subr.mxu1 %v23159_v39  ;;  %23199 = vst [vmem:[#allocation6_spill] sm:$0xff] %v17472_v16  ;;  %v17481_v39 = vsub.f32 %v243_v35, %v17459_v13  ;;  %v23214_v35 = vand.u32 4294901760, %v17201_v55  ;;  %v254_v55 = vld [vmem:[%s21623_s1 + $0x6d0] sm:$0xff] }
 0x263   :  { %12124 = vmatpush3.msra.mxu0 %v23196_v36  ;;  %12151 = vmatpush3.msra.mxu1 %v23161_v37  ;;  %v256_v37 = vld [vmem:[%s21623_s1 + $0x6e0] sm:$0xff]  ;;  %v17546_v36 = vand.u32 4294901760, %v255_v10 }
 0x264   :  { %12125 = vmatprep.subr.mxu0 %v23198_v17  ;;  %12152 = vmatprep.subr.mxu1 %v23162_v49  ;;  %v17492_v49 = vsub.f32 %v259_v58, %v17457_v21  ;;  %v17514_v45 = vand.u32 4294901760, %v256_v37  ;;  %v22064_v29 = vand.u32 4294901760, %v17481_v39  ;;  %v22062_v58 = vand.u32 4294901760, %v17498_v62 }
 0x265   :  { %12126 = vmatpush3.msra.mxu0 %v23200_v15  ;;  %12153 = vmatpush3.msra.mxu1 %v23164_v34  ;;  %v23204_v34 = vand.u32 4294901760, %v17132_v9  ;;  %v23208_v9 = vld [vmem:[#allocation25_spill] sm:$0xff]  ;;  %23217 = vst [vmem:[#allocation7_spill] sm:$0xff] %v17546_v36  ;;  %v23218_v17 = vand.u32 4294901760, %v17239_v54 }
 0x266   :  { %12127 = vmatprep.subr.mxu0 %v23201_v0  ;;  %12154 = vmatprep.subr.mxu1 %v23165_v27  ;;  %v17504_v27 = vsub.f32 %v242_v41, %v17472_v16  ;;  %23207 = vst [vmem:[#allocation14_spill] sm:$0xff] %v17514_v45  ;;  %v23209_v31 = vand.u32 4294901760, %v23208_v9  ;;  %v22066_v11 = vand.u32 4294901760, %v17492_v49  ;;  %v23216_v41 = vand.u32 4294901760, %v17177_v46  ;;  %v238_v0 = vld [vmem:[%s21623_s1 + $0x650] sm:$0xff] }
 0x267   :  { %12128 = vmatpush3.msra.mxu0 %v23203_v4  ;;  %12155 = vmatpush3.msra.mxu1 %v23167_v38  ;;  %v17512_v38 = vand.u32 4294901760, %v241_v30  ;;  %v17562_v46 = vand.u32 4294901760, %v239_v48  ;;  %v17567_v15 = vsub.f32 %v17481_v39, %v22064_v29  ;;  %v17578_v4 = vsub.f32 %v240_v23, %v17530_v7 }
 0x268   :  { %12129 = vmatprep.subr.mxu0 %v23204_v34  ;;  %12156 = vmatprep.subr.mxu1 %v23168_v60  ;;  %v23210_v60 = vld [vmem:[#allocation17_spill] sm:$0xff]  ;;  %v11723_v59 = vpop.f32.mrf.mxu0  ;;  %v22061_v22 = vand.u32 4294901760, %v17504_v27  ;;  %v17583_v34 = vsub.f32 %v17498_v62, %v22062_v58  ;;  %v17588_v9 = vand.u32 4294901760, %v254_v55  ;;  %v17598_v23 = vand.u32 4294901760, %v238_v0 }
 0x269   :  { %12130 = vmatpush3.msra.mxu0 %v23205_v32  ;;  %12157 = vmatpush3.msra.mxu1 %v23170_v3  ;;  %23206 = vst [vmem:[#allocation33_spill] sm:$0xff] %v17512_v38  ;;  %v17525_v3 = vsub.f32 %v257_v50, %v17483_v1  ;;  %v17544_v2 = vsub.f32 %v241_v30, %v17512_v38  ;;  %23219 = vst [vmem:[#allocation26_spill] sm:$0xff] %v17562_v46  ;;  %v23220_v30 = vld [vmem:[#allocation38_spill] sm:$0xff]  ;;  %v23222_v32 = vand.u32 4294901760, %v17261_v12  ;;  %v253_v12 = vld [vmem:[%s21623_s1 + $0x6c8] sm:$0xff] }
 0x26a   :  { %12131 = vmatprep.subr.mxu0 %v23209_v31  ;;  %12158 = vmatprep.subr.mxu1 %v23210_v60  ;;  %v11724_v25 = vpop.f32.mrf.mxu0  ;;  %v17552_v50 = vsub.f32 %v256_v37, %v17514_v45  ;;  %23223 = vst [vmem:[#allocation13_spill] sm:$0xff] %v17588_v9  ;;  %23225 = vst [vmem:[#allocation21_spill] sm:$0xff] %v17598_v23 }
 0x26b   :  { %12132 = vmatpush3.msra.mxu0 %v23212_v19  ;;  %12159 = vmatpush3.msra.mxu1 %v23172_v8  ;;  %v11725_v8 = vadd.f32 %v11724_v25, %v11723_v59  ;;  %v22060_v54 = vand.u32 4294901760, %v17525_v3  ;;  %v22063_v31 = vand.u32 4294901760, %v17544_v2  ;;  %v17609_v59 = vsub.f32 %v255_v10, %v17546_v36  ;;  %v23246_v25 = vld [vmem:[#allocation27_spill] sm:$0xff] }
 0x26c   :  { %12133 = vmatprep.subr.mxu0 %v23214_v35  ;;  %12160 = vmatprep.subr.mxu1 %v23215_v63  ;;  %v22065_v60 = vand.u32 4294901760, %v17552_v50  ;;  %v23228_v35 = vld [vmem:[#allocation24_spill] sm:$0xff] }
 0x26d   :  { %12134 = vmatpush3.msra.mxu0 %v23216_v41  ;;  %12161 = vmatpush3.msra.mxu1 %v23174_v14  ;;  %v17560_v14 = vsub.f32 %v17492_v49, %v22066_v11  ;;  %v4018_v37 = vadd.f32 %v11725_v8, %v17406_v42  ;;  %v23224_v42 = vand.u32 4294901760, %v17255_v24  ;;  %v23226_v24 = vld [vmem:[#allocation35_spill] sm:$0xff]  ;;  %v17620_v19 = vsub.f32 %v17525_v3, %v22060_v54 }
 0x26e   :  { %12135 = vmatprep.subr.mxu0 %v23218_v17  ;;  %12162 = vmatprep.subr.mxu1 %v23175_v33  ;;  %v23221_v33 = vand.u32 4294901760, %v23220_v30  ;;  %v23227_v52 = vand.u32 4294901760, %v23226_v24  ;;  %v23229_v63 = vand.u32 4294901760, %v23228_v35  ;;  %v22067_v8 = vand.u32 4294901760, %v17578_v4  ;;  %v23230_v17 = vld [vmem:[#allocation34_spill] sm:$0xff]  ;;  %v252_v24 = vld [vmem:[%s21623_s1 + $0x6c0] sm:$0xff] }
 0x26f   :  { %12163 = vmatpush3.msra.mxu1 %v23176_v20  ;;  %v17593_v20 = vsub.f32 %v17504_v27, %v22061_v22  ;;  %v23231_v30 = vand.u32 4294901760, %v23230_v17  ;;  %v23235_v35 = vld [vmem:[#allocation11_spill] sm:$0xff]  ;;  %v17655_v54 = vsub.f32 %v17544_v2, %v22063_v31  ;;  %v17660_v22 = vsub.f32 %v17552_v50, %v22065_v60 }
 0x270   :  { %12136 = vmatpush3.msra.mxu0 %v23221_v33  ;;  %12164 = vmatprep.subr.mxu1 %v17061_v51  ;;  %v237_v51 = vld [vmem:[%s21623_s1 + $0x648] sm:$0xff]  ;;  %v23232_v33 = vld [vmem:[#allocation32_spill] sm:$0xff]  ;;  %v23237_v17 = vld [vmem:[#allocation39_spill] sm:$0xff]  ;;  %v17674_v60 = vand.u32 4294901760, %v252_v24  ;;  %v17679_v11 = vsub.f32 %v17578_v4, %v22067_v8 }
 0x271   :  { %12137 = vmatprep.subr.mxu0 %v23222_v32  ;;  %12165 = vmatpush3.msra.mxu1 %v23177_v47  ;;  %v17615_v47 = vsub.f32 %v239_v48, %v17562_v46  ;;  %v11758_v10 = vpop.f32.mrf.mxu1  ;;  %v236_v48 = vld [vmem:[%s21623_s1 + $0x640] sm:$0xff]  ;;  %v17636_v32 = vand.u32 4294901760, %v253_v12 }
 0x272   :  { %12138 = vmatpush3.msra.mxu0 %v23224_v42  ;;  %12166 = vmatprep.subr.mxu1 %v23178_v5  ;;  %v17638_v42 = vand.u32 4294901760, %v237_v51  ;;  %v17669_v31 = vand.u32 4294901760, %v236_v48  ;;  %23240 = vst [vmem:[#allocation36_spill] sm:$0xff] %v17674_v60  ;;  %v234_v5 = vld [vmem:[%s21623_s1 + $0x630] sm:$0xff] }
 0x273   :  { %12139 = vmatprep.subr.mxu0 %v23227_v52  ;;  %12167 = vmatpush3.msra.mxu1 %v23179_v57  ;;  %23233 = vst [vmem:[#allocation5_spill] sm:$0xff] %v17636_v32  ;;  %v17644_v52 = vsub.f32 %v254_v55, %v17588_v9  ;;  %v251_v55 = vld [vmem:[%s21623_s1 + $0x6b8] sm:$0xff]  ;;  %v22069_v29 = vand.u32 4294901760, %v17615_v47 }
 0x274   :  { %12140 = vmatpush3.msra.mxu0 %v23229_v63  ;;  %12168 = vmatprep.subr.mxu1 %v23232_v33  ;;  %23234 = vst [vmem:[#allocation28_spill] sm:$0xff] %v17638_v42  ;;  %v23236_v63 = vand.u32 4294901760, %v23235_v35  ;;  %v17650_v33 = vsub.f32 %v238_v0, %v17598_v23  ;;  %v22068_v35 = vand.u32 4294901760, %v17609_v59  ;;  %v23238_v0 = vld [vmem:[#allocation16_spill] sm:$0xff]  ;;  %23239 = vst [vmem:[#allocation23_spill] sm:$0xff] %v17669_v31  ;;  %v17697_v58 = vand.u32 4294901760, %v251_v55 }
 0x275   :  { %12141 = vmatprep.subr.mxu0 %v23231_v30  ;;  %5738 = vmatprep.mubr.f32.mxu0 %v23237_v17  ;;  %v11759_v30 = vpop.f32.mrf.mxu1  ;;  %v17695_v8 = vsub.f32 %v237_v51, %v17638_v42  ;;  %v17719_v41 = vsub.f32 %v236_v48, %v17669_v31  ;;  %v17738_v48 = vld [vmem:[%s21623_s1 + $0x6a8] sm:$0xff] }
 0x276   :  { %12142 = vmatpush3.msra.mxu0 %v23236_v63  ;;  %12169 = vmatpush3.msra.mxu1 %v23180_v28  ;;  %v11760_v63 = vadd.f32 %v11759_v30, %v11758_v10  ;;  %v235_v28 = vld [vmem:[%s21623_s1 + $0x638] sm:$0xff]  ;;  %23242 = vst [vmem:[#allocation20_spill] sm:$0xff] %v17697_v58 }
 0x277   :  { %5740 = vmatmul.mubr.f32.vlgmr.msra.gmra.mxu0 %v23238_v0  ;;  %12170 = vmatprep.subr.mxu1 %v17147_v61  ;;  %v13254_v10 = vld [vmem:[%s21622_s0 + $0x18] ss:$48 sps:$4 sm:$0xff]   ;;  %23241 = vst [vmem:[#allocation31_spill] sm:$0xff] %v17695_v8  ;;  %23243 = vst [vmem:[#allocation18_spill] sm:$0xff] %v17719_v41 }
 0x278   :  { %12181 = vmatprep.subr.mxu0 %v17457_v21  ;;  %v13256_v61 = vld [vmem:[%s21622_s0 + $0x78] ss:$48 sps:$4 sm:$0xff]   ;;  %12171 = vmatpush3.msra.mxu1 %v17120_v53  ;;  %v17692_v30 = vadd.f32 %v11760_v63, %v4018_v37  ;;  %v17709_v37 = vsub.f32 %v17609_v59, %v22068_v35  ;;  %v17713_v63 = vsub.f32 %v253_v12, %v17636_v32  ;;  %v17721_v53 = vand.u32 4294901760, %v235_v28  ;;  %v250_v12 = vld [vmem:[%s21623_s1 + $0x6b0] sm:$0xff] }
 0x279   :  { %12182 = vmatpush3.msra.mxu0 %v17459_v13  ;;  %12172 = vmatprep.subr.mxu1 %v17194_v40  ;;  %v17726_v35 = vsub.f32 %v17615_v47, %v22069_v29  ;;  %v233_v29 = vld [vmem:[%s21623_s1 + $0x628] sm:$0xff]  ;;  %v17744_v40 = vsub.f32 %v252_v24, %v17674_v60  ;;  %v553_v51 = vrot.slane %v13254_v10, %v23246_v25  ;;  %v17763_v10 = vand.u32 4294901760, %v250_v12 }
 0x27a   :  { %12183 = vmatprep.subr.mxu0 %v17464_v44  ;;  %12173 = vmatpush3.msra.mxu1 %v17208_v56  ;;  %23244 = vst [vmem:[#allocation30_spill] sm:$0xff] %v17721_v53  ;;  %v17733_v56 = vand.u32 4294901760, %v234_v5  ;;  %v17758_v24 = vsub.f32 %v251_v55, %v17697_v58  ;;  %v17774_v55 = vsub.f32 %v235_v28, %v17721_v53  ;;  %v17780_v44 = vand.u32 4294901760, %v233_v29  ;;  %v248_v28 = vld [vmem:[%s21623_s1 + $0x6a0] sm:$0xff] }
 0x27b   :  { %12184 = vmatpush3.msra.mxu0 %v17472_v16  ;;  %12174 = vmatprep.subr.mxu1 %v17235_v26  ;;  %v567_v26 = vrot.slane %v13256_v61, %v23246_v25  ;;  %v23248_v61 = vand.u32 4294901760, %v17650_v33 }
 0x27c   :  { %12185 = vmatprep.subr.mxu0 %v17483_v1  ;;  %23245 = vst [vmem:[#allocation22_spill] sm:$0xff] %v17733_v56  ;;  %12175 = vmatpush3.msra.mxu1 %v17221_v6  ;;  %v23247_v1 = vand.u32 4294901760, %v17644_v52  ;;  %23249 = vst [vmem:[#allocation37_spill] sm:$0xff] %v17774_v55  ;;  %v17778_v6 = vand.u32 4294901760, %v17738_v48 }
 0x27d   :  { %12186 = vmatpush3.msra.mxu0 %v17512_v38  ;;  %12176 = vmatprep.subr.mxu1 %v17257_v43  ;;  %v17768_v57 = vsub.f32 %v17650_v33, %v23248_v61  ;;  %23251 = vst [vmem:[#allocation19_spill] sm:$0xff] %v17780_v44  ;;  %v232_v61 = vld [vmem:[%s21623_s1 + $0x620] sm:$0xff]  ;;  %v576_v25 = vcombine.high %v553_v51, %v567_v26  ;;  %v247_v38 = vld [vmem:[%s21623_s1 + $0x698] sm:$0xff]  ;;  %v23262_v43 = vand.u32 4294901760, %v17744_v40 }
 0x27e   :  { %v17754_v16 = vsub.f32 %v17644_v52, %v23247_v1  ;;  %12187 = vmatprep.subr.mxu0 %v17514_v45  ;;  %12177 = vmatpush3.msra.mxu1 %v17249_v18  ;;  %23250 = vst [vmem:[#allocation8_spill] sm:$0xff] %v17778_v6  ;;  %v231_v18 = vld [vmem:[%s21623_s1 + $0x618] sm:$0xff]  ;;  %v23253_v45 = vand.u32 4294901760, %v17560_v14  ;;  %v575_v1 = vcombine.low %v553_v51, %v567_v26  ;;  %v23256_v14 = vand.u32 4294901760, %v17713_v63 }
 0x27f   :  { %5842 = vmatprep.mubr.f32.mxu1 %v23237_v17  ;;  %12188 = vmatpush3.msra.mxu0 %v17530_v7  ;;  %v17791_v17 = vsub.f32 %v234_v5, %v17733_v56  ;;  %v23258_v51 = vand.u32 4294901760, %v17583_v34  ;;  %v17828_v26 = vsub.f32 %v233_v29, %v17780_v44  ;;  %v17842_v34 = vsub.f32 %v17744_v40, %v23262_v43 }
 0x280   :  { %5844 = vmatmul.mubr.f32.vlgmr.msra.gmra.mxu1 %v23238_v0  ;;  %12189 = vmatprep.subr.mxu0 %v17546_v36  ;;  %v23254_v0 = vand.u32 4294901760, %v17695_v8  ;;  %v23255_v36 = vand.u32 4294901760, %v17567_v15  ;;  %v17818_v7 = vsub.f32 %v17713_v63, %v23256_v14  ;;  %v23261_v14 = vand.u32 4294901760, %v17593_v20 }
 0x281   :  { %23252 = vst [vmem:[#allocation25_spill] sm:$0xff] %v17791_v17  ;;  %12216 = vmatprep.subr.mxu1 %v23253_v45  ;;  %12190 = vmatpush3.msra.mxu0 %v17562_v46  ;;  %23259 = vst [vmem:[#allocation29_spill] sm:$0xff] %v17828_v26  ;;  %v17834_v45 = vsub.f32 %v250_v12, %v17763_v10  ;;  %v23263_v29 = vand.u32 4294901760, %v17719_v41  ;;  %v246_v12 = vld [vmem:[%s21623_s1 + $0x690] sm:$0xff]  ;;  %v17854_v15 = vand.u32 4294901760, %v576_v25  ;;  %v23265_v20 = vand.u32 4294901760, %v17620_v19 }
 0x282   :  { %v17805_v5 = vsub.f32 %v17695_v8, %v23254_v0  ;;  %12217 = vmatpush3.msra.mxu1 %v23255_v36  ;;  %v17820_v0 = vand.u32 4294901760, %v232_v61  ;;  %v17822_v8 = vand.u32 4294901760, %v231_v18  ;;  %12191 = vmatprep.subr.mxu0 %v17588_v9  ;;  %v17830_v36 = vand.u32 4294901760, %v248_v28 }
 0x283   :  { %12218 = vmatprep.subr.mxu1 %v23258_v51  ;;  %12192 = vmatpush3.msra.mxu0 %v17598_v23  ;;  %v17847_v51 = vsub.f32 %v17719_v41, %v23263_v29  ;;  %v17849_v9 = vand.u32 4294901760, %v247_v38  ;;  %23264 = vst [vmem:[#allocation38_spill] sm:$0xff] %v17854_v15  ;;  %v230_v23 = vld [vmem:[%s21623_s1 + $0x610] sm:$0xff]  ;;  %v17870_v46 = vsub.f32 %v17738_v48, %v17778_v6  ;;  %v17872_v41 = vand.u32 4294901760, %v575_v1  ;;  %v229_v48 = vld [vmem:[%s21623_s1 + $0x608] sm:$0xff] }
 0x284   :  { %23257 = vst [vmem:[#allocation17_spill] sm:$0xff] %v17820_v0  ;;  %23260 = vst [vmem:[#allocation12_spill] sm:$0xff] %v17830_v36  ;;  %12219 = vmatpush3.msra.mxu1 %v23261_v14  ;;  %12193 = vmatprep.subr.mxu0 %v17636_v32  ;;  %v6008_v43 = vand.u32 4294901760, %v17805_v5  ;;  %v23266_v14 = vand.u32 4294901760, %v17758_v24  ;;  %v23269_v19 = vand.u32 4294901760, %v17655_v54  ;;  %v6120_v5 = vand.u32 4294901760, %v17818_v7 }
 0x285   :  { %12220 = vmatprep.subr.mxu1 %v23265_v20  ;;  %23267 = vst [vmem:[#allocation35_spill] sm:$0xff] %v17870_v46  ;;  %23268 = vst [vmem:[#allocation24_spill] sm:$0xff] %v17872_v41  ;;  %12194 = vmatpush3.msra.mxu0 %v17638_v42  ;;  %v17879_v20 = vsub.f32 %v232_v61, %v17820_v0  ;;  %v23271_v42 = vand.u32 4294901760, %v17660_v22  ;;  %v23272_v54 = vand.u32 4294901760, %v17774_v55  ;;  %v17896_v61 = vand.u32 4294901760, %v246_v12 }
 0x286   :  { %v17863_v29 = vsub.f32 %v17758_v24, %v23266_v14  ;;  %12221 = vmatpush3.msra.mxu1 %v23269_v19  ;;  %v17882_v14 = vsub.f32 %v231_v18, %v17822_v8  ;;  %12195 = vmatprep.subr.mxu0 %v17674_v60  ;;  %v245_v19 = vld [vmem:[%s21623_s1 + $0x688] sm:$0xff]  ;;  %v17903_v32 = vsub.f32 %v248_v28, %v17830_v36  ;;  %v23273_v22 = vand.u32 4294901760, %v17679_v11  ;;  %v228_v18 = vld [vmem:[%s21623_s1 + $0x600] sm:$0xff] }
 0x287   :  { %12222 = vmatprep.subr.mxu1 %v23271_v42  ;;  %v17894_v7 = vsub.f32 %v17774_v55, %v23272_v54  ;;  %12196 = vmatpush3.msra.mxu0 %v17669_v31  ;;  %v6127_v42 = vand.u32 4294901760, %v17842_v34  ;;  %v6015_v54 = vand.u32 4294901760, %v17847_v51  ;;  %v17910_v60 = vand.u32 4294901760, %v230_v23  ;;  %v244_v51 = vld [vmem:[%s21623_s1 + $0x680] sm:$0xff] }
 0x288   :  { %23270 = vst [vmem:[#allocation34_spill] sm:$0xff] %v17882_v14  ;;  %12223 = vmatpush3.msra.mxu1 %v23273_v22  ;;  %v17916_v55 = vsub.f32 %v576_v25, %v17854_v15  ;;  %12197 = vmatprep.subr.mxu0 %v17697_v58  ;;  %v23274_v28 = vand.u32 4294901760, %v17709_v37  ;;  %v6134_v11 = vand.u32 4294901760, %v17863_v29  ;;  %v17923_v22 = vand.u32 4294901760, %v229_v48 }
 0x289   :  { %v17929_v31 = vsub.f32 %v575_v1, %v17872_v41  ;;  %12198 = vmatpush3.msra.mxu0 %v17721_v53  ;;  %v23275_v25 = vand.u32 4294901760, %v17726_v35  ;;  %v23276_v37 = vand.u32 4294901760, %v17791_v17  ;;  %v17941_v58 = vsub.f32 %v247_v38, %v17849_v9  ;;  %6186 = vmatprep.mubr.f32.mxu1 %v17854_v15 }
 0x28a   :  { %12224 = vmatprep.subr.mxu1 %v23274_v28  ;;  %v17937_v28 = vand.u32 4294901760, %v245_v19  ;;  %12199 = vmatprep.subr.mxu0 %v17763_v10  ;;  %v23277_v1 = vand.u32 4294901760, %v17754_v16  ;;  %v6022_v53 = vand.u32 4294901760, %v17894_v7  ;;  %v23278_v35 = vand.u32 4294901760, %v17834_v45 }
 0x28b   :  { %12225 = vmatpush3.msra.mxu1 %v23275_v25  ;;  %v6028_v29 = vsub.f32 %v17791_v17, %v23276_v37  ;;  %v17951_v17 = vand.u32 4294901760, %v228_v18  ;;  %12200 = vmatpush3.msra.mxu0 %v17733_v56  ;;  %v23279_v38 = vand.u32 4294901760, %v17768_v57  ;;  %v17957_v34 = vsub.f32 %v230_v23, %v17910_v60 }
 0x28c   :  { %12226 = vmatprep.subr.mxu1 %v23277_v1  ;;  %v6140_v25 = vsub.f32 %v17834_v45, %v23278_v35  ;;  %v17959_v16 = vand.u32 4294901760, %v244_v51  ;;  %v17963_v1 = vsub.f32 %v246_v12, %v17896_v61  ;;  %12201 = vmatprep.subr.mxu0 %v17778_v6  ;;  %v23280_v35 = vand.u32 4294901760, %v17870_v46 }
 0x28d   :  { %12227 = vmatpush3.msra.mxu1 %v23279_v38  ;;  %v17970_v57 = vsub.f32 %v229_v48, %v17923_v22  ;;  %v11793_v38 = vpop.f32.mrf.mxu0  ;;  %12202 = vmatpush3.msra.mxu0 %v17780_v44  ;;  %v6029_v12 = vand.u32 4294901760, %v6028_v29  ;;  %v23282_v7 = vand.u32 4294901760, %v17828_v26  ;;  %v23284_v23 = vand.u32 4294901760, %v17903_v32 }
 0x28e   :  { %12228 = vmatprep.subr.mxu1 %v6120_v5  ;;  %v6147_v37 = vsub.f32 %v17870_v46, %v23280_v35  ;;  %v17980_v35 = vsub.f32 %v245_v19, %v17937_v28  ;;  %12203 = vmatprep.subr.mxu0 %v17830_v36  ;;  %v6141_v48 = vand.u32 4294901760, %v6140_v25  ;;  %v23286_v19 = vand.u32 4294901760, %v17916_v55 }
 0x28f   :  { %23281 = vst [vmem:[#allocation32_spill] sm:$0xff] %v17970_v57  ;;  %12229 = vmatpush3.msra.mxu1 %v6008_v43  ;;  %v6035_v5 = vsub.f32 %v17828_v26, %v23282_v7  ;;  %v6154_v56 = vsub.f32 %v17903_v32, %v23284_v23  ;;  %v17987_v43 = vsub.f32 %v228_v18, %v17951_v17  ;;  %v11794_v44 = vpop.f32.mrf.mxu0  ;;  %v23288_v23 = vand.u32 4294901760, %v17879_v20 }
 0x290   :  { %23283 = vst [vmem:[#allocation11_spill] sm:$0xff] %v17980_v35  ;;  %12230 = vmatprep.subr.mxu1 %v6127_v42  ;;  %12204 = vmatpush3.msra.mxu0 %v17820_v0  ;;  %v5948_v7 = vsub.f32 %v17916_v55, %v23286_v19  ;;  %v11795_v6 = vadd.f32 %v11794_v44, %v11793_v38  ;;  %v6148_v18 = vand.u32 4294901760, %v6147_v37  ;;  %v22119_v37 = vand.u32 4294901760, %v17980_v35 }
 0x291   :  { %23285 = vst [vmem:[#allocation39_spill] sm:$0xff] %v17987_v43  ;;  %12231 = vmatpush3.msra.mxu1 %v6015_v54  ;;  %v17996_v25 = vsub.f32 %v244_v51, %v17959_v16  ;;  %12205 = vmatprep.subr.mxu0 %v17849_v9  ;;  %v6042_v29 = vsub.f32 %v17879_v20, %v23288_v23  ;;  %v23289_v54 = vand.u32 4294901760, %v17929_v31  ;;  %v6036_v44 = vand.u32 4294901760, %v6035_v5 }
 0x292   :  { %12232 = vmatprep.subr.mxu1 %v6134_v11  ;;  %12206 = vmatpush3.msra.mxu0 %v17822_v8  ;;  %v23290_v51 = vand.u32 4294901760, %v17941_v58  ;;  %v4234_v11 = vadd.f32 %v11795_v6, %v17692_v30  ;;  %v6155_v23 = vand.u32 4294901760, %v6154_v56  ;;  %v23292_v5 = vand.u32 4294901760, %v17963_v1 }
 0x293   :  { %23287 = vst [vmem:[#allocation16_spill] sm:$0xff] %v17996_v25  ;;  %v5954_v0 = vsub.f32 %v17929_v31, %v23289_v54  ;;  %12233 = vmatpush3.msra.mxu1 %v6022_v53  ;;  %12207 = vmatprep.subr.mxu0 %v17896_v61  ;;  %v23291_v54 = vand.u32 4294901760, %v17882_v14  ;;  %v5949_v53 = vand.u32 4294901760, %v5948_v7  ;;  %v22121_v6 = vand.u32 4294901760, %v17996_v25 }
 0x294   :  { %v6161_v38 = vsub.f32 %v17941_v58, %v23290_v51  ;;  %12234 = vmatprep.subr.mxu1 %v6141_v48  ;;  %12208 = vmatpush3.msra.mxu0 %v17910_v60  ;;  %v6168_v30 = vsub.f32 %v17963_v1, %v23292_v5  ;;  %v6043_v56 = vand.u32 4294901760, %v6042_v29  ;;  %v23293_v51 = vand.u32 4294901760, %v17957_v34  ;;  %v11828_v5 = vpop.f32.mrf.mxu1 }
 0x295   :  { %v6049_v19 = vsub.f32 %v17882_v14, %v23291_v54  ;;  %12235 = vmatpush3.msra.mxu1 %v6029_v12  ;;  %12209 = vmatprep.subr.mxu0 %v17937_v28  ;;  %v5955_v48 = vand.u32 4294901760, %v5954_v0  ;;  %v22120_v42 = vand.u32 4294901760, %v17987_v43  ;;  %v6175_v7 = vsub.f32 %v17980_v35, %v22119_v37 }
 0x296   :  { %12236 = vmatprep.subr.mxu1 %v6148_v18  ;;  %v6056_v54 = vsub.f32 %v17957_v34, %v23293_v51  ;;  %12210 = vmatpush3.msra.mxu0 %v17923_v22  ;;  %v6162_v12 = vand.u32 4294901760, %v6161_v38  ;;  %v23294_v0 = vand.u32 4294901760, %v17970_v57  ;;  %v6169_v51 = vand.u32 4294901760, %v6168_v30  ;;  %v11829_v38 = vpop.f32.mrf.mxu1 }
 0x297   :  { %12237 = vmatpush3.msra.mxu1 %v6036_v44  ;;  %12211 = vmatprep.subr.mxu0 %v17959_v16  ;;  %v6050_v29 = vand.u32 4294901760, %v6049_v19  ;;  %v6182_v44 = vsub.f32 %v17996_v25, %v22121_v6  ;;  %v6070_v19 = vsub.f32 %v17987_v43, %v22120_v42  ;;  %v23311_v42 = vld [vmem:[#allocation36_spill] sm:$0xff] }
 0x298   :  { %12238 = vmatprep.subr.mxu1 %v6155_v23  ;;  %v6063_v18 = vsub.f32 %v17970_v57, %v23294_v0  ;;  %12212 = vmatpush3.msra.mxu0 %v17951_v17  ;;  %v6057_v37 = vand.u32 4294901760, %v6056_v54  ;;  %v11830_v23 = vadd.f32 %v11829_v38, %v11828_v5  ;;  %v6176_v0 = vand.u32 4294901760, %v6175_v7  ;;  %v23297_v54 = vld [vmem:[#allocation9_spill] sm:$0xff]  ;;  %v23300_v5 = vld [vmem:[#allocation14_spill] sm:$0xff] }
 0x299   :  { %5950 = vmatprep.mubr.f32.mxu0 %v5949_v53  ;;  %12239 = vmatpush3.msra.mxu1 %v6043_v56  ;;  %v6183_v56 = vand.u32 4294901760, %v6182_v44  ;;  %v23299_v7 = vld [vmem:[#allocation33_spill] sm:$0xff]  ;;  %v23305_v38 = vld [vmem:[#allocation26_spill] sm:$0xff] }
 0x29a   :  { %5956 = vmatmul.mubr.f32.vlgmr.msra.gmra.mxu0 %v5955_v48  ;;  %12240 = vmatprep.subr.mxu1 %v6162_v12  ;;  %v6064_v53 = vand.u32 4294901760, %v6063_v18  ;;  %v4466_v30 = vadd.f32 %v11830_v23, %v4234_v11  ;;  %v6071_v48 = vand.u32 4294901760, %v6070_v19  ;;  %v23295_v11 = vld [vmem:[#allocation10_spill] sm:$0xff]  ;;  %v23298_v12 = vld [vmem:[#allocation31_spill] sm:$0xff]  ;;  %v23304_v44 = vld [vmem:[#allocation37_spill] sm:$0xff] }
 0x29b   :  { %12251 = vmatprep.subr.mxu0 %v17492_v49  ;;  %12241 = vmatpush3.msra.mxu1 %v6050_v29  ;;  %v23301_v29 = vld [vmem:[#allocation18_spill] sm:$0xff]  ;;  %v23302_v18 = vld [vmem:[#allocation15_spill] sm:$0xff]  ;;  %v23306_v19 = vld [vmem:[#allocation13_spill] sm:$0xff] }
 0x29c   :  { %12252 = vmatpush3.msra.mxu0 %v17481_v39  ;;  %12242 = vmatprep.subr.mxu1 %v6169_v51  ;;  %v23303_v51 = vld [vmem:[#allocation7_spill] sm:$0xff]  ;;  %v23307_v23 = vld [vmem:[#allocation25_spill] sm:$0xff] }
 0x29d   :  { %12253 = vmatprep.subr.mxu0 %v17498_v62  ;;  %12243 = vmatpush3.msra.mxu1 %v6057_v37  ;;  %v23296_v37 = vld [vmem:[#allocation6_spill] sm:$0xff] }
 0x29e   :  { %12254 = vmatpush3.msra.mxu0 %v17504_v27  ;;  %12244 = vmatprep.subr.mxu1 %v6176_v0  ;;  %v23308_v0 = vld [vmem:[#allocation21_spill] sm:$0xff] }
 0x29f   :  { %12255 = vmatprep.subr.mxu0 %v17525_v3  ;;  %12245 = vmatpush3.msra.mxu1 %v6064_v53  ;;  %v23309_v53 = vld [vmem:[#allocation5_spill] sm:$0xff] }
 0x2a0   :  { %12256 = vmatpush3.msra.mxu0 %v17544_v2  ;;  %12246 = vmatprep.subr.mxu1 %v6183_v56 }
 0x2a1   :  { %12257 = vmatprep.subr.mxu0 %v17552_v50  ;;  %12247 = vmatpush3.msra.mxu1 %v6071_v48  ;;  %v23310_v48 = vld [vmem:[#allocation28_spill] sm:$0xff] }
 0x2a2   :  { %12258 = vmatpush3.msra.mxu0 %v17578_v4  ;;  %6188 = vmatmul.mubr.f32.vlgmr.msra.gmra.mxu1 %v17872_v41  ;;  %v23312_v41 = vld [vmem:[#allocation23_spill] sm:$0xff] }
 0x2a3   :  { %12259 = vmatprep.subr.mxu0 %v17609_v59  ;;  %12286 = vmatprep.subr.mxu1 %v17457_v21 }
 0x2a4   :  { %12260 = vmatpush3.msra.mxu0 %v17615_v47  ;;  %12287 = vmatpush3.msra.mxu1 %v17459_v13 }
 0x2a5   :  { %12261 = vmatprep.subr.mxu0 %v17644_v52  ;;  %12288 = vmatprep.subr.mxu1 %v23295_v11 }
 0x2a6   :  { %12262 = vmatpush3.msra.mxu0 %v17650_v33  ;;  %12289 = vmatpush3.msra.mxu1 %v23296_v37 }
 0x2a7   :  { %12263 = vmatprep.subr.mxu0 %v17713_v63  ;;  %12290 = vmatprep.subr.mxu1 %v23297_v54 }
 0x2a8   :  { %12264 = vmatpush3.msra.mxu0 %v23298_v12  ;;  %12291 = vmatpush3.msra.mxu1 %v23299_v7 }
 0x2a9   :  { %12265 = vmatprep.subr.mxu0 %v17744_v40  ;;  %12292 = vmatprep.subr.mxu1 %v23300_v5 }
 0x2aa   :  { %12266 = vmatpush3.msra.mxu0 %v23301_v29  ;;  %12293 = vmatpush3.msra.mxu1 %v23302_v18 }
 0x2ab   :  { %12267 = vmatprep.subr.mxu0 %v17758_v24  ;;  %12294 = vmatprep.subr.mxu1 %v23303_v51 }
 0x2ac   :  { %12268 = vmatpush3.msra.mxu0 %v23304_v44  ;;  %12295 = vmatpush3.msra.mxu1 %v23305_v38 }
 0x2ad   :  { %12269 = vmatprep.subr.mxu0 %v17834_v45  ;;  %12296 = vmatprep.subr.mxu1 %v23306_v19  ;;  %v11863_v56 = vpop.f32.mrf.mxu0 }
 0x2ae   :  { %12270 = vmatpush3.msra.mxu0 %v23307_v23  ;;  %12297 = vmatpush3.msra.mxu1 %v23308_v0 }
 0x2af   :  { %12271 = vmatprep.subr.mxu0 %v17870_v46  ;;  %12298 = vmatprep.subr.mxu1 %v23309_v53  ;;  %v11864_v6 = vpop.f32.mrf.mxu0  ;;  %v23313_v46 = vld [vmem:[#allocation20_spill] sm:$0xff]  ;;  %v23314_v53 = vld [vmem:[#allocation30_spill] sm:$0xff] }
 0x2b0   :  { %12272 = vmatpush3.msra.mxu0 %v17828_v26  ;;  %12299 = vmatpush3.msra.mxu1 %v23310_v48  ;;  %v11865_v15 = vadd.f32 %v11864_v6, %v11863_v56  ;;  %v23316_v6 = vld [vmem:[#allocation8_spill] sm:$0xff]  ;;  %v23317_v56 = vld [vmem:[#allocation19_spill] sm:$0xff] }
 0x2b1   :  { %12273 = vmatprep.subr.mxu0 %v17903_v32  ;;  %12300 = vmatprep.subr.mxu1 %v23311_v42  ;;  %v23315_v42 = vld [vmem:[#allocation22_spill] sm:$0xff] }
 0x2b2   :  { %12274 = vmatpush3.msra.mxu0 %v17879_v20  ;;  %12301 = vmatpush3.msra.mxu1 %v23312_v41  ;;  %v4604_v26 = vadd.f32 %v11865_v15, %v4466_v30  ;;  %v23318_v30 = vld [vmem:[#allocation17_spill] sm:$0xff] }
 0x2b3   :  { %12275 = vmatprep.subr.mxu0 %v17941_v58  ;;  %12302 = vmatprep.subr.mxu1 %v23313_v46 }
 0x2b4   :  { %12276 = vmatpush3.msra.mxu0 %v17882_v14  ;;  %12303 = vmatpush3.msra.mxu1 %v23314_v53 }
 0x2b5   :  { %12277 = vmatprep.subr.mxu0 %v17963_v1  ;;  %12304 = vmatprep.subr.mxu1 %v17763_v10 }
 0x2b6   :  { %12278 = vmatpush3.msra.mxu0 %v17957_v34  ;;  %12305 = vmatpush3.msra.mxu1 %v23315_v42  ;;  %v11898_v14 = vpop.f32.mrf.mxu1 }
 0x2b7   :  { %12279 = vmatprep.subr.mxu0 %v17980_v35  ;;  %12306 = vmatprep.subr.mxu1 %v23316_v6 }
 0x2b8   :  { %12280 = vmatpush3.msra.mxu0 %v17970_v57  ;;  %12307 = vmatpush3.msra.mxu1 %v23317_v56  ;;  %v11899_v15 = vpop.f32.mrf.mxu1  ;;  %v23319_v57 = vand.u32 4294901760, %v17492_v49  ;;  %v23323_v49 = vand.u32 4294901760, %v17525_v3  ;;  %v23328_v3 = vand.u32 4294901760, %v17929_v31 }
 0x2b9   :  { %12281 = vmatprep.subr.mxu0 %v17996_v25  ;;  %12308 = vmatprep.subr.mxu1 %v17830_v36  ;;  %v11900_v35 = vadd.f32 %v11899_v15, %v11898_v14  ;;  %v23320_v25 = vand.u32 4294901760, %v17481_v39  ;;  %v23322_v14 = vand.u32 4294901760, %v17504_v27  ;;  %v23324_v39 = vand.u32 4294901760, %v17544_v2  ;;  %v272_v15 = vld [vmem:[%s21623_s1 + $0x760] sm:$0xff] }
 0x2ba   :  { %12282 = vmatpush3.msra.mxu0 %v17987_v43  ;;  %6323 = vmatprep.mubr.f32.mxu0 %v17916_v55  ;;  %v23321_v43 = vand.u32 4294901760, %v17498_v62  ;;  %v23325_v62 = vand.u32 4294901760, %v17552_v50  ;;  %v23326_v27 = vand.u32 4294901760, %v17916_v55  ;;  %v23330_v2 = vand.u32 4294901760, %v17615_v47  ;;  %v291_v50 = vld [vmem:[%s21623_s1 + $0x7f8] sm:$0xff] }
 0x2bb   :  { %12309 = vmatpush3.msra.mxu1 %v23318_v30  ;;  %6326 = vmatmul.mubr.f32.vlgmr.msra.gmra.mxu0 %v17929_v31  ;;  %v18108_v36 = vadd.f32 %v11900_v35, %v4604_v26  ;;  %v23327_v26 = vand.u32 4294901760, %v17578_v4  ;;  %v275_v4 = vld [vmem:[%s21623_s1 + $0x778] sm:$0xff]  ;;  %v23331_v31 = vand.u32 4294901760, %v17644_v52  ;;  %v23333_v47 = vand.u32 4294901760, %v17713_v63 }
 0x2bc   :  { %12310 = vmatprep.subr.mxu1 %v17849_v9  ;;  %12321 = vmatprep.subr.mxu0 %v23319_v57  ;;  %v23329_v57 = vand.u32 4294901760, %v17609_v59  ;;  %v23332_v59 = vand.u32 4294901760, %v17650_v33  ;;  %v18159_v52 = vand.u32 4294901760, %v291_v50  ;;  %v18161_v55 = vand.u32 4294901760, %v275_v4 }
 0x2bd   :  { %12311 = vmatpush3.msra.mxu1 %v17822_v8  ;;  %12322 = vmatpush3.msra.mxu0 %v23320_v25  ;;  %v23334_v35 = vand.u32 4294901760, %v23298_v12  ;;  %v23336_v63 = vand.u32 4294901760, %v17744_v40  ;;  %v273_v40 = vld [vmem:[%s21623_s1 + $0x768] sm:$0xff] }
 0x2be   :  { %12312 = vmatprep.subr.mxu1 %v17896_v61  ;;  %12323 = vmatprep.subr.mxu0 %v23321_v43  ;;  %v289_v43 = vld [vmem:[%s21623_s1 + $0x7e8] sm:$0xff] }
 0x2bf   :  { %12313 = vmatpush3.msra.mxu1 %v17910_v60  ;;  %12324 = vmatpush3.msra.mxu0 %v23322_v14  ;;  %v18185_v12 = vand.u32 4294901760, %v289_v43 }
 0x2c0   :  { %12314 = vmatprep.subr.mxu1 %v17937_v28  ;;  %12325 = vmatprep.subr.mxu0 %v23323_v49 }
 0x2c1   :  { %12315 = vmatpush3.msra.mxu1 %v17923_v22  ;;  %12326 = vmatpush3.msra.mxu0 %v23324_v39  ;;  %23340 = vst [vmem:[#allocation9_spill] sm:$0xff] %v18185_v12 }
 0x2c2   :  { %12316 = vmatprep.subr.mxu1 %v17959_v16  ;;  %12327 = vmatprep.subr.mxu0 %v23325_v62  ;;  %v287_v62 = vld [vmem:[%s21623_s1 + $0x7d8] sm:$0xff] }
 0x2c3   :  { %12317 = vmatpush3.msra.mxu1 %v17951_v17  ;;  %6430 = vmatprep.mubr.f32.mxu1 %v23326_v27 }
 0x2c4   :  { %12328 = vmatpush3.msra.mxu0 %v23327_v26  ;;  %6434 = vmatmul.mubr.f32.vlgmr.msra.gmra.mxu1 %v23328_v3  ;;  %v23349_v26 = vld [vmem:[#allocation29_spill] sm:$0xff] }
 0x2c5   :  { %12329 = vmatprep.subr.mxu0 %v23329_v57  ;;  %12356 = vmatprep.subr.mxu1 %v17457_v21  ;;  %v290_v21 = vld [vmem:[%s21623_s1 + $0x7f0] sm:$0xff]  ;;  %v23350_v3 = vand.u32 4294901760, %v23349_v26  ;;  %v18232_v57 = vand.u32 4294901760, %v272_v15 }
 0x2c6   :  { %12330 = vmatpush3.msra.mxu0 %v23330_v2  ;;  %12357 = vmatpush3.msra.mxu1 %v17459_v13  ;;  %v274_v13 = vld [vmem:[%s21623_s1 + $0x770] sm:$0xff]  ;;  %v18166_v33 = vand.u32 4294901760, %v290_v21  ;;  %v271_v2 = vld [vmem:[%s21623_s1 + $0x758] sm:$0xff] }
 0x2c7   :  { %12331 = vmatprep.subr.mxu0 %v23331_v31  ;;  %12358 = vmatprep.subr.mxu1 %v23295_v11  ;;  %v18174_v25 = vand.u32 4294901760, %v274_v13  ;;  %v23338_v11 = vand.u32 4294901760, %v23301_v29  ;;  %23351 = vst [vmem:[#allocation14_spill] sm:$0xff] %v18232_v57  ;;  %v23353_v31 = vld [vmem:[#allocation36_spill] sm:$0xff] }
 0x2c8   :  { %12332 = vmatpush3.msra.mxu0 %v23332_v59  ;;  %12359 = vmatpush3.msra.mxu1 %v23296_v37  ;;  %23335 = vst [vmem:[#allocation10_spill] sm:$0xff] %v18166_v33  ;;  %v23339_v37 = vand.u32 4294901760, %v17758_v24  ;;  %v23341_v24 = vand.u32 4294901760, %v23304_v44  ;;  %v18200_v29 = vsub.f32 %v290_v21, %v18166_v33  ;;  %v23343_v44 = vand.u32 4294901760, %v23307_v23 }
 0x2c9   :  { %12333 = vmatprep.subr.mxu0 %v23333_v47  ;;  %12360 = vmatprep.subr.mxu1 %v23297_v54  ;;  %23337 = vst [vmem:[#allocation6_spill] sm:$0xff] %v18174_v25  ;;  %v18183_v54 = vsub.f32 %v275_v4, %v18161_v55  ;;  %v23352_v4 = vand.u32 4294901760, %v17903_v32  ;;  %v286_v32 = vld [vmem:[%s21623_s1 + $0x7d0] sm:$0xff] }
 0x2ca   :  { %12334 = vmatpush3.msra.mxu0 %v23334_v35  ;;  %12361 = vmatpush3.msra.mxu1 %v23299_v7  ;;  %v288_v7 = vld [vmem:[%s21623_s1 + $0x7e0] sm:$0xff]  ;;  %v18248_v35 = vand.u32 4294901760, %v287_v62 }
 0x2cb   :  { %12335 = vmatprep.subr.mxu0 %v23336_v63  ;;  %12362 = vmatprep.subr.mxu1 %v23300_v5  ;;  %v18194_v5 = vsub.f32 %v291_v50, %v18159_v52  ;;  %v18216_v14 = vand.u32 4294901760, %v288_v7  ;;  %v22138_v23 = vand.u32 4294901760, %v18183_v54  ;;  %v22136_v50 = vand.u32 4294901760, %v18200_v29 }
 0x2cc   :  { %12336 = vmatpush3.msra.mxu0 %v23338_v11  ;;  %12363 = vmatpush3.msra.mxu1 %v23302_v18  ;;  %v23342_v18 = vand.u32 4294901760, %v17834_v45  ;;  %v23346_v45 = vld [vmem:[#allocation35_spill] sm:$0xff]  ;;  %23355 = vst [vmem:[#allocation18_spill] sm:$0xff] %v18248_v35  ;;  %v23356_v63 = vand.u32 4294901760, %v17941_v58 }
 0x2cd   :  { %12337 = vmatprep.subr.mxu0 %v23339_v37  ;;  %12364 = vmatprep.subr.mxu1 %v23303_v51  ;;  %v18206_v51 = vsub.f32 %v274_v13, %v18174_v25  ;;  %23345 = vst [vmem:[#allocation33_spill] sm:$0xff] %v18216_v14  ;;  %v23347_v49 = vand.u32 4294901760, %v23346_v45  ;;  %v22140_v27 = vand.u32 4294901760, %v18194_v5  ;;  %v23354_v13 = vand.u32 4294901760, %v17879_v20  ;;  %v270_v37 = vld [vmem:[%s21623_s1 + $0x750] sm:$0xff] }
 0x2ce   :  { %12338 = vmatpush3.msra.mxu0 %v23341_v24  ;;  %12365 = vmatpush3.msra.mxu1 %v23305_v38  ;;  %v18214_v38 = vand.u32 4294901760, %v273_v40  ;;  %v18264_v20 = vand.u32 4294901760, %v271_v2  ;;  %v18269_v11 = vsub.f32 %v18183_v54, %v22138_v23  ;;  %v18280_v24 = vsub.f32 %v272_v15, %v18232_v57 }
 0x2cf   :  { %12339 = vmatprep.subr.mxu0 %v23342_v18  ;;  %12366 = vmatprep.subr.mxu1 %v23306_v19  ;;  %v23348_v19 = vld [vmem:[#allocation5_spill] sm:$0xff]  ;;  %v22135_v59 = vand.u32 4294901760, %v18206_v51  ;;  %v18285_v18 = vsub.f32 %v18200_v29, %v22136_v50  ;;  %v18290_v45 = vand.u32 4294901760, %v286_v32  ;;  %v18300_v15 = vand.u32 4294901760, %v270_v37 }
 0x2d0   :  { %12340 = vmatpush3.msra.mxu0 %v23343_v44  ;;  %12367 = vmatpush3.msra.mxu1 %v23308_v0  ;;  %23344 = vst [vmem:[#allocation31_spill] sm:$0xff] %v18214_v38  ;;  %v11933_v39 = vpop.f32.mrf.mxu0  ;;  %v18227_v0 = vsub.f32 %v289_v43, %v18185_v12  ;;  %v18246_v47 = vsub.f32 %v273_v40, %v18214_v38  ;;  %23357 = vst [vmem:[#allocation15_spill] sm:$0xff] %v18264_v20  ;;  %v23358_v40 = vld [vmem:[#allocation34_spill] sm:$0xff]  ;;  %v23360_v44 = vand.u32 4294901760, %v17963_v1  ;;  %v285_v1 = vld [vmem:[%s21623_s1 + $0x7c8] sm:$0xff] }
 0x2d1   :  { %12341 = vmatprep.subr.mxu0 %v23347_v49  ;;  %12368 = vmatprep.subr.mxu1 %v23348_v19  ;;  %v18254_v43 = vsub.f32 %v288_v7, %v18216_v14  ;;  %23361 = vst [vmem:[#allocation7_spill] sm:$0xff] %v18290_v45  ;;  %23363 = vst [vmem:[#allocation37_spill] sm:$0xff] %v18300_v15 }
 0x2d2   :  { %12342 = vmatpush3.msra.mxu0 %v23350_v3  ;;  %12369 = vmatpush3.msra.mxu1 %v23310_v48  ;;  %v11934_v21 = vpop.f32.mrf.mxu0  ;;  %v22134_v58 = vand.u32 4294901760, %v18227_v0  ;;  %v22137_v49 = vand.u32 4294901760, %v18246_v47 }
 0x2d3   :  { %12343 = vmatprep.subr.mxu0 %v23352_v4  ;;  %12370 = vmatprep.subr.mxu1 %v23353_v31  ;;  %v11935_v48 = vadd.f32 %v11934_v21, %v11933_v39  ;;  %v22139_v19 = vand.u32 4294901760, %v18254_v43  ;;  %v18311_v39 = vsub.f32 %v287_v62, %v18248_v35  ;;  %v23366_v4 = vld [vmem:[#allocation32_spill] sm:$0xff]  ;;  %v23384_v21 = vld [vmem:[#allocation27_spill] sm:$0xff] }
 0x2d4   :  { %12344 = vmatpush3.msra.mxu0 %v23354_v13  ;;  %12371 = vmatpush3.msra.mxu1 %v23312_v41  ;;  %v18262_v41 = vsub.f32 %v18194_v5, %v22140_v27  ;;  %v18322_v3 = vsub.f32 %v18227_v0, %v22134_v58  ;;  %v23367_v31 = vand.u32 4294901760, %v23366_v4  ;;  %v23373_v4 = vld [vmem:[#allocation39_spill] sm:$0xff]  ;;  %v18357_v58 = vsub.f32 %v18246_v47, %v22137_v49 }
 0x2d5   :  { %12345 = vmatprep.subr.mxu0 %v23356_v63  ;;  %12372 = vmatprep.subr.mxu1 %v23313_v46  ;;  %v23359_v46 = vand.u32 4294901760, %v23358_v40  ;;  %v4880_v7 = vadd.f32 %v11935_v48, %v18108_v36  ;;  %v23362_v36 = vand.u32 4294901760, %v17957_v34  ;;  %v23364_v34 = vld [vmem:[#allocation11_spill] sm:$0xff]  ;;  %v22141_v48 = vand.u32 4294901760, %v18280_v24  ;;  %v23368_v63 = vld [vmem:[#allocation16_spill] sm:$0xff] }
 0x2d6   :  { %12373 = vmatpush3.msra.mxu1 %v23314_v53  ;;  %v18295_v53 = vsub.f32 %v18206_v51, %v22135_v59  ;;  %v23365_v26 = vand.u32 4294901760, %v23364_v34  ;;  %v23369_v40 = vand.u32 4294901760, %v23368_v63  ;;  %v284_v34 = vld [vmem:[%s21623_s1 + $0x7c0] sm:$0xff]  ;;  %v23375_v63 = vld [vmem:[#allocation38_spill] sm:$0xff]  ;;  %v18362_v59 = vsub.f32 %v18254_v43, %v22139_v19 }
 0x2d7   :  { %12346 = vmatpush3.msra.mxu0 %v23359_v46  ;;  %12374 = vmatprep.subr.mxu1 %v17763_v10  ;;  %v269_v10 = vld [vmem:[%s21623_s1 + $0x748] sm:$0xff]  ;;  %v23370_v46 = vld [vmem:[#allocation12_spill] sm:$0xff]  ;;  %v18376_v19 = vand.u32 4294901760, %v284_v34  ;;  %v18381_v27 = vsub.f32 %v18280_v24, %v22141_v48 }
 0x2d8   :  { %12347 = vmatprep.subr.mxu0 %v23360_v44  ;;  %12375 = vmatpush3.msra.mxu1 %v23315_v42  ;;  %v18317_v42 = vsub.f32 %v271_v2, %v18264_v20  ;;  %v268_v2 = vld [vmem:[%s21623_s1 + $0x740] sm:$0xff]  ;;  %v18338_v44 = vand.u32 4294901760, %v285_v1 }
 0x2d9   :  { %12348 = vmatpush3.msra.mxu0 %v23362_v36  ;;  %12376 = vmatprep.subr.mxu1 %v23316_v6  ;;  %v11968_v62 = vpop.f32.mrf.mxu1  ;;  %v18340_v36 = vand.u32 4294901760, %v269_v10  ;;  %v18371_v49 = vand.u32 4294901760, %v268_v2  ;;  %23378 = vst [vmem:[#allocation21_spill] sm:$0xff] %v18376_v19  ;;  %v266_v6 = vld [vmem:[%s21623_s1 + $0x730] sm:$0xff] }
 0x2da   :  { %12349 = vmatprep.subr.mxu0 %v23365_v26  ;;  %12377 = vmatpush3.msra.mxu1 %v23317_v56  ;;  %23371 = vst [vmem:[#allocation26_spill] sm:$0xff] %v18338_v44  ;;  %v18346_v26 = vsub.f32 %v286_v32, %v18290_v45  ;;  %v283_v32 = vld [vmem:[%s21623_s1 + $0x7b8] sm:$0xff]  ;;  %v22143_v23 = vand.u32 4294901760, %v18317_v42 }
 0x2db   :  { %12350 = vmatpush3.msra.mxu0 %v23367_v31  ;;  %12378 = vmatprep.subr.mxu1 %v23370_v46  ;;  %23372 = vst [vmem:[#allocation13_spill] sm:$0xff] %v18340_v36  ;;  %v23374_v31 = vand.u32 4294901760, %v23373_v4  ;;  %v18352_v46 = vsub.f32 %v270_v37, %v18300_v15  ;;  %v22142_v4 = vand.u32 4294901760, %v18311_v39  ;;  %v23376_v37 = vld [vmem:[#allocation24_spill] sm:$0xff]  ;;  %23377 = vst [vmem:[#allocation25_spill] sm:$0xff] %v18371_v49  ;;  %v18399_v50 = vand.u32 4294901760, %v283_v32 }
 0x2dc   :  { %12351 = vmatprep.subr.mxu0 %v23369_v40  ;;  %6600 = vmatprep.mubr.f32.mxu0 %v23375_v63  ;;  %v11969_v40 = vpop.f32.mrf.mxu1  ;;  %v18397_v48 = vsub.f32 %v269_v10, %v18340_v36  ;;  %v18421_v13 = vsub.f32 %v268_v2, %v18371_v49  ;;  %v18440_v2 = vld [vmem:[%s21623_s1 + $0x7a8] sm:$0xff] }
 0x2dd   :  { %12352 = vmatpush3.msra.mxu0 %v23374_v31  ;;  %12379 = vmatpush3.msra.mxu1 %v23318_v30  ;;  %v11970_v31 = vadd.f32 %v11969_v40, %v11968_v62  ;;  %v267_v30 = vld [vmem:[%s21623_s1 + $0x738] sm:$0xff]  ;;  %23380 = vst [vmem:[#allocation23_spill] sm:$0xff] %v18399_v50 }
 0x2de   :  { %6602 = vmatmul.mubr.f32.vlgmr.msra.gmra.mxu0 %v23376_v37  ;;  %12380 = vmatprep.subr.mxu1 %v17849_v9  ;;  %v13258_v62 = vld [vmem:[%s21622_s0 + $0x1c] ss:$48 sps:$4 sm:$0xff]   ;;  %23379 = vst [vmem:[#allocation28_spill] sm:$0xff] %v18397_v48  ;;  %23381 = vst [vmem:[#allocation20_spill] sm:$0xff] %v18421_v13 }
 0x2df   :  { %12391 = vmatprep.subr.mxu0 %v18159_v52  ;;  %v13259_v9 = vld [vmem:[%s21622_s0 + $0x7c] ss:$48 sps:$4 sm:$0xff]   ;;  %12381 = vmatpush3.msra.mxu1 %v17822_v8  ;;  %v18394_v40 = vadd.f32 %v11970_v31, %v4880_v7  ;;  %v18411_v7 = vsub.f32 %v18311_v39, %v22142_v4  ;;  %v18415_v31 = vsub.f32 %v285_v1, %v18338_v44  ;;  %v18423_v8 = vand.u32 4294901760, %v267_v30  ;;  %v282_v1 = vld [vmem:[%s21623_s1 + $0x7b0] sm:$0xff] }
 0x2e0   :  { %12392 = vmatpush3.msra.mxu0 %v18161_v55  ;;  %12382 = vmatprep.subr.mxu1 %v17896_v61  ;;  %v18428_v4 = vsub.f32 %v18317_v42, %v22143_v23  ;;  %v265_v23 = vld [vmem:[%s21623_s1 + $0x728] sm:$0xff]  ;;  %v18446_v61 = vsub.f32 %v284_v34, %v18376_v19  ;;  %v560_v10 = vrot.slane %v13258_v62, %v23384_v21  ;;  %v18465_v62 = vand.u32 4294901760, %v282_v1 }
 0x2e1   :  { %12393 = vmatprep.subr.mxu0 %v18166_v33  ;;  %12383 = vmatpush3.msra.mxu1 %v17910_v60  ;;  %23382 = vst [vmem:[#allocation30_spill] sm:$0xff] %v18423_v8  ;;  %v18435_v60 = vand.u32 4294901760, %v266_v6  ;;  %v18460_v34 = vsub.f32 %v283_v32, %v18399_v50  ;;  %v18476_v32 = vsub.f32 %v267_v30, %v18423_v8  ;;  %v18482_v33 = vand.u32 4294901760, %v265_v23  ;;  %v280_v30 = vld [vmem:[%s21623_s1 + $0x7a0] sm:$0xff] }
 0x2e2   :  { %12394 = vmatpush3.msra.mxu0 %v18174_v25  ;;  %12384 = vmatprep.subr.mxu1 %v17937_v28  ;;  %v574_v28 = vrot.slane %v13259_v9, %v23384_v21  ;;  %v23386_v9 = vand.u32 4294901760, %v18352_v46 }
 0x2e3   :  { %12395 = vmatprep.subr.mxu0 %v18185_v12  ;;  %23383 = vst [vmem:[#allocation22_spill] sm:$0xff] %v18435_v60  ;;  %12385 = vmatpush3.msra.mxu1 %v17923_v22  ;;  %v23385_v12 = vand.u32 4294901760, %v18346_v26  ;;  %23387 = vst [vmem:[#allocation8_spill] sm:$0xff] %v18476_v32  ;;  %v18480_v22 = vand.u32 4294901760, %v18440_v2 }
 0x2e4   :  { %12396 = vmatpush3.msra.mxu0 %v18214_v38  ;;  %12386 = vmatprep.subr.mxu1 %v17959_v16  ;;  %v18470_v56 = vsub.f32 %v18352_v46, %v23386_v9  ;;  %23389 = vst [vmem:[#allocation17_spill] sm:$0xff] %v18482_v33  ;;  %v264_v9 = vld [vmem:[%s21623_s1 + $0x720] sm:$0xff]  ;;  %v578_v21 = vcombine.high %v560_v10, %v574_v28  ;;  %v279_v38 = vld [vmem:[%s21623_s1 + $0x798] sm:$0xff]  ;;  %v23400_v16 = vand.u32 4294901760, %v18446_v61 }
 0x2e5   :  { %v18456_v25 = vsub.f32 %v18346_v26, %v23385_v12  ;;  %12397 = vmatprep.subr.mxu0 %v18216_v14  ;;  %12387 = vmatpush3.msra.mxu1 %v17951_v17  ;;  %23388 = vst [vmem:[#allocation19_spill] sm:$0xff] %v18480_v22  ;;  %v263_v17 = vld [vmem:[%s21623_s1 + $0x718] sm:$0xff]  ;;  %v23391_v14 = vand.u32 4294901760, %v18262_v41  ;;  %v577_v12 = vcombine.low %v560_v10, %v574_v28  ;;  %v23394_v41 = vand.u32 4294901760, %v18415_v31 }
 0x2e6   :  { %6704 = vmatprep.mubr.f32.mxu1 %v23375_v63  ;;  %12398 = vmatpush3.msra.mxu0 %v18232_v57  ;;  %v18493_v63 = vsub.f32 %v266_v6, %v18435_v60  ;;  %v23396_v10 = vand.u32 4294901760, %v18285_v18  ;;  %v18530_v28 = vsub.f32 %v265_v23, %v18482_v33  ;;  %v18544_v18 = vsub.f32 %v18446_v61, %v23400_v16 }
 0x2e7   :  { %6706 = vmatmul.mubr.f32.vlgmr.msra.gmra.mxu1 %v23376_v37  ;;  %12399 = vmatprep.subr.mxu0 %v18248_v35  ;;  %v23392_v37 = vand.u32 4294901760, %v18397_v48  ;;  %v23393_v35 = vand.u32 4294901760, %v18269_v11  ;;  %v18520_v57 = vsub.f32 %v18415_v31, %v23394_v41  ;;  %v23399_v41 = vand.u32 4294901760, %v18295_v53 }
 0x2e8   :  { %23390 = vst [vmem:[#allocation35_spill] sm:$0xff] %v18493_v63  ;;  %12426 = vmatprep.subr.mxu1 %v23391_v14  ;;  %12400 = vmatpush3.msra.mxu0 %v18264_v20  ;;  %23397 = vst [vmem:[#allocation29_spill] sm:$0xff] %v18530_v28  ;;  %v18536_v14 = vsub.f32 %v282_v1, %v18465_v62  ;;  %v23401_v23 = vand.u32 4294901760, %v18421_v13  ;;  %v278_v1 = vld [vmem:[%s21623_s1 + $0x790] sm:$0xff]  ;;  %v18556_v11 = vand.u32 4294901760, %v578_v21  ;;  %v23403_v53 = vand.u32 4294901760, %v18322_v3 }
 0x2e9   :  { %v18507_v6 = vsub.f32 %v18397_v48, %v23392_v37  ;;  %12427 = vmatpush3.msra.mxu1 %v23393_v35  ;;  %v18522_v37 = vand.u32 4294901760, %v264_v9  ;;  %v18524_v48 = vand.u32 4294901760, %v263_v17  ;;  %12401 = vmatprep.subr.mxu0 %v18290_v45  ;;  %v18532_v35 = vand.u32 4294901760, %v280_v30 }
 0x2ea   :  { %12428 = vmatprep.subr.mxu1 %v23396_v10  ;;  %12402 = vmatpush3.msra.mxu0 %v18300_v15  ;;  %v18549_v10 = vsub.f32 %v18421_v13, %v23401_v23  ;;  %v18551_v45 = vand.u32 4294901760, %v279_v38  ;;  %23402 = vst [vmem:[#allocation34_spill] sm:$0xff] %v18556_v11  ;;  %v262_v15 = vld [vmem:[%s21623_s1 + $0x710] sm:$0xff]  ;;  %v18572_v20 = vsub.f32 %v18440_v2, %v18480_v22  ;;  %v18574_v13 = vand.u32 4294901760, %v577_v12  ;;  %v261_v2 = vld [vmem:[%s21623_s1 + $0x708] sm:$0xff] }
 0x2eb   :  { %23395 = vst [vmem:[#allocation5_spill] sm:$0xff] %v18522_v37  ;;  %23398 = vst [vmem:[#allocation36_spill] sm:$0xff] %v18532_v35  ;;  %12429 = vmatpush3.msra.mxu1 %v23399_v41  ;;  %12403 = vmatprep.subr.mxu0 %v18338_v44  ;;  %v6870_v16 = vand.u32 4294901760, %v18507_v6  ;;  %v23404_v41 = vand.u32 4294901760, %v18460_v34  ;;  %v23407_v3 = vand.u32 4294901760, %v18357_v58  ;;  %v6982_v6 = vand.u32 4294901760, %v18520_v57 }
 0x2ec   :  { %12430 = vmatprep.subr.mxu1 %v23403_v53  ;;  %23405 = vst [vmem:[#allocation11_spill] sm:$0xff] %v18572_v20  ;;  %23406 = vst [vmem:[#allocation32_spill] sm:$0xff] %v18574_v13  ;;  %12404 = vmatpush3.msra.mxu0 %v18340_v36  ;;  %v18581_v53 = vsub.f32 %v264_v9, %v18522_v37  ;;  %v23409_v36 = vand.u32 4294901760, %v18362_v59  ;;  %v23410_v58 = vand.u32 4294901760, %v18476_v32  ;;  %v18598_v9 = vand.u32 4294901760, %v278_v1 }
 0x2ed   :  { %v18565_v23 = vsub.f32 %v18460_v34, %v23404_v41  ;;  %12431 = vmatpush3.msra.mxu1 %v23407_v3  ;;  %v18584_v41 = vsub.f32 %v263_v17, %v18524_v48  ;;  %12405 = vmatprep.subr.mxu0 %v18376_v19  ;;  %v277_v3 = vld [vmem:[%s21623_s1 + $0x788] sm:$0xff]  ;;  %v18605_v44 = vsub.f32 %v280_v30, %v18532_v35  ;;  %v23411_v59 = vand.u32 4294901760, %v18381_v27  ;;  %v260_v17 = vld [vmem:[%s21623_s1 + $0x700] sm:$0xff] }
 0x2ee   :  { %12432 = vmatprep.subr.mxu1 %v23409_v36  ;;  %v18596_v57 = vsub.f32 %v18476_v32, %v23410_v58  ;;  %12406 = vmatpush3.msra.mxu0 %v18371_v49  ;;  %v6989_v36 = vand.u32 4294901760, %v18544_v18  ;;  %v6877_v58 = vand.u32 4294901760, %v18549_v10  ;;  %v18612_v19 = vand.u32 4294901760, %v262_v15  ;;  %v276_v10 = vld [vmem:[%s21623_s1 + $0x780] sm:$0xff] }
 0x2ef   :  { %23408 = vst [vmem:[#allocation16_spill] sm:$0xff] %v18584_v41  ;;  %12433 = vmatpush3.msra.mxu1 %v23411_v59  ;;  %v18618_v32 = vsub.f32 %v578_v21, %v18556_v11  ;;  %12407 = vmatprep.subr.mxu0 %v18399_v50  ;;  %v23412_v30 = vand.u32 4294901760, %v18411_v7  ;;  %v6996_v27 = vand.u32 4294901760, %v18565_v23  ;;  %v18625_v59 = vand.u32 4294901760, %v261_v2 }
 0x2f0   :  { %v18631_v49 = vsub.f32 %v577_v12, %v18574_v13  ;;  %12408 = vmatpush3.msra.mxu0 %v18423_v8  ;;  %v23413_v21 = vand.u32 4294901760, %v18428_v4  ;;  %v23414_v7 = vand.u32 4294901760, %v18493_v63  ;;  %v18643_v50 = vsub.f32 %v279_v38, %v18551_v45  ;;  %7048 = vmatprep.mubr.f32.mxu1 %v18556_v11 }
 0x2f1   :  { %12434 = vmatprep.subr.mxu1 %v23412_v30  ;;  %v18639_v30 = vand.u32 4294901760, %v277_v3  ;;  %12409 = vmatprep.subr.mxu0 %v18465_v62  ;;  %v23415_v12 = vand.u32 4294901760, %v18456_v25  ;;  %v6884_v8 = vand.u32 4294901760, %v18596_v57  ;;  %v23416_v4 = vand.u32 4294901760, %v18536_v14 }
 0x2f2   :  { %12435 = vmatpush3.msra.mxu1 %v23413_v21  ;;  %v6890_v23 = vsub.f32 %v18493_v63, %v23414_v7  ;;  %v18653_v63 = vand.u32 4294901760, %v260_v17  ;;  %12410 = vmatpush3.msra.mxu0 %v18435_v60  ;;  %v23417_v38 = vand.u32 4294901760, %v18470_v56  ;;  %v18659_v18 = vsub.f32 %v262_v15, %v18612_v19 }
 0x2f3   :  { %12436 = vmatprep.subr.mxu1 %v23415_v12  ;;  %v7002_v21 = vsub.f32 %v18536_v14, %v23416_v4  ;;  %v18661_v25 = vand.u32 4294901760, %v276_v10  ;;  %v18665_v12 = vsub.f32 %v278_v1, %v18598_v9  ;;  %12411 = vmatprep.subr.mxu0 %v18480_v22  ;;  %v23418_v4 = vand.u32 4294901760, %v18572_v20 }
 0x2f4   :  { %12437 = vmatpush3.msra.mxu1 %v23417_v38  ;;  %v18672_v56 = vsub.f32 %v261_v2, %v18625_v59  ;;  %v12003_v38 = vpop.f32.mrf.mxu0  ;;  %12412 = vmatpush3.msra.mxu0 %v18482_v33  ;;  %v6891_v1 = vand.u32 4294901760, %v6890_v23  ;;  %v23420_v57 = vand.u32 4294901760, %v18530_v28  ;;  %v23422_v15 = vand.u32 4294901760, %v18605_v44 }
 0x2f5   :  { %12438 = vmatprep.subr.mxu1 %v6982_v6  ;;  %v7009_v7 = vsub.f32 %v18572_v20, %v23418_v4  ;;  %v18682_v4 = vsub.f32 %v277_v3, %v18639_v30  ;;  %12413 = vmatprep.subr.mxu0 %v18532_v35  ;;  %v7003_v2 = vand.u32 4294901760, %v7002_v21  ;;  %v23424_v3 = vand.u32 4294901760, %v18618_v32 }
 0x2f6   :  { %23419 = vst [vmem:[#allocation12_spill] sm:$0xff] %v18672_v56  ;;  %12439 = vmatpush3.msra.mxu1 %v6870_v16  ;;  %v6897_v6 = vsub.f32 %v18530_v28, %v23420_v57  ;;  %v7016_v60 = vsub.f32 %v18605_v44, %v23422_v15  ;;  %v18689_v16 = vsub.f32 %v260_v17, %v18653_v63  ;;  %v12004_v33 = vpop.f32.mrf.mxu0  ;;  %v23426_v15 = vand.u32 4294901760, %v18581_v53 }
 0x2f7   :  { %23421 = vst [vmem:[#allocation39_spill] sm:$0xff] %v18682_v4  ;;  %12440 = vmatprep.subr.mxu1 %v6989_v36  ;;  %12414 = vmatpush3.msra.mxu0 %v18522_v37  ;;  %v6810_v57 = vsub.f32 %v18618_v32, %v23424_v3  ;;  %v12005_v22 = vadd.f32 %v12004_v33, %v12003_v38  ;;  %v7010_v17 = vand.u32 4294901760, %v7009_v7  ;;  %v22193_v7 = vand.u32 4294901760, %v18682_v4 }
 0x2f8   :  { %23423 = vst [vmem:[#allocation38_spill] sm:$0xff] %v18689_v16  ;;  %12441 = vmatpush3.msra.mxu1 %v6877_v58  ;;  %v18698_v21 = vsub.f32 %v276_v10, %v18661_v25  ;;  %12415 = vmatprep.subr.mxu0 %v18551_v45  ;;  %v6904_v23 = vsub.f32 %v18581_v53, %v23426_v15  ;;  %v23427_v58 = vand.u32 4294901760, %v18631_v49  ;;  %v6898_v33 = vand.u32 4294901760, %v6897_v6 }
 0x2f9   :  { %12442 = vmatprep.subr.mxu1 %v6996_v27  ;;  %12416 = vmatpush3.msra.mxu0 %v18524_v48  ;;  %v23428_v10 = vand.u32 4294901760, %v18643_v50  ;;  %v5096_v27 = vadd.f32 %v12005_v22, %v18394_v40  ;;  %v7017_v15 = vand.u32 4294901760, %v7016_v60  ;;  %v23430_v6 = vand.u32 4294901760, %v18665_v12 }
 0x2fa   :  { %23425 = vst [vmem:[#allocation24_spill] sm:$0xff] %v18698_v21  ;;  %v6816_v37 = vsub.f32 %v18631_v49, %v23427_v58  ;;  %12443 = vmatpush3.msra.mxu1 %v6884_v8  ;;  %12417 = vmatprep.subr.mxu0 %v18598_v9  ;;  %v23429_v58 = vand.u32 4294901760, %v18584_v41  ;;  %v6811_v8 = vand.u32 4294901760, %v6810_v57  ;;  %v22195_v22 = vand.u32 4294901760, %v18698_v21 }
 0x2fb   :  { %v7023_v38 = vsub.f32 %v18643_v50, %v23428_v10  ;;  %12444 = vmatprep.subr.mxu1 %v7003_v2  ;;  %12418 = vmatpush3.msra.mxu0 %v18612_v19  ;;  %v7030_v40 = vsub.f32 %v18665_v12, %v23430_v6  ;;  %v6905_v60 = vand.u32 4294901760, %v6904_v23  ;;  %v23431_v10 = vand.u32 4294901760, %v18659_v18  ;;  %v12038_v6 = vpop.f32.mrf.mxu1 }
 0x2fc   :  { %v6911_v3 = vsub.f32 %v18584_v41, %v23429_v58  ;;  %12445 = vmatpush3.msra.mxu1 %v6891_v1  ;;  %12419 = vmatprep.subr.mxu0 %v18639_v30  ;;  %v6817_v2 = vand.u32 4294901760, %v6816_v37  ;;  %v22194_v36 = vand.u32 4294901760, %v18689_v16  ;;  %v7037_v57 = vsub.f32 %v18682_v4, %v22193_v7 }
 0x2fd   :  { %12446 = vmatprep.subr.mxu1 %v7010_v17  ;;  %v6918_v58 = vsub.f32 %v18659_v18, %v23431_v10  ;;  %12420 = vmatpush3.msra.mxu0 %v18625_v59  ;;  %v7024_v1 = vand.u32 4294901760, %v7023_v38  ;;  %v23432_v37 = vand.u32 4294901760, %v18672_v56  ;;  %v7031_v10 = vand.u32 4294901760, %v7030_v40  ;;  %v12039_v38 = vpop.f32.mrf.mxu1 }
 0x2fe   :  { %12447 = vmatpush3.msra.mxu1 %v6898_v33  ;;  %12421 = vmatprep.subr.mxu0 %v18661_v25  ;;  %v6912_v23 = vand.u32 4294901760, %v6911_v3  ;;  %v7044_v33 = vsub.f32 %v18698_v21, %v22195_v22  ;;  %v6932_v3 = vsub.f32 %v18689_v16, %v22194_v36  ;;  %v23449_v36 = vld [vmem:[#allocation21_spill] sm:$0xff] }
 0x2ff   :  { %12448 = vmatprep.subr.mxu1 %v7017_v15  ;;  %v6925_v17 = vsub.f32 %v18672_v56, %v23432_v37  ;;  %12422 = vmatpush3.msra.mxu0 %v18653_v63  ;;  %v6919_v7 = vand.u32 4294901760, %v6918_v58  ;;  %v12040_v15 = vadd.f32 %v12039_v38, %v12038_v6  ;;  %v7038_v37 = vand.u32 4294901760, %v7037_v57  ;;  %v23435_v58 = vld [vmem:[#allocation9_spill] sm:$0xff]  ;;  %v23437_v57 = vld [vmem:[#allocation31_spill] sm:$0xff] }
 0x300   :  { %6812 = vmatprep.mubr.f32.mxu0 %v6811_v8  ;;  %12449 = vmatpush3.msra.mxu1 %v6905_v60  ;;  %v7045_v60 = vand.u32 4294901760, %v7044_v33  ;;  %v23438_v6 = vld [vmem:[#allocation33_spill] sm:$0xff]  ;;  %v23442_v33 = vld [vmem:[#allocation8_spill] sm:$0xff]  ;;  %v23443_v38 = vld [vmem:[#allocation15_spill] sm:$0xff] }
 0x301   :  { %6818 = vmatmul.mubr.f32.vlgmr.msra.gmra.mxu0 %v6817_v2  ;;  %12450 = vmatprep.subr.mxu1 %v7024_v1  ;;  %v6926_v8 = vand.u32 4294901760, %v6925_v17  ;;  %v5328_v40 = vadd.f32 %v12040_v15, %v5096_v27  ;;  %v6933_v2 = vand.u32 4294901760, %v6932_v3  ;;  %v23433_v27 = vld [vmem:[#allocation10_spill] sm:$0xff]  ;;  %v23436_v1 = vld [vmem:[#allocation28_spill] sm:$0xff]  ;;  %v23444_v3 = vld [vmem:[#allocation7_spill] sm:$0xff] }
 0x302   :  { %12461 = vmatprep.subr.mxu0 %v18194_v5  ;;  %12451 = vmatpush3.msra.mxu1 %v6912_v23  ;;  %v23439_v23 = vld [vmem:[#allocation20_spill] sm:$0xff]  ;;  %v23440_v17 = vld [vmem:[#allocation14_spill] sm:$0xff]  ;;  %v23445_v15 = vld [vmem:[#allocation35_spill] sm:$0xff] }
 0x303   :  { %12462 = vmatpush3.msra.mxu0 %v18183_v54  ;;  %12452 = vmatprep.subr.mxu1 %v7031_v10  ;;  %v23441_v10 = vld [vmem:[#allocation18_spill] sm:$0xff] }
 0x304   :  { %12463 = vmatprep.subr.mxu0 %v18200_v29  ;;  %12453 = vmatpush3.msra.mxu1 %v6919_v7  ;;  %v23434_v7 = vld [vmem:[#allocation6_spill] sm:$0xff] }
 0x305   :  { %12464 = vmatpush3.msra.mxu0 %v18206_v51  ;;  %12454 = vmatprep.subr.mxu1 %v7038_v37  ;;  %v23446_v37 = vld [vmem:[#allocation37_spill] sm:$0xff] }
 0x306   :  { %12465 = vmatprep.subr.mxu0 %v18227_v0  ;;  %12455 = vmatpush3.msra.mxu1 %v6926_v8  ;;  %v23447_v8 = vld [vmem:[#allocation26_spill] sm:$0xff] }
 0x307   :  { %12466 = vmatpush3.msra.mxu0 %v18246_v47  ;;  %12456 = vmatprep.subr.mxu1 %v7045_v60 }
 0x308   :  { %12467 = vmatprep.subr.mxu0 %v18254_v43  ;;  %12457 = vmatpush3.msra.mxu1 %v6933_v2  ;;  %v23448_v2 = vld [vmem:[#allocation13_spill] sm:$0xff] }
 0x309   :  { %12468 = vmatpush3.msra.mxu0 %v18280_v24  ;;  %7050 = vmatmul.mubr.f32.vlgmr.msra.gmra.mxu1 %v18574_v13  ;;  %v23450_v13 = vld [vmem:[#allocation25_spill] sm:$0xff] }
 0x30a   :  { %12469 = vmatprep.subr.mxu0 %v18311_v39  ;;  %12496 = vmatprep.subr.mxu1 %v18159_v52 }
 0x30b   :  { %12470 = vmatpush3.msra.mxu0 %v18317_v42  ;;  %12497 = vmatpush3.msra.mxu1 %v18161_v55 }
 0x30c   :  { %12471 = vmatprep.subr.mxu0 %v18346_v26  ;;  %12498 = vmatprep.subr.mxu1 %v23433_v27 }
 0x30d   :  { %12472 = vmatpush3.msra.mxu0 %v18352_v46  ;;  %12499 = vmatpush3.msra.mxu1 %v23434_v7 }
 0x30e   :  { %12473 = vmatprep.subr.mxu0 %v18415_v31  ;;  %12500 = vmatprep.subr.mxu1 %v23435_v58 }
 0x30f   :  { %12474 = vmatpush3.msra.mxu0 %v23436_v1  ;;  %12501 = vmatpush3.msra.mxu1 %v23437_v57 }
 0x310   :  { %12475 = vmatprep.subr.mxu0 %v18446_v61  ;;  %12502 = vmatprep.subr.mxu1 %v23438_v6 }
 0x311   :  { %12476 = vmatpush3.msra.mxu0 %v23439_v23  ;;  %12503 = vmatpush3.msra.mxu1 %v23440_v17 }
 0x312   :  { %12477 = vmatprep.subr.mxu0 %v18460_v34  ;;  %12504 = vmatprep.subr.mxu1 %v23441_v10 }
 0x313   :  { %12478 = vmatpush3.msra.mxu0 %v23442_v33  ;;  %12505 = vmatpush3.msra.mxu1 %v23443_v38 }
 0x314   :  { %12479 = vmatprep.subr.mxu0 %v18536_v14  ;;  %12506 = vmatprep.subr.mxu1 %v23444_v3  ;;  %v12073_v60 = vpop.f32.mrf.mxu0 }
 0x315   :  { %12480 = vmatpush3.msra.mxu0 %v23445_v15  ;;  %12507 = vmatpush3.msra.mxu1 %v23446_v37 }
 0x316   :  { %12481 = vmatprep.subr.mxu0 %v18572_v20  ;;  %12508 = vmatprep.subr.mxu1 %v23447_v8  ;;  %v12074_v22 = vpop.f32.mrf.mxu0  ;;  %v23451_v20 = vld [vmem:[#allocation23_spill] sm:$0xff]  ;;  %v23452_v8 = vld [vmem:[#allocation30_spill] sm:$0xff] }
 0x317   :  { %12482 = vmatpush3.msra.mxu0 %v18530_v28  ;;  %12509 = vmatpush3.msra.mxu1 %v23448_v2  ;;  %v12075_v11 = vadd.f32 %v12074_v22, %v12073_v60  ;;  %v23454_v22 = vld [vmem:[#allocation19_spill] sm:$0xff]  ;;  %v23455_v60 = vld [vmem:[#allocation17_spill] sm:$0xff] }
 0x318   :  { %12483 = vmatprep.subr.mxu0 %v18605_v44  ;;  %12510 = vmatprep.subr.mxu1 %v23449_v36  ;;  %v23453_v36 = vld [vmem:[#allocation22_spill] sm:$0xff] }
 0x319   :  { %12484 = vmatpush3.msra.mxu0 %v18581_v53  ;;  %12511 = vmatpush3.msra.mxu1 %v23450_v13  ;;  %v5466_v28 = vadd.f32 %v12075_v11, %v5328_v40  ;;  %v23456_v40 = vld [vmem:[#allocation5_spill] sm:$0xff] }
 0x31a   :  { %12485 = vmatprep.subr.mxu0 %v18643_v50  ;;  %12512 = vmatprep.subr.mxu1 %v23451_v20 }
 0x31b   :  { %12486 = vmatpush3.msra.mxu0 %v18584_v41  ;;  %12513 = vmatpush3.msra.mxu1 %v23452_v8 }
 0x31c   :  { %12487 = vmatprep.subr.mxu0 %v18665_v12  ;;  %12514 = vmatprep.subr.mxu1 %v18465_v62 }
 0x31d   :  { %12488 = vmatpush3.msra.mxu0 %v18659_v18  ;;  %12515 = vmatpush3.msra.mxu1 %v23453_v36  ;;  %v12108_v41 = vpop.f32.mrf.mxu1 }
 0x31e   :  { %12489 = vmatprep.subr.mxu0 %v18682_v4  ;;  %12516 = vmatprep.subr.mxu1 %v23454_v22 }
 0x31f   :  { %12490 = vmatpush3.msra.mxu0 %v18672_v56  ;;  %12517 = vmatpush3.msra.mxu1 %v23455_v60  ;;  %v12109_v11 = vpop.f32.mrf.mxu1  ;;  %v23457_v56 = vand.u32 4294901760, %v18194_v5  ;;  %v23461_v5 = vand.u32 4294901760, %v18227_v0  ;;  %v23466_v0 = vand.u32 4294901760, %v18631_v49 }
 0x320   :  { %12491 = vmatprep.subr.mxu0 %v18698_v21  ;;  %12518 = vmatprep.subr.mxu1 %v18532_v35  ;;  %v12110_v4 = vadd.f32 %v12109_v11, %v12108_v41  ;;  %v23458_v21 = vand.u32 4294901760, %v18183_v54  ;;  %v23460_v41 = vand.u32 4294901760, %v18206_v51  ;;  %v23462_v54 = vand.u32 4294901760, %v18246_v47  ;;  %v304_v11 = vld [vmem:[%s21623_s1 + $0x860] sm:$0xff] }
 0x321   :  { %12492 = vmatpush3.msra.mxu0 %v18689_v16  ;;  %7185 = vmatprep.mubr.f32.mxu0 %v18618_v32  ;;  %v23459_v16 = vand.u32 4294901760, %v18200_v29  ;;  %v23463_v29 = vand.u32 4294901760, %v18254_v43  ;;  %v23464_v51 = vand.u32 4294901760, %v18618_v32  ;;  %v23468_v47 = vand.u32 4294901760, %v18317_v42  ;;  %v323_v43 = vld [vmem:[%s21623_s1 + $0x8f8] sm:$0xff] }
 0x322   :  { %12519 = vmatpush3.msra.mxu1 %v23456_v40  ;;  %7188 = vmatmul.mubr.f32.vlgmr.msra.gmra.mxu0 %v18631_v49  ;;  %v18810_v35 = vadd.f32 %v12110_v4, %v5466_v28  ;;  %v23465_v28 = vand.u32 4294901760, %v18280_v24  ;;  %v307_v24 = vld [vmem:[%s21623_s1 + $0x878] sm:$0xff]  ;;  %v23469_v49 = vand.u32 4294901760, %v18346_v26  ;;  %v23471_v42 = vand.u32 4294901760, %v18415_v31 }
 0x323   :  { %12520 = vmatprep.subr.mxu1 %v18551_v45  ;;  %12531 = vmatprep.subr.mxu0 %v23457_v56  ;;  %v23467_v56 = vand.u32 4294901760, %v18311_v39  ;;  %v23470_v39 = vand.u32 4294901760, %v18352_v46  ;;  %v18861_v26 = vand.u32 4294901760, %v323_v43  ;;  %v18863_v32 = vand.u32 4294901760, %v307_v24 }
 0x324   :  { %12521 = vmatpush3.msra.mxu1 %v18524_v48  ;;  %12532 = vmatpush3.msra.mxu0 %v23458_v21  ;;  %v23472_v4 = vand.u32 4294901760, %v23436_v1  ;;  %v23474_v31 = vand.u32 4294901760, %v18446_v61  ;;  %v305_v61 = vld [vmem:[%s21623_s1 + $0x868] sm:$0xff] }
 0x325   :  { %12522 = vmatprep.subr.mxu1 %v18598_v9  ;;  %12533 = vmatprep.subr.mxu0 %v23459_v16  ;;  %v321_v16 = vld [vmem:[%s21623_s1 + $0x8e8] sm:$0xff] }
 0x326   :  { %12523 = vmatpush3.msra.mxu1 %v18612_v19  ;;  %12534 = vmatpush3.msra.mxu0 %v23460_v41  ;;  %v18887_v1 = vand.u32 4294901760, %v321_v16 }
 0x327   :  { %12524 = vmatprep.subr.mxu1 %v18639_v30  ;;  %12535 = vmatprep.subr.mxu0 %v23461_v5 }
 0x328   :  { %12525 = vmatpush3.msra.mxu1 %v18625_v59  ;;  %12536 = vmatpush3.msra.mxu0 %v23462_v54  ;;  %23478 = vst [vmem:[#allocation9_spill] sm:$0xff] %v18887_v1 }
 0x329   :  { %12526 = vmatprep.subr.mxu1 %v18661_v25  ;;  %12537 = vmatprep.subr.mxu0 %v23463_v29  ;;  %v319_v29 = vld [vmem:[%s21623_s1 + $0x8d8] sm:$0xff] }
 0x32a   :  { %12527 = vmatpush3.msra.mxu1 %v18653_v63  ;;  %7292 = vmatprep.mubr.f32.mxu1 %v23464_v51 }
 0x32b   :  { %12538 = vmatpush3.msra.mxu0 %v23465_v28  ;;  %7296 = vmatmul.mubr.f32.vlgmr.msra.gmra.mxu1 %v23466_v0  ;;  %v23487_v28 = vld [vmem:[#allocation29_spill] sm:$0xff] }
 0x32c   :  { %12539 = vmatprep.subr.mxu0 %v23467_v56  ;;  %12566 = vmatprep.subr.mxu1 %v18159_v52  ;;  %v322_v52 = vld [vmem:[%s21623_s1 + $0x8f0] sm:$0xff]  ;;  %v23488_v0 = vand.u32 4294901760, %v23487_v28  ;;  %v18934_v56 = vand.u32 4294901760, %v304_v11 }
 0x32d   :  { %12540 = vmatpush3.msra.mxu0 %v23468_v47  ;;  %12567 = vmatpush3.msra.mxu1 %v18161_v55  ;;  %v306_v55 = vld [vmem:[%s21623_s1 + $0x870] sm:$0xff]  ;;  %v18868_v46 = vand.u32 4294901760, %v322_v52  ;;  %v303_v47 = vld [vmem:[%s21623_s1 + $0x858] sm:$0xff] }
 0x32e   :  { %12541 = vmatprep.subr.mxu0 %v23469_v49  ;;  %12568 = vmatprep.subr.mxu1 %v23433_v27  ;;  %v18876_v21 = vand.u32 4294901760, %v306_v55  ;;  %v23476_v27 = vand.u32 4294901760, %v23439_v23  ;;  %23489 = vst [vmem:[#allocation33_spill] sm:$0xff] %v18934_v56  ;;  %v23491_v49 = vld [vmem:[#allocation21_spill] sm:$0xff] }
 0x32f   :  { %12542 = vmatpush3.msra.mxu0 %v23470_v39  ;;  %12569 = vmatpush3.msra.mxu1 %v23434_v7  ;;  %23473 = vst [vmem:[#allocation10_spill] sm:$0xff] %v18868_v46  ;;  %v23477_v7 = vand.u32 4294901760, %v18460_v34  ;;  %v23479_v34 = vand.u32 4294901760, %v23442_v33  ;;  %v18902_v23 = vsub.f32 %v322_v52, %v18868_v46  ;;  %v23481_v33 = vand.u32 4294901760, %v23445_v15 }
 0x330   :  { %12543 = vmatprep.subr.mxu0 %v23471_v42  ;;  %12570 = vmatprep.subr.mxu1 %v23435_v58  ;;  %23475 = vst [vmem:[#allocation6_spill] sm:$0xff] %v18876_v21  ;;  %v18885_v58 = vsub.f32 %v307_v24, %v18863_v32  ;;  %v23490_v24 = vand.u32 4294901760, %v18605_v44  ;;  %v318_v44 = vld [vmem:[%s21623_s1 + $0x8d0] sm:$0xff] }
 0x331   :  { %12544 = vmatpush3.msra.mxu0 %v23472_v4  ;;  %12571 = vmatpush3.msra.mxu1 %v23437_v57  ;;  %v320_v57 = vld [vmem:[%s21623_s1 + $0x8e0] sm:$0xff]  ;;  %v18950_v4 = vand.u32 4294901760, %v319_v29 }
 0x332   :  { %12545 = vmatprep.subr.mxu0 %v23474_v31  ;;  %12572 = vmatprep.subr.mxu1 %v23438_v6  ;;  %v18896_v6 = vsub.f32 %v323_v43, %v18861_v26  ;;  %v18918_v41 = vand.u32 4294901760, %v320_v57  ;;  %v22212_v15 = vand.u32 4294901760, %v18885_v58  ;;  %v22210_v43 = vand.u32 4294901760, %v18902_v23 }
 0x333   :  { %12546 = vmatpush3.msra.mxu0 %v23476_v27  ;;  %12573 = vmatpush3.msra.mxu1 %v23440_v17  ;;  %v23480_v17 = vand.u32 4294901760, %v18536_v14  ;;  %v23484_v14 = vld [vmem:[#allocation11_spill] sm:$0xff]  ;;  %23493 = vst [vmem:[#allocation20_spill] sm:$0xff] %v18950_v4  ;;  %v23494_v31 = vand.u32 4294901760, %v18643_v50 }
 0x334   :  { %12547 = vmatprep.subr.mxu0 %v23477_v7  ;;  %12574 = vmatprep.subr.mxu1 %v23441_v10  ;;  %v18908_v10 = vsub.f32 %v306_v55, %v18876_v21  ;;  %23483 = vst [vmem:[#allocation31_spill] sm:$0xff] %v18918_v41  ;;  %v23485_v5 = vand.u32 4294901760, %v23484_v14  ;;  %v22214_v51 = vand.u32 4294901760, %v18896_v6  ;;  %v23492_v55 = vand.u32 4294901760, %v18581_v53  ;;  %v302_v7 = vld [vmem:[%s21623_s1 + $0x850] sm:$0xff] }
 0x335   :  { %12548 = vmatpush3.msra.mxu0 %v23479_v34  ;;  %12575 = vmatpush3.msra.mxu1 %v23443_v38  ;;  %v18916_v38 = vand.u32 4294901760, %v305_v61  ;;  %v18966_v53 = vand.u32 4294901760, %v303_v47  ;;  %v18971_v27 = vsub.f32 %v18885_v58, %v22212_v15  ;;  %v18982_v34 = vsub.f32 %v304_v11, %v18934_v56 }
 0x336   :  { %12549 = vmatprep.subr.mxu0 %v23480_v17  ;;  %12576 = vmatprep.subr.mxu1 %v23444_v3  ;;  %v23486_v3 = vld [vmem:[#allocation26_spill] sm:$0xff]  ;;  %v22209_v39 = vand.u32 4294901760, %v18908_v10  ;;  %v18987_v17 = vsub.f32 %v18902_v23, %v22210_v43  ;;  %v18992_v14 = vand.u32 4294901760, %v318_v44  ;;  %v19002_v11 = vand.u32 4294901760, %v302_v7 }
 0x337   :  { %12550 = vmatpush3.msra.mxu0 %v23481_v33  ;;  %12577 = vmatpush3.msra.mxu1 %v23446_v37  ;;  %23482 = vst [vmem:[#allocation28_spill] sm:$0xff] %v18916_v38  ;;  %v12143_v54 = vpop.f32.mrf.mxu0  ;;  %v18929_v37 = vsub.f32 %v321_v16, %v18887_v1  ;;  %v18948_v42 = vsub.f32 %v305_v61, %v18916_v38  ;;  %23495 = vst [vmem:[#allocation14_spill] sm:$0xff] %v18966_v53  ;;  %v23496_v61 = vld [vmem:[#allocation16_spill] sm:$0xff]  ;;  %v23498_v33 = vand.u32 4294901760, %v18665_v12  ;;  %v317_v12 = vld [vmem:[%s21623_s1 + $0x8c8] sm:$0xff] }
 0x338   :  { %12551 = vmatprep.subr.mxu0 %v23485_v5  ;;  %12578 = vmatprep.subr.mxu1 %v23486_v3  ;;  %v18956_v16 = vsub.f32 %v320_v57, %v18918_v41  ;;  %23499 = vst [vmem:[#allocation18_spill] sm:$0xff] %v18992_v14  ;;  %23501 = vst [vmem:[#allocation8_spill] sm:$0xff] %v19002_v11 }
 0x339   :  { %12552 = vmatpush3.msra.mxu0 %v23488_v0  ;;  %12579 = vmatpush3.msra.mxu1 %v23448_v2  ;;  %v12144_v52 = vpop.f32.mrf.mxu0  ;;  %v22208_v50 = vand.u32 4294901760, %v18929_v37  ;;  %v22211_v5 = vand.u32 4294901760, %v18948_v42 }
 0x33a   :  { %12553 = vmatprep.subr.mxu0 %v23490_v24  ;;  %12580 = vmatprep.subr.mxu1 %v23491_v49  ;;  %v12145_v2 = vadd.f32 %v12144_v52, %v12143_v54  ;;  %v22213_v3 = vand.u32 4294901760, %v18956_v16  ;;  %v19013_v54 = vsub.f32 %v319_v29, %v18950_v4  ;;  %v23504_v24 = vld [vmem:[#allocation12_spill] sm:$0xff]  ;;  %v23522_v52 = vld [vmem:[#allocation27_spill] sm:$0xff] }
 0x33b   :  { %12554 = vmatpush3.msra.mxu0 %v23492_v55  ;;  %12581 = vmatpush3.msra.mxu1 %v23450_v13  ;;  %v18964_v13 = vsub.f32 %v18896_v6, %v22214_v51  ;;  %v19024_v0 = vsub.f32 %v18929_v37, %v22208_v50  ;;  %v23505_v49 = vand.u32 4294901760, %v23504_v24  ;;  %v23511_v24 = vld [vmem:[#allocation38_spill] sm:$0xff]  ;;  %v19059_v50 = vsub.f32 %v18948_v42, %v22211_v5 }
 0x33c   :  { %12555 = vmatprep.subr.mxu0 %v23494_v31  ;;  %12582 = vmatprep.subr.mxu1 %v23451_v20  ;;  %v23497_v20 = vand.u32 4294901760, %v23496_v61  ;;  %v5742_v57 = vadd.f32 %v12145_v2, %v18810_v35  ;;  %v23500_v35 = vand.u32 4294901760, %v18659_v18  ;;  %v23502_v18 = vld [vmem:[#allocation39_spill] sm:$0xff]  ;;  %v22215_v2 = vand.u32 4294901760, %v18982_v34  ;;  %v23506_v31 = vld [vmem:[#allocation24_spill] sm:$0xff] }
 0x33d   :  { %12583 = vmatpush3.msra.mxu1 %v23452_v8  ;;  %v18997_v8 = vsub.f32 %v18908_v10, %v22209_v39  ;;  %v23503_v28 = vand.u32 4294901760, %v23502_v18  ;;  %v23507_v61 = vand.u32 4294901760, %v23506_v31  ;;  %v316_v18 = vld [vmem:[%s21623_s1 + $0x8c0] sm:$0xff]  ;;  %v23513_v31 = vld [vmem:[#allocation34_spill] sm:$0xff]  ;;  %v19064_v39 = vsub.f32 %v18956_v16, %v22213_v3 }
 0x33e   :  { %12556 = vmatpush3.msra.mxu0 %v23497_v20  ;;  %12584 = vmatprep.subr.mxu1 %v18465_v62  ;;  %v301_v62 = vld [vmem:[%s21623_s1 + $0x848] sm:$0xff]  ;;  %v23508_v20 = vld [vmem:[#allocation36_spill] sm:$0xff]  ;;  %v19078_v3 = vand.u32 4294901760, %v316_v18  ;;  %v19083_v51 = vsub.f32 %v18982_v34, %v22215_v2 }
 0x33f   :  { %12557 = vmatprep.subr.mxu0 %v23498_v33  ;;  %12585 = vmatpush3.msra.mxu1 %v23453_v36  ;;  %v19019_v36 = vsub.f32 %v303_v47, %v18966_v53  ;;  %v300_v47 = vld [vmem:[%s21623_s1 + $0x840] sm:$0xff]  ;;  %v19040_v33 = vand.u32 4294901760, %v317_v12 }
 0x340   :  { %12558 = vmatpush3.msra.mxu0 %v23500_v35  ;;  %12586 = vmatprep.subr.mxu1 %v23454_v22  ;;  %v12178_v29 = vpop.f32.mrf.mxu1  ;;  %v19042_v35 = vand.u32 4294901760, %v301_v62  ;;  %v19073_v5 = vand.u32 4294901760, %v300_v47  ;;  %23516 = vst [vmem:[#allocation37_spill] sm:$0xff] %v19078_v3  ;;  %v298_v22 = vld [vmem:[%s21623_s1 + $0x830] sm:$0xff] }
 0x341   :  { %12559 = vmatprep.subr.mxu0 %v23503_v28  ;;  %12587 = vmatpush3.msra.mxu1 %v23455_v60  ;;  %23509 = vst [vmem:[#allocation15_spill] sm:$0xff] %v19040_v33  ;;  %v19048_v28 = vsub.f32 %v318_v44, %v18992_v14  ;;  %v315_v44 = vld [vmem:[%s21623_s1 + $0x8b8] sm:$0xff]  ;;  %v22217_v15 = vand.u32 4294901760, %v19019_v36 }
 0x342   :  { %12560 = vmatpush3.msra.mxu0 %v23505_v49  ;;  %12588 = vmatprep.subr.mxu1 %v23508_v20  ;;  %23510 = vst [vmem:[#allocation7_spill] sm:$0xff] %v19042_v35  ;;  %v23512_v49 = vand.u32 4294901760, %v23511_v24  ;;  %v19054_v20 = vsub.f32 %v302_v7, %v19002_v11  ;;  %v22216_v24 = vand.u32 4294901760, %v19013_v54  ;;  %v23514_v7 = vld [vmem:[#allocation32_spill] sm:$0xff]  ;;  %23515 = vst [vmem:[#allocation35_spill] sm:$0xff] %v19073_v5  ;;  %v19101_v43 = vand.u32 4294901760, %v315_v44 }
 0x343   :  { %12561 = vmatprep.subr.mxu0 %v23507_v61  ;;  %7462 = vmatprep.mubr.f32.mxu0 %v23513_v31  ;;  %v12179_v61 = vpop.f32.mrf.mxu1  ;;  %v19099_v2 = vsub.f32 %v301_v62, %v19042_v35  ;;  %v19123_v55 = vsub.f32 %v300_v47, %v19073_v5  ;;  %v19142_v47 = vld [vmem:[%s21623_s1 + $0x8a8] sm:$0xff] }
 0x344   :  { %12562 = vmatpush3.msra.mxu0 %v23512_v49  ;;  %12589 = vmatpush3.msra.mxu1 %v23456_v40  ;;  %v12180_v49 = vadd.f32 %v12179_v61, %v12178_v29  ;;  %v299_v40 = vld [vmem:[%s21623_s1 + $0x838] sm:$0xff]  ;;  %v13260_v29 = vld [vmem:[%s21622_s0 + $0x20] ss:$48 sps:$4 sm:$0xff]   ;;  %23518 = vst [vmem:[#allocation25_spill] sm:$0xff] %v19101_v43 }
 0x345   :  { %7464 = vmatmul.mubr.f32.vlgmr.msra.gmra.mxu0 %v23514_v7  ;;  %12590 = vmatprep.subr.mxu1 %v18551_v45  ;;  %v13262_v45 = vld [vmem:[%s21622_s0 + $0x80] ss:$48 sps:$4 sm:$0xff]   ;;  %23517 = vst [vmem:[#allocation13_spill] sm:$0xff] %v19099_v2  ;;  %23519 = vst [vmem:[#allocation23_spill] sm:$0xff] %v19123_v55  ;;  %v589_v62 = vrot.slane %v13260_v29, %v23522_v52 }
 0x346   :  { %12601 = vmatprep.subr.mxu0 %v18861_v26  ;;  %12591 = vmatpush3.msra.mxu1 %v18524_v48  ;;  %v19096_v61 = vadd.f32 %v12180_v49, %v5742_v57  ;;  %v19113_v57 = vsub.f32 %v19013_v54, %v22216_v24  ;;  %v19117_v49 = vsub.f32 %v317_v12, %v19040_v33  ;;  %v19125_v48 = vand.u32 4294901760, %v299_v40  ;;  %v314_v12 = vld [vmem:[%s21623_s1 + $0x8b0] sm:$0xff] }
 0x347   :  { %12602 = vmatpush3.msra.mxu0 %v18863_v32  ;;  %12592 = vmatprep.subr.mxu1 %v18598_v9  ;;  %v19130_v24 = vsub.f32 %v19019_v36, %v22217_v15  ;;  %v297_v15 = vld [vmem:[%s21623_s1 + $0x828] sm:$0xff]  ;;  %v19148_v9 = vsub.f32 %v316_v18, %v19078_v3  ;;  %v19162_v18 = vsub.f32 %v315_v44, %v19101_v43  ;;  %v19167_v29 = vand.u32 4294901760, %v314_v12 }
 0x348   :  { %12603 = vmatprep.subr.mxu0 %v18868_v46  ;;  %12593 = vmatpush3.msra.mxu1 %v18612_v19  ;;  %23520 = vst [vmem:[#allocation30_spill] sm:$0xff] %v19125_v48  ;;  %v19137_v19 = vand.u32 4294901760, %v298_v22  ;;  %v19178_v44 = vsub.f32 %v299_v40, %v19125_v48  ;;  %v19184_v46 = vand.u32 4294901760, %v297_v15  ;;  %v312_v40 = vld [vmem:[%s21623_s1 + $0x8a0] sm:$0xff] }
 0x349   :  { %12604 = vmatpush3.msra.mxu0 %v18876_v21  ;;  %12594 = vmatprep.subr.mxu1 %v18639_v30  ;;  %v603_v30 = vrot.slane %v13262_v45, %v23522_v52  ;;  %v23524_v45 = vand.u32 4294901760, %v19054_v20 }
 0x34a   :  { %12605 = vmatprep.subr.mxu0 %v18887_v1  ;;  %23521 = vst [vmem:[#allocation22_spill] sm:$0xff] %v19137_v19  ;;  %12595 = vmatpush3.msra.mxu1 %v18625_v59  ;;  %v23523_v1 = vand.u32 4294901760, %v19048_v28  ;;  %23525 = vst [vmem:[#allocation19_spill] sm:$0xff] %v19178_v44  ;;  %v19182_v59 = vand.u32 4294901760, %v19142_v47 }
 0x34b   :  { %12606 = vmatpush3.msra.mxu0 %v18916_v38  ;;  %12596 = vmatprep.subr.mxu1 %v18661_v25  ;;  %v19172_v60 = vsub.f32 %v19054_v20, %v23524_v45  ;;  %23527 = vst [vmem:[#allocation5_spill] sm:$0xff] %v19184_v46  ;;  %v296_v45 = vld [vmem:[%s21623_s1 + $0x820] sm:$0xff]  ;;  %v612_v52 = vcombine.high %v589_v62, %v603_v30  ;;  %v311_v38 = vld [vmem:[%s21623_s1 + $0x898] sm:$0xff]  ;;  %v23538_v25 = vand.u32 4294901760, %v19148_v9 }
 0x34c   :  { %v19158_v21 = vsub.f32 %v19048_v28, %v23523_v1  ;;  %12607 = vmatprep.subr.mxu0 %v18918_v41  ;;  %12597 = vmatpush3.msra.mxu1 %v18653_v63  ;;  %23526 = vst [vmem:[#allocation17_spill] sm:$0xff] %v19182_v59  ;;  %v295_v63 = vld [vmem:[%s21623_s1 + $0x818] sm:$0xff]  ;;  %v23529_v41 = vand.u32 4294901760, %v18964_v13  ;;  %v611_v1 = vcombine.low %v589_v62, %v603_v30  ;;  %v23532_v13 = vand.u32 4294901760, %v19117_v49 }
 0x34d   :  { %7566 = vmatprep.mubr.f32.mxu1 %v23513_v31  ;;  %12608 = vmatpush3.msra.mxu0 %v18934_v56  ;;  %v19195_v31 = vsub.f32 %v298_v22, %v19137_v19  ;;  %v23534_v62 = vand.u32 4294901760, %v18987_v17  ;;  %v19232_v30 = vsub.f32 %v297_v15, %v19184_v46  ;;  %v19246_v17 = vsub.f32 %v19148_v9, %v23538_v25 }
 0x34e   :  { %7568 = vmatmul.mubr.f32.vlgmr.msra.gmra.mxu1 %v23514_v7  ;;  %12609 = vmatprep.subr.mxu0 %v18950_v4  ;;  %v23530_v7 = vand.u32 4294901760, %v19099_v2  ;;  %v23531_v4 = vand.u32 4294901760, %v18971_v27  ;;  %v19222_v56 = vsub.f32 %v19117_v49, %v23532_v13  ;;  %v23537_v13 = vand.u32 4294901760, %v18997_v8 }
 0x34f   :  { %23528 = vst [vmem:[#allocation11_spill] sm:$0xff] %v19195_v31  ;;  %12636 = vmatprep.subr.mxu1 %v23529_v41  ;;  %12610 = vmatpush3.msra.mxu0 %v18966_v53  ;;  %23535 = vst [vmem:[#allocation29_spill] sm:$0xff] %v19232_v30  ;;  %v19238_v41 = vsub.f32 %v314_v12, %v19167_v29  ;;  %v23539_v15 = vand.u32 4294901760, %v19123_v55  ;;  %v310_v12 = vld [vmem:[%s21623_s1 + $0x890] sm:$0xff]  ;;  %v19258_v27 = vand.u32 4294901760, %v612_v52  ;;  %v23541_v8 = vand.u32 4294901760, %v19024_v0 }
 0x350   :  { %v19209_v22 = vsub.f32 %v19099_v2, %v23530_v7  ;;  %12637 = vmatpush3.msra.mxu1 %v23531_v4  ;;  %v19224_v7 = vand.u32 4294901760, %v296_v45  ;;  %v19226_v2 = vand.u32 4294901760, %v295_v63  ;;  %12611 = vmatprep.subr.mxu0 %v18992_v14  ;;  %v19234_v4 = vand.u32 4294901760, %v312_v40 }
 0x351   :  { %12638 = vmatprep.subr.mxu1 %v23534_v62  ;;  %12612 = vmatpush3.msra.mxu0 %v19002_v11  ;;  %v19251_v62 = vsub.f32 %v19123_v55, %v23539_v15  ;;  %v19253_v14 = vand.u32 4294901760, %v311_v38  ;;  %23540 = vst [vmem:[#allocation16_spill] sm:$0xff] %v19258_v27  ;;  %v294_v11 = vld [vmem:[%s21623_s1 + $0x810] sm:$0xff]  ;;  %v19274_v53 = vsub.f32 %v19142_v47, %v19182_v59  ;;  %v19276_v55 = vand.u32 4294901760, %v611_v1  ;;  %v293_v47 = vld [vmem:[%s21623_s1 + $0x808] sm:$0xff] }
 0x352   :  { %23533 = vst [vmem:[#allocation26_spill] sm:$0xff] %v19224_v7  ;;  %23536 = vst [vmem:[#allocation21_spill] sm:$0xff] %v19234_v4  ;;  %12639 = vmatpush3.msra.mxu1 %v23537_v13  ;;  %12613 = vmatprep.subr.mxu0 %v19040_v33  ;;  %v7732_v25 = vand.u32 4294901760, %v19209_v22  ;;  %v23542_v13 = vand.u32 4294901760, %v19162_v18  ;;  %v23545_v0 = vand.u32 4294901760, %v19059_v50  ;;  %v7844_v22 = vand.u32 4294901760, %v19222_v56 }
 0x353   :  { %12640 = vmatprep.subr.mxu1 %v23541_v8  ;;  %23543 = vst [vmem:[#allocation39_spill] sm:$0xff] %v19274_v53  ;;  %23544 = vst [vmem:[#allocation12_spill] sm:$0xff] %v19276_v55  ;;  %12614 = vmatpush3.msra.mxu0 %v19042_v35  ;;  %v19283_v8 = vsub.f32 %v296_v45, %v19224_v7  ;;  %v23547_v35 = vand.u32 4294901760, %v19064_v39  ;;  %v23548_v50 = vand.u32 4294901760, %v19178_v44  ;;  %v19300_v45 = vand.u32 4294901760, %v310_v12 }
 0x354   :  { %v19267_v15 = vsub.f32 %v19162_v18, %v23542_v13  ;;  %12641 = vmatpush3.msra.mxu1 %v23545_v0  ;;  %v19286_v13 = vsub.f32 %v295_v63, %v19226_v2  ;;  %12615 = vmatprep.subr.mxu0 %v19078_v3  ;;  %v309_v0 = vld [vmem:[%s21623_s1 + $0x888] sm:$0xff]  ;;  %v19307_v33 = vsub.f32 %v312_v40, %v19234_v4  ;;  %v23549_v39 = vand.u32 4294901760, %v19083_v51  ;;  %v292_v63 = vld [vmem:[%s21623_s1 + $0x800] sm:$0xff] }
 0x355   :  { %12642 = vmatprep.subr.mxu1 %v23547_v35  ;;  %v19298_v56 = vsub.f32 %v19178_v44, %v23548_v50  ;;  %12616 = vmatpush3.msra.mxu0 %v19073_v5  ;;  %v7851_v35 = vand.u32 4294901760, %v19246_v17  ;;  %v7739_v50 = vand.u32 4294901760, %v19251_v62  ;;  %v19314_v3 = vand.u32 4294901760, %v294_v11  ;;  %v308_v62 = vld [vmem:[%s21623_s1 + $0x880] sm:$0xff] }
 0x356   :  { %23546 = vst [vmem:[#allocation24_spill] sm:$0xff] %v19286_v13  ;;  %12643 = vmatpush3.msra.mxu1 %v23549_v39  ;;  %v19320_v44 = vsub.f32 %v612_v52, %v19258_v27  ;;  %12617 = vmatprep.subr.mxu0 %v19101_v43  ;;  %v23550_v40 = vand.u32 4294901760, %v19113_v57  ;;  %v7858_v51 = vand.u32 4294901760, %v19267_v15  ;;  %v19327_v39 = vand.u32 4294901760, %v293_v47 }
 0x357   :  { %v19333_v5 = vsub.f32 %v611_v1, %v19276_v55  ;;  %12618 = vmatpush3.msra.mxu0 %v19125_v48  ;;  %v23551_v52 = vand.u32 4294901760, %v19130_v24  ;;  %v23552_v57 = vand.u32 4294901760, %v19195_v31  ;;  %v19345_v43 = vsub.f32 %v311_v38, %v19253_v14  ;;  %7910 = vmatprep.mubr.f32.mxu1 %v19258_v27 }
 0x358   :  { %12644 = vmatprep.subr.mxu1 %v23550_v40  ;;  %v19341_v40 = vand.u32 4294901760, %v309_v0  ;;  %12619 = vmatprep.subr.mxu0 %v19167_v29  ;;  %v23553_v1 = vand.u32 4294901760, %v19158_v21  ;;  %v7746_v48 = vand.u32 4294901760, %v19298_v56  ;;  %v23554_v24 = vand.u32 4294901760, %v19238_v41 }
 0x359   :  { %12645 = vmatpush3.msra.mxu1 %v23551_v52  ;;  %v7752_v15 = vsub.f32 %v19195_v31, %v23552_v57  ;;  %v19355_v31 = vand.u32 4294901760, %v292_v63  ;;  %12620 = vmatpush3.msra.mxu0 %v19137_v19  ;;  %v23555_v38 = vand.u32 4294901760, %v19172_v60  ;;  %v19361_v17 = vsub.f32 %v294_v11, %v19314_v3 }
 0x35a   :  { %12646 = vmatprep.subr.mxu1 %v23553_v1  ;;  %v7864_v52 = vsub.f32 %v19238_v41, %v23554_v24  ;;  %v19363_v21 = vand.u32 4294901760, %v308_v62  ;;  %v19367_v1 = vsub.f32 %v310_v12, %v19300_v45  ;;  %12621 = vmatprep.subr.mxu0 %v19182_v59  ;;  %v23556_v24 = vand.u32 4294901760, %v19274_v53 }
 0x35b   :  { %12647 = vmatpush3.msra.mxu1 %v23555_v38  ;;  %v19374_v60 = vsub.f32 %v293_v47, %v19327_v39  ;;  %v12213_v38 = vpop.f32.mrf.mxu0  ;;  %12622 = vmatpush3.msra.mxu0 %v19184_v46  ;;  %v7753_v12 = vand.u32 4294901760, %v7752_v15  ;;  %v23558_v56 = vand.u32 4294901760, %v19232_v30  ;;  %v23560_v11 = vand.u32 4294901760, %v19307_v33 }
 0x35c   :  { %12648 = vmatprep.subr.mxu1 %v7844_v22  ;;  %v7871_v57 = vsub.f32 %v19274_v53, %v23556_v24  ;;  %v19384_v24 = vsub.f32 %v309_v0, %v19341_v40  ;;  %12623 = vmatprep.subr.mxu0 %v19234_v4  ;;  %v7865_v47 = vand.u32 4294901760, %v7864_v52  ;;  %v23562_v0 = vand.u32 4294901760, %v19320_v44 }
 0x35d   :  { %23557 = vst [vmem:[#allocation36_spill] sm:$0xff] %v19374_v60  ;;  %12649 = vmatpush3.msra.mxu1 %v7732_v25  ;;  %v7759_v22 = vsub.f32 %v19232_v30, %v23558_v56  ;;  %v7878_v19 = vsub.f32 %v19307_v33, %v23560_v11  ;;  %v19391_v25 = vsub.f32 %v292_v63, %v19355_v31  ;;  %v12214_v46 = vpop.f32.mrf.mxu0  ;;  %v23564_v11 = vand.u32 4294901760, %v19283_v8 }
 0x35e   :  { %23559 = vst [vmem:[#allocation38_spill] sm:$0xff] %v19384_v24  ;;  %12650 = vmatprep.subr.mxu1 %v7851_v35  ;;  %12624 = vmatpush3.msra.mxu0 %v19224_v7  ;;  %v7672_v56 = vsub.f32 %v19320_v44, %v23562_v0  ;;  %v12215_v59 = vadd.f32 %v12214_v46, %v12213_v38  ;;  %v7872_v63 = vand.u32 4294901760, %v7871_v57  ;;  %v22267_v57 = vand.u32 4294901760, %v19384_v24 }
 0x35f   :  { %23561 = vst [vmem:[#allocation34_spill] sm:$0xff] %v19391_v25  ;;  %12651 = vmatpush3.msra.mxu1 %v7739_v50  ;;  %v19400_v52 = vsub.f32 %v308_v62, %v19363_v21  ;;  %12625 = vmatprep.subr.mxu0 %v19253_v14  ;;  %v7766_v15 = vsub.f32 %v19283_v8, %v23564_v11  ;;  %v23565_v50 = vand.u32 4294901760, %v19333_v5  ;;  %v7760_v46 = vand.u32 4294901760, %v7759_v22 }
 0x360   :  { %12652 = vmatprep.subr.mxu1 %v7858_v51  ;;  %12626 = vmatpush3.msra.mxu0 %v19226_v2  ;;  %v23566_v62 = vand.u32 4294901760, %v19345_v43  ;;  %v5958_v51 = vadd.f32 %v12215_v59, %v19096_v61  ;;  %v7879_v11 = vand.u32 4294901760, %v7878_v19  ;;  %v23568_v22 = vand.u32 4294901760, %v19367_v1 }
 0x361   :  { %23563 = vst [vmem:[#allocation32_spill] sm:$0xff] %v19400_v52  ;;  %v7678_v7 = vsub.f32 %v19333_v5, %v23565_v50  ;;  %12653 = vmatpush3.msra.mxu1 %v7746_v48  ;;  %12627 = vmatprep.subr.mxu0 %v19300_v45  ;;  %v23567_v50 = vand.u32 4294901760, %v19286_v13  ;;  %v7673_v48 = vand.u32 4294901760, %v7672_v56  ;;  %v22269_v59 = vand.u32 4294901760, %v19400_v52 }
 0x362   :  { %v7885_v38 = vsub.f32 %v19345_v43, %v23566_v62  ;;  %12654 = vmatprep.subr.mxu1 %v7865_v47  ;;  %12628 = vmatpush3.msra.mxu0 %v19314_v3  ;;  %v7892_v61 = vsub.f32 %v19367_v1, %v23568_v22  ;;  %v7767_v19 = vand.u32 4294901760, %v7766_v15  ;;  %v23569_v62 = vand.u32 4294901760, %v19361_v17  ;;  %v12248_v22 = vpop.f32.mrf.mxu1 }
 0x363   :  { %v7773_v0 = vsub.f32 %v19286_v13, %v23567_v50  ;;  %12655 = vmatpush3.msra.mxu1 %v7753_v12  ;;  %12629 = vmatprep.subr.mxu0 %v19341_v40  ;;  %v7679_v47 = vand.u32 4294901760, %v7678_v7  ;;  %v22268_v35 = vand.u32 4294901760, %v19391_v25  ;;  %v7899_v56 = vsub.f32 %v19384_v24, %v22267_v57 }
 0x364   :  { %12656 = vmatprep.subr.mxu1 %v7872_v63  ;;  %v7780_v50 = vsub.f32 %v19361_v17, %v23569_v62  ;;  %12630 = vmatpush3.msra.mxu0 %v19327_v39  ;;  %v7886_v12 = vand.u32 4294901760, %v7885_v38  ;;  %v23570_v7 = vand.u32 4294901760, %v19374_v60  ;;  %v7893_v62 = vand.u32 4294901760, %v7892_v61  ;;  %v12249_v38 = vpop.f32.mrf.mxu1 }
 0x365   :  { %12657 = vmatpush3.msra.mxu1 %v7760_v46  ;;  %12631 = vmatprep.subr.mxu0 %v19363_v21  ;;  %v7774_v15 = vand.u32 4294901760, %v7773_v0  ;;  %v7906_v46 = vsub.f32 %v19400_v52, %v22269_v59  ;;  %v7794_v0 = vsub.f32 %v19391_v25, %v22268_v35  ;;  %v23587_v35 = vld [vmem:[#allocation37_spill] sm:$0xff] }
 0x366   :  { %12658 = vmatprep.subr.mxu1 %v7879_v11  ;;  %v7787_v63 = vsub.f32 %v19374_v60, %v23570_v7  ;;  %12632 = vmatpush3.msra.mxu0 %v19355_v31  ;;  %v7781_v57 = vand.u32 4294901760, %v7780_v50  ;;  %v12250_v11 = vadd.f32 %v12249_v38, %v12248_v22  ;;  %v7900_v7 = vand.u32 4294901760, %v7899_v56  ;;  %v23573_v50 = vld [vmem:[#allocation9_spill] sm:$0xff]  ;;  %v23575_v56 = vld [vmem:[#allocation28_spill] sm:$0xff]  ;;  %v23576_v22 = vld [vmem:[#allocation31_spill] sm:$0xff] }
 0x367   :  { %7674 = vmatprep.mubr.f32.mxu0 %v7673_v48  ;;  %12659 = vmatpush3.msra.mxu1 %v7767_v19  ;;  %v7907_v19 = vand.u32 4294901760, %v7906_v46  ;;  %v23580_v46 = vld [vmem:[#allocation19_spill] sm:$0xff]  ;;  %v23581_v38 = vld [vmem:[#allocation14_spill] sm:$0xff] }
 0x368   :  { %7680 = vmatmul.mubr.f32.vlgmr.msra.gmra.mxu0 %v7679_v47  ;;  %12660 = vmatprep.subr.mxu1 %v7886_v12  ;;  %v7788_v48 = vand.u32 4294901760, %v7787_v63  ;;  %v6190_v61 = vadd.f32 %v12250_v11, %v5958_v51  ;;  %v7795_v47 = vand.u32 4294901760, %v7794_v0  ;;  %v23571_v51 = vld [vmem:[#allocation10_spill] sm:$0xff]  ;;  %v23574_v12 = vld [vmem:[#allocation13_spill] sm:$0xff]  ;;  %v23583_v11 = vld [vmem:[#allocation11_spill] sm:$0xff] }
 0x369   :  { %12671 = vmatprep.subr.mxu0 %v18896_v6  ;;  %12661 = vmatpush3.msra.mxu1 %v7774_v15  ;;  %v23577_v15 = vld [vmem:[#allocation23_spill] sm:$0xff]  ;;  %v23578_v63 = vld [vmem:[#allocation33_spill] sm:$0xff]  ;;  %v23582_v0 = vld [vmem:[#allocation18_spill] sm:$0xff] }
 0x36a   :  { %12672 = vmatpush3.msra.mxu0 %v18885_v58  ;;  %12662 = vmatprep.subr.mxu1 %v7893_v62  ;;  %v23579_v62 = vld [vmem:[#allocation20_spill] sm:$0xff] }
 0x36b   :  { %12673 = vmatprep.subr.mxu0 %v18902_v23  ;;  %12663 = vmatpush3.msra.mxu1 %v7781_v57  ;;  %v23572_v57 = vld [vmem:[#allocation6_spill] sm:$0xff] }
 0x36c   :  { %12674 = vmatpush3.msra.mxu0 %v18908_v10  ;;  %12664 = vmatprep.subr.mxu1 %v7900_v7  ;;  %v23584_v7 = vld [vmem:[#allocation8_spill] sm:$0xff] }
 0x36d   :  { %12675 = vmatprep.subr.mxu0 %v18929_v37  ;;  %12665 = vmatpush3.msra.mxu1 %v7788_v48  ;;  %v23585_v48 = vld [vmem:[#allocation15_spill] sm:$0xff] }
 0x36e   :  { %12676 = vmatpush3.msra.mxu0 %v18948_v42  ;;  %12666 = vmatprep.subr.mxu1 %v7907_v19 }
 0x36f   :  { %12677 = vmatprep.subr.mxu0 %v18956_v16  ;;  %12667 = vmatpush3.msra.mxu1 %v7795_v47  ;;  %v23586_v47 = vld [vmem:[#allocation7_spill] sm:$0xff] }
 0x370   :  { %12678 = vmatpush3.msra.mxu0 %v18982_v34  ;;  %7912 = vmatmul.mubr.f32.vlgmr.msra.gmra.mxu1 %v19276_v55  ;;  %v23588_v55 = vld [vmem:[#allocation35_spill] sm:$0xff] }
 0x371   :  { %12679 = vmatprep.subr.mxu0 %v19013_v54  ;;  %12706 = vmatprep.subr.mxu1 %v18861_v26 }
 0x372   :  { %12680 = vmatpush3.msra.mxu0 %v19019_v36  ;;  %12707 = vmatpush3.msra.mxu1 %v18863_v32 }
 0x373   :  { %12681 = vmatprep.subr.mxu0 %v19048_v28  ;;  %12708 = vmatprep.subr.mxu1 %v23571_v51 }
 0x374   :  { %12682 = vmatpush3.msra.mxu0 %v19054_v20  ;;  %12709 = vmatpush3.msra.mxu1 %v23572_v57 }
 0x375   :  { %12683 = vmatprep.subr.mxu0 %v19117_v49  ;;  %12710 = vmatprep.subr.mxu1 %v23573_v50 }
 0x376   :  { %12684 = vmatpush3.msra.mxu0 %v23574_v12  ;;  %12711 = vmatpush3.msra.mxu1 %v23575_v56 }
 0x377   :  { %12685 = vmatprep.subr.mxu0 %v19148_v9  ;;  %12712 = vmatprep.subr.mxu1 %v23576_v22 }
 0x378   :  { %12686 = vmatpush3.msra.mxu0 %v23577_v15  ;;  %12713 = vmatpush3.msra.mxu1 %v23578_v63 }
 0x379   :  { %12687 = vmatprep.subr.mxu0 %v19162_v18  ;;  %12714 = vmatprep.subr.mxu1 %v23579_v62 }
 0x37a   :  { %12688 = vmatpush3.msra.mxu0 %v23580_v46  ;;  %12715 = vmatpush3.msra.mxu1 %v23581_v38 }
 0x37b   :  { %12689 = vmatprep.subr.mxu0 %v19238_v41  ;;  %12716 = vmatprep.subr.mxu1 %v23582_v0  ;;  %v12283_v19 = vpop.f32.mrf.mxu0 }
 0x37c   :  { %12690 = vmatpush3.msra.mxu0 %v23583_v11  ;;  %12717 = vmatpush3.msra.mxu1 %v23584_v7 }
 0x37d   :  { %12691 = vmatprep.subr.mxu0 %v19274_v53  ;;  %12718 = vmatprep.subr.mxu1 %v23585_v48  ;;  %v12284_v59 = vpop.f32.mrf.mxu0  ;;  %v23589_v53 = vld [vmem:[#allocation25_spill] sm:$0xff]  ;;  %v23590_v48 = vld [vmem:[#allocation30_spill] sm:$0xff] }
 0x37e   :  { %12692 = vmatpush3.msra.mxu0 %v19232_v30  ;;  %12719 = vmatpush3.msra.mxu1 %v23586_v47  ;;  %v12285_v27 = vadd.f32 %v12284_v59, %v12283_v19  ;;  %v23592_v59 = vld [vmem:[#allocation17_spill] sm:$0xff] }
 0x37f   :  { %12693 = vmatprep.subr.mxu0 %v19307_v33  ;;  %12720 = vmatprep.subr.mxu1 %v23587_v35  ;;  %v23591_v35 = vld [vmem:[#allocation22_spill] sm:$0xff]  ;;  %v23593_v19 = vld [vmem:[#allocation5_spill] sm:$0xff] }
 0x380   :  { %12694 = vmatpush3.msra.mxu0 %v19283_v8  ;;  %12721 = vmatpush3.msra.mxu1 %v23588_v55  ;;  %v6328_v30 = vadd.f32 %v12285_v27, %v6190_v61  ;;  %v23594_v61 = vld [vmem:[#allocation26_spill] sm:$0xff] }
 0x381   :  { %12695 = vmatprep.subr.mxu0 %v19345_v43  ;;  %12722 = vmatprep.subr.mxu1 %v23589_v53 }
 0x382   :  { %12696 = vmatpush3.msra.mxu0 %v19286_v13  ;;  %12723 = vmatpush3.msra.mxu1 %v23590_v48 }
 0x383   :  { %12697 = vmatprep.subr.mxu0 %v19367_v1  ;;  %12724 = vmatprep.subr.mxu1 %v19167_v29 }
 0x384   :  { %12698 = vmatpush3.msra.mxu0 %v19361_v17  ;;  %12725 = vmatpush3.msra.mxu1 %v23591_v35  ;;  %v12318_v13 = vpop.f32.mrf.mxu1 }
 0x385   :  { %12699 = vmatprep.subr.mxu0 %v19384_v24  ;;  %12726 = vmatprep.subr.mxu1 %v23592_v59 }
 0x386   :  { %12700 = vmatpush3.msra.mxu0 %v19374_v60  ;;  %12727 = vmatpush3.msra.mxu1 %v23593_v19  ;;  %v12319_v27 = vpop.f32.mrf.mxu1  ;;  %v23595_v60 = vand.u32 4294901760, %v18896_v6  ;;  %v23599_v6 = vand.u32 4294901760, %v18929_v37  ;;  %v23604_v37 = vand.u32 4294901760, %v19333_v5 }
 0x387   :  { %12701 = vmatprep.subr.mxu0 %v19400_v52  ;;  %12728 = vmatprep.subr.mxu1 %v19234_v4  ;;  %v12320_v24 = vadd.f32 %v12319_v27, %v12318_v13  ;;  %v23596_v52 = vand.u32 4294901760, %v18885_v58  ;;  %v23598_v13 = vand.u32 4294901760, %v18908_v10  ;;  %v23600_v58 = vand.u32 4294901760, %v18948_v42  ;;  %v336_v27 = vld [vmem:[%s21623_s1 + $0x960] sm:$0xff] }
 0x388   :  { %12702 = vmatpush3.msra.mxu0 %v19391_v25  ;;  %8047 = vmatprep.mubr.f32.mxu0 %v19320_v44  ;;  %v23597_v25 = vand.u32 4294901760, %v18902_v23  ;;  %v23601_v23 = vand.u32 4294901760, %v18956_v16  ;;  %v23602_v10 = vand.u32 4294901760, %v19320_v44  ;;  %v23606_v42 = vand.u32 4294901760, %v19019_v36  ;;  %v355_v16 = vld [vmem:[%s21623_s1 + $0x9f8] sm:$0xff] }
 0x389   :  { %12729 = vmatpush3.msra.mxu1 %v23594_v61  ;;  %8050 = vmatmul.mubr.f32.vlgmr.msra.gmra.mxu0 %v19333_v5  ;;  %v19512_v4 = vadd.f32 %v12320_v24, %v6328_v30  ;;  %v23603_v30 = vand.u32 4294901760, %v18982_v34  ;;  %v339_v34 = vld [vmem:[%s21623_s1 + $0x978] sm:$0xff]  ;;  %v23607_v5 = vand.u32 4294901760, %v19048_v28  ;;  %v23609_v36 = vand.u32 4294901760, %v19117_v49 }
 0x38a   :  { %12730 = vmatprep.subr.mxu1 %v19253_v14  ;;  %12741 = vmatprep.subr.mxu0 %v23595_v60  ;;  %v23605_v60 = vand.u32 4294901760, %v19013_v54  ;;  %v23608_v54 = vand.u32 4294901760, %v19054_v20  ;;  %v19563_v28 = vand.u32 4294901760, %v355_v16  ;;  %v19565_v44 = vand.u32 4294901760, %v339_v34 }
 0x38b   :  { %12731 = vmatpush3.msra.mxu1 %v19226_v2  ;;  %12742 = vmatpush3.msra.mxu0 %v23596_v52  ;;  %v23610_v24 = vand.u32 4294901760, %v23574_v12  ;;  %v23612_v49 = vand.u32 4294901760, %v19148_v9  ;;  %v337_v9 = vld [vmem:[%s21623_s1 + $0x968] sm:$0xff] }
 0x38c   :  { %12732 = vmatprep.subr.mxu1 %v19300_v45  ;;  %12743 = vmatprep.subr.mxu0 %v23597_v25  ;;  %v353_v25 = vld [vmem:[%s21623_s1 + $0x9e8] sm:$0xff] }
 0x38d   :  { %12733 = vmatpush3.msra.mxu1 %v19314_v3  ;;  %12744 = vmatpush3.msra.mxu0 %v23598_v13  ;;  %v19589_v12 = vand.u32 4294901760, %v353_v25 }
 0x38e   :  { %12734 = vmatprep.subr.mxu1 %v19341_v40  ;;  %12745 = vmatprep.subr.mxu0 %v23599_v6 }
 0x38f   :  { %12735 = vmatpush3.msra.mxu1 %v19327_v39  ;;  %12746 = vmatpush3.msra.mxu0 %v23600_v58  ;;  %23616 = vst [vmem:[#allocation9_spill] sm:$0xff] %v19589_v12 }
 0x390   :  { %12736 = vmatprep.subr.mxu1 %v19363_v21  ;;  %12747 = vmatprep.subr.mxu0 %v23601_v23  ;;  %v351_v23 = vld [vmem:[%s21623_s1 + $0x9d8] sm:$0xff] }
 0x391   :  { %12737 = vmatpush3.msra.mxu1 %v19355_v31  ;;  %8154 = vmatprep.mubr.f32.mxu1 %v23602_v10 }
 0x392   :  { %12748 = vmatpush3.msra.mxu0 %v23603_v30  ;;  %8158 = vmatmul.mubr.f32.vlgmr.msra.gmra.mxu1 %v23604_v37  ;;  %v23625_v30 = vld [vmem:[#allocation29_spill] sm:$0xff] }
 0x393   :  { %12749 = vmatprep.subr.mxu0 %v23605_v60  ;;  %12776 = vmatprep.subr.mxu1 %v18861_v26  ;;  %v354_v26 = vld [vmem:[%s21623_s1 + $0x9f0] sm:$0xff]  ;;  %v23626_v37 = vand.u32 4294901760, %v23625_v30  ;;  %v19636_v60 = vand.u32 4294901760, %v336_v27 }
 0x394   :  { %12750 = vmatpush3.msra.mxu0 %v23606_v42  ;;  %12777 = vmatpush3.msra.mxu1 %v18863_v32  ;;  %v338_v32 = vld [vmem:[%s21623_s1 + $0x970] sm:$0xff]  ;;  %v19570_v20 = vand.u32 4294901760, %v354_v26  ;;  %v335_v42 = vld [vmem:[%s21623_s1 + $0x958] sm:$0xff] }
 0x395   :  { %12751 = vmatprep.subr.mxu0 %v23607_v5  ;;  %12778 = vmatprep.subr.mxu1 %v23571_v51  ;;  %v19578_v52 = vand.u32 4294901760, %v338_v32  ;;  %v23614_v51 = vand.u32 4294901760, %v23577_v15  ;;  %23627 = vst [vmem:[#allocation31_spill] sm:$0xff] %v19636_v60  ;;  %v23629_v5 = vld [vmem:[#allocation37_spill] sm:$0xff] }
 0x396   :  { %12752 = vmatpush3.msra.mxu0 %v23608_v54  ;;  %12779 = vmatpush3.msra.mxu1 %v23572_v57  ;;  %23611 = vst [vmem:[#allocation10_spill] sm:$0xff] %v19570_v20  ;;  %v23615_v57 = vand.u32 4294901760, %v19162_v18  ;;  %v23617_v18 = vand.u32 4294901760, %v23580_v46  ;;  %v19604_v15 = vsub.f32 %v354_v26, %v19570_v20  ;;  %v23619_v46 = vand.u32 4294901760, %v23583_v11 }
 0x397   :  { %12753 = vmatprep.subr.mxu0 %v23609_v36  ;;  %12780 = vmatprep.subr.mxu1 %v23573_v50  ;;  %23613 = vst [vmem:[#allocation6_spill] sm:$0xff] %v19578_v52  ;;  %v19587_v50 = vsub.f32 %v339_v34, %v19565_v44  ;;  %v23628_v34 = vand.u32 4294901760, %v19307_v33  ;;  %v350_v33 = vld [vmem:[%s21623_s1 + $0x9d0] sm:$0xff] }
 0x398   :  { %12754 = vmatpush3.msra.mxu0 %v23610_v24  ;;  %12781 = vmatpush3.msra.mxu1 %v23575_v56  ;;  %v352_v56 = vld [vmem:[%s21623_s1 + $0x9e0] sm:$0xff]  ;;  %v19652_v24 = vand.u32 4294901760, %v351_v23 }
 0x399   :  { %12755 = vmatprep.subr.mxu0 %v23612_v49  ;;  %12782 = vmatprep.subr.mxu1 %v23576_v22  ;;  %v19598_v22 = vsub.f32 %v355_v16, %v19563_v28  ;;  %v19620_v13 = vand.u32 4294901760, %v352_v56  ;;  %v22286_v11 = vand.u32 4294901760, %v19587_v50  ;;  %v22284_v16 = vand.u32 4294901760, %v19604_v15 }
 0x39a   :  { %12756 = vmatpush3.msra.mxu0 %v23614_v51  ;;  %12783 = vmatpush3.msra.mxu1 %v23578_v63  ;;  %v23618_v63 = vand.u32 4294901760, %v19238_v41  ;;  %v23622_v41 = vld [vmem:[#allocation39_spill] sm:$0xff]  ;;  %23631 = vst [vmem:[#allocation23_spill] sm:$0xff] %v19652_v24  ;;  %v23632_v49 = vand.u32 4294901760, %v19345_v43 }
 0x39b   :  { %12757 = vmatprep.subr.mxu0 %v23615_v57  ;;  %12784 = vmatprep.subr.mxu1 %v23579_v62  ;;  %v19610_v62 = vsub.f32 %v338_v32, %v19578_v52  ;;  %23621 = vst [vmem:[#allocation28_spill] sm:$0xff] %v19620_v13  ;;  %v23623_v6 = vand.u32 4294901760, %v23622_v41  ;;  %v22288_v10 = vand.u32 4294901760, %v19598_v22  ;;  %v23630_v32 = vand.u32 4294901760, %v19283_v8  ;;  %v334_v57 = vld [vmem:[%s21623_s1 + $0x950] sm:$0xff] }
 0x39c   :  { %12758 = vmatpush3.msra.mxu0 %v23617_v18  ;;  %12785 = vmatpush3.msra.mxu1 %v23581_v38  ;;  %v19618_v38 = vand.u32 4294901760, %v337_v9  ;;  %v19668_v8 = vand.u32 4294901760, %v335_v42  ;;  %v19673_v51 = vsub.f32 %v19587_v50, %v22286_v11  ;;  %v19684_v18 = vsub.f32 %v336_v27, %v19636_v60 }
 0x39d   :  { %12759 = vmatprep.subr.mxu0 %v23618_v63  ;;  %12786 = vmatprep.subr.mxu1 %v23582_v0  ;;  %v23624_v0 = vld [vmem:[#allocation15_spill] sm:$0xff]  ;;  %v22283_v54 = vand.u32 4294901760, %v19610_v62  ;;  %v19689_v63 = vsub.f32 %v19604_v15, %v22284_v16  ;;  %v19694_v41 = vand.u32 4294901760, %v350_v33  ;;  %v19704_v27 = vand.u32 4294901760, %v334_v57 }
 0x39e   :  { %12760 = vmatpush3.msra.mxu0 %v23619_v46  ;;  %12787 = vmatpush3.msra.mxu1 %v23584_v7  ;;  %23620 = vst [vmem:[#allocation13_spill] sm:$0xff] %v19618_v38  ;;  %v12353_v58 = vpop.f32.mrf.mxu0  ;;  %v19631_v7 = vsub.f32 %v353_v25, %v19589_v12  ;;  %v19650_v36 = vsub.f32 %v337_v9, %v19618_v38  ;;  %23633 = vst [vmem:[#allocation33_spill] sm:$0xff] %v19668_v8  ;;  %v23634_v9 = vld [vmem:[#allocation24_spill] sm:$0xff]  ;;  %v23636_v46 = vand.u32 4294901760, %v19367_v1  ;;  %v349_v1 = vld [vmem:[%s21623_s1 + $0x9c8] sm:$0xff] }
 0x39f   :  { %12761 = vmatprep.subr.mxu0 %v23623_v6  ;;  %12788 = vmatprep.subr.mxu1 %v23624_v0  ;;  %v19658_v25 = vsub.f32 %v352_v56, %v19620_v13  ;;  %23637 = vst [vmem:[#allocation20_spill] sm:$0xff] %v19694_v41  ;;  %23639 = vst [vmem:[#allocation19_spill] sm:$0xff] %v19704_v27 }
 0x3a0   :  { %12762 = vmatpush3.msra.mxu0 %v23626_v37  ;;  %12789 = vmatpush3.msra.mxu1 %v23586_v47  ;;  %v12354_v26 = vpop.f32.mrf.mxu0  ;;  %v22282_v43 = vand.u32 4294901760, %v19631_v7  ;;  %v22285_v6 = vand.u32 4294901760, %v19650_v36 }
 0x3a1   :  { %12763 = vmatprep.subr.mxu0 %v23628_v34  ;;  %12790 = vmatprep.subr.mxu1 %v23629_v5  ;;  %v12355_v47 = vadd.f32 %v12354_v26, %v12353_v58  ;;  %v22287_v0 = vand.u32 4294901760, %v19658_v25  ;;  %v19715_v58 = vsub.f32 %v351_v23, %v19652_v24  ;;  %v23642_v34 = vld [vmem:[#allocation36_spill] sm:$0xff]  ;;  %v23660_v26 = vld [vmem:[#allocation27_spill] sm:$0xff] }
 0x3a2   :  { %12764 = vmatpush3.msra.mxu0 %v23630_v32  ;;  %12791 = vmatpush3.msra.mxu1 %v23588_v55  ;;  %v19666_v55 = vsub.f32 %v19598_v22, %v22288_v10  ;;  %v19726_v37 = vsub.f32 %v19631_v7, %v22282_v43  ;;  %v23643_v5 = vand.u32 4294901760, %v23642_v34  ;;  %v23649_v34 = vld [vmem:[#allocation34_spill] sm:$0xff]  ;;  %v19761_v43 = vsub.f32 %v19650_v36, %v22285_v6 }
 0x3a3   :  { %12765 = vmatprep.subr.mxu0 %v23632_v49  ;;  %12792 = vmatprep.subr.mxu1 %v23589_v53  ;;  %v23635_v53 = vand.u32 4294901760, %v23634_v9  ;;  %v6604_v56 = vadd.f32 %v12355_v47, %v19512_v4  ;;  %v23638_v4 = vand.u32 4294901760, %v19361_v17  ;;  %v23640_v17 = vld [vmem:[#allocation38_spill] sm:$0xff]  ;;  %v22289_v47 = vand.u32 4294901760, %v19684_v18  ;;  %v23644_v49 = vld [vmem:[#allocation32_spill] sm:$0xff] }
 0x3a4   :  { %12793 = vmatpush3.msra.mxu1 %v23590_v48  ;;  %v19699_v48 = vsub.f32 %v19610_v62, %v22283_v54  ;;  %v23641_v30 = vand.u32 4294901760, %v23640_v17  ;;  %v23645_v9 = vand.u32 4294901760, %v23644_v49  ;;  %v348_v17 = vld [vmem:[%s21623_s1 + $0x9c0] sm:$0xff]  ;;  %v19766_v54 = vsub.f32 %v19658_v25, %v22287_v0 }
 0x3a5   :  { %12766 = vmatpush3.msra.mxu0 %v23635_v53  ;;  %12794 = vmatprep.subr.mxu1 %v19167_v29  ;;  %v333_v29 = vld [vmem:[%s21623_s1 + $0x948] sm:$0xff]  ;;  %v23651_v49 = vld [vmem:[#allocation16_spill] sm:$0xff]  ;;  %v19780_v0 = vand.u32 4294901760, %v348_v17  ;;  %v19785_v10 = vsub.f32 %v19684_v18, %v22289_v47 }
 0x3a6   :  { %12767 = vmatprep.subr.mxu0 %v23636_v46  ;;  %12795 = vmatpush3.msra.mxu1 %v23591_v35  ;;  %v19721_v35 = vsub.f32 %v335_v42, %v19668_v8  ;;  %v332_v42 = vld [vmem:[%s21623_s1 + $0x940] sm:$0xff]  ;;  %v23646_v53 = vld [vmem:[#allocation21_spill] sm:$0xff]  ;;  %v19742_v46 = vand.u32 4294901760, %v349_v1 }
 0x3a7   :  { %12768 = vmatpush3.msra.mxu0 %v23638_v4  ;;  %12796 = vmatprep.subr.mxu1 %v23592_v59  ;;  %v12388_v23 = vpop.f32.mrf.mxu1  ;;  %v19744_v4 = vand.u32 4294901760, %v333_v29  ;;  %v19775_v6 = vand.u32 4294901760, %v332_v42  ;;  %23654 = vst [vmem:[#allocation8_spill] sm:$0xff] %v19780_v0  ;;  %v330_v59 = vld [vmem:[%s21623_s1 + $0x930] sm:$0xff] }
 0x3a8   :  { %12769 = vmatprep.subr.mxu0 %v23641_v30  ;;  %12797 = vmatpush3.msra.mxu1 %v23593_v19  ;;  %23647 = vst [vmem:[#allocation14_spill] sm:$0xff] %v19742_v46  ;;  %v19750_v30 = vsub.f32 %v350_v33, %v19694_v41  ;;  %v347_v33 = vld [vmem:[%s21623_s1 + $0x9b8] sm:$0xff]  ;;  %v22291_v11 = vand.u32 4294901760, %v19721_v35 }
 0x3a9   :  { %12770 = vmatpush3.msra.mxu0 %v23643_v5  ;;  %12798 = vmatprep.subr.mxu1 %v23646_v53  ;;  %23648 = vst [vmem:[#allocation18_spill] sm:$0xff] %v19744_v4  ;;  %v23650_v5 = vand.u32 4294901760, %v23649_v34  ;;  %v19756_v53 = vsub.f32 %v334_v57, %v19704_v27  ;;  %v22290_v34 = vand.u32 4294901760, %v19715_v58  ;;  %v23652_v57 = vld [vmem:[#allocation12_spill] sm:$0xff]  ;;  %23653 = vst [vmem:[#allocation11_spill] sm:$0xff] %v19775_v6  ;;  %v19803_v16 = vand.u32 4294901760, %v347_v33 }
 0x3aa   :  { %12771 = vmatprep.subr.mxu0 %v23645_v9  ;;  %8324 = vmatprep.mubr.f32.mxu0 %v23651_v49  ;;  %v12389_v9 = vpop.f32.mrf.mxu1  ;;  %v19801_v47 = vsub.f32 %v333_v29, %v19744_v4  ;;  %v19825_v32 = vsub.f32 %v332_v42, %v19775_v6  ;;  %v19844_v42 = vld [vmem:[%s21623_s1 + $0x9a8] sm:$0xff] }
 0x3ab   :  { %12772 = vmatpush3.msra.mxu0 %v23650_v5  ;;  %12799 = vmatpush3.msra.mxu1 %v23594_v61  ;;  %v12390_v5 = vadd.f32 %v12389_v9, %v12388_v23  ;;  %v331_v61 = vld [vmem:[%s21623_s1 + $0x938] sm:$0xff]  ;;  %v13264_v23 = vld [vmem:[%s21622_s0 + $0x24] ss:$48 sps:$4 sm:$0xff]   ;;  %23656 = vst [vmem:[#allocation35_spill] sm:$0xff] %v19803_v16 }
 0x3ac   :  { %8326 = vmatmul.mubr.f32.vlgmr.msra.gmra.mxu0 %v23652_v57  ;;  %12800 = vmatprep.subr.mxu1 %v19253_v14  ;;  %v13265_v14 = vld [vmem:[%s21622_s0 + $0x84] ss:$48 sps:$4 sm:$0xff]   ;;  %23655 = vst [vmem:[#allocation7_spill] sm:$0xff] %v19801_v47  ;;  %23657 = vst [vmem:[#allocation25_spill] sm:$0xff] %v19825_v32  ;;  %v596_v29 = vrot.slane %v13264_v23, %v23660_v26 }
 0x3ad   :  { %12811 = vmatprep.subr.mxu0 %v19563_v28  ;;  %12801 = vmatpush3.msra.mxu1 %v19226_v2  ;;  %v19798_v9 = vadd.f32 %v12390_v5, %v6604_v56  ;;  %v19815_v56 = vsub.f32 %v19715_v58, %v22290_v34  ;;  %v19819_v5 = vsub.f32 %v349_v1, %v19742_v46  ;;  %v19827_v2 = vand.u32 4294901760, %v331_v61  ;;  %v346_v1 = vld [vmem:[%s21623_s1 + $0x9b0] sm:$0xff] }
 0x3ae   :  { %12812 = vmatpush3.msra.mxu0 %v19565_v44  ;;  %12802 = vmatprep.subr.mxu1 %v19300_v45  ;;  %v19832_v34 = vsub.f32 %v19721_v35, %v22291_v11  ;;  %v329_v11 = vld [vmem:[%s21623_s1 + $0x928] sm:$0xff]  ;;  %v19850_v45 = vsub.f32 %v348_v17, %v19780_v0  ;;  %v19864_v17 = vsub.f32 %v347_v33, %v19803_v16  ;;  %v19869_v23 = vand.u32 4294901760, %v346_v1 }
 0x3af   :  { %12813 = vmatprep.subr.mxu0 %v19570_v20  ;;  %12803 = vmatpush3.msra.mxu1 %v19314_v3  ;;  %23658 = vst [vmem:[#allocation30_spill] sm:$0xff] %v19827_v2  ;;  %v19839_v3 = vand.u32 4294901760, %v330_v59  ;;  %v19880_v33 = vsub.f32 %v331_v61, %v19827_v2  ;;  %v19886_v20 = vand.u32 4294901760, %v329_v11  ;;  %v344_v61 = vld [vmem:[%s21623_s1 + $0x9a0] sm:$0xff] }
 0x3b0   :  { %12814 = vmatpush3.msra.mxu0 %v19578_v52  ;;  %12804 = vmatprep.subr.mxu1 %v19341_v40  ;;  %v610_v40 = vrot.slane %v13265_v14, %v23660_v26  ;;  %v23662_v14 = vand.u32 4294901760, %v19756_v53 }
 0x3b1   :  { %12815 = vmatprep.subr.mxu0 %v19589_v12  ;;  %23659 = vst [vmem:[#allocation22_spill] sm:$0xff] %v19839_v3  ;;  %12805 = vmatpush3.msra.mxu1 %v19327_v39  ;;  %v23661_v12 = vand.u32 4294901760, %v19750_v30  ;;  %23663 = vst [vmem:[#allocation17_spill] sm:$0xff] %v19880_v33  ;;  %v19884_v39 = vand.u32 4294901760, %v19844_v42 }
 0x3b2   :  { %12816 = vmatpush3.msra.mxu0 %v19618_v38  ;;  %12806 = vmatprep.subr.mxu1 %v19363_v21  ;;  %v19874_v19 = vsub.f32 %v19756_v53, %v23662_v14  ;;  %23665 = vst [vmem:[#allocation26_spill] sm:$0xff] %v19886_v20  ;;  %v328_v14 = vld [vmem:[%s21623_s1 + $0x920] sm:$0xff]  ;;  %v614_v26 = vcombine.high %v596_v29, %v610_v40  ;;  %v343_v38 = vld [vmem:[%s21623_s1 + $0x998] sm:$0xff]  ;;  %v23676_v21 = vand.u32 4294901760, %v19850_v45 }
 0x3b3   :  { %v19860_v52 = vsub.f32 %v19750_v30, %v23661_v12  ;;  %12817 = vmatprep.subr.mxu0 %v19620_v13  ;;  %12807 = vmatpush3.msra.mxu1 %v19355_v31  ;;  %23664 = vst [vmem:[#allocation5_spill] sm:$0xff] %v19884_v39  ;;  %v327_v31 = vld [vmem:[%s21623_s1 + $0x918] sm:$0xff]  ;;  %v23667_v13 = vand.u32 4294901760, %v19666_v55  ;;  %v613_v12 = vcombine.low %v596_v29, %v610_v40  ;;  %v23670_v55 = vand.u32 4294901760, %v19819_v5 }
 0x3b4   :  { %8428 = vmatprep.mubr.f32.mxu1 %v23651_v49  ;;  %12818 = vmatpush3.msra.mxu0 %v19636_v60  ;;  %v19897_v49 = vsub.f32 %v330_v59, %v19839_v3  ;;  %v23672_v29 = vand.u32 4294901760, %v19689_v63  ;;  %v19934_v40 = vsub.f32 %v329_v11, %v19886_v20  ;;  %v19948_v63 = vsub.f32 %v19850_v45, %v23676_v21 }
 0x3b5   :  { %8430 = vmatmul.mubr.f32.vlgmr.msra.gmra.mxu1 %v23652_v57  ;;  %12819 = vmatprep.subr.mxu0 %v19652_v24  ;;  %v23668_v57 = vand.u32 4294901760, %v19801_v47  ;;  %v23669_v24 = vand.u32 4294901760, %v19673_v51  ;;  %v19924_v60 = vsub.f32 %v19819_v5, %v23670_v55  ;;  %v23675_v55 = vand.u32 4294901760, %v19699_v48 }
 0x3b6   :  { %23666 = vst [vmem:[#allocation39_spill] sm:$0xff] %v19897_v49  ;;  %12846 = vmatprep.subr.mxu1 %v23667_v13  ;;  %12820 = vmatpush3.msra.mxu0 %v19668_v8  ;;  %23673 = vst [vmem:[#allocation29_spill] sm:$0xff] %v19934_v40  ;;  %v19940_v13 = vsub.f32 %v346_v1, %v19869_v23  ;;  %v23677_v11 = vand.u32 4294901760, %v19825_v32  ;;  %v342_v1 = vld [vmem:[%s21623_s1 + $0x990] sm:$0xff]  ;;  %v19960_v51 = vand.u32 4294901760, %v614_v26  ;;  %v23679_v48 = vand.u32 4294901760, %v19726_v37 }
 0x3b7   :  { %v19911_v59 = vsub.f32 %v19801_v47, %v23668_v57  ;;  %12847 = vmatpush3.msra.mxu1 %v23669_v24  ;;  %v19926_v57 = vand.u32 4294901760, %v328_v14  ;;  %v19928_v47 = vand.u32 4294901760, %v327_v31  ;;  %12821 = vmatprep.subr.mxu0 %v19694_v41  ;;  %v19936_v24 = vand.u32 4294901760, %v344_v61 }
 0x3b8   :  { %12848 = vmatprep.subr.mxu1 %v23672_v29  ;;  %12822 = vmatpush3.msra.mxu0 %v19704_v27  ;;  %v19953_v29 = vsub.f32 %v19825_v32, %v23677_v11  ;;  %v19955_v41 = vand.u32 4294901760, %v343_v38  ;;  %23678 = vst [vmem:[#allocation24_spill] sm:$0xff] %v19960_v51  ;;  %v326_v27 = vld [vmem:[%s21623_s1 + $0x910] sm:$0xff]  ;;  %v19976_v8 = vsub.f32 %v19844_v42, %v19884_v39  ;;  %v19978_v32 = vand.u32 4294901760, %v613_v12  ;;  %v325_v42 = vld [vmem:[%s21623_s1 + $0x908] sm:$0xff] }
 0x3b9   :  { %23671 = vst [vmem:[#allocation15_spill] sm:$0xff] %v19926_v57  ;;  %23674 = vst [vmem:[#allocation37_spill] sm:$0xff] %v19936_v24  ;;  %12849 = vmatpush3.msra.mxu1 %v23675_v55  ;;  %12823 = vmatprep.subr.mxu0 %v19742_v46  ;;  %v8594_v21 = vand.u32 4294901760, %v19911_v59  ;;  %v23680_v55 = vand.u32 4294901760, %v19864_v17  ;;  %v23683_v37 = vand.u32 4294901760, %v19761_v43  ;;  %v8706_v59 = vand.u32 4294901760, %v19924_v60 }
 0x3ba   :  { %12850 = vmatprep.subr.mxu1 %v23679_v48  ;;  %23681 = vst [vmem:[#allocation38_spill] sm:$0xff] %v19976_v8  ;;  %23682 = vst [vmem:[#allocation36_spill] sm:$0xff] %v19978_v32  ;;  %12824 = vmatpush3.msra.mxu0 %v19744_v4  ;;  %v19985_v48 = vsub.f32 %v328_v14, %v19926_v57  ;;  %v23685_v4 = vand.u32 4294901760, %v19766_v54  ;;  %v23686_v43 = vand.u32 4294901760, %v19880_v33  ;;  %v20002_v14 = vand.u32 4294901760, %v342_v1 }
 0x3bb   :  { %v19969_v11 = vsub.f32 %v19864_v17, %v23680_v55  ;;  %12851 = vmatpush3.msra.mxu1 %v23683_v37  ;;  %v19988_v55 = vsub.f32 %v327_v31, %v19928_v47  ;;  %12825 = vmatprep.subr.mxu0 %v19780_v0  ;;  %v341_v37 = vld [vmem:[%s21623_s1 + $0x988] sm:$0xff]  ;;  %v20009_v46 = vsub.f32 %v344_v61, %v19936_v24  ;;  %v23687_v54 = vand.u32 4294901760, %v19785_v10  ;;  %v324_v31 = vld [vmem:[%s21623_s1 + $0x900] sm:$0xff] }
 0x3bc   :  { %12852 = vmatprep.subr.mxu1 %v23685_v4  ;;  %v20000_v60 = vsub.f32 %v19880_v33, %v23686_v43  ;;  %12826 = vmatpush3.msra.mxu0 %v19775_v6  ;;  %v8713_v4 = vand.u32 4294901760, %v19948_v63  ;;  %v8601_v43 = vand.u32 4294901760, %v19953_v29  ;;  %v20016_v0 = vand.u32 4294901760, %v326_v27  ;;  %v340_v29 = vld [vmem:[%s21623_s1 + $0x980] sm:$0xff] }
 0x3bd   :  { %23684 = vst [vmem:[#allocation32_spill] sm:$0xff] %v19988_v55  ;;  %12853 = vmatpush3.msra.mxu1 %v23687_v54  ;;  %v20022_v33 = vsub.f32 %v614_v26, %v19960_v51  ;;  %12827 = vmatprep.subr.mxu0 %v19803_v16  ;;  %v23688_v61 = vand.u32 4294901760, %v19815_v56  ;;  %v8720_v10 = vand.u32 4294901760, %v19969_v11  ;;  %v20029_v54 = vand.u32 4294901760, %v325_v42 }
 0x3be   :  { %v20035_v6 = vsub.f32 %v613_v12, %v19978_v32  ;;  %12828 = vmatpush3.msra.mxu0 %v19827_v2  ;;  %v23689_v26 = vand.u32 4294901760, %v19832_v34  ;;  %v23690_v56 = vand.u32 4294901760, %v19897_v49  ;;  %v20047_v16 = vsub.f32 %v343_v38, %v19955_v41  ;;  %8772 = vmatprep.mubr.f32.mxu1 %v19960_v51 }
 0x3bf   :  { %12854 = vmatprep.subr.mxu1 %v23688_v61  ;;  %v20043_v61 = vand.u32 4294901760, %v341_v37  ;;  %12829 = vmatprep.subr.mxu0 %v19869_v23  ;;  %v23691_v12 = vand.u32 4294901760, %v19860_v52  ;;  %v8608_v2 = vand.u32 4294901760, %v20000_v60  ;;  %v23692_v34 = vand.u32 4294901760, %v19940_v13 }
 0x3c0   :  { %12855 = vmatpush3.msra.mxu1 %v23689_v26  ;;  %v8614_v11 = vsub.f32 %v19897_v49, %v23690_v56  ;;  %v20057_v49 = vand.u32 4294901760, %v324_v31  ;;  %12830 = vmatpush3.msra.mxu0 %v19839_v3  ;;  %v23693_v38 = vand.u32 4294901760, %v19874_v19  ;;  %v20063_v63 = vsub.f32 %v326_v27, %v20016_v0 }
 0x3c1   :  { %12856 = vmatprep.subr.mxu1 %v23691_v12  ;;  %v8726_v26 = vsub.f32 %v19940_v13, %v23692_v34  ;;  %v20065_v52 = vand.u32 4294901760, %v340_v29  ;;  %v20069_v12 = vsub.f32 %v342_v1, %v20002_v14  ;;  %12831 = vmatprep.subr.mxu0 %v19884_v39  ;;  %v23694_v34 = vand.u32 4294901760, %v19976_v8 }
 0x3c2   :  { %12857 = vmatpush3.msra.mxu1 %v23693_v38  ;;  %v20076_v19 = vsub.f32 %v325_v42, %v20029_v54  ;;  %v12423_v38 = vpop.f32.mrf.mxu0  ;;  %12832 = vmatpush3.msra.mxu0 %v19886_v20  ;;  %v8615_v1 = vand.u32 4294901760, %v8614_v11  ;;  %v23696_v60 = vand.u32 4294901760, %v19934_v40  ;;  %v23698_v27 = vand.u32 4294901760, %v20009_v46 }
 0x3c3   :  { %12858 = vmatprep.subr.mxu1 %v8706_v59  ;;  %v8733_v56 = vsub.f32 %v19976_v8, %v23694_v34  ;;  %v20086_v34 = vsub.f32 %v341_v37, %v20043_v61  ;;  %12833 = vmatprep.subr.mxu0 %v19936_v24  ;;  %v8727_v42 = vand.u32 4294901760, %v8726_v26  ;;  %v23700_v37 = vand.u32 4294901760, %v20022_v33 }
 0x3c4   :  { %23695 = vst [vmem:[#allocation21_spill] sm:$0xff] %v20076_v19  ;;  %12859 = vmatpush3.msra.mxu1 %v8594_v21  ;;  %v8621_v59 = vsub.f32 %v19934_v40, %v23696_v60  ;;  %v8740_v3 = vsub.f32 %v20009_v46, %v23698_v27  ;;  %v20093_v21 = vsub.f32 %v324_v31, %v20057_v49  ;;  %v12424_v20 = vpop.f32.mrf.mxu0  ;;  %v23702_v27 = vand.u32 4294901760, %v19985_v48 }
 0x3c5   :  { %23697 = vst [vmem:[#allocation34_spill] sm:$0xff] %v20086_v34  ;;  %12860 = vmatprep.subr.mxu1 %v8713_v4  ;;  %12834 = vmatpush3.msra.mxu0 %v19926_v57  ;;  %v8534_v60 = vsub.f32 %v20022_v33, %v23700_v37  ;;  %v12425_v39 = vadd.f32 %v12424_v20, %v12423_v38  ;;  %v8734_v31 = vand.u32 4294901760, %v8733_v56  ;;  %v22341_v56 = vand.u32 4294901760, %v20086_v34 }
 0x3c6   :  { %23699 = vst [vmem:[#allocation16_spill] sm:$0xff] %v20093_v21  ;;  %12861 = vmatpush3.msra.mxu1 %v8601_v43  ;;  %v20102_v26 = vsub.f32 %v340_v29, %v20065_v52  ;;  %12835 = vmatprep.subr.mxu0 %v19955_v41  ;;  %v8628_v11 = vsub.f32 %v19985_v48, %v23702_v27  ;;  %v23703_v43 = vand.u32 4294901760, %v20035_v6  ;;  %v8622_v20 = vand.u32 4294901760, %v8621_v59 }
 0x3c7   :  { %12862 = vmatprep.subr.mxu1 %v8720_v10  ;;  %12836 = vmatpush3.msra.mxu0 %v19928_v47  ;;  %v23704_v29 = vand.u32 4294901760, %v20047_v16  ;;  %v6820_v10 = vadd.f32 %v12425_v39, %v19798_v9  ;;  %v8741_v27 = vand.u32 4294901760, %v8740_v3  ;;  %v23706_v59 = vand.u32 4294901760, %v20069_v12 }
 0x3c8   :  { %23701 = vst [vmem:[#allocation12_spill] sm:$0xff] %v20102_v26  ;;  %v8540_v57 = vsub.f32 %v20035_v6, %v23703_v43  ;;  %12863 = vmatpush3.msra.mxu1 %v8608_v2  ;;  %12837 = vmatprep.subr.mxu0 %v20002_v14  ;;  %v23705_v43 = vand.u32 4294901760, %v19988_v55  ;;  %v8535_v2 = vand.u32 4294901760, %v8534_v60  ;;  %v22343_v39 = vand.u32 4294901760, %v20102_v26 }
 0x3c9   :  { %v8747_v38 = vsub.f32 %v20047_v16, %v23704_v29  ;;  %12864 = vmatprep.subr.mxu1 %v8727_v42  ;;  %12838 = vmatpush3.msra.mxu0 %v20016_v0  ;;  %v8754_v9 = vsub.f32 %v20069_v12, %v23706_v59  ;;  %v8629_v3 = vand.u32 4294901760, %v8628_v11  ;;  %v23707_v29 = vand.u32 4294901760, %v20063_v63  ;;  %v12458_v59 = vpop.f32.mrf.mxu1 }
 0x3ca   :  { %v8635_v37 = vsub.f32 %v19988_v55, %v23705_v43  ;;  %12865 = vmatpush3.msra.mxu1 %v8615_v1  ;;  %12839 = vmatprep.subr.mxu0 %v20043_v61  ;;  %v8541_v42 = vand.u32 4294901760, %v8540_v57  ;;  %v22342_v4 = vand.u32 4294901760, %v20093_v21  ;;  %v8761_v60 = vsub.f32 %v20086_v34, %v22341_v56 }
 0x3cb   :  { %12866 = vmatprep.subr.mxu1 %v8734_v31  ;;  %v8642_v43 = vsub.f32 %v20063_v63, %v23707_v29  ;;  %12840 = vmatpush3.msra.mxu0 %v20029_v54  ;;  %v8748_v1 = vand.u32 4294901760, %v8747_v38  ;;  %v23708_v57 = vand.u32 4294901760, %v20076_v19  ;;  %v8755_v29 = vand.u32 4294901760, %v8754_v9  ;;  %v12459_v38 = vpop.f32.mrf.mxu1 }
 0x3cc   :  { %12867 = vmatpush3.msra.mxu1 %v8622_v20  ;;  %12841 = vmatprep.subr.mxu0 %v20065_v52  ;;  %v8636_v11 = vand.u32 4294901760, %v8635_v37  ;;  %v8768_v20 = vsub.f32 %v20102_v26, %v22343_v39  ;;  %v8656_v37 = vsub.f32 %v20093_v21, %v22342_v4  ;;  %v23725_v4 = vld [vmem:[#allocation8_spill] sm:$0xff] }
 0x3cd   :  { %12868 = vmatprep.subr.mxu1 %v8741_v27  ;;  %v8649_v31 = vsub.f32 %v20076_v19, %v23708_v57  ;;  %12842 = vmatpush3.msra.mxu0 %v20057_v49  ;;  %v8643_v56 = vand.u32 4294901760, %v8642_v43  ;;  %v12460_v27 = vadd.f32 %v12459_v38, %v12458_v59  ;;  %v8762_v57 = vand.u32 4294901760, %v8761_v60  ;;  %v23711_v43 = vld [vmem:[#allocation9_spill] sm:$0xff]  ;;  %v23714_v59 = vld [vmem:[#allocation28_spill] sm:$0xff] }
 0x3ce   :  { %8536 = vmatprep.mubr.f32.mxu0 %v8535_v2  ;;  %12869 = vmatpush3.msra.mxu1 %v8629_v3  ;;  %v8769_v3 = vand.u32 4294901760, %v8768_v20  ;;  %v23713_v60 = vld [vmem:[#allocation13_spill] sm:$0xff] }
 0x3cf   :  { %8542 = vmatmul.mubr.f32.vlgmr.msra.gmra.mxu0 %v8541_v42  ;;  %12870 = vmatprep.subr.mxu1 %v8748_v1  ;;  %v8650_v2 = vand.u32 4294901760, %v8649_v31  ;;  %v7052_v9 = vadd.f32 %v12460_v27, %v6820_v10  ;;  %v8657_v42 = vand.u32 4294901760, %v8656_v37  ;;  %v23709_v10 = vld [vmem:[#allocation10_spill] sm:$0xff]  ;;  %v23712_v1 = vld [vmem:[#allocation7_spill] sm:$0xff]  ;;  %v23718_v20 = vld [vmem:[#allocation17_spill] sm:$0xff] }
 0x3d0   :  { %12881 = vmatprep.subr.mxu0 %v19598_v22  ;;  %12871 = vmatpush3.msra.mxu1 %v8636_v11  ;;  %v23715_v11 = vld [vmem:[#allocation25_spill] sm:$0xff]  ;;  %v23716_v31 = vld [vmem:[#allocation31_spill] sm:$0xff]  ;;  %v23720_v37 = vld [vmem:[#allocation20_spill] sm:$0xff] }
 0x3d1   :  { %12882 = vmatpush3.msra.mxu0 %v19587_v50  ;;  %12872 = vmatprep.subr.mxu1 %v8755_v29  ;;  %v23717_v29 = vld [vmem:[#allocation23_spill] sm:$0xff]  ;;  %v23719_v38 = vld [vmem:[#allocation33_spill] sm:$0xff] }
 0x3d2   :  { %12883 = vmatprep.subr.mxu0 %v19604_v15  ;;  %12873 = vmatpush3.msra.mxu1 %v8643_v56  ;;  %v23710_v56 = vld [vmem:[#allocation6_spill] sm:$0xff]  ;;  %v23721_v27 = vld [vmem:[#allocation39_spill] sm:$0xff] }
 0x3d3   :  { %12884 = vmatpush3.msra.mxu0 %v19610_v62  ;;  %12874 = vmatprep.subr.mxu1 %v8762_v57  ;;  %v23722_v57 = vld [vmem:[#allocation19_spill] sm:$0xff] }
 0x3d4   :  { %12885 = vmatprep.subr.mxu0 %v19631_v7  ;;  %12875 = vmatpush3.msra.mxu1 %v8650_v2  ;;  %v23723_v2 = vld [vmem:[#allocation14_spill] sm:$0xff] }
 0x3d5   :  { %12886 = vmatpush3.msra.mxu0 %v19650_v36  ;;  %12876 = vmatprep.subr.mxu1 %v8769_v3 }
 0x3d6   :  { %12887 = vmatprep.subr.mxu0 %v19658_v25  ;;  %12877 = vmatpush3.msra.mxu1 %v8657_v42  ;;  %v23724_v42 = vld [vmem:[#allocation18_spill] sm:$0xff] }
 0x3d7   :  { %12888 = vmatpush3.msra.mxu0 %v19684_v18  ;;  %8774 = vmatmul.mubr.f32.vlgmr.msra.gmra.mxu1 %v19978_v32  ;;  %v23726_v32 = vld [vmem:[#allocation11_spill] sm:$0xff] }
 0x3d8   :  { %12889 = vmatprep.subr.mxu0 %v19715_v58  ;;  %12916 = vmatprep.subr.mxu1 %v19563_v28 }
 0x3d9   :  { %12890 = vmatpush3.msra.mxu0 %v19721_v35  ;;  %12917 = vmatpush3.msra.mxu1 %v19565_v44 }
 0x3da   :  { %12891 = vmatprep.subr.mxu0 %v19750_v30  ;;  %12918 = vmatprep.subr.mxu1 %v23709_v10 }
 0x3db   :  { %12892 = vmatpush3.msra.mxu0 %v19756_v53  ;;  %12919 = vmatpush3.msra.mxu1 %v23710_v56 }
 0x3dc   :  { %12893 = vmatprep.subr.mxu0 %v19819_v5  ;;  %12920 = vmatprep.subr.mxu1 %v23711_v43 }
 0x3dd   :  { %12894 = vmatpush3.msra.mxu0 %v23712_v1  ;;  %12921 = vmatpush3.msra.mxu1 %v23713_v60 }
 0x3de   :  { %12895 = vmatprep.subr.mxu0 %v19850_v45  ;;  %12922 = vmatprep.subr.mxu1 %v23714_v59 }
 0x3df   :  { %12896 = vmatpush3.msra.mxu0 %v23715_v11  ;;  %12923 = vmatpush3.msra.mxu1 %v23716_v31 }
 0x3e0   :  { %12897 = vmatprep.subr.mxu0 %v19864_v17  ;;  %12924 = vmatprep.subr.mxu1 %v23717_v29 }
 0x3e1   :  { %12898 = vmatpush3.msra.mxu0 %v23718_v20  ;;  %12925 = vmatpush3.msra.mxu1 %v23719_v38 }
 0x3e2   :  { %12899 = vmatprep.subr.mxu0 %v19940_v13  ;;  %12926 = vmatprep.subr.mxu1 %v23720_v37  ;;  %v12493_v3 = vpop.f32.mrf.mxu0 }
 0x3e3   :  { %12900 = vmatpush3.msra.mxu0 %v23721_v27  ;;  %12927 = vmatpush3.msra.mxu1 %v23722_v57 }
 0x3e4   :  { %12901 = vmatprep.subr.mxu0 %v19976_v8  ;;  %12928 = vmatprep.subr.mxu1 %v23723_v2  ;;  %v12494_v39 = vpop.f32.mrf.mxu0  ;;  %v23727_v8 = vld [vmem:[#allocation35_spill] sm:$0xff]  ;;  %v23728_v2 = vld [vmem:[#allocation30_spill] sm:$0xff] }
 0x3e5   :  { %12902 = vmatpush3.msra.mxu0 %v19934_v40  ;;  %12929 = vmatpush3.msra.mxu1 %v23724_v42  ;;  %v12495_v51 = vadd.f32 %v12494_v39, %v12493_v3  ;;  %v23730_v39 = vld [vmem:[#allocation5_spill] sm:$0xff]  ;;  %v23731_v3 = vld [vmem:[#allocation26_spill] sm:$0xff] }
 0x3e6   :  { %12903 = vmatprep.subr.mxu0 %v20009_v46  ;;  %12930 = vmatprep.subr.mxu1 %v23725_v4  ;;  %v23729_v4 = vld [vmem:[#allocation22_spill] sm:$0xff] }
 0x3e7   :  { %12904 = vmatpush3.msra.mxu0 %v19985_v48  ;;  %12931 = vmatpush3.msra.mxu1 %v23726_v32  ;;  %v7190_v40 = vadd.f32 %v12495_v51, %v7052_v9  ;;  %v23732_v9 = vld [vmem:[#allocation15_spill] sm:$0xff] }
 0x3e8   :  { %12905 = vmatprep.subr.mxu0 %v20047_v16  ;;  %12932 = vmatprep.subr.mxu1 %v23727_v8 }
 0x3e9   :  { %12906 = vmatpush3.msra.mxu0 %v19988_v55  ;;  %12933 = vmatpush3.msra.mxu1 %v23728_v2 }
 0x3ea   :  { %12907 = vmatprep.subr.mxu0 %v20069_v12  ;;  %12934 = vmatprep.subr.mxu1 %v19869_v23 }
 0x3eb   :  { %12908 = vmatpush3.msra.mxu0 %v20063_v63  ;;  %12935 = vmatpush3.msra.mxu1 %v23729_v4  ;;  %v12528_v55 = vpop.f32.mrf.mxu1 }
 0x3ec   :  { %12909 = vmatprep.subr.mxu0 %v20086_v34  ;;  %12936 = vmatprep.subr.mxu1 %v23730_v39 }
 0x3ed   :  { %12910 = vmatpush3.msra.mxu0 %v20076_v19  ;;  %12937 = vmatpush3.msra.mxu1 %v23731_v3  ;;  %v12529_v51 = vpop.f32.mrf.mxu1  ;;  %v23733_v19 = vand.u32 4294901760, %v19598_v22  ;;  %v23737_v22 = vand.u32 4294901760, %v19631_v7  ;;  %v23742_v7 = vand.u32 4294901760, %v20035_v6 }
 0x3ee   :  { %12911 = vmatprep.subr.mxu0 %v20102_v26  ;;  %12938 = vmatprep.subr.mxu1 %v19936_v24  ;;  %v12530_v34 = vadd.f32 %v12529_v51, %v12528_v55  ;;  %v23734_v26 = vand.u32 4294901760, %v19587_v50  ;;  %v23736_v55 = vand.u32 4294901760, %v19610_v62  ;;  %v23738_v50 = vand.u32 4294901760, %v19650_v36  ;;  %v368_v51 = vld [vmem:[%s21623_s1 + $0xa60] sm:$0xff] }
 0x3ef   :  { %12912 = vmatpush3.msra.mxu0 %v20093_v21  ;;  %8909 = vmatprep.mubr.f32.mxu0 %v20022_v33  ;;  %v23735_v21 = vand.u32 4294901760, %v19604_v15  ;;  %v23739_v15 = vand.u32 4294901760, %v19658_v25  ;;  %v23740_v62 = vand.u32 4294901760, %v20022_v33  ;;  %v23744_v36 = vand.u32 4294901760, %v19721_v35  ;;  %v387_v25 = vld [vmem:[%s21623_s1 + $0xaf8] sm:$0xff] }
 0x3f0   :  { %12939 = vmatpush3.msra.mxu1 %v23732_v9  ;;  %8912 = vmatmul.mubr.f32.vlgmr.msra.gmra.mxu0 %v20035_v6  ;;  %v20214_v24 = vadd.f32 %v12530_v34, %v7190_v40  ;;  %v23741_v40 = vand.u32 4294901760, %v19684_v18  ;;  %v371_v18 = vld [vmem:[%s21623_s1 + $0xa78] sm:$0xff]  ;;  %v23745_v6 = vand.u32 4294901760, %v19750_v30  ;;  %v23747_v35 = vand.u32 4294901760, %v19819_v5 }
 0x3f1   :  { %12940 = vmatprep.subr.mxu1 %v19955_v41  ;;  %12951 = vmatprep.subr.mxu0 %v23733_v19  ;;  %v23743_v19 = vand.u32 4294901760, %v19715_v58  ;;  %v23746_v58 = vand.u32 4294901760, %v19756_v53  ;;  %v20265_v30 = vand.u32 4294901760, %v387_v25  ;;  %v20267_v33 = vand.u32 4294901760, %v371_v18 }
 0x3f2   :  { %12941 = vmatpush3.msra.mxu1 %v19928_v47  ;;  %12952 = vmatpush3.msra.mxu0 %v23734_v26  ;;  %v23748_v34 = vand.u32 4294901760, %v23712_v1  ;;  %v23750_v5 = vand.u32 4294901760, %v19850_v45  ;;  %v369_v45 = vld [vmem:[%s21623_s1 + $0xa68] sm:$0xff] }
 0x3f3   :  { %12942 = vmatprep.subr.mxu1 %v20002_v14  ;;  %12953 = vmatprep.subr.mxu0 %v23735_v21  ;;  %v385_v21 = vld [vmem:[%s21623_s1 + $0xae8] sm:$0xff] }
 0x3f4   :  { %12943 = vmatpush3.msra.mxu1 %v20016_v0  ;;  %12954 = vmatpush3.msra.mxu0 %v23736_v55  ;;  %v20291_v1 = vand.u32 4294901760, %v385_v21 }
 0x3f5   :  { %12944 = vmatprep.subr.mxu1 %v20043_v61  ;;  %12955 = vmatprep.subr.mxu0 %v23737_v22 }
 0x3f6   :  { %12945 = vmatpush3.msra.mxu1 %v20029_v54  ;;  %12956 = vmatpush3.msra.mxu0 %v23738_v50  ;;  %23754 = vst [vmem:[#allocation9_spill] sm:$0xff] %v20291_v1 }
 0x3f7   :  { %12946 = vmatprep.subr.mxu1 %v20065_v52  ;;  %12957 = vmatprep.subr.mxu0 %v23739_v15  ;;  %v383_v15 = vld [vmem:[%s21623_s1 + $0xad8] sm:$0xff] }
 0x3f8   :  { %12947 = vmatpush3.msra.mxu1 %v20057_v49  ;;  %9016 = vmatprep.mubr.f32.mxu1 %v23740_v62 }
 0x3f9   :  { %12958 = vmatpush3.msra.mxu0 %v23741_v40  ;;  %9020 = vmatmul.mubr.f32.vlgmr.msra.gmra.mxu1 %v23742_v7  ;;  %v23763_v40 = vld [vmem:[#allocation29_spill] sm:$0xff] }
 0x3fa   :  { %12959 = vmatprep.subr.mxu0 %v23743_v19  ;;  %12986 = vmatprep.subr.mxu1 %v19563_v28  ;;  %v386_v28 = vld [vmem:[%s21623_s1 + $0xaf0] sm:$0xff]  ;;  %v23764_v7 = vand.u32 4294901760, %v23763_v40  ;;  %v20338_v19 = vand.u32 4294901760, %v368_v51 }
 0x3fb   :  { %12960 = vmatpush3.msra.mxu0 %v23744_v36  ;;  %12987 = vmatpush3.msra.mxu1 %v19565_v44  ;;  %v370_v44 = vld [vmem:[%s21623_s1 + $0xa70] sm:$0xff]  ;;  %v20272_v53 = vand.u32 4294901760, %v386_v28  ;;  %v367_v36 = vld [vmem:[%s21623_s1 + $0xa58] sm:$0xff] }
 0x3fc   :  { %12961 = vmatprep.subr.mxu0 %v23745_v6  ;;  %12988 = vmatprep.subr.mxu1 %v23709_v10  ;;  %v20280_v26 = vand.u32 4294901760, %v370_v44  ;;  %v23752_v10 = vand.u32 4294901760, %v23715_v11  ;;  %23765 = vst [vmem:[#allocation28_spill] sm:$0xff] %v20338_v19  ;;  %v23767_v6 = vld [vmem:[#allocation8_spill] sm:$0xff] }
 0x3fd   :  { %12962 = vmatpush3.msra.mxu0 %v23746_v58  ;;  %12989 = vmatpush3.msra.mxu1 %v23710_v56  ;;  %23749 = vst [vmem:[#allocation10_spill] sm:$0xff] %v20272_v53  ;;  %v23753_v56 = vand.u32 4294901760, %v19864_v17  ;;  %v23755_v17 = vand.u32 4294901760, %v23718_v20  ;;  %v20306_v11 = vsub.f32 %v386_v28, %v20272_v53  ;;  %v23757_v20 = vand.u32 4294901760, %v23721_v27 }
 0x3fe   :  { %12963 = vmatprep.subr.mxu0 %v23747_v35  ;;  %12990 = vmatprep.subr.mxu1 %v23711_v43  ;;  %23751 = vst [vmem:[#allocation6_spill] sm:$0xff] %v20280_v26  ;;  %v20289_v43 = vsub.f32 %v371_v18, %v20267_v33  ;;  %v23766_v18 = vand.u32 4294901760, %v20009_v46  ;;  %v382_v46 = vld [vmem:[%s21623_s1 + $0xad0] sm:$0xff] }
 0x3ff   :  { %12964 = vmatpush3.msra.mxu0 %v23748_v34  ;;  %12991 = vmatpush3.msra.mxu1 %v23713_v60  ;;  %v384_v60 = vld [vmem:[%s21623_s1 + $0xae0] sm:$0xff]  ;;  %v20354_v34 = vand.u32 4294901760, %v383_v15 }
 0x400   :  { %12965 = vmatprep.subr.mxu0 %v23750_v5  ;;  %12992 = vmatprep.subr.mxu1 %v23714_v59  ;;  %v20300_v59 = vsub.f32 %v387_v25, %v20265_v30  ;;  %v20322_v55 = vand.u32 4294901760, %v384_v60  ;;  %v22360_v27 = vand.u32 4294901760, %v20289_v43  ;;  %v22358_v25 = vand.u32 4294901760, %v20306_v11 }
 0x401   :  { %12966 = vmatpush3.msra.mxu0 %v23752_v10  ;;  %12993 = vmatpush3.msra.mxu1 %v23716_v31  ;;  %v23756_v31 = vand.u32 4294901760, %v19940_v13  ;;  %v23760_v13 = vld [vmem:[#allocation38_spill] sm:$0xff]  ;;  %23769 = vst [vmem:[#allocation25_spill] sm:$0xff] %v20354_v34  ;;  %v23770_v5 = vand.u32 4294901760, %v20047_v16 }
 0x402   :  { %12967 = vmatprep.subr.mxu0 %v23753_v56  ;;  %12994 = vmatprep.subr.mxu1 %v23717_v29  ;;  %v20312_v29 = vsub.f32 %v370_v44, %v20280_v26  ;;  %23759 = vst [vmem:[#allocation13_spill] sm:$0xff] %v20322_v55  ;;  %v23761_v22 = vand.u32 4294901760, %v23760_v13  ;;  %v22362_v62 = vand.u32 4294901760, %v20300_v59  ;;  %v23768_v44 = vand.u32 4294901760, %v19985_v48  ;;  %v366_v56 = vld [vmem:[%s21623_s1 + $0xa50] sm:$0xff] }
 0x403   :  { %12968 = vmatpush3.msra.mxu0 %v23755_v17  ;;  %12995 = vmatpush3.msra.mxu1 %v23719_v38  ;;  %v20320_v38 = vand.u32 4294901760, %v369_v45  ;;  %v20370_v48 = vand.u32 4294901760, %v367_v36  ;;  %v20375_v10 = vsub.f32 %v20289_v43, %v22360_v27  ;;  %v20386_v17 = vsub.f32 %v368_v51, %v20338_v19 }
 0x404   :  { %12969 = vmatprep.subr.mxu0 %v23756_v31  ;;  %12996 = vmatprep.subr.mxu1 %v23720_v37  ;;  %v23762_v37 = vld [vmem:[#allocation14_spill] sm:$0xff]  ;;  %v22357_v58 = vand.u32 4294901760, %v20312_v29  ;;  %v20391_v31 = vsub.f32 %v20306_v11, %v22358_v25  ;;  %v20396_v13 = vand.u32 4294901760, %v382_v46  ;;  %v20406_v51 = vand.u32 4294901760, %v366_v56 }
 0x405   :  { %12970 = vmatpush3.msra.mxu0 %v23757_v20  ;;  %12997 = vmatpush3.msra.mxu1 %v23722_v57  ;;  %23758 = vst [vmem:[#allocation7_spill] sm:$0xff] %v20320_v38  ;;  %v12563_v50 = vpop.f32.mrf.mxu0  ;;  %v20333_v57 = vsub.f32 %v385_v21, %v20291_v1  ;;  %v20352_v35 = vsub.f32 %v369_v45, %v20320_v38  ;;  %23771 = vst [vmem:[#allocation31_spill] sm:$0xff] %v20370_v48  ;;  %v23772_v45 = vld [vmem:[#allocation32_spill] sm:$0xff]  ;;  %v23774_v20 = vand.u32 4294901760, %v20069_v12  ;;  %v381_v12 = vld [vmem:[%s21623_s1 + $0xac8] sm:$0xff] }
 0x406   :  { %12971 = vmatprep.subr.mxu0 %v23761_v22  ;;  %12998 = vmatprep.subr.mxu1 %v23762_v37  ;;  %v20360_v21 = vsub.f32 %v384_v60, %v20322_v55  ;;  %23775 = vst [vmem:[#allocation23_spill] sm:$0xff] %v20396_v13  ;;  %23777 = vst [vmem:[#allocation17_spill] sm:$0xff] %v20406_v51 }
 0x407   :  { %12972 = vmatpush3.msra.mxu0 %v23764_v7  ;;  %12999 = vmatpush3.msra.mxu1 %v23724_v42  ;;  %v12564_v28 = vpop.f32.mrf.mxu0  ;;  %v22356_v16 = vand.u32 4294901760, %v20333_v57  ;;  %v22359_v22 = vand.u32 4294901760, %v20352_v35 }
 0x408   :  { %12973 = vmatprep.subr.mxu0 %v23766_v18  ;;  %13000 = vmatprep.subr.mxu1 %v23767_v6  ;;  %v12565_v42 = vadd.f32 %v12564_v28, %v12563_v50  ;;  %v22361_v37 = vand.u32 4294901760, %v20360_v21  ;;  %v20417_v50 = vsub.f32 %v383_v15, %v20354_v34  ;;  %v23780_v18 = vld [vmem:[#allocation21_spill] sm:$0xff]  ;;  %v23798_v28 = vld [vmem:[#allocation27_spill] sm:$0xff] }
 0x409   :  { %12974 = vmatpush3.msra.mxu0 %v23768_v44  ;;  %13001 = vmatpush3.msra.mxu1 %v23726_v32  ;;  %v20368_v32 = vsub.f32 %v20300_v59, %v22362_v62  ;;  %v20428_v7 = vsub.f32 %v20333_v57, %v22356_v16  ;;  %v23781_v6 = vand.u32 4294901760, %v23780_v18  ;;  %v23787_v18 = vld [vmem:[#allocation16_spill] sm:$0xff]  ;;  %v20463_v16 = vsub.f32 %v20352_v35, %v22359_v22 }
 0x40a   :  { %12975 = vmatprep.subr.mxu0 %v23770_v5  ;;  %13002 = vmatprep.subr.mxu1 %v23727_v8  ;;  %v23773_v8 = vand.u32 4294901760, %v23772_v45  ;;  %v7466_v60 = vadd.f32 %v12565_v42, %v20214_v24  ;;  %v23776_v24 = vand.u32 4294901760, %v20063_v63  ;;  %v23778_v63 = vld [vmem:[#allocation34_spill] sm:$0xff]  ;;  %v22363_v42 = vand.u32 4294901760, %v20386_v17  ;;  %v23782_v5 = vld [vmem:[#allocation12_spill] sm:$0xff] }
 0x40b   :  { %13003 = vmatpush3.msra.mxu1 %v23728_v2  ;;  %v20401_v2 = vsub.f32 %v20312_v29, %v22357_v58  ;;  %v23779_v40 = vand.u32 4294901760, %v23778_v63  ;;  %v23783_v45 = vand.u32 4294901760, %v23782_v5  ;;  %v380_v63 = vld [vmem:[%s21623_s1 + $0xac0] sm:$0xff]  ;;  %v20468_v58 = vsub.f32 %v20360_v21, %v22361_v37 }
 0x40c   :  { %12976 = vmatpush3.msra.mxu0 %v23773_v8  ;;  %13004 = vmatprep.subr.mxu1 %v19869_v23  ;;  %v365_v23 = vld [vmem:[%s21623_s1 + $0xa48] sm:$0xff]  ;;  %v23789_v5 = vld [vmem:[#allocation24_spill] sm:$0xff]  ;;  %v20482_v37 = vand.u32 4294901760, %v380_v63  ;;  %v20487_v62 = vsub.f32 %v20386_v17, %v22363_v42 }
 0x40d   :  { %12977 = vmatprep.subr.mxu0 %v23774_v20  ;;  %13005 = vmatpush3.msra.mxu1 %v23729_v4  ;;  %v20423_v4 = vsub.f32 %v367_v36, %v20370_v48  ;;  %v364_v36 = vld [vmem:[%s21623_s1 + $0xa40] sm:$0xff]  ;;  %v23784_v8 = vld [vmem:[#allocation37_spill] sm:$0xff]  ;;  %v20444_v20 = vand.u32 4294901760, %v381_v12 }
 0x40e   :  { %12978 = vmatpush3.msra.mxu0 %v23776_v24  ;;  %13006 = vmatprep.subr.mxu1 %v23730_v39  ;;  %v12598_v15 = vpop.f32.mrf.mxu1  ;;  %v20446_v24 = vand.u32 4294901760, %v365_v23  ;;  %v20477_v22 = vand.u32 4294901760, %v364_v36  ;;  %23792 = vst [vmem:[#allocation19_spill] sm:$0xff] %v20482_v37  ;;  %v362_v39 = vld [vmem:[%s21623_s1 + $0xa30] sm:$0xff] }
 0x40f   :  { %12979 = vmatprep.subr.mxu0 %v23779_v40  ;;  %13007 = vmatpush3.msra.mxu1 %v23731_v3  ;;  %23785 = vst [vmem:[#allocation33_spill] sm:$0xff] %v20444_v20  ;;  %v20452_v40 = vsub.f32 %v382_v46, %v20396_v13  ;;  %v379_v46 = vld [vmem:[%s21623_s1 + $0xab8] sm:$0xff]  ;;  %v22365_v27 = vand.u32 4294901760, %v20423_v4 }
 0x410   :  { %12980 = vmatpush3.msra.mxu0 %v23781_v6  ;;  %13008 = vmatprep.subr.mxu1 %v23784_v8  ;;  %23786 = vst [vmem:[#allocation20_spill] sm:$0xff] %v20446_v24  ;;  %v23788_v6 = vand.u32 4294901760, %v23787_v18  ;;  %v20458_v8 = vsub.f32 %v366_v56, %v20406_v51  ;;  %v22364_v18 = vand.u32 4294901760, %v20417_v50  ;;  %v23790_v56 = vld [vmem:[#allocation36_spill] sm:$0xff]  ;;  %23791 = vst [vmem:[#allocation39_spill] sm:$0xff] %v20477_v22  ;;  %v20505_v25 = vand.u32 4294901760, %v379_v46 }
 0x411   :  { %12981 = vmatprep.subr.mxu0 %v23783_v45  ;;  %9186 = vmatprep.mubr.f32.mxu0 %v23789_v5  ;;  %v12599_v45 = vpop.f32.mrf.mxu1  ;;  %v20503_v42 = vsub.f32 %v365_v23, %v20446_v24  ;;  %v20527_v44 = vsub.f32 %v364_v36, %v20477_v22  ;;  %v20546_v36 = vld [vmem:[%s21623_s1 + $0xaa8] sm:$0xff] }
 0x412   :  { %12982 = vmatpush3.msra.mxu0 %v23788_v6  ;;  %13009 = vmatpush3.msra.mxu1 %v23732_v9  ;;  %v12600_v6 = vadd.f32 %v12599_v45, %v12598_v15  ;;  %v363_v9 = vld [vmem:[%s21623_s1 + $0xa38] sm:$0xff]  ;;  %23794 = vst [vmem:[#allocation11_spill] sm:$0xff] %v20505_v25 }
 0x413   :  { %9188 = vmatmul.mubr.f32.vlgmr.msra.gmra.mxu0 %v23790_v56  ;;  %13010 = vmatprep.subr.mxu1 %v19955_v41  ;;  %v13266_v15 = vld [vmem:[%s21622_s0 + $0x28] ss:$48 sps:$4 sm:$0xff]   ;;  %23793 = vst [vmem:[#allocation18_spill] sm:$0xff] %v20503_v42  ;;  %23795 = vst [vmem:[#allocation35_spill] sm:$0xff] %v20527_v44 }
 0x414   :  { %13021 = vmatprep.subr.mxu0 %v20265_v30  ;;  %v13268_v41 = vld [vmem:[%s21622_s0 + $0x88] ss:$48 sps:$4 sm:$0xff]   ;;  %13011 = vmatpush3.msra.mxu1 %v19928_v47  ;;  %v20500_v45 = vadd.f32 %v12600_v6, %v7466_v60  ;;  %v20517_v60 = vsub.f32 %v20417_v50, %v22364_v18  ;;  %v20521_v6 = vsub.f32 %v381_v12, %v20444_v20  ;;  %v20529_v47 = vand.u32 4294901760, %v363_v9  ;;  %v378_v12 = vld [vmem:[%s21623_s1 + $0xab0] sm:$0xff] }
 0x415   :  { %13022 = vmatpush3.msra.mxu0 %v20267_v33  ;;  %13012 = vmatprep.subr.mxu1 %v20002_v14  ;;  %v20534_v18 = vsub.f32 %v20423_v4, %v22365_v27  ;;  %v361_v27 = vld [vmem:[%s21623_s1 + $0xa28] sm:$0xff]  ;;  %v20552_v14 = vsub.f32 %v380_v63, %v20482_v37  ;;  %v625_v23 = vrot.slane %v13266_v15, %v23798_v28  ;;  %v20571_v15 = vand.u32 4294901760, %v378_v12 }
 0x416   :  { %13023 = vmatprep.subr.mxu0 %v20272_v53  ;;  %13013 = vmatpush3.msra.mxu1 %v20016_v0  ;;  %23796 = vst [vmem:[#allocation30_spill] sm:$0xff] %v20529_v47  ;;  %v20541_v0 = vand.u32 4294901760, %v362_v39  ;;  %v20566_v63 = vsub.f32 %v379_v46, %v20505_v25  ;;  %v20582_v46 = vsub.f32 %v363_v9, %v20529_v47  ;;  %v20588_v53 = vand.u32 4294901760, %v361_v27  ;;  %v376_v9 = vld [vmem:[%s21623_s1 + $0xaa0] sm:$0xff] }
 0x417   :  { %13024 = vmatpush3.msra.mxu0 %v20280_v26  ;;  %13014 = vmatprep.subr.mxu1 %v20043_v61  ;;  %v639_v61 = vrot.slane %v13268_v41, %v23798_v28  ;;  %v23800_v41 = vand.u32 4294901760, %v20458_v8 }
 0x418   :  { %13025 = vmatprep.subr.mxu0 %v20291_v1  ;;  %23797 = vst [vmem:[#allocation22_spill] sm:$0xff] %v20541_v0  ;;  %13015 = vmatpush3.msra.mxu1 %v20029_v54  ;;  %v23799_v1 = vand.u32 4294901760, %v20452_v40  ;;  %23801 = vst [vmem:[#allocation5_spill] sm:$0xff] %v20582_v46  ;;  %v20586_v54 = vand.u32 4294901760, %v20546_v36 }
 0x419   :  { %13026 = vmatpush3.msra.mxu0 %v20320_v38  ;;  %13016 = vmatprep.subr.mxu1 %v20065_v52  ;;  %v20576_v3 = vsub.f32 %v20458_v8, %v23800_v41  ;;  %23803 = vst [vmem:[#allocation15_spill] sm:$0xff] %v20588_v53  ;;  %v360_v41 = vld [vmem:[%s21623_s1 + $0xa20] sm:$0xff]  ;;  %v648_v28 = vcombine.high %v625_v23, %v639_v61  ;;  %v375_v38 = vld [vmem:[%s21623_s1 + $0xa98] sm:$0xff]  ;;  %v23814_v52 = vand.u32 4294901760, %v20552_v14 }
 0x41a   :  { %v20562_v26 = vsub.f32 %v20452_v40, %v23799_v1  ;;  %13027 = vmatprep.subr.mxu0 %v20322_v55  ;;  %13017 = vmatpush3.msra.mxu1 %v20057_v49  ;;  %23802 = vst [vmem:[#allocation26_spill] sm:$0xff] %v20586_v54  ;;  %v359_v49 = vld [vmem:[%s21623_s1 + $0xa18] sm:$0xff]  ;;  %v23805_v55 = vand.u32 4294901760, %v20368_v32  ;;  %v647_v1 = vcombine.low %v625_v23, %v639_v61  ;;  %v23808_v32 = vand.u32 4294901760, %v20521_v6 }
 0x41b   :  { %9290 = vmatprep.mubr.f32.mxu1 %v23789_v5  ;;  %13028 = vmatpush3.msra.mxu0 %v20338_v19  ;;  %v20599_v5 = vsub.f32 %v362_v39, %v20541_v0  ;;  %v23810_v23 = vand.u32 4294901760, %v20391_v31  ;;  %v20636_v61 = vsub.f32 %v361_v27, %v20588_v53  ;;  %v20650_v31 = vsub.f32 %v20552_v14, %v23814_v52 }
 0x41c   :  { %9292 = vmatmul.mubr.f32.vlgmr.msra.gmra.mxu1 %v23790_v56  ;;  %13029 = vmatprep.subr.mxu0 %v20354_v34  ;;  %v23806_v56 = vand.u32 4294901760, %v20503_v42  ;;  %v23807_v34 = vand.u32 4294901760, %v20375_v10  ;;  %v20626_v19 = vsub.f32 %v20521_v6, %v23808_v32  ;;  %v23813_v32 = vand.u32 4294901760, %v20401_v2 }
 0x41d   :  { %23804 = vst [vmem:[#allocation38_spill] sm:$0xff] %v20599_v5  ;;  %13056 = vmatprep.subr.mxu1 %v23805_v55  ;;  %13030 = vmatpush3.msra.mxu0 %v20370_v48  ;;  %23811 = vst [vmem:[#allocation29_spill] sm:$0xff] %v20636_v61  ;;  %v20642_v55 = vsub.f32 %v378_v12, %v20571_v15  ;;  %v23815_v27 = vand.u32 4294901760, %v20527_v44  ;;  %v374_v12 = vld [vmem:[%s21623_s1 + $0xa90] sm:$0xff]  ;;  %v20662_v10 = vand.u32 4294901760, %v648_v28  ;;  %v23817_v2 = vand.u32 4294901760, %v20428_v7 }
 0x41e   :  { %v20613_v39 = vsub.f32 %v20503_v42, %v23806_v56  ;;  %13057 = vmatpush3.msra.mxu1 %v23807_v34  ;;  %v20628_v56 = vand.u32 4294901760, %v360_v41  ;;  %v20630_v42 = vand.u32 4294901760, %v359_v49  ;;  %13031 = vmatprep.subr.mxu0 %v20396_v13  ;;  %v20638_v34 = vand.u32 4294901760, %v376_v9 }
 0x41f   :  { %13058 = vmatprep.subr.mxu1 %v23810_v23  ;;  %13032 = vmatpush3.msra.mxu0 %v20406_v51  ;;  %v20655_v23 = vsub.f32 %v20527_v44, %v23815_v27  ;;  %v20657_v13 = vand.u32 4294901760, %v375_v38  ;;  %23816 = vst [vmem:[#allocation32_spill] sm:$0xff] %v20662_v10  ;;  %v358_v51 = vld [vmem:[%s21623_s1 + $0xa10] sm:$0xff]  ;;  %v20678_v48 = vsub.f32 %v20546_v36, %v20586_v54  ;;  %v20680_v44 = vand.u32 4294901760, %v647_v1  ;;  %v357_v36 = vld [vmem:[%s21623_s1 + $0xa08] sm:$0xff] }
 0x420   :  { %23809 = vst [vmem:[#allocation14_spill] sm:$0xff] %v20628_v56  ;;  %23812 = vst [vmem:[#allocation8_spill] sm:$0xff] %v20638_v34  ;;  %13059 = vmatpush3.msra.mxu1 %v23813_v32  ;;  %13033 = vmatprep.subr.mxu0 %v20444_v20  ;;  %v9456_v52 = vand.u32 4294901760, %v20613_v39  ;;  %v23818_v32 = vand.u32 4294901760, %v20566_v63  ;;  %v23821_v7 = vand.u32 4294901760, %v20463_v16  ;;  %v9568_v39 = vand.u32 4294901760, %v20626_v19 }
 0x421   :  { %13060 = vmatprep.subr.mxu1 %v23817_v2  ;;  %23819 = vst [vmem:[#allocation34_spill] sm:$0xff] %v20678_v48  ;;  %23820 = vst [vmem:[#allocation21_spill] sm:$0xff] %v20680_v44  ;;  %13034 = vmatpush3.msra.mxu0 %v20446_v24  ;;  %v20687_v2 = vsub.f32 %v360_v41, %v20628_v56  ;;  %v23823_v24 = vand.u32 4294901760, %v20468_v58  ;;  %v23824_v16 = vand.u32 4294901760, %v20582_v46  ;;  %v20704_v41 = vand.u32 4294901760, %v374_v12 }
 0x422   :  { %v20671_v27 = vsub.f32 %v20566_v63, %v23818_v32  ;;  %13061 = vmatpush3.msra.mxu1 %v23821_v7  ;;  %v20690_v32 = vsub.f32 %v359_v49, %v20630_v42  ;;  %13035 = vmatprep.subr.mxu0 %v20482_v37  ;;  %v373_v7 = vld [vmem:[%s21623_s1 + $0xa88] sm:$0xff]  ;;  %v20711_v20 = vsub.f32 %v376_v9, %v20638_v34  ;;  %v23825_v58 = vand.u32 4294901760, %v20487_v62  ;;  %v356_v49 = vld [vmem:[%s21623_s1 + $0xa00] sm:$0xff] }
 0x423   :  { %13062 = vmatprep.subr.mxu1 %v23823_v24  ;;  %v20702_v19 = vsub.f32 %v20582_v46, %v23824_v16  ;;  %13036 = vmatpush3.msra.mxu0 %v20477_v22  ;;  %v9575_v24 = vand.u32 4294901760, %v20650_v31  ;;  %v9463_v16 = vand.u32 4294901760, %v20655_v23  ;;  %v20718_v37 = vand.u32 4294901760, %v358_v51  ;;  %v372_v23 = vld [vmem:[%s21623_s1 + $0xa80] sm:$0xff] }
 0x424   :  { %23822 = vst [vmem:[#allocation12_spill] sm:$0xff] %v20690_v32  ;;  %13063 = vmatpush3.msra.mxu1 %v23825_v58  ;;  %v20724_v46 = vsub.f32 %v648_v28, %v20662_v10  ;;  %13037 = vmatprep.subr.mxu0 %v20505_v25  ;;  %v23826_v9 = vand.u32 4294901760, %v20517_v60  ;;  %v9582_v62 = vand.u32 4294901760, %v20671_v27  ;;  %v20731_v58 = vand.u32 4294901760, %v357_v36 }
 0x425   :  { %v20737_v22 = vsub.f32 %v647_v1, %v20680_v44  ;;  %13038 = vmatpush3.msra.mxu0 %v20529_v47  ;;  %v23827_v28 = vand.u32 4294901760, %v20534_v18  ;;  %v23828_v60 = vand.u32 4294901760, %v20599_v5  ;;  %v20749_v25 = vsub.f32 %v375_v38, %v20657_v13  ;;  %9634 = vmatprep.mubr.f32.mxu1 %v20662_v10 }
 0x426   :  { %13064 = vmatprep.subr.mxu1 %v23826_v9  ;;  %v20745_v9 = vand.u32 4294901760, %v373_v7  ;;  %13039 = vmatprep.subr.mxu0 %v20571_v15  ;;  %v23829_v1 = vand.u32 4294901760, %v20562_v26  ;;  %v9470_v47 = vand.u32 4294901760, %v20702_v19  ;;  %v23830_v18 = vand.u32 4294901760, %v20642_v55 }
 0x427   :  { %13065 = vmatpush3.msra.mxu1 %v23827_v28  ;;  %v9476_v27 = vsub.f32 %v20599_v5, %v23828_v60  ;;  %v20759_v5 = vand.u32 4294901760, %v356_v49  ;;  %13040 = vmatpush3.msra.mxu0 %v20541_v0  ;;  %v23831_v38 = vand.u32 4294901760, %v20576_v3  ;;  %v20765_v31 = vsub.f32 %v358_v51, %v20718_v37 }
 0x428   :  { %13066 = vmatprep.subr.mxu1 %v23829_v1  ;;  %v9588_v28 = vsub.f32 %v20642_v55, %v23830_v18  ;;  %v20767_v26 = vand.u32 4294901760, %v372_v23  ;;  %v20771_v1 = vsub.f32 %v374_v12, %v20704_v41  ;;  %13041 = vmatprep.subr.mxu0 %v20586_v54  ;;  %v23832_v18 = vand.u32 4294901760, %v20678_v48 }
 0x429   :  { %13067 = vmatpush3.msra.mxu1 %v23831_v38  ;;  %v20778_v3 = vsub.f32 %v357_v36, %v20731_v58  ;;  %v12633_v38 = vpop.f32.mrf.mxu0  ;;  %13042 = vmatpush3.msra.mxu0 %v20588_v53  ;;  %v9477_v12 = vand.u32 4294901760, %v9476_v27  ;;  %v23834_v19 = vand.u32 4294901760, %v20636_v61  ;;  %v23836_v51 = vand.u32 4294901760, %v20711_v20 }
 0x42a   :  { %13068 = vmatprep.subr.mxu1 %v9568_v39  ;;  %v9595_v60 = vsub.f32 %v20678_v48, %v23832_v18  ;;  %v20788_v18 = vsub.f32 %v373_v7, %v20745_v9  ;;  %13043 = vmatprep.subr.mxu0 %v20638_v34  ;;  %v9589_v36 = vand.u32 4294901760, %v9588_v28  ;;  %v23838_v7 = vand.u32 4294901760, %v20724_v46 }
 0x42b   :  { %23833 = vst [vmem:[#allocation37_spill] sm:$0xff] %v20778_v3  ;;  %13069 = vmatpush3.msra.mxu1 %v9456_v52  ;;  %v9483_v39 = vsub.f32 %v20636_v61, %v23834_v19  ;;  %v9602_v0 = vsub.f32 %v20711_v20, %v23836_v51  ;;  %v20795_v52 = vsub.f32 %v356_v49, %v20759_v5  ;;  %v12634_v53 = vpop.f32.mrf.mxu0  ;;  %v23840_v51 = vand.u32 4294901760, %v20687_v2 }
 0x42c   :  { %23835 = vst [vmem:[#allocation16_spill] sm:$0xff] %v20788_v18  ;;  %13070 = vmatprep.subr.mxu1 %v9575_v24  ;;  %13044 = vmatpush3.msra.mxu0 %v20628_v56  ;;  %v9396_v19 = vsub.f32 %v20724_v46, %v23838_v7  ;;  %v12635_v54 = vadd.f32 %v12634_v53, %v12633_v38  ;;  %v9596_v49 = vand.u32 4294901760, %v9595_v60  ;;  %v22415_v60 = vand.u32 4294901760, %v20788_v18 }
 0x42d   :  { %23837 = vst [vmem:[#allocation24_spill] sm:$0xff] %v20795_v52  ;;  %13071 = vmatpush3.msra.mxu1 %v9463_v16  ;;  %v20804_v28 = vsub.f32 %v372_v23, %v20767_v26  ;;  %13045 = vmatprep.subr.mxu0 %v20657_v13  ;;  %v9490_v27 = vsub.f32 %v20687_v2, %v23840_v51  ;;  %v23841_v16 = vand.u32 4294901760, %v20737_v22  ;;  %v9484_v53 = vand.u32 4294901760, %v9483_v39 }
 0x42e   :  { %13072 = vmatprep.subr.mxu1 %v9582_v62  ;;  %13046 = vmatpush3.msra.mxu0 %v20630_v42  ;;  %v23842_v23 = vand.u32 4294901760, %v20749_v25  ;;  %v7682_v62 = vadd.f32 %v12635_v54, %v20500_v45  ;;  %v9603_v51 = vand.u32 4294901760, %v9602_v0  ;;  %v23844_v39 = vand.u32 4294901760, %v20771_v1 }
 0x42f   :  { %23839 = vst [vmem:[#allocation36_spill] sm:$0xff] %v20804_v28  ;;  %v9402_v56 = vsub.f32 %v20737_v22, %v23841_v16  ;;  %13073 = vmatpush3.msra.mxu1 %v9470_v47  ;;  %13047 = vmatprep.subr.mxu0 %v20704_v41  ;;  %v23843_v16 = vand.u32 4294901760, %v20690_v32  ;;  %v9397_v47 = vand.u32 4294901760, %v9396_v19  ;;  %v22417_v54 = vand.u32 4294901760, %v20804_v28 }
 0x430   :  { %v9609_v38 = vsub.f32 %v20749_v25, %v23842_v23  ;;  %13074 = vmatprep.subr.mxu1 %v9589_v36  ;;  %13048 = vmatpush3.msra.mxu0 %v20718_v37  ;;  %v9616_v45 = vsub.f32 %v20771_v1, %v23844_v39  ;;  %v9491_v0 = vand.u32 4294901760, %v9490_v27  ;;  %v23845_v23 = vand.u32 4294901760, %v20765_v31  ;;  %v12668_v39 = vpop.f32.mrf.mxu1 }
 0x431   :  { %v9497_v7 = vsub.f32 %v20690_v32, %v23843_v16  ;;  %13075 = vmatpush3.msra.mxu1 %v9477_v12  ;;  %13049 = vmatprep.subr.mxu0 %v20745_v9  ;;  %v9403_v36 = vand.u32 4294901760, %v9402_v56  ;;  %v22416_v24 = vand.u32 4294901760, %v20795_v52  ;;  %v9623_v19 = vsub.f32 %v20788_v18, %v22415_v60 }
 0x432   :  { %13076 = vmatprep.subr.mxu1 %v9596_v49  ;;  %v9504_v16 = vsub.f32 %v20765_v31, %v23845_v23  ;;  %13050 = vmatpush3.msra.mxu0 %v20731_v58  ;;  %v9610_v12 = vand.u32 4294901760, %v9609_v38  ;;  %v23846_v56 = vand.u32 4294901760, %v20778_v3  ;;  %v9617_v23 = vand.u32 4294901760, %v9616_v45  ;;  %v12669_v38 = vpop.f32.mrf.mxu1 }
 0x433   :  { %13077 = vmatpush3.msra.mxu1 %v9484_v53  ;;  %13051 = vmatprep.subr.mxu0 %v20767_v26  ;;  %v9498_v27 = vand.u32 4294901760, %v9497_v7  ;;  %v9630_v53 = vsub.f32 %v20804_v28, %v22417_v54  ;;  %v9518_v7 = vsub.f32 %v20795_v52, %v22416_v24  ;;  %v23863_v24 = vld [vmem:[#allocation19_spill] sm:$0xff] }
 0x434   :  { %13078 = vmatprep.subr.mxu1 %v9603_v51  ;;  %v9511_v49 = vsub.f32 %v20778_v3, %v23846_v56  ;;  %13052 = vmatpush3.msra.mxu0 %v20759_v5  ;;  %v9505_v60 = vand.u32 4294901760, %v9504_v16  ;;  %v12670_v51 = vadd.f32 %v12669_v38, %v12668_v39  ;;  %v9624_v56 = vand.u32 4294901760, %v9623_v19  ;;  %v23849_v16 = vld [vmem:[#allocation9_spill] sm:$0xff]  ;;  %v23851_v19 = vld [vmem:[#allocation7_spill] sm:$0xff] }
 0x435   :  { %9398 = vmatprep.mubr.f32.mxu0 %v9397_v47  ;;  %13079 = vmatpush3.msra.mxu1 %v9491_v0  ;;  %v9631_v0 = vand.u32 4294901760, %v9630_v53  ;;  %v23852_v39 = vld [vmem:[#allocation13_spill] sm:$0xff]  ;;  %v23857_v38 = vld [vmem:[#allocation31_spill] sm:$0xff] }
 0x436   :  { %9404 = vmatmul.mubr.f32.vlgmr.msra.gmra.mxu0 %v9403_v36  ;;  %13080 = vmatprep.subr.mxu1 %v9610_v12  ;;  %v9512_v47 = vand.u32 4294901760, %v9511_v49  ;;  %v7914_v45 = vadd.f32 %v12670_v51, %v7682_v62  ;;  %v9519_v36 = vand.u32 4294901760, %v9518_v7  ;;  %v23847_v62 = vld [vmem:[#allocation10_spill] sm:$0xff]  ;;  %v23854_v49 = vld [vmem:[#allocation28_spill] sm:$0xff]  ;;  %v23856_v53 = vld [vmem:[#allocation5_spill] sm:$0xff] }
 0x437   :  { %13091 = vmatprep.subr.mxu0 %v20300_v59  ;;  %13081 = vmatpush3.msra.mxu1 %v9498_v27  ;;  %v23850_v12 = vld [vmem:[#allocation18_spill] sm:$0xff]  ;;  %v23853_v27 = vld [vmem:[#allocation35_spill] sm:$0xff] }
 0x438   :  { %13092 = vmatpush3.msra.mxu0 %v20289_v43  ;;  %13082 = vmatprep.subr.mxu1 %v9617_v23  ;;  %v23855_v23 = vld [vmem:[#allocation25_spill] sm:$0xff]  ;;  %v23858_v7 = vld [vmem:[#allocation23_spill] sm:$0xff]  ;;  %v23859_v51 = vld [vmem:[#allocation38_spill] sm:$0xff] }
 0x439   :  { %13093 = vmatprep.subr.mxu0 %v20306_v11  ;;  %13083 = vmatpush3.msra.mxu1 %v9505_v60  ;;  %v23848_v60 = vld [vmem:[#allocation6_spill] sm:$0xff] }
 0x43a   :  { %13094 = vmatpush3.msra.mxu0 %v20312_v29  ;;  %13084 = vmatprep.subr.mxu1 %v9624_v56  ;;  %v23860_v56 = vld [vmem:[#allocation17_spill] sm:$0xff] }
 0x43b   :  { %13095 = vmatprep.subr.mxu0 %v20333_v57  ;;  %13085 = vmatpush3.msra.mxu1 %v9512_v47  ;;  %v23861_v47 = vld [vmem:[#allocation33_spill] sm:$0xff] }
 0x43c   :  { %13096 = vmatpush3.msra.mxu0 %v20352_v35  ;;  %13086 = vmatprep.subr.mxu1 %v9631_v0 }
 0x43d   :  { %13097 = vmatprep.subr.mxu0 %v20360_v21  ;;  %13087 = vmatpush3.msra.mxu1 %v9519_v36  ;;  %v23862_v36 = vld [vmem:[#allocation20_spill] sm:$0xff] }
 0x43e   :  { %13098 = vmatpush3.msra.mxu0 %v20386_v17  ;;  %9636 = vmatmul.mubr.f32.vlgmr.msra.gmra.mxu1 %v20680_v44  ;;  %v23864_v44 = vld [vmem:[#allocation39_spill] sm:$0xff] }
 0x43f   :  { %13099 = vmatprep.subr.mxu0 %v20417_v50  ;;  %13126 = vmatprep.subr.mxu1 %v20265_v30 }
 0x440   :  { %13100 = vmatpush3.msra.mxu0 %v20423_v4  ;;  %13127 = vmatpush3.msra.mxu1 %v20267_v33 }
 0x441   :  { %13101 = vmatprep.subr.mxu0 %v20452_v40  ;;  %13128 = vmatprep.subr.mxu1 %v23847_v62 }
 0x442   :  { %13102 = vmatpush3.msra.mxu0 %v20458_v8  ;;  %13129 = vmatpush3.msra.mxu1 %v23848_v60 }
 0x443   :  { %13103 = vmatprep.subr.mxu0 %v20521_v6  ;;  %13130 = vmatprep.subr.mxu1 %v23849_v16 }
 0x444   :  { %13104 = vmatpush3.msra.mxu0 %v23850_v12  ;;  %13131 = vmatpush3.msra.mxu1 %v23851_v19 }
 0x445   :  { %13105 = vmatprep.subr.mxu0 %v20552_v14  ;;  %13132 = vmatprep.subr.mxu1 %v23852_v39 }
 0x446   :  { %13106 = vmatpush3.msra.mxu0 %v23853_v27  ;;  %13133 = vmatpush3.msra.mxu1 %v23854_v49 }
 0x447   :  { %13107 = vmatprep.subr.mxu0 %v20566_v63  ;;  %13134 = vmatprep.subr.mxu1 %v23855_v23 }
 0x448   :  { %13108 = vmatpush3.msra.mxu0 %v23856_v53  ;;  %13135 = vmatpush3.msra.mxu1 %v23857_v38 }
 0x449   :  { %13109 = vmatprep.subr.mxu0 %v20642_v55  ;;  %13136 = vmatprep.subr.mxu1 %v23858_v7  ;;  %v12703_v0 = vpop.f32.mrf.mxu0 }
 0x44a   :  { %13110 = vmatpush3.msra.mxu0 %v23859_v51  ;;  %13137 = vmatpush3.msra.mxu1 %v23860_v56 }
 0x44b   :  { %13111 = vmatprep.subr.mxu0 %v20678_v48  ;;  %13138 = vmatprep.subr.mxu1 %v23861_v47  ;;  %v12704_v54 = vpop.f32.mrf.mxu0  ;;  %v23865_v48 = vld [vmem:[#allocation11_spill] sm:$0xff]  ;;  %v23866_v47 = vld [vmem:[#allocation30_spill] sm:$0xff] }
 0x44c   :  { %13112 = vmatpush3.msra.mxu0 %v20636_v61  ;;  %13139 = vmatpush3.msra.mxu1 %v23862_v36  ;;  %v12705_v10 = vadd.f32 %v12704_v54, %v12703_v0  ;;  %v23868_v54 = vld [vmem:[#allocation26_spill] sm:$0xff]  ;;  %v23869_v0 = vld [vmem:[#allocation15_spill] sm:$0xff] }
 0x44d   :  { %13113 = vmatprep.subr.mxu0 %v20711_v20  ;;  %13140 = vmatprep.subr.mxu1 %v23863_v24  ;;  %v23867_v24 = vld [vmem:[#allocation22_spill] sm:$0xff] }
 0x44e   :  { %13114 = vmatpush3.msra.mxu0 %v20687_v2  ;;  %13141 = vmatpush3.msra.mxu1 %v23864_v44  ;;  %v8052_v61 = vadd.f32 %v12705_v10, %v7914_v45  ;;  %v23870_v45 = vld [vmem:[#allocation14_spill] sm:$0xff] }
 0x44f   :  { %13115 = vmatprep.subr.mxu0 %v20749_v25  ;;  %13142 = vmatprep.subr.mxu1 %v23865_v48 }
 0x450   :  { %13116 = vmatpush3.msra.mxu0 %v20690_v32  ;;  %13143 = vmatpush3.msra.mxu1 %v23866_v47 }
 0x451   :  { %13117 = vmatprep.subr.mxu0 %v20771_v1  ;;  %13144 = vmatprep.subr.mxu1 %v20571_v15 }
 0x452   :  { %13118 = vmatpush3.msra.mxu0 %v20765_v31  ;;  %13145 = vmatpush3.msra.mxu1 %v23867_v24  ;;  %v12738_v32 = vpop.f32.mrf.mxu1 }
 0x453   :  { %13119 = vmatprep.subr.mxu0 %v20788_v18  ;;  %13146 = vmatprep.subr.mxu1 %v23868_v54 }
 0x454   :  { %13120 = vmatpush3.msra.mxu0 %v20778_v3  ;;  %13147 = vmatpush3.msra.mxu1 %v23869_v0  ;;  %v12739_v10 = vpop.f32.mrf.mxu1  ;;  %v23871_v3 = vand.u32 4294901760, %v20300_v59  ;;  %v23875_v59 = vand.u32 4294901760, %v20333_v57  ;;  %v23880_v57 = vand.u32 4294901760, %v20737_v22 }
 0x455   :  { %13121 = vmatprep.subr.mxu0 %v20804_v28  ;;  %13148 = vmatprep.subr.mxu1 %v20638_v34  ;;  %v12740_v18 = vadd.f32 %v12739_v10, %v12738_v32  ;;  %v23872_v28 = vand.u32 4294901760, %v20289_v43  ;;  %v23874_v32 = vand.u32 4294901760, %v20312_v29  ;;  %v23876_v43 = vand.u32 4294901760, %v20352_v35  ;;  %v23910_v10 = vld [vmem:[#allocation36_spill] sm:$0xff] }
 0x456   :  { %13122 = vmatpush3.msra.mxu0 %v20795_v52  ;;  %9771 = vmatprep.mubr.f32.mxu0 %v20724_v46  ;;  %v23873_v52 = vand.u32 4294901760, %v20306_v11  ;;  %v23877_v11 = vand.u32 4294901760, %v20360_v21  ;;  %v23878_v29 = vand.u32 4294901760, %v20724_v46  ;;  %v23882_v35 = vand.u32 4294901760, %v20423_v4 }
 0x457   :  { %13149 = vmatpush3.msra.mxu1 %v23870_v45  ;;  %9774 = vmatmul.mubr.f32.vlgmr.msra.gmra.mxu0 %v20737_v22  ;;  %v8160_v34 = vadd.f32 %v12740_v18, %v8052_v61  ;;  %v23879_v61 = vand.u32 4294901760, %v20386_v17  ;;  %v23883_v21 = vand.u32 4294901760, %v20452_v40  ;;  %v23884_v17 = vand.u32 4294901760, %v20458_v8  ;;  %v23895_v18 = vld [vmem:[#allocation33_spill] sm:$0xff] }
 0x458   :  { %13150 = vmatprep.subr.mxu1 %v20657_v13  ;;  %13161 = vmatprep.subr.mxu0 %v23871_v3  ;;  %v23881_v3 = vand.u32 4294901760, %v20417_v50  ;;  %v23885_v22 = vand.u32 4294901760, %v20521_v6  ;;  %v23888_v50 = vand.u32 4294901760, %v23853_v27  ;;  %v23889_v4 = vand.u32 4294901760, %v20566_v63  ;;  %v23893_v63 = vld [vmem:[#allocation34_spill] sm:$0xff] }
 0x459   :  { %13151 = vmatpush3.msra.mxu1 %v20630_v42  ;;  %13162 = vmatpush3.msra.mxu0 %v23872_v28  ;;  %v23890_v40 = vand.u32 4294901760, %v23856_v53  ;;  %v23891_v8 = vand.u32 4294901760, %v20642_v55  ;;  %v23892_v6 = vand.u32 4294901760, %v23859_v51  ;;  %v23894_v46 = vand.u32 4294901760, %v23893_v63  ;;  %v23896_v28 = vld [vmem:[#allocation29_spill] sm:$0xff]  ;;  %v23906_v51 = vld [vmem:[#allocation16_spill] sm:$0xff] }
 0x45a   :  { %13152 = vmatprep.subr.mxu1 %v20704_v41  ;;  %13163 = vmatprep.subr.mxu0 %v23873_v52  ;;  %v23897_v55 = vand.u32 4294901760, %v23896_v28 }
 0x45b   :  { %13153 = vmatpush3.msra.mxu1 %v20718_v37  ;;  %13164 = vmatpush3.msra.mxu0 %v23874_v32  ;;  %v23911_v32 = vand.u32 4294901760, %v23910_v10 }
 0x45c   :  { %13154 = vmatprep.subr.mxu1 %v20745_v9  ;;  %13165 = vmatprep.subr.mxu0 %v23875_v59  ;;  %v23912_v59 = vld [vmem:[#allocation8_spill] sm:$0xff] }
 0x45d   :  { %13155 = vmatpush3.msra.mxu1 %v20731_v58  ;;  %13166 = vmatpush3.msra.mxu0 %v23876_v43  ;;  %v398_v43 = vld [vmem:[%s21623_s1 + $0xb50] sm:$0xff] }
 0x45e   :  { %13156 = vmatprep.subr.mxu1 %v20767_v26  ;;  %13167 = vmatprep.subr.mxu0 %v23877_v11  ;;  %v23913_v11 = vld [vmem:[#allocation24_spill] sm:$0xff] }
 0x45f   :  { %13157 = vmatpush3.msra.mxu1 %v20759_v5  ;;  %9878 = vmatprep.mubr.f32.mxu1 %v23878_v29  ;;  %v23914_v29 = vand.u32 4294901760, %v23913_v11 }
 0x460   :  { %13168 = vmatpush3.msra.mxu0 %v23879_v61  ;;  %9882 = vmatmul.mubr.f32.vlgmr.msra.gmra.mxu1 %v23880_v57 }
 0x461   :  { %13169 = vmatprep.subr.mxu0 %v23881_v3  ;;  %13196 = vmatprep.subr.mxu1 %v20265_v30  ;;  %v23886_v30 = vand.u32 4294901760, %v23850_v12 }
 0x462   :  { %13170 = vmatpush3.msra.mxu0 %v23882_v35  ;;  %13197 = vmatpush3.msra.mxu1 %v20267_v33  ;;  %v23887_v33 = vand.u32 4294901760, %v20552_v14  ;;  %v403_v14 = vld [vmem:[%s21623_s1 + $0xb78] sm:$0xff]  ;;  %v23916_v35 = vld [vmem:[#allocation21_spill] sm:$0xff] }
 0x463   :  { %13171 = vmatprep.subr.mxu0 %v23883_v21  ;;  %13198 = vmatprep.subr.mxu1 %v23847_v62  ;;  %v23898_v62 = vand.u32 4294901760, %v20711_v20  ;;  %v401_v20 = vld [vmem:[%s21623_s1 + $0xb68] sm:$0xff] }
 0x464   :  { %13172 = vmatpush3.msra.mxu0 %v23884_v17  ;;  %13199 = vmatpush3.msra.mxu1 %v23848_v60  ;;  %v23899_v60 = vld [vmem:[#allocation19_spill] sm:$0xff]  ;;  %v397_v17 = vld [vmem:[%s21623_s1 + $0xb48] sm:$0xff] }
 0x465   :  { %13173 = vmatprep.subr.mxu0 %v23885_v22  ;;  %13200 = vmatprep.subr.mxu1 %v23849_v16  ;;  %v20986_v16 = vand.u32 4294901760, %v403_v14  ;;  %v13295_v22 = vmov 0.0  }
 0x466   :  { %13174 = vmatpush3.msra.mxu0 %v23886_v30  ;;  %13201 = vmatpush3.msra.mxu1 %v23851_v19  ;;  %v402_v19 = vld [vmem:[%s21623_s1 + $0xb70] sm:$0xff] }
 0x467   :  { %13175 = vmatprep.subr.mxu0 %v23887_v33  ;;  %13202 = vmatprep.subr.mxu1 %v23852_v39  ;;  %v23900_v39 = vand.u32 4294901760, %v20687_v2  ;;  %v21003_v2 = vand.u32 4294901760, %v402_v19  ;;  %v21058_v33 = vand.u32 4294901760, %v398_v43 }
 0x468   :  { %13176 = vmatpush3.msra.mxu0 %v23888_v50  ;;  %13203 = vmatpush3.msra.mxu1 %v23854_v49  ;;  %v23901_v49 = vand.u32 4294901760, %v20749_v25  ;;  %v21009_v25 = vsub.f32 %v403_v14, %v20986_v16 }
 0x469   :  { %13177 = vmatprep.subr.mxu0 %v23889_v4  ;;  %13204 = vmatprep.subr.mxu1 %v23855_v23  ;;  %v23902_v23 = vld [vmem:[#allocation12_spill] sm:$0xff] }
 0x46a   :  { %13178 = vmatpush3.msra.mxu0 %v23890_v40  ;;  %13205 = vmatpush3.msra.mxu1 %v23857_v38  ;;  %v23903_v53 = vand.u32 4294901760, %v23902_v23 }
 0x46b   :  { %13179 = vmatprep.subr.mxu0 %v23891_v8  ;;  %13206 = vmatprep.subr.mxu1 %v23858_v7  ;;  %v23905_v7 = vand.u32 4294901760, %v20765_v31  ;;  %v21029_v31 = vsub.f32 %v402_v19, %v21003_v2 }
 0x46c   :  { %13180 = vmatpush3.msra.mxu0 %v23892_v6  ;;  %13207 = vmatpush3.msra.mxu1 %v23860_v56  ;;  %v12773_v52 = vpop.f32.mrf.mxu0  ;;  %v23907_v56 = vand.u32 4294901760, %v23906_v51  ;;  %v395_v6 = vld [vmem:[%s21623_s1 + $0xb38] sm:$0xff] }
 0x46d   :  { %13181 = vmatprep.subr.mxu0 %v23894_v46  ;;  %13208 = vmatprep.subr.mxu1 %v23895_v18  ;;  %v22444_v50 = vand.u32 4294901760, %v21029_v31  ;;  %v394_v46 = vld [vmem:[%s21623_s1 + $0xb30] sm:$0xff]  ;;  %v21108_v28 = vand.u32 4294901760, %v395_v6 }
 0x46e   :  { %13182 = vmatpush3.msra.mxu0 %v23897_v55  ;;  %13209 = vmatpush3.msra.mxu1 %v23862_v36  ;;  %v12774_v12 = vpop.f32.mrf.mxu0 }
 0x46f   :  { %13183 = vmatprep.subr.mxu0 %v23898_v62  ;;  %13210 = vmatprep.subr.mxu1 %v23899_v60  ;;  %v12775_v27 = vadd.f32 %v12774_v12, %v12773_v52  ;;  %v10273_v14 = vsub.f32 %v21029_v31, %v22444_v50 }
 0x470   :  { %13184 = vmatpush3.msra.mxu0 %v23900_v39  ;;  %13211 = vmatpush3.msra.mxu1 %v23864_v44  ;;  %v23904_v44 = vand.u32 4294901760, %v20771_v1  ;;  %v23908_v1 = vld [vmem:[#allocation37_spill] sm:$0xff] }
 0x471   :  { %13185 = vmatprep.subr.mxu0 %v23901_v49  ;;  %13212 = vmatprep.subr.mxu1 %v23865_v48  ;;  %v8328_v38 = vadd.f32 %v12775_v27, %v8160_v34  ;;  %v400_v48 = vld [vmem:[%s21623_s1 + $0xb60] sm:$0xff]  ;;  %v21017_v34 = vand.u32 4294901760, %v401_v20  ;;  %v10274_v62 = vand.u32 4294901760, %v10273_v14  ;;  %v21136_v49 = vsub.f32 %v395_v6, %v21108_v28 }
 0x472   :  { %13186 = vmatpush3.msra.mxu0 %v23903_v53  ;;  %13213 = vmatpush3.msra.mxu1 %v23866_v47  ;;  %v23909_v47 = vand.u32 4294901760, %v23908_v1  ;;  %v391_v53 = vld [vmem:[%s21623_s1 + $0xb18] sm:$0xff] }
 0x473   :  { %13187 = vmatprep.subr.mxu0 %v23904_v44  ;;  %13214 = vmatprep.subr.mxu1 %v20571_v15  ;;  %v399_v15 = vld [vmem:[%s21623_s1 + $0xb58] sm:$0xff]  ;;  %v21044_v61 = vsub.f32 %v401_v20, %v21017_v34 }
 0x474   :  { %13188 = vmatpush3.msra.mxu0 %v23905_v7  ;;  %13215 = vmatpush3.msra.mxu1 %v23867_v24  ;;  %v21031_v24 = vand.u32 4294901760, %v400_v48  ;;  %v21046_v57 = vand.u32 4294901760, %v399_v15  ;;  %v13271_v7 = vld [vmem:[%s21622_s0 + $0x8c] ss:$48 sps:$4 sm:$0xff]  }
 0x475   :  { %13189 = vmatprep.subr.mxu0 %v23907_v56  ;;  %13216 = vmatprep.subr.mxu1 %v23868_v54  ;;  %v12808_v36 = vpop.f32.mrf.mxu1  ;;  %v22445_v54 = vand.u32 4294901760, %v21009_v25  ;;  %v22442_v8 = vand.u32 4294901760, %v21044_v61 }
 0x476   :  { %13190 = vmatpush3.msra.mxu0 %v23909_v47  ;;  %13217 = vmatpush3.msra.mxu1 %v23869_v0  ;;  %v23915_v0 = vld [vmem:[#allocation32_spill] sm:$0xff]  ;;  %v21056_v30 = vsub.f32 %v400_v48, %v21031_v24  ;;  %v21074_v40 = vsub.f32 %v399_v15, %v21046_v57  ;;  %v13270_v48 = vld [vmem:[%s21622_s0 + $0x2c] ss:$48 sps:$4 sm:$0xff]   ;;  %v21168_v47 = vand.u32 4294901760, %v391_v53 }
 0x477   :  { %13191 = vmatprep.subr.mxu0 %v23911_v32  ;;  %13218 = vmatprep.subr.mxu1 %v23912_v59  ;;  %v12809_v3 = vpop.f32.mrf.mxu1  ;;  %v10280_v52 = vsub.f32 %v21044_v61, %v22442_v8  ;;  %v22432_v59 = vand.u32 4294901760, %v21136_v49  ;;  %v404_v8 = vld [vmem:[%s21623_s1 + $0xb80] sm:$0xff] }
 0x478   :  { %13192 = vmatpush3.msra.mxu0 %v23914_v29  ;;  %10048 = vmatprep.mubr.f32.mxu0 %v23915_v0  ;;  %v12810_v21 = vadd.f32 %v12809_v3, %v12808_v36  ;;  %v22440_v55 = vand.u32 4294901760, %v21074_v40  ;;  %v390_v36 = vld [vmem:[%s21623_s1 + $0xb10] sm:$0xff] }
 0x479   :  { %13219 = vmatpush3.msra.mxu1 %v23870_v45  ;;  %10050 = vmatmul.mubr.f32.vlgmr.msra.gmra.mxu0 %v23916_v35  ;;  %v10266_v45 = vsub.f32 %v21009_v25, %v22445_v54  ;;  %v10281_v27 = vand.u32 4294901760, %v10280_v52  ;;  %v10322_v52 = vsub.f32 %v21136_v49, %v22432_v59 }
 0x47a   :  { %13220 = vmatprep.subr.mxu1 %v20657_v13  ;;  %10159 = vmatprep.subr.mxu0 %v13295_v22  ;;  %v21066_v4 = vadd.f32 %v12810_v21, %v8328_v38  ;;  %v396_v13 = vld [vmem:[%s21623_s1 + $0xb40] sm:$0xff]  ;;  %v10294_v20 = vsub.f32 %v21074_v40, %v22440_v55 }
 0x47b   :  { %13221 = vmatpush3.msra.mxu1 %v20630_v42  ;;  %10161 = vmatpush1.msra.mxu0 %v20986_v16  ;;  %v21076_v42 = vand.u32 4294901760, %v397_v17  ;;  %v21092_v63 = vand.u32 4294901760, %v396_v13 }
 0x47c   :  { %13222 = vmatprep.subr.mxu1 %v20704_v41  ;;  %10162 = vmatprep.subr.mxu0 %v13295_v22  ;;  %v21087_v41 = vsub.f32 %v398_v43, %v21058_v33  ;;  %v10295_v10 = vand.u32 4294901760, %v10294_v20  ;;  %v389_v43 = vld [vmem:[%s21623_s1 + $0xb08] sm:$0xff] }
 0x47d   :  { %13223 = vmatpush3.msra.mxu1 %v20718_v37  ;;  %10164 = vmatpush1.msra.mxu0 %v21003_v2  ;;  %v22441_v37 = vand.u32 4294901760, %v21056_v30  ;;  %v21103_v18 = vsub.f32 %v397_v17, %v21076_v42  ;;  %v21121_v60 = vsub.f32 %v396_v13, %v21092_v63  ;;  %v21198_v13 = vsub.f32 %v391_v53, %v21168_v47 }
 0x47e   :  { %13224 = vmatprep.subr.mxu1 %v20745_v9  ;;  %10165 = vmatprep.subr.mxu0 %v13295_v22  ;;  %v10267_v9 = vand.u32 4294901760, %v10266_v45  ;;  %v22438_v19 = vand.u32 4294901760, %v21087_v41  ;;  %v21193_v45 = vand.u32 4294901760, %v390_v36  ;;  %v21200_v6 = vand.u32 4294901760, %v389_v43 }
 0x47f   :  { %13225 = vmatpush3.msra.mxu1 %v20731_v58  ;;  %10167 = vmatpush1.msra.mxu0 %v21017_v34  ;;  %v393_v58 = vld [vmem:[%s21623_s1 + $0xb28] sm:$0xff]  ;;  %v10287_v12 = vsub.f32 %v21056_v30, %v22441_v37  ;;  %v22437_v23 = vand.u32 4294901760, %v21103_v18  ;;  %v22435_v15 = vand.u32 4294901760, %v21121_v60 }
 0x480   :  { %13226 = vmatprep.subr.mxu1 %v20767_v26  ;;  %10168 = vmatprep.subr.mxu0 %v13295_v22  ;;  %v21116_v26 = vand.u32 4294901760, %v394_v46  ;;  %v21132_v39 = vand.u32 4294901760, %v393_v58  ;;  %v10301_v56 = vsub.f32 %v21087_v41, %v22438_v19  ;;  %v21221_v20 = vsub.f32 %v390_v36, %v21193_v45  ;;  %v409_v36 = vld [vmem:[%s21623_s1 + $0xba8] sm:$0xff] }
 0x481   :  { %13227 = vmatpush3.msra.mxu1 %v20759_v5  ;;  %10152 = vmatprep.mubr.f32.mxu1 %v23915_v0  ;;  %v392_v5 = vld [vmem:[%s21623_s1 + $0xb20] sm:$0xff]  ;;  %v10288_v51 = vand.u32 4294901760, %v10287_v12  ;;  %v10308_v32 = vsub.f32 %v21103_v18, %v22437_v23  ;;  %v23917_v0 = vld [vmem:[#allocation27_spill] sm:$0xff]  ;;  %v10315_v17 = vsub.f32 %v21121_v60, %v22435_v15  ;;  %v410_v12 = vld [vmem:[%s21623_s1 + $0xbb0] sm:$0xff] }
 0x482   :  { %10170 = vmatpush1.msra.mxu0 %v21031_v24  ;;  %10154 = vmatmul.mubr.f32.vlgmr.msra.gmra.mxu1 %v23916_v35  ;;  %v21148_v38 = vsub.f32 %v394_v46, %v21116_v26  ;;  %v21150_v44 = vand.u32 4294901760, %v392_v5  ;;  %v21166_v1 = vsub.f32 %v393_v58, %v21132_v39  ;;  %v632_v3 = vrot.slane %v13270_v48, %v23917_v0  ;;  %v388_v46 = vld [vmem:[%s21623_s1 + $0xb00] sm:$0xff]  ;;  %v405_v19 = vld [vmem:[%s21623_s1 + $0xb88] sm:$0xff] }
 0x483   :  { %10171 = vmatprep.subr.mxu0 %v13295_v22  ;;  %10262 = vmatprep.subr.mxu1 %v13295_v22  ;;  %v646_v35 = vrot.slane %v13271_v7, %v23917_v0  ;;  %v10302_v21 = vand.u32 4294901760, %v10301_v56  ;;  %v21223_v53 = vand.u32 4294901760, %v388_v46  ;;  %v21228_v48 = vsub.f32 %v389_v43, %v21200_v6 }
 0x484   :  { %10173 = vmatpush1.msra.mxu0 %v21046_v57  ;;  %10268 = vmatpush1.msra.mxu1 %v10267_v9  ;;  %v21184_v11 = vsub.f32 %v392_v5, %v21150_v44  ;;  %v22431_v29 = vand.u32 4294901760, %v21148_v38  ;;  %v22430_v14 = vand.u32 4294901760, %v21166_v1  ;;  %v10309_v9 = vand.u32 4294901760, %v10308_v32 }
 0x485   :  { %10174 = vmatprep.subr.mxu0 %v13295_v22  ;;  %10269 = vmatprep.subr.mxu1 %v13295_v22  ;;  %v650_v5 = vcombine.high %v632_v3, %v646_v35  ;;  %v22434_v56 = vand.u32 4294901760, %v21198_v13  ;;  %v21238_v32 = vand.u32 4294901760, %v410_v12  ;;  %v22436_v59 = vand.u32 4294901760, %v21221_v20 }
 0x486   :  { %10176 = vmatpush1.msra.mxu0 %v21058_v33  ;;  %10275 = vmatpush1.msra.mxu1 %v10274_v62  ;;  %v10329_v58 = vsub.f32 %v21148_v38, %v22431_v29  ;;  %v22433_v62 = vand.u32 4294901760, %v21184_v11  ;;  %v10336_v7 = vsub.f32 %v21166_v1, %v22430_v14 }
 0x487   :  { %10177 = vmatprep.subr.mxu0 %v13295_v22  ;;  %10276 = vmatprep.subr.mxu1 %v13295_v22  ;;  %v675_v14 = vsel %vm674_vm0, %v650_v5, 0 }
 0x488   :  { %10179 = vmatpush1.msra.mxu0 %v21076_v42  ;;  %10282 = vmatpush1.msra.mxu1 %v10281_v27  ;;  %v10316_v27 = vand.u32 4294901760, %v10315_v17  ;;  %v10330_v43 = vand.u32 4294901760, %v10329_v58  ;;  %v10343_v0 = vsub.f32 %v21184_v11, %v22433_v62  ;;  %v408_v17 = vld [vmem:[%s21623_s1 + $0xba0] sm:$0xff]  ;;  %v21253_v58 = vand.u32 4294901760, %v409_v36 }
 0x489   :  { %10180 = vmatprep.subr.mxu0 %v13295_v22  ;;  %10283 = vmatprep.subr.mxu1 %v13295_v22  ;;  %v10337_v62 = vand.u32 4294901760, %v10336_v7  ;;  %v407_v7 = vld [vmem:[%s21623_s1 + $0xb98] sm:$0xff] }
 0x48a   :  { %10182 = vmatpush1.msra.mxu0 %v21092_v63  ;;  %10289 = vmatpush1.msra.mxu1 %v10288_v51 }
 0x48b   :  { %10183 = vmatprep.subr.mxu0 %v13295_v22  ;;  %10290 = vmatprep.subr.mxu1 %v13295_v22 }
 0x48c   :  { %10185 = vmatpush1.msra.mxu0 %v21108_v28  ;;  %10296 = vmatpush1.msra.mxu1 %v10295_v10  ;;  %v10323_v10 = vand.u32 4294901760, %v10322_v52  ;;  %v21251_v52 = vsub.f32 %v388_v46, %v21223_v53  ;;  %v21264_v46 = vsub.f32 %v410_v12, %v21238_v32  ;;  %v10344_v12 = vand.u32 4294901760, %v10343_v0 }
 0x48d   :  { %10186 = vmatprep.subr.mxu0 %v13295_v22  ;;  %10297 = vmatprep.subr.mxu1 %v13295_v22 }
 0x48e   :  { %10188 = vmatpush1.msra.mxu0 %v21116_v26  ;;  %10303 = vmatpush1.msra.mxu1 %v10302_v21  ;;  %v22446_v23 = vand.u32 4294901760, %v21264_v46 }
 0x48f   :  { %10189 = vmatprep.subr.mxu0 %v13295_v22  ;;  %10304 = vmatprep.subr.mxu1 %v13295_v22  ;;  %v12843_v51 = vpop.f32.mrf.mxu0 }
 0x490   :  { %10191 = vmatpush1.msra.mxu0 %v21132_v39  ;;  %10310 = vmatpush1.msra.mxu1 %v10309_v9  ;;  %v649_v9 = vcombine.low %v632_v3, %v646_v35  ;;  %v10350_v3 = vsub.f32 %v21198_v13, %v22434_v56  ;;  %v22439_v35 = vand.u32 4294901760, %v21228_v48  ;;  %v406_v56 = vld [vmem:[%s21623_s1 + $0xb90] sm:$0xff]  ;;  %v10396_v50 = vsub.f32 %v21264_v46, %v22446_v23 }
 0x491   :  { %10192 = vmatprep.subr.mxu0 %v13295_v22  ;;  %10311 = vmatprep.subr.mxu1 %v13295_v22  ;;  %v12844_v21 = vpop.f32.mrf.mxu0 }
 0x492   :  { %10194 = vmatpush1.msra.mxu0 %v21150_v44  ;;  %10317 = vmatpush1.msra.mxu1 %v10316_v27  ;;  %v12845_v29 = vadd.f32 %v12844_v21, %v12843_v51  ;;  %v21267_v27 = vand.u32 4294901760, %v408_v17  ;;  %v21272_v51 = vand.u32 4294901760, %v675_v14  ;;  %v21276_v21 = vand.u32 4294901760, %v649_v9 }
 0x493   :  { %10195 = vmatprep.subr.mxu0 %v13295_v22  ;;  %10318 = vmatprep.subr.mxu1 %v13295_v22  ;;  %v10351_v15 = vand.u32 4294901760, %v10350_v3  ;;  %v10364_v0 = vsub.f32 %v21228_v48, %v22439_v35 }
 0x494   :  { %10197 = vmatpush1.msra.mxu0 %v21168_v47  ;;  %10324 = vmatpush1.msra.mxu1 %v10323_v10  ;;  %v8544_v5 = vadd.f32 %v12845_v29, %v21066_v4  ;;  %v21280_v4 = vsub.f32 %v409_v36, %v21253_v58  ;;  %v10357_v29 = vsub.f32 %v21221_v20, %v22436_v59  ;;  %v22443_v10 = vand.u32 4294901760, %v21251_v52 }
 0x495   :  { %10198 = vmatprep.subr.mxu0 %v13295_v22  ;;  %10325 = vmatprep.subr.mxu1 %v13295_v22  ;;  %v21295_v36 = vsub.f32 %v408_v17, %v21267_v27  ;;  %v21305_v3 = vsub.f32 %v675_v14, %v21272_v51  ;;  %v21312_v17 = vsub.f32 %v649_v9, %v21276_v21 }
 0x496   :  { %10200 = vmatpush1.msra.mxu0 %v21193_v45  ;;  %10331 = vmatpush1.msra.mxu1 %v10330_v43  ;;  %v21291_v43 = vand.u32 4294901760, %v407_v7  ;;  %v10358_v35 = vand.u32 4294901760, %v10357_v29  ;;  %v10371_v55 = vsub.f32 %v21251_v52, %v22443_v10  ;;  %v21327_v29 = vand.u32 4294901760, %v405_v19 }
 0x497   :  { %10201 = vmatprep.subr.mxu0 %v13295_v22  ;;  %10332 = vmatprep.subr.mxu1 %v13295_v22  ;;  %v12878_v59 = vpop.f32.mrf.mxu1  ;;  %23919 = vst [vmem:[#allocation6_spill] sm:$0xff] %v21312_v17  ;;  %v10365_v10 = vand.u32 4294901760, %v10364_v0  ;;  %v22447_v54 = vand.u32 4294901760, %v21305_v3  ;;  %v23920_v23 = vand.u32 4294901760, %v21280_v4 }
 0x498   :  { %23918 = vst [vmem:[#allocation10_spill] sm:$0xff] %v21291_v43  ;;  %10203 = vmatpush1.msra.mxu0 %v21200_v6  ;;  %10338 = vmatpush1.msra.mxu1 %v10337_v62  ;;  %v21309_v62 = vand.u32 4294901760, %v406_v56  ;;  %v21325_v9 = vsub.f32 %v407_v7, %v21291_v43  ;;  %v21342_v7 = vand.u32 4294901760, %v404_v8  ;;  %v10372_v0 = vand.u32 4294901760, %v10371_v55 }
 0x499   :  { %10204 = vmatprep.subr.mxu0 %v13295_v22  ;;  %10339 = vmatprep.subr.mxu1 %v13295_v22  ;;  %v12879_v37 = vpop.f32.mrf.mxu1  ;;  %v10403_v14 = vsub.f32 %v21280_v4, %v23920_v23  ;;  %v10249_v55 = vsub.f32 %v21305_v3, %v22447_v54 }
 0x49a   :  { %10206 = vmatpush1.msra.mxu0 %v21223_v53  ;;  %10345 = vmatpush1.msra.mxu1 %v10344_v12  ;;  %v12880_v12 = vadd.f32 %v12879_v37, %v12878_v59  ;;  %v21338_v37 = vsub.f32 %v406_v56, %v21309_v62  ;;  %v21352_v56 = vsub.f32 %v405_v19, %v21327_v29  ;;  %v23921_v19 = vand.u32 4294901760, %v21295_v36 }
 0x49b   :  { %10225 = vmatprep.subr.mxu0 %v13295_v22  ;;  %10346 = vmatprep.subr.mxu1 %v13295_v22  ;;  %v21362_v23 = vsub.f32 %v404_v8, %v21342_v7  ;;  %v10404_v54 = vand.u32 4294901760, %v10403_v14 }
 0x49c   :  { %10227 = vmatpush2.msra.mxu0 %v21238_v32  ;;  %10352 = vmatpush1.msra.mxu1 %v10351_v15  ;;  %v21340_v59 = vadd.f32 %v12880_v12, %v8544_v5  ;;  %v22448_v15 = vand.u32 4294901760, %v21312_v17  ;;  %v10416_v5 = vand.u32 4294901760, %v21325_v9  ;;  %v10397_v12 = vand.u32 4294901760, %v10396_v50 }
 0x49d   :  { %10228 = vmatprep.subr.mxu0 %v13295_v22  ;;  %10353 = vmatprep.subr.mxu1 %v13295_v22  ;;  %v10423_v50 = vand.u32 4294901760, %v21338_v37 }
 0x49e   :  { %10230 = vmatpush2.msra.mxu0 %v21253_v58  ;;  %10359 = vmatpush1.msra.mxu1 %v10358_v35  ;;  %v10410_v35 = vsub.f32 %v21295_v36, %v23921_v19  ;;  %v10417_v8 = vsub.f32 %v21325_v9, %v10416_v5  ;;  %v10430_v19 = vand.u32 4294901760, %v21352_v56 }
 0x49f   :  { %10231 = vmatprep.subr.mxu0 %v13295_v22  ;;  %10360 = vmatprep.subr.mxu1 %v13295_v22 }
 0x4a0   :  { %10233 = vmatpush2.msra.mxu0 %v21267_v27  ;;  %10366 = vmatpush1.msra.mxu1 %v10365_v10  ;;  %v10255_v10 = vsub.f32 %v21312_v17, %v22448_v15  ;;  %v10250_v15 = vand.u32 4294901760, %v10249_v55  ;;  %v10437_v17 = vand.u32 4294901760, %v21362_v23  ;;  %v10431_v55 = vsub.f32 %v21352_v56, %v10430_v19 }
 0x4a1   :  { %10234 = vmatprep.subr.mxu0 %v13295_v22  ;;  %10367 = vmatprep.subr.mxu1 %v13295_v22 }
 0x4a2   :  { %10236 = vmatpush2.msra.mxu0 %v21291_v43  ;;  %10373 = vmatpush1.msra.mxu1 %v10372_v0  ;;  %v10411_v0 = vand.u32 4294901760, %v10410_v35  ;;  %v10256_v14 = vand.u32 4294901760, %v10255_v10  ;;  %v10424_v43 = vsub.f32 %v21338_v37, %v10423_v50  ;;  %v10438_v10 = vsub.f32 %v21362_v23, %v10437_v17 }
 0x4a3   :  { %10237 = vmatprep.subr.mxu0 %v13295_v22  ;;  %10392 = vmatprep.subr.mxu1 %v13295_v22 }
 0x4a4   :  { %10239 = vmatpush2.msra.mxu0 %v21309_v62  ;;  %10398 = vmatpush2.msra.mxu1 %v10397_v12  ;;  %v10418_v12 = vand.u32 4294901760, %v10417_v8  ;;  %v10425_v35 = vand.u32 4294901760, %v10424_v43  ;;  %v10439_v43 = vand.u32 4294901760, %v10438_v10 }
 0x4a5   :  { %10240 = vmatprep.subr.mxu0 %v13295_v22  ;;  %10399 = vmatprep.subr.mxu1 %v13295_v22 }
 0x4a6   :  { %10242 = vmatpush2.msra.mxu0 %v21327_v29  ;;  %10405 = vmatpush2.msra.mxu1 %v10404_v54  ;;  %v10432_v54 = vand.u32 4294901760, %v10431_v55 }
 0x4a7   :  { %10243 = vmatprep.subr.mxu0 %v13295_v22  ;;  %10406 = vmatprep.subr.mxu1 %v13295_v22 }
 0x4a8   :  { %10245 = vmatpush2.msra.mxu0 %v21342_v7  ;;  %10251 = vmatprep.mubr.f32.mxu0 %v10250_v15 }
 0x4a9   :  { %10412 = vmatpush2.msra.mxu1 %v10411_v0  ;;  %10257 = vmatmul.mubr.f32.vlgmr.msra.gmra.mxu0 %v10256_v14 }
 0x4aa   :  { %10413 = vmatprep.subr.mxu1 %v13295_v22  ;;  %10449 = vmatprep.subr.mxu0 %v13295_v22 }
 0x4ab   :  { %10419 = vmatpush2.msra.mxu1 %v10418_v12  ;;  %10452 = vmatpush1.msra.mxu0 %v21009_v25 }
 0x4ac   :  { %10420 = vmatprep.subr.mxu1 %v13295_v22  ;;  %10453 = vmatprep.subr.mxu0 %v13295_v22 }
 0x4ad   :  { %10426 = vmatpush2.msra.mxu1 %v10425_v35  ;;  %10456 = vmatpush1.msra.mxu0 %v21029_v31 }
 0x4ae   :  { %10427 = vmatprep.subr.mxu1 %v13295_v22  ;;  %10457 = vmatprep.subr.mxu0 %v13295_v22 }
 0x4af   :  { %10433 = vmatpush2.msra.mxu1 %v10432_v54  ;;  %10460 = vmatpush1.msra.mxu0 %v21044_v61 }
 0x4b0   :  { %10434 = vmatprep.subr.mxu1 %v13295_v22  ;;  %10461 = vmatprep.subr.mxu0 %v13295_v22  ;;  %v12913_v15 = vpop.f32.mrf.mxu0 }
 0x4b1   :  { %10440 = vmatpush2.msra.mxu1 %v10439_v43  ;;  %10442 = vmatprep.mubr.f32.mxu1 %v21272_v51 }
 0x4b2   :  { %10464 = vmatpush1.msra.mxu0 %v21056_v30  ;;  %10444 = vmatmul.mubr.f32.vlgmr.msra.gmra.mxu1 %v21276_v21  ;;  %v12914_v8 = vpop.f32.mrf.mxu0 }
 0x4b3   :  { %10465 = vmatprep.subr.mxu0 %v13295_v22  ;;  %10569 = vmatprep.subr.mxu1 %v13295_v22  ;;  %v12915_v0 = vadd.f32 %v12914_v8, %v12913_v15  ;;  %v23922_v8 = vld [vmem:[#allocation6_spill] sm:$0xff] }
 0x4b4   :  { %10468 = vmatpush1.msra.mxu0 %v21074_v40  ;;  %10571 = vmatpush1.msra.mxu1 %v20986_v16 }
 0x4b5   :  { %10469 = vmatprep.subr.mxu0 %v13295_v22  ;;  %10572 = vmatprep.subr.mxu1 %v13295_v22  ;;  %v8914_v14 = vadd.f32 %v12915_v0, %v21340_v59  ;;  %v23923_v0 = vld [vmem:[#allocation10_spill] sm:$0xff] }
 0x4b6   :  { %10472 = vmatpush1.msra.mxu0 %v21087_v41  ;;  %10574 = vmatpush1.msra.mxu1 %v21003_v2 }
 0x4b7   :  { %10473 = vmatprep.subr.mxu0 %v13295_v22  ;;  %10575 = vmatprep.subr.mxu1 %v13295_v22 }
 0x4b8   :  { %10476 = vmatpush1.msra.mxu0 %v21103_v18  ;;  %10577 = vmatpush1.msra.mxu1 %v21017_v34 }
 0x4b9   :  { %10477 = vmatprep.subr.mxu0 %v13295_v22  ;;  %10578 = vmatprep.subr.mxu1 %v13295_v22  ;;  %v12948_v12 = vpop.f32.mrf.mxu1 }
 0x4ba   :  { %10480 = vmatpush1.msra.mxu0 %v21121_v60  ;;  %10580 = vmatpush1.msra.mxu1 %v21031_v24 }
 0x4bb   :  { %10481 = vmatprep.subr.mxu0 %v13295_v22  ;;  %10581 = vmatprep.subr.mxu1 %v13295_v22  ;;  %v12949_v59 = vpop.f32.mrf.mxu1 }
 0x4bc   :  { %10484 = vmatpush1.msra.mxu0 %v21136_v49  ;;  %10583 = vmatpush1.msra.mxu1 %v21046_v57  ;;  %v12950_v55 = vadd.f32 %v12949_v59, %v12948_v12  ;;  %v23925_v59 = vand.u32 4294901760, %v21029_v31  ;;  %v23927_v31 = vand.u32 4294901760, %v21305_v3 }
 0x4bd   :  { %10485 = vmatprep.subr.mxu0 %v13295_v22  ;;  %10584 = vmatprep.subr.mxu1 %v13295_v22 }
 0x4be   :  { %10488 = vmatpush1.msra.mxu0 %v21148_v38  ;;  %10586 = vmatpush1.msra.mxu1 %v21058_v33  ;;  %v9022_v35 = vadd.f32 %v12950_v55, %v8914_v14  ;;  %v23924_v14 = vand.u32 4294901760, %v21009_v25  ;;  %v23926_v25 = vand.u32 4294901760, %v21044_v61  ;;  %v23930_v61 = vand.u32 4294901760, %v21074_v40 }
 0x4bf   :  { %10489 = vmatprep.subr.mxu0 %v13295_v22  ;;  %10587 = vmatprep.subr.mxu1 %v13295_v22 }
 0x4c0   :  { %10492 = vmatpush1.msra.mxu0 %v21166_v1  ;;  %10589 = vmatpush1.msra.mxu1 %v21076_v42 }
 0x4c1   :  { %10493 = vmatprep.subr.mxu0 %v13295_v22  ;;  %10590 = vmatprep.subr.mxu1 %v13295_v22 }
 0x4c2   :  { %10496 = vmatpush1.msra.mxu0 %v21184_v11  ;;  %10592 = vmatpush1.msra.mxu1 %v21092_v63 }
 0x4c3   :  { %10497 = vmatprep.subr.mxu0 %v13295_v22  ;;  %10593 = vmatprep.subr.mxu1 %v13295_v22 }
 0x4c4   :  { %10500 = vmatpush1.msra.mxu0 %v21198_v13  ;;  %10595 = vmatpush1.msra.mxu1 %v21108_v28 }
 0x4c5   :  { %10501 = vmatprep.subr.mxu0 %v13295_v22  ;;  %10596 = vmatprep.subr.mxu1 %v13295_v22 }
 0x4c6   :  { %10504 = vmatpush1.msra.mxu0 %v21221_v20  ;;  %10598 = vmatpush1.msra.mxu1 %v21116_v26 }
 0x4c7   :  { %10505 = vmatprep.subr.mxu0 %v13295_v22  ;;  %10599 = vmatprep.subr.mxu1 %v13295_v22 }
 0x4c8   :  { %10508 = vmatpush1.msra.mxu0 %v21228_v48  ;;  %10601 = vmatpush1.msra.mxu1 %v21132_v39 }
 0x4c9   :  { %10509 = vmatprep.subr.mxu0 %v13295_v22  ;;  %10602 = vmatprep.subr.mxu1 %v13295_v22 }
 0x4ca   :  { %10512 = vmatpush1.msra.mxu0 %v21251_v52  ;;  %10604 = vmatpush1.msra.mxu1 %v21150_v44 }
 0x4cb   :  { %10531 = vmatprep.subr.mxu0 %v13295_v22  ;;  %10605 = vmatprep.subr.mxu1 %v13295_v22 }
 0x4cc   :  { %10534 = vmatpush2.msra.mxu0 %v21264_v46  ;;  %10607 = vmatpush1.msra.mxu1 %v21168_v47 }
 0x4cd   :  { %10535 = vmatprep.subr.mxu0 %v13295_v22  ;;  %10608 = vmatprep.subr.mxu1 %v13295_v22 }
 0x4ce   :  { %10538 = vmatpush2.msra.mxu0 %v21280_v4  ;;  %10610 = vmatpush1.msra.mxu1 %v21193_v45 }
 0x4cf   :  { %10539 = vmatprep.subr.mxu0 %v13295_v22  ;;  %10611 = vmatprep.subr.mxu1 %v13295_v22 }
 0x4d0   :  { %10542 = vmatpush2.msra.mxu0 %v21295_v36  ;;  %10613 = vmatpush1.msra.mxu1 %v21200_v6 }
 0x4d1   :  { %10543 = vmatprep.subr.mxu0 %v13295_v22  ;;  %10614 = vmatprep.subr.mxu1 %v13295_v22 }
 0x4d2   :  { %10546 = vmatpush2.msra.mxu0 %v21325_v9  ;;  %10616 = vmatpush1.msra.mxu1 %v21223_v53 }
 0x4d3   :  { %10547 = vmatprep.subr.mxu0 %v13295_v22  ;;  %10635 = vmatprep.subr.mxu1 %v13295_v22  ;;  %v12983_v10 = vpop.f32.mrf.mxu0 }
 0x4d4   :  { %10550 = vmatpush2.msra.mxu0 %v21338_v37  ;;  %10637 = vmatpush2.msra.mxu1 %v21238_v32 }
 0x4d5   :  { %10551 = vmatprep.subr.mxu0 %v13295_v22  ;;  %10638 = vmatprep.subr.mxu1 %v13295_v22  ;;  %v12984_v54 = vpop.f32.mrf.mxu0 }
 0x4d6   :  { %10554 = vmatpush2.msra.mxu0 %v21352_v56  ;;  %10640 = vmatpush2.msra.mxu1 %v21253_v58  ;;  %v12985_v43 = vadd.f32 %v12984_v54, %v12983_v10  ;;  %v23928_v54 = vand.u32 4294901760, %v21056_v30  ;;  %v23932_v30 = vand.u32 4294901760, %v21103_v18 }
 0x4d7   :  { %10555 = vmatprep.subr.mxu0 %v13295_v22  ;;  %10641 = vmatprep.subr.mxu1 %v13295_v22 }
 0x4d8   :  { %10558 = vmatpush2.msra.mxu0 %v21362_v23  ;;  %10561 = vmatprep.mubr.f32.mxu0 %v21305_v3  ;;  %v9190_v15 = vadd.f32 %v12985_v43, %v9022_v35  ;;  %v23929_v43 = vand.u32 4294901760, %v23922_v8  ;;  %v23931_v3 = vand.u32 4294901760, %v21087_v41 }
 0x4d9   :  { %10643 = vmatpush2.msra.mxu1 %v21267_v27  ;;  %10564 = vmatmul.mubr.f32.vlgmr.msra.gmra.mxu0 %v23922_v8 }
 0x4da   :  { %10644 = vmatprep.subr.mxu1 %v13295_v22  ;;  %10668 = vmatprep.subr.mxu0 %v13295_v22 }
 0x4db   :  { %10646 = vmatpush2.msra.mxu1 %v23923_v0  ;;  %10672 = vmatpush1.msra.mxu0 %v23924_v14 }
 0x4dc   :  { %10647 = vmatprep.subr.mxu1 %v13295_v22  ;;  %10673 = vmatprep.subr.mxu0 %v13295_v22  ;;  %v13018_v12 = vpop.f32.mrf.mxu1 }
 0x4dd   :  { %10649 = vmatpush2.msra.mxu1 %v21309_v62  ;;  %10677 = vmatpush1.msra.mxu0 %v23925_v59 }
 0x4de   :  { %10650 = vmatprep.subr.mxu1 %v13295_v22  ;;  %10678 = vmatprep.subr.mxu0 %v13295_v22  ;;  %v13019_v55 = vpop.f32.mrf.mxu1 }
 0x4df   :  { %10652 = vmatpush2.msra.mxu1 %v21327_v29  ;;  %10682 = vmatpush1.msra.mxu0 %v23926_v25  ;;  %v13020_v35 = vadd.f32 %v13019_v55, %v13018_v12 }
 0x4e0   :  { %10653 = vmatprep.subr.mxu1 %v13295_v22  ;;  %10683 = vmatprep.subr.mxu0 %v13295_v22 }
 0x4e1   :  { %10655 = vmatpush2.msra.mxu1 %v21342_v7  ;;  %10659 = vmatprep.mubr.f32.mxu1 %v23927_v31  ;;  %v9294_v10 = vadd.f32 %v13020_v35, %v9190_v15 }
 0x4e2   :  { %10687 = vmatpush1.msra.mxu0 %v23928_v54  ;;  %10663 = vmatmul.mubr.f32.vlgmr.msra.gmra.mxu1 %v23929_v43 }
 0x4e3   :  { %10688 = vmatprep.subr.mxu0 %v13295_v22  ;;  %10809 = vmatprep.subr.mxu1 %v13295_v22 }
 0x4e4   :  { %10692 = vmatpush1.msra.mxu0 %v23930_v61  ;;  %10811 = vmatpush1.msra.mxu1 %v20986_v16  ;;  %v23933_v16 = vand.u32 4294901760, %v21121_v60  ;;  %v23942_v60 = vand.u32 4294901760, %v21264_v46 }
 0x4e5   :  { %10693 = vmatprep.subr.mxu0 %v13295_v22  ;;  %10812 = vmatprep.subr.mxu1 %v13295_v22 }
 0x4e6   :  { %10697 = vmatpush1.msra.mxu0 %v23931_v3  ;;  %10814 = vmatpush1.msra.mxu1 %v21003_v2  ;;  %v23934_v2 = vand.u32 4294901760, %v21136_v49 }
 0x4e7   :  { %10698 = vmatprep.subr.mxu0 %v13295_v22  ;;  %10815 = vmatprep.subr.mxu1 %v13295_v22 }
 0x4e8   :  { %10702 = vmatpush1.msra.mxu0 %v23932_v30  ;;  %10817 = vmatpush1.msra.mxu1 %v21017_v34  ;;  %v23935_v34 = vand.u32 4294901760, %v21148_v38  ;;  %v23944_v38 = vand.u32 4294901760, %v21295_v36 }
 0x4e9   :  { %10703 = vmatprep.subr.mxu0 %v13295_v22  ;;  %10818 = vmatprep.subr.mxu1 %v13295_v22 }
 0x4ea   :  { %10707 = vmatpush1.msra.mxu0 %v23933_v16  ;;  %10820 = vmatpush1.msra.mxu1 %v21031_v24  ;;  %v23936_v24 = vand.u32 4294901760, %v21166_v1 }
 0x4eb   :  { %10708 = vmatprep.subr.mxu0 %v13295_v22  ;;  %10821 = vmatprep.subr.mxu1 %v13295_v22 }
 0x4ec   :  { %10712 = vmatpush1.msra.mxu0 %v23934_v2  ;;  %10823 = vmatpush1.msra.mxu1 %v21046_v57  ;;  %v23937_v57 = vand.u32 4294901760, %v21184_v11 }
 0x4ed   :  { %10713 = vmatprep.subr.mxu0 %v13295_v22  ;;  %10824 = vmatprep.subr.mxu1 %v13295_v22 }
 0x4ee   :  { %10717 = vmatpush1.msra.mxu0 %v23935_v34  ;;  %10826 = vmatpush1.msra.mxu1 %v21058_v33  ;;  %v23938_v33 = vand.u32 4294901760, %v21198_v13 }
 0x4ef   :  { %10718 = vmatprep.subr.mxu0 %v13295_v22  ;;  %10827 = vmatprep.subr.mxu1 %v13295_v22 }
 0x4f0   :  { %10722 = vmatpush1.msra.mxu0 %v23936_v24  ;;  %10829 = vmatpush1.msra.mxu1 %v21076_v42  ;;  %v23939_v42 = vand.u32 4294901760, %v21221_v20 }
 0x4f1   :  { %10723 = vmatprep.subr.mxu0 %v13295_v22  ;;  %10830 = vmatprep.subr.mxu1 %v13295_v22 }
 0x4f2   :  { %10727 = vmatpush1.msra.mxu0 %v23937_v57  ;;  %10832 = vmatpush1.msra.mxu1 %v21092_v63  ;;  %v23940_v63 = vand.u32 4294901760, %v21228_v48 }
 0x4f3   :  { %10728 = vmatprep.subr.mxu0 %v13295_v22  ;;  %10833 = vmatprep.subr.mxu1 %v13295_v22 }
 0x4f4   :  { %10732 = vmatpush1.msra.mxu0 %v23938_v33  ;;  %10835 = vmatpush1.msra.mxu1 %v21108_v28  ;;  %v23941_v28 = vand.u32 4294901760, %v21251_v52 }
 0x4f5   :  { %10733 = vmatprep.subr.mxu0 %v13295_v22  ;;  %10836 = vmatprep.subr.mxu1 %v13295_v22 }
 0x4f6   :  { %v13053_v40 = vpop.f32.mrf.mxu0  ;;  %10737 = vmatpush1.msra.mxu0 %v23939_v42  ;;  %10838 = vmatpush1.msra.mxu1 %v21116_v26 }
 0x4f7   :  { %10738 = vmatprep.subr.mxu0 %v13295_v22  ;;  %10839 = vmatprep.subr.mxu1 %v13295_v22 }
 0x4f8   :  { %v13054_v41 = vpop.f32.mrf.mxu0  ;;  %10742 = vmatpush1.msra.mxu0 %v23940_v63  ;;  %10841 = vmatpush1.msra.mxu1 %v21132_v39  ;;  %v23943_v39 = vand.u32 4294901760, %v21280_v4 }
 0x4f9   :  { %v13055_v18 = vadd.f32 %v13054_v41, %v13053_v40  ;;  %10743 = vmatprep.subr.mxu0 %v13295_v22  ;;  %10842 = vmatprep.subr.mxu1 %v13295_v22 }
 0x4fa   :  { %10747 = vmatpush1.msra.mxu0 %v23941_v28  ;;  %10844 = vmatpush1.msra.mxu1 %v21150_v44 }
 0x4fb   :  { %v9406_v26 = vadd.f32 %v13055_v18, %v9294_v10  ;;  %10766 = vmatprep.subr.mxu0 %v13295_v22  ;;  %10845 = vmatprep.subr.mxu1 %v13295_v22 }
 0x4fc   :  { %10770 = vmatpush2.msra.mxu0 %v23942_v60  ;;  %10847 = vmatpush1.msra.mxu1 %v21168_v47 }
 0x4fd   :  { %10771 = vmatprep.subr.mxu0 %v13295_v22  ;;  %10848 = vmatprep.subr.mxu1 %v13295_v22 }
 0x4fe   :  { %10775 = vmatpush2.msra.mxu0 %v23943_v39  ;;  %10850 = vmatpush1.msra.mxu1 %v21193_v45  ;;  %v13088_v49 = vpop.f32.mrf.mxu1 }
 0x4ff   :  { %10776 = vmatprep.subr.mxu0 %v13295_v22  ;;  %10851 = vmatprep.subr.mxu1 %v13295_v22 }
 0x500   :  { %10780 = vmatpush2.msra.mxu0 %v23944_v38  ;;  %10853 = vmatpush1.msra.mxu1 %v21200_v6  ;;  %v13089_v44 = vpop.f32.mrf.mxu1 }
 0x501   :  { %10781 = vmatprep.subr.mxu0 %v13295_v22  ;;  %10854 = vmatprep.subr.mxu1 %v13295_v22  ;;  %v13090_v1 = vadd.f32 %v13089_v44, %v13088_v49 }
 0x502   :  { %10785 = vmatpush2.msra.mxu0 %v10416_v5  ;;  %10856 = vmatpush1.msra.mxu1 %v21223_v53 }
 0x503   :  { %10786 = vmatprep.subr.mxu0 %v13295_v22  ;;  %10875 = vmatprep.subr.mxu1 %v13295_v22  ;;  %v9638_v47 = vadd.f32 %v13090_v1, %v9406_v26 }
 0x504   :  { %10790 = vmatpush2.msra.mxu0 %v10423_v50  ;;  %10877 = vmatpush2.msra.mxu1 %v21238_v32 }
 0x505   :  { %10791 = vmatprep.subr.mxu0 %v13295_v22  ;;  %10878 = vmatprep.subr.mxu1 %v13295_v22 }
 0x506   :  { %10795 = vmatpush2.msra.mxu0 %v10430_v19  ;;  %10880 = vmatpush2.msra.mxu1 %v21253_v58 }
 0x507   :  { %10796 = vmatprep.subr.mxu0 %v13295_v22  ;;  %10881 = vmatprep.subr.mxu1 %v13295_v22 }
 0x508   :  { %10800 = vmatpush2.msra.mxu0 %v10437_v17  ;;  %10802 = vmatprep.mubr.f32.mxu0 %v21272_v51 }
 0x509   :  { %10883 = vmatpush2.msra.mxu1 %v21267_v27  ;;  %10804 = vmatmul.mubr.f32.vlgmr.msra.gmra.mxu0 %v21276_v21 }
 0x50a   :  { %10884 = vmatprep.subr.mxu1 %v13295_v22  ;;  %10897 = vmatprep.mubr.f32.mxu1 %v21272_v51 }
 0x50b   :  { %10886 = vmatpush2.msra.mxu1 %v23923_v0 }
 0x50c   :  { %10887 = vmatprep.subr.mxu1 %v13295_v22 }
 0x50d   :  { %10889 = vmatpush2.msra.mxu1 %v21309_v62 }
 0x50e   :  { %10890 = vmatprep.subr.mxu1 %v13295_v22 }
 0x50f   :  { %10892 = vmatpush2.msra.mxu1 %v21327_v29 }
 0x510   :  { %10893 = vmatprep.subr.mxu1 %v13295_v22 }
 0x511   :  { %10895 = vmatpush2.msra.mxu1 %v21342_v7 }
 0x512   :  { %10899 = vmatmul.mubr.f32.vlgmr.msra.gmra.mxu1 %v21276_v21 }
 0x517   :  { %v13123_v11 = vpop.f32.mrf.mxu0 }
 0x519   :  { %v13124_v45 = vpop.f32.mrf.mxu0 }
 0x51a   :  { %v13125_v13 = vadd.f32 %v13124_v45, %v13123_v11 }
 0x51c   :  { %v9776_v6 = vadd.f32 %v13125_v13, %v9638_v47 }
 0x520   :  { %v13158_v20 = vpop.f32.mrf.mxu1 }
 0x522   :  { %v13159_v53 = vpop.f32.mrf.mxu1 }
 0x523   :  { %v13160_v48 = vadd.f32 %v13159_v53, %v13158_v20 }
 0x525   :  { %v9884_v32 = vadd.f32 %v13160_v48, %v9776_v6 }
 0x539   :  { %v13193_v52 = vpop.f32.mrf.mxu0 }
 0x53b   :  { %v13194_v58 = vpop.f32.mrf.mxu0 }
 0x53c   :  { %v13195_v46 = vadd.f32 %v13194_v58, %v13193_v52 }
 0x53e   :  { %v10052_v27 = vadd.f32 %v13195_v46, %v9884_v32 }
 0x542   :  { %v13228_v51 = vpop.f32.mrf.mxu1 }
 0x544   :  { %v13229_v4 = vpop.f32.mrf.mxu1 }
 0x545   :  { %v13230_v36 = vadd.f32 %v13229_v4, %v13228_v51 }
 0x547   :  { %v10156_v22 = vadd.f32 %v13230_v36, %v10052_v27 }
 0x569   :  { %v10258_v62 = vpop.f32.mrf.mxu0 }
 0x56a   :  { %v10259_v17 = vadd.f32 %v10258_v62, %v10156_v22 }
 0x56b   :  { %v10260_v9 = vpop.f32.mrf.mxu0 }
 0x572   :  { %v10445_v21 = vpop.f32.mrf.mxu1 }
 0x573   :  { %v10446_v29 = vadd.f32 %v10445_v21, %v10259_v17 }
 0x574   :  { %v10447_v37 = vpop.f32.mrf.mxu1 }
 0x599   :  { %v10565_v7 = vpop.f32.mrf.mxu0 }
 0x59a   :  { %v10566_v15 = vadd.f32 %v10565_v7, %v10446_v29 }
 0x59b   :  { %v10567_v56 = vpop.f32.mrf.mxu0 }
 0x5a2   :  { %v10664_v5 = vpop.f32.mrf.mxu1 }
 0x5a3   :  { %v10665_v8 = vadd.f32 %v10664_v5, %v10566_v15 }
 0x5a4   :  { %v10666_v23 = vpop.f32.mrf.mxu1 }
 0x5c9   :  { %v10805_v50 = vpop.f32.mrf.mxu0 }
 0x5ca   :  { %v10806_v0 = vadd.f32 %v10805_v50, %v10665_v8 }
 0x5cb   :  { %v10807_v19 = vpop.f32.mrf.mxu0 }
 0x5d2   :  { %v10900_v14 = vpop.f32.mrf.mxu1 }
 0x5d3   :  { %v10901_v12 = vadd.f32 %v10900_v14, %v10806_v0 }
 0x5d4   :  { %v10902_v59 = vpop.f32.mrf.mxu1 }
 0x5d5   :  { %10904 = vst [vmem:[#allocation2] sm:$0xff] %v10901_v12 }
 0x5d6   :  { %10909 = vsyncadd [#allocation3], 96  ;;  %s13296_s1 = smov [#allocation2]  }
 0x5d7   :  { %s10910_s22 = sshll.u32 %s13296_s1, 4  ;;  %s10911_s22 = int_to_ptr.vmem [resolvable:$true] %s10910_s22 }
 0x5d8   :  { %s13272_s23 = scalar_lea.vmem %s10911_s22, 32  ;;  %s13276_s24 = scalar_lea.vmem %s10911_s22, 128 }
 0x5d9   :  { %p13273_p0 = scmp.ne.s32.totalorder %s10911_s22, %s13272_s23  ;;  %p13277_p1 = scmp.lt.s32.totalorder %s10911_s22, %s10911_s22 }
 0x5da   :  { %p13278_p2 = scmp.lt.s32.totalorder %s13276_s24, %s13272_s23 }
 0x5dc   :  { %p13279_p3 = por %p13278_p2, %p13277_p1 }
 0x5de   :  { %p13280_p4 = pnand %p13279_p3, %p13273_p0 }
 0x5e0   :  { %13283 = shalt.err (!%p13280_p4)
}
 0x5e1   :  { %s13297_s25 = smov 32   ;;  %s13298_s26 = smov 2  }
 0x5e2   :  { %10916 = dma.vmem_to_hbm [thread:$0]  %s10911_s22, 32, %s21624_s2, [#allocation3], %s13297_s25, %s13297_s25, %s13298_s26  }
 0x5e3   :  { %13292 = dma.done.wait [#allocation3], 128  }
 0x5e4   :  { %13293 = vsyncadd [#allocation3], 4294967168 }
 0x5e5   :  { %10920 = vsyncpa [#allocation3], 1 }

</bundles_post_ra>
